<compile_context>
chip_gen: v7x
topology: tpu7x:2x2x1
jax: 0.10.0
libtpu: 0.0.40
codegen_flags: <defaults>
</compile_context>

<pallas_src>
import functools

import jax
import jax.numpy as jnp
from jax.experimental import pallas as pl
from jax.experimental.pallas import tpu as pltpu

BN_EPS = 1e-5


# ----------------------------------------------------------------------------
# Fused ResidualBlock kernel (one grid step == Bt batch images)
# ----------------------------------------------------------------------------
def _resblock_kernel(x_ref, w1_ref, s1_ref, t1_ref, w2_ref, s2_ref, t2_ref,
                     *rest, Bt, H, W, Cin, Cout, has_skip_conv, fuse_conv2,
                     nchw_out):
    i = 0
    if has_skip_conv:
        wsk_ref, ssk_ref, tsk_ref = rest[0:3]
        i = 3
    o_ref, xp_ref, h1p_ref = rest[i:i + 3]
    patch_ref = rest[i + 3] if fuse_conv2 else None

    HW = H * W
    M = Bt * HW

    # ---- zero ONLY the 1-px halo borders (interior fully rewritten below).
    #      Per-step (not once at program_id==0): with ("parallel",) grid
    #      semantics each TensorCore has its own scratch and only one core
    #      ever sees grid step 0, so a one-time init would be unsafe there.
    def _zero_border(ref, c, dt):
        z_row = jnp.zeros((Bt, 1, W + 2, c), dt)
        z_col = jnp.zeros((Bt, H + 2, 1, c), dt)
        ref[:, 0:1, :, :] = z_row
        ref[:, H + 1:H + 2, :, :] = z_row
        ref[:, :, 0:1, :] = z_col
        ref[:, :, W + 1:W + 2, :] = z_col

    _zero_border(xp_ref, Cin, jnp.float32)
    _zero_border(h1p_ref, Cout, jnp.bfloat16)

    # ---- input halo (f32: identity-skip add must stay exact) ----------------
    xp_ref[:, 1:H + 1, 1:W + 1, :] = x_ref[...]

    # ---- conv1 (3x3, pad 1) + BN1 + ReLU ------------------------------------
    # Cin is tiny (e.g. 4): 9 accumulating K=Cin dots; a K=36 im2col concat is
    # lane-unaligned for no MXU gain (conv1 is ~3% of FLOPs).
    acc1 = jnp.zeros((M, Cout), jnp.float32)
    for t in range(9):
        kh, kw = divmod(t, 3)
        tap = xp_ref[:, kh:kh + H, kw:kw + W, :].reshape(M, Cin)
        acc1 = acc1 + jnp.dot(tap.astype(jnp.bfloat16), w1_ref[t],
                              preferred_element_type=jnp.float32)
    h1 = jnp.maximum(acc1 * s1_ref[...] + t1_ref[...], 0.0)        # f32 epilogue

    # ---- conv1 activation halo stored ONCE in bf16 (MXU operand dtype) ------
    h1p_ref[:, 1:H + 1, 1:W + 1, :] = (
        h1.reshape(Bt, H, W, Cout).astype(jnp.bfloat16))

    # ---- conv2 (3x3) + BN2 ---------------------------------------------------
    if fuse_conv2:
        # v6e/v7x: write taps straight into the (M, 9*Cout) bf16 patch scratch
        # (lane-aligned 128-wide column blocks), then ONE K=9*Cout MXU matmul.
        for t in range(9):
            kh, kw = divmod(t, 3)
            patch_ref[:, t * Cout:(t + 1) * Cout] = (
                h1p_ref[:, kh:kh + H, kw:kw + W, :].reshape(M, Cout))
        y2 = jnp.dot(patch_ref[...], w2_ref[...],
                     preferred_element_type=jnp.float32)
    else:
        # v5e: K=Cout already fills the 128-wide MXU; 9 accumulating dots avoid
        # materializing the ~1 MiB patch matrix.
        y2 = jnp.zeros((M, Cout), jnp.float32)
        for t in range(9):
            kh, kw = divmod(t, 3)
            tap = h1p_ref[:, kh:kh + H, kw:kw + W, :].reshape(M, Cout)
            y2 = y2 + jnp.dot(tap, w2_ref[t],
                              preferred_element_type=jnp.float32)
    y2 = y2 * s2_ref[...] + t2_ref[...]

    # ---- skip path (1x1 conv + BN when in_channels != out_channels) ---------
    xc = xp_ref[:, 1:H + 1, 1:W + 1, :].reshape(M, Cin)            # unpadded x
    if has_skip_conv:
        sk = jnp.dot(xc.astype(jnp.bfloat16), wsk_ref[...],
                     preferred_element_type=jnp.float32)
        sk = sk * ssk_ref[...] + tsk_ref[...]
    else:
        sk = xc                                                    # identity (f32)

    out = jnp.maximum(y2 + sk, 0.0)                                # (M, Cout) f32

    if nchw_out:
        # Lane-dense NCHW store: (Cout, HW) per image, HW a multiple of 128.
        for b in range(Bt):
            o_ref[b] = out[b * HW:(b + 1) * HW, :].T
    else:
        # Lane-dense NHWC store (Cout multiple of 128); wrapper relayouts.
        o_ref[...] = out.reshape(Bt, HW, Cout)


# ----------------------------------------------------------------------------
# Wrapper
# ----------------------------------------------------------------------------
def _fold_bn(bias, gamma, beta, mean, var, eps=BN_EPS):
    # TODO(synk): eval-mode BatchNorm only (running stats); training-mode batch
    # statistics are not computed.
    scale = (gamma / jnp.sqrt(var + eps)).astype(jnp.float32)
    shift = ((bias - mean) * scale + beta).astype(jnp.float32)
    return scale, shift


def _prefers_tap_conv2():
    """True on chips with a 128-wide MXU K dimension (v5e and older), where the
    fused K=9*Cout im2col matmul buys no MXU efficiency."""
    try:
        kind = jax.devices()[0].device_kind.lower()
    except Exception:
        return False
    return any(s in kind for s in ("v5e", "v5 lite", "v5lite", "v4", "v3", "v2"))


def _pick_block_batch(B, H, W, Cout):
    # Amortize the ~0.35us per-grid-step overhead, but keep >= 2 grid steps so
    # dimension_semantics=("parallel",) can feed both v7x TensorCores, and keep
    # the bf16 patch scratch under ~8 MiB (v7x 64 MiB VMEM headroom).
    for bt in (8, 4, 2):
        if B % bt == 0 and B // bt >= 2 and bt * H * W * 9 * Cout * 2 <= (8 << 20):
            return bt
    return 1


def residual_block(x_nchw, params, *, stride=1, block_batch=None,
                   conv2_mode="auto", out_layout="nchw"):
    """x_nchw: (B, Cin, H, W) float32 -> (B, Cout, H, W) float32 (NCHW)."""
    if stride != 1:
        # TODO(synk): stride > 1 (strided im2col + strided 1x1 skip) not implemented.
        raise NotImplementedError("stride != 1 not supported by the fused kernel")
    B, Cin, H, W = x_nchw.shape
    Cout = params['w1'].shape[-1]
    has_skip_conv = 'w_skip' in params
    if not has_skip_conv and Cin != Cout:
        raise ValueError("identity skip requires in_channels == out_channels")

    Bt = block_batch if block_batch is not None else _pick_block_batch(B, H, W, Cout)
    if B % Bt != 0:
        raise ValueError(f"batch {B} not divisible by block_batch {Bt}")
    fuse_conv2 = (conv2_mode == "fused"
                  or (conv2_mode == "auto" and not _prefers_tap_conv2()))
    nchw_out = (out_layout == "nchw")
    HW = H * W

    # NHWC inside the kernel (input relayout is tiny: Cin channels only).
    x = jnp.transpose(x_nchw, (0, 2, 3, 1))
    # Weights as bf16 MXU operands; conv bias + BN folded into f32 scale/shift.
    w1 = params['w1'].reshape(9, Cin, Cout).astype(jnp.bfloat16)
    s1, t1 = _fold_bn(params['b1'], **params['bn1'])
    s2, t2 = _fold_bn(params['b2'], **params['bn2'])
    if fuse_conv2:
        w2 = params['w2'].reshape(9 * Cout, Cout).astype(jnp.bfloat16)
        w2_spec = pl.BlockSpec((9 * Cout, Cout), lambda n: (0, 0))
    else:
        w2 = params['w2'].reshape(9, Cout, Cout).astype(jnp.bfloat16)
        w2_spec = pl.BlockSpec((9, Cout, Cout), lambda n: (0, 0, 0))

    vec_spec = pl.BlockSpec((1, Cout), lambda n: (0, 0))
    args = [x, w1, s1.reshape(1, Cout), t1.reshape(1, Cout),
            w2, s2.reshape(1, Cout), t2.reshape(1, Cout)]
    in_specs = [
        pl.BlockSpec((Bt, H, W, Cin), lambda n: (n, 0, 0, 0)),
        pl.BlockSpec((9, Cin, Cout), lambda n: (0, 0, 0)),
        vec_spec, vec_spec, w2_spec, vec_spec, vec_spec,
    ]
    if has_skip_conv:
        wsk = params['w_skip'].reshape(Cin, Cout).astype(jnp.bfloat16)
        ssk, tsk = _fold_bn(params['b_skip'], **params['bn_skip'])
        args += [wsk, ssk.reshape(1, Cout), tsk.reshape(1, Cout)]
        in_specs += [pl.BlockSpec((Cin, Cout), lambda n: (0, 0)),
                     vec_spec, vec_spec]

    if nchw_out:
        out_shape = jax.ShapeDtypeStruct((B, Cout, HW), jnp.float32)
        out_specs = pl.BlockSpec((Bt, Cout, HW), lambda n: (n, 0, 0))
    else:
        out_shape = jax.ShapeDtypeStruct((B, HW, Cout), jnp.float32)
        out_specs = pl.BlockSpec((Bt, HW, Cout), lambda n: (n, 0, 0))

    scratch = [pltpu.VMEM((Bt, H + 2, W + 2, Cin), jnp.float32),     # x halo
               pltpu.VMEM((Bt, H + 2, W + 2, Cout), jnp.bfloat16)]   # h1 halo (bf16)
    if fuse_conv2:
        scratch.append(pltpu.VMEM((Bt * HW, 9 * Cout), jnp.bfloat16))  # im2col patches

    kern = functools.partial(_resblock_kernel, Bt=Bt, H=H, W=W, Cin=Cin,
                             Cout=Cout, has_skip_conv=has_skip_conv,
                             fuse_conv2=fuse_conv2, nchw_out=nchw_out)
    out = pl.pallas_call(
        kern,
        out_shape=out_shape,
        grid=(B // Bt,),
        in_specs=in_specs,
        out_specs=out_specs,
        scratch_shapes=scratch,
        compiler_params=pltpu.CompilerParams(
            dimension_semantics=("parallel",),      # v7x: batch blocks over both TCs
            vmem_limit_bytes=32 * 1024 * 1024),
    )(*args)
    if nchw_out:
        return out.reshape(B, Cout, H, W)           # already NCHW, free reshape
    return jnp.transpose(out.reshape(B, H, W, Cout), (0, 3, 1, 2))


# ----------------------------------------------------------------------------
# Pure-JAX references
# ----------------------------------------------------------------------------
def _bn_ref(x, gamma, beta, mean, var):
    inv = (gamma / jnp.sqrt(var + BN_EPS)).reshape(1, -1, 1, 1)
    return (x - mean.reshape(1, -1, 1, 1)) * inv + beta.reshape(1, -1, 1, 1)


def _conv2d_ref(x, w_hwio, b, padding):
    y = jax.lax.conv_general_dilated(
        x, w_hwio, window_strides=(1, 1), padding=padding,
        dimension_numbers=('NCHW', 'HWIO', 'NCHW'),
        precision=jax.lax.Precision.HIGHEST)
    return y + b.reshape(1, -1, 1, 1)


def residual_block_ref(x, params):
    """Full-f32 reference (module semantics)."""
    out = _conv2d_ref(x, params['w1'], params['b1'], 'SAME')
    out = jax.nn.relu(_bn_ref(out, **params['bn1']))
    out = _conv2d_ref(out, params['w2'], params['b2'], 'SAME')
    out = _bn_ref(out, **params['bn2'])
    if 'w_skip' in params:
        sk = _bn_ref(_conv2d_ref(x, params['w_skip'], params['b_skip'], 'VALID'),
                     **params['bn_skip'])
    else:
        sk = x
    return jax.nn.relu(out + sk)


def _conv_bf16_ref(x, w_hwio, b, padding):
    y = jax.lax.conv_general_dilated(
        x.astype(jnp.bfloat16), w_hwio.astype(jnp.bfloat16),
        window_strides=(1, 1), padding=padding,
        dimension_numbers=('NCHW', 'HWIO', 'NCHW'),
        preferred_element_type=jnp.float32)
    return y + b.reshape(1, -1, 1, 1)


def residual_block_ref_bf16(x, params):
    """Reference with the kernel's exact quantization points (bf16 MXU
    operands, f32 accumulation / epilogue, bf16 conv1 activation)."""
    h = jax.nn.relu(_bn_ref(_conv_bf16_ref(x, params['w1'], params['b1'], 'SAME'),
                            **params['bn1']))
    h = h.astype(jnp.bfloat16).astype(jnp.float32)     # kernel stores h1 halo in bf16
    out = _bn_ref(_conv_bf16_ref(h, params['w2'], params['b2'], 'SAME'),
                  **params['bn2'])
    if 'w_skip' in params:
        sk = _bn_ref(_conv_bf16_ref(x, params['w_skip'], params['b_skip'], 'VALID'),
                     **params['bn_skip'])
    else:
        sk = x
    return jax.nn.relu(out + sk)


# ----------------------------------------------------------------------------
# Deterministic parameter init (shapes follow the PyTorch module __init__)
# ----------------------------------------------------------------------------
def init_params(key, cin, cout):
    ks = jax.random.split(key, 9)

    def conv_w(k, kh, kw, ci, co):
        fan_in = ci * kh * kw
        return jax.random.normal(k, (kh, kw, ci, co), jnp.float32) / jnp.sqrt(
            jnp.float32(fan_in))

    def bn(k, c):
        k1, k2, k3, k4 = jax.random.split(k, 4)
        return dict(gamma=1.0 + 0.1 * jax.random.normal(k1, (c,), jnp.float32),
                    beta=0.1 * jax.random.normal(k2, (c,), jnp.float32),
                    mean=0.1 * jax.random.normal(k3, (c,), jnp.float32),
                    var=1.0 + 0.1 * jax.random.uniform(k4, (c,), jnp.float32))

    p = dict(w1=conv_w(ks[0], 3, 3, cin, cout),
             b1=0.01 * jax.random.normal(ks[1], (cout,), jnp.float32),
             bn1=bn(ks[2], cout),
             w2=conv_w(ks[3], 3, 3, cout, cout),
             b2=0.01 * jax.random.normal(ks[4], (cout,), jnp.float32),
             bn2=bn(ks[5], cout))
    if cin != cout:                     # stride == 1: skip conv iff channels differ
        p['w_skip'] = conv_w(ks[6], 1, 1, cin, cout)
        p['b_skip'] = 0.01 * jax.random.normal(ks[7], (cout,), jnp.float32)
        p['bn_skip'] = bn(ks[8], cout)
    return p


# ----------------------------------------------------------------------------
if __name__ == "__main__":
    # out_channels = 128 keeps every channel axis a multiple of 128 lanes
    # (lane-aligned im2col column blocks, lane-dense stores, well-fed MXU).
    B, Cin, Cout, H, W = 2, 4, 128, 16, 16

    key = jax.random.PRNGKey(0)
    kx, kp = jax.random.split(key)
    x = jax.random.normal(kx, (B, Cin, H, W), jnp.float32)
    params = init_params(kp, Cin, Cout)

    fwd = jax.jit(residual_block)
    out = fwd(x, params)
    out = jax.block_until_ready(out)
    assert out.shape == (B, Cout, H, W), out.shape
    assert bool(jnp.all(jnp.isfinite(out)))

    # Tight check vs. a reference that applies the kernel's exact bf16 quantization.
    ref_q = residual_block_ref_bf16(x, params)
    err_q = float(jnp.max(jnp.abs(out - ref_q)))
    scale_q = float(jnp.max(jnp.abs(ref_q)))
    assert err_q <= 2e-3 * scale_q + 2e-3, (err_q, scale_q)

    # Loose sanity check vs. the full-f32 reference (bounds the bf16 quantization).
    ref = residual_block_ref(x, params)
    err = float(jnp.max(jnp.abs(out - ref)))
    scale = float(jnp.max(jnp.abs(ref)))
    assert err <= 5e-2 * scale + 5e-2, (err, scale)

    print("KERNEL_OK")
</pallas_src>

<mosaic_0001>
module attributes {stable_mosaic.version = 11 : i64} {
  func.func @_resblock_kernel(%arg0: i32, %arg1: memref<1x16x16x4xf32, #tpu.memory_space<vmem>>, %arg2: memref<9x4x128xbf16, #tpu.memory_space<vmem>>, %arg3: memref<1x128xf32, #tpu.memory_space<vmem>>, %arg4: memref<1x128xf32, #tpu.memory_space<vmem>>, %arg5: memref<1152x128xbf16, #tpu.memory_space<vmem>>, %arg6: memref<1x128xf32, #tpu.memory_space<vmem>>, %arg7: memref<1x128xf32, #tpu.memory_space<vmem>>, %arg8: memref<4x128xbf16, #tpu.memory_space<vmem>>, %arg9: memref<1x128xf32, #tpu.memory_space<vmem>>, %arg10: memref<1x128xf32, #tpu.memory_space<vmem>>, %arg11: memref<1x128x256xf32, #tpu.memory_space<vmem>>, %arg12: memref<1x18x18x4xf32, #tpu.memory_space<vmem>>, %arg13: memref<1x18x18x128xbf16, #tpu.memory_space<vmem>>, %arg14: memref<256x1152xbf16, #tpu.memory_space<vmem>>) attributes {dimension_semantics = [#tpu.dimension_semantics<parallel>], iteration_bounds = array<i64: 2>, scalar_prefetch = 0 : i64, scratch_operands = 3 : i64, tpu.core_type = #tpu.core_type<tc>, window_params = [{transform_indices = @transform_0, window_bounds = array<i64: 1, 16, 16, 4>}, {pipeline_mode = #tpu.pipeline_mode<synchronous>, transform_indices = @transform_1, window_bounds = array<i64: 9, 4, 128>}, {pipeline_mode = #tpu.pipeline_mode<synchronous>, transform_indices = @transform_2, window_bounds = array<i64: 1, 128>}, {pipeline_mode = #tpu.pipeline_mode<synchronous>, transform_indices = @transform_3, window_bounds = array<i64: 1, 128>}, {pipeline_mode = #tpu.pipeline_mode<synchronous>, transform_indices = @transform_4, window_bounds = array<i64: 1152, 128>}, {pipeline_mode = #tpu.pipeline_mode<synchronous>, transform_indices = @transform_5, window_bounds = array<i64: 1, 128>}, {pipeline_mode = #tpu.pipeline_mode<synchronous>, transform_indices = @transform_6, window_bounds = array<i64: 1, 128>}, {pipeline_mode = #tpu.pipeline_mode<synchronous>, transform_indices = @transform_7, window_bounds = array<i64: 4, 128>}, {pipeline_mode = #tpu.pipeline_mode<synchronous>, transform_indices = @transform_8, window_bounds = array<i64: 1, 128>}, {pipeline_mode = #tpu.pipeline_mode<synchronous>, transform_indices = @transform_9, window_bounds = array<i64: 1, 128>}, {transform_indices = @transform_10, window_bounds = array<i64: 1, 128, 256>}]} {
    %cst = arith.constant 0.000000e+00 : f32
    %0 = vector.broadcast %cst : f32 to vector<1x1x18x4xf32>
    %cst_0 = arith.constant 0.000000e+00 : f32
    %1 = vector.broadcast %cst_0 : f32 to vector<1x18x1x4xf32>
    %c0 = arith.constant 0 : index
    %c0_1 = arith.constant 0 : index
    %c0_2 = arith.constant 0 : index
    %c0_3 = arith.constant 0 : index
    %2 = vector.load %arg12[%c0, %c0_1, %c0_2, %c0_3] : memref<1x18x18x4xf32, #tpu.memory_space<vmem>>, vector<1x1x18x4xf32>
    tpu.vector_store %arg12[%c0, %c0_1, %c0_2, %c0_3], %0 {strides = array<i32>} : memref<1x18x18x4xf32, #tpu.memory_space<vmem>>, vector<1x1x18x4xf32>,
    %c0_4 = arith.constant 0 : index
    %c17 = arith.constant 17 : index
    %c0_5 = arith.constant 0 : index
    %c0_6 = arith.constant 0 : index
    %3 = vector.load %arg12[%c0_4, %c17, %c0_5, %c0_6] : memref<1x18x18x4xf32, #tpu.memory_space<vmem>>, vector<1x1x18x4xf32>
    tpu.vector_store %arg12[%c0_4, %c17, %c0_5, %c0_6], %0 {strides = array<i32>} : memref<1x18x18x4xf32, #tpu.memory_space<vmem>>, vector<1x1x18x4xf32>,
    %c0_7 = arith.constant 0 : index
    %c0_8 = arith.constant 0 : index
    %c0_9 = arith.constant 0 : index
    %c0_10 = arith.constant 0 : index
    %4 = vector.load %arg12[%c0_7, %c0_8, %c0_9, %c0_10] : memref<1x18x18x4xf32, #tpu.memory_space<vmem>>, vector<1x18x1x4xf32>
    tpu.vector_store %arg12[%c0_7, %c0_8, %c0_9, %c0_10], %1 {strides = array<i32>} : memref<1x18x18x4xf32, #tpu.memory_space<vmem>>, vector<1x18x1x4xf32>,
    %c0_11 = arith.constant 0 : index
    %c0_12 = arith.constant 0 : index
    %c17_13 = arith.constant 17 : index
    %c0_14 = arith.constant 0 : index
    %5 = vector.load %arg12[%c0_11, %c0_12, %c17_13, %c0_14] : memref<1x18x18x4xf32, #tpu.memory_space<vmem>>, vector<1x18x1x4xf32>
    tpu.vector_store %arg12[%c0_11, %c0_12, %c17_13, %c0_14], %1 {strides = array<i32>} : memref<1x18x18x4xf32, #tpu.memory_space<vmem>>, vector<1x18x1x4xf32>,
    %cst_15 = arith.constant 0.000000e+00 : bf16
    %6 = vector.broadcast %cst_15 : bf16 to vector<1x1x18x128xbf16>
    %cst_16 = arith.constant 0.000000e+00 : bf16
    %7 = vector.broadcast %cst_16 : bf16 to vector<1x18x1x128xbf16>
    %c0_17 = arith.constant 0 : index
    %c0_18 = arith.constant 0 : index
    %c0_19 = arith.constant 0 : index
    %c0_20 = arith.constant 0 : index
    %8 = vector.load %arg13[%c0_17, %c0_18, %c0_19, %c0_20] : memref<1x18x18x128xbf16, #tpu.memory_space<vmem>>, vector<1x1x18x128xbf16>
    tpu.vector_store %arg13[%c0_17, %c0_18, %c0_19, %c0_20], %6 {strides = array<i32>} : memref<1x18x18x128xbf16, #tpu.memory_space<vmem>>, vector<1x1x18x128xbf16>,
    %c0_21 = arith.constant 0 : index
    %c17_22 = arith.constant 17 : index
    %c0_23 = arith.constant 0 : index
    %c0_24 = arith.constant 0 : index
    %9 = vector.load %arg13[%c0_21, %c17_22, %c0_23, %c0_24] : memref<1x18x18x128xbf16, #tpu.memory_space<vmem>>, vector<1x1x18x128xbf16>
    tpu.vector_store %arg13[%c0_21, %c17_22, %c0_23, %c0_24], %6 {strides = array<i32>} : memref<1x18x18x128xbf16, #tpu.memory_space<vmem>>, vector<1x1x18x128xbf16>,
    %c0_25 = arith.constant 0 : index
    %c0_26 = arith.constant 0 : index
    %c0_27 = arith.constant 0 : index
    %c0_28 = arith.constant 0 : index
    %10 = vector.load %arg13[%c0_25, %c0_26, %c0_27, %c0_28] : memref<1x18x18x128xbf16, #tpu.memory_space<vmem>>, vector<1x18x1x128xbf16>
    tpu.vector_store %arg13[%c0_25, %c0_26, %c0_27, %c0_28], %7 {strides = array<i32>} : memref<1x18x18x128xbf16, #tpu.memory_space<vmem>>, vector<1x18x1x128xbf16>,
    %c0_29 = arith.constant 0 : index
    %c0_30 = arith.constant 0 : index
    %c17_31 = arith.constant 17 : index
    %c0_32 = arith.constant 0 : index
    %11 = vector.load %arg13[%c0_29, %c0_30, %c17_31, %c0_32] : memref<1x18x18x128xbf16, #tpu.memory_space<vmem>>, vector<1x18x1x128xbf16>
    tpu.vector_store %arg13[%c0_29, %c0_30, %c17_31, %c0_32], %7 {strides = array<i32>} : memref<1x18x18x128xbf16, #tpu.memory_space<vmem>>, vector<1x18x1x128xbf16>,
    %c0_33 = arith.constant 0 : index
    %c0_34 = arith.constant 0 : index
    %c0_35 = arith.constant 0 : index
    %c0_36 = arith.constant 0 : index
    %12 = vector.load %arg1[%c0_33, %c0_34, %c0_35, %c0_36] : memref<1x16x16x4xf32, #tpu.memory_space<vmem>>, vector<1x16x16x4xf32>
    %c0_37 = arith.constant 0 : index
    %c1 = arith.constant 1 : index
    %c1_38 = arith.constant 1 : index
    %c0_39 = arith.constant 0 : index
    %13 = vector.load %arg12[%c0_37, %c1, %c1_38, %c0_39] : memref<1x18x18x4xf32, #tpu.memory_space<vmem>>, vector<1x16x16x4xf32>
    tpu.vector_store %arg12[%c0_37, %c1, %c1_38, %c0_39], %12 {strides = array<i32>} : memref<1x18x18x4xf32, #tpu.memory_space<vmem>>, vector<1x16x16x4xf32>,
    %cst_40 = arith.constant 0.000000e+00 : f32
    %14 = vector.broadcast %cst_40 : f32 to vector<256x128xf32>
    %c0_41 = arith.constant 0 : index
    %c0_42 = arith.constant 0 : index
    %c0_43 = arith.constant 0 : index
    %c0_44 = arith.constant 0 : index
    %15 = vector.load %arg12[%c0_41, %c0_42, %c0_43, %c0_44] : memref<1x18x18x4xf32, #tpu.memory_space<vmem>>, vector<1x16x16x4xf32>
    %16 = vector.shape_cast %15 : vector<1x16x16x4xf32> to vector<256x4xf32>
    %17 = arith.truncf %16 : vector<256x4xf32> to vector<256x4xbf16>
    %c0_45 = arith.constant 0 : index
    %c0_46 = arith.constant 0 : index
    %c0_47 = arith.constant 0 : index
    %18 = vector.load %arg2[%c0_45, %c0_46, %c0_47] : memref<9x4x128xbf16, #tpu.memory_space<vmem>>, vector<1x4x128xbf16>
    %19 = vector.shape_cast %18 : vector<1x4x128xbf16> to vector<4x128xbf16>
    %cst_48 = arith.constant dense<0.000000e+00> : vector<256x128xf32>
    %20 = tpu.matmul %17, %19, %cst_48 {dimension_numbers = #tpu.dot_dimension_numbers<[1], [0], [0], [1], [0, 0, 1, 1], [], []>} : vector<256x4xbf16>, vector<4x128xbf16>, vector<256x128xf32> -> vector<256x128xf32>
    %21 = arith.addf %14, %20 : vector<256x128xf32>
    %c0_49 = arith.constant 0 : index
    %c0_50 = arith.constant 0 : index
    %c1_51 = arith.constant 1 : index
    %c0_52 = arith.constant 0 : index
    %22 = vector.load %arg12[%c0_49, %c0_50, %c1_51, %c0_52] : memref<1x18x18x4xf32, #tpu.memory_space<vmem>>, vector<1x16x16x4xf32>
    %23 = vector.shape_cast %22 : vector<1x16x16x4xf32> to vector<256x4xf32>
    %24 = arith.truncf %23 : vector<256x4xf32> to vector<256x4xbf16>
    %c1_53 = arith.constant 1 : index
    %c0_54 = arith.constant 0 : index
    %c0_55 = arith.constant 0 : index
    %25 = vector.load %arg2[%c1_53, %c0_54, %c0_55] : memref<9x4x128xbf16, #tpu.memory_space<vmem>>, vector<1x4x128xbf16>
    %26 = vector.shape_cast %25 : vector<1x4x128xbf16> to vector<4x128xbf16>
    %cst_56 = arith.constant dense<0.000000e+00> : vector<256x128xf32>
    %27 = tpu.matmul %24, %26, %cst_56 {dimension_numbers = #tpu.dot_dimension_numbers<[1], [0], [0], [1], [0, 0, 1, 1], [], []>} : vector<256x4xbf16>, vector<4x128xbf16>, vector<256x128xf32> -> vector<256x128xf32>
    %28 = arith.addf %21, %27 : vector<256x128xf32>
    %c0_57 = arith.constant 0 : index
    %c0_58 = arith.constant 0 : index
    %c2 = arith.constant 2 : index
    %c0_59 = arith.constant 0 : index
    %29 = vector.load %arg12[%c0_57, %c0_58, %c2, %c0_59] : memref<1x18x18x4xf32, #tpu.memory_space<vmem>>, vector<1x16x16x4xf32>
    %30 = vector.shape_cast %29 : vector<1x16x16x4xf32> to vector<256x4xf32>
    %31 = arith.truncf %30 : vector<256x4xf32> to vector<256x4xbf16>
    %c2_60 = arith.constant 2 : index
    %c0_61 = arith.constant 0 : index
    %c0_62 = arith.constant 0 : index
    %32 = vector.load %arg2[%c2_60, %c0_61, %c0_62] : memref<9x4x128xbf16, #tpu.memory_space<vmem>>, vector<1x4x128xbf16>
    %33 = vector.shape_cast %32 : vector<1x4x128xbf16> to vector<4x128xbf16>
    %cst_63 = arith.constant dense<0.000000e+00> : vector<256x128xf32>
    %34 = tpu.matmul %31, %33, %cst_63 {dimension_numbers = #tpu.dot_dimension_numbers<[1], [0], [0], [1], [0, 0, 1, 1], [], []>} : vector<256x4xbf16>, vector<4x128xbf16>, vector<256x128xf32> -> vector<256x128xf32>
    %35 = arith.addf %28, %34 : vector<256x128xf32>
    %c0_64 = arith.constant 0 : index
    %c1_65 = arith.constant 1 : index
    %c0_66 = arith.constant 0 : index
    %c0_67 = arith.constant 0 : index
    %36 = vector.load %arg12[%c0_64, %c1_65, %c0_66, %c0_67] : memref<1x18x18x4xf32, #tpu.memory_space<vmem>>, vector<1x16x16x4xf32>
    %37 = vector.shape_cast %36 : vector<1x16x16x4xf32> to vector<256x4xf32>
    %38 = arith.truncf %37 : vector<256x4xf32> to vector<256x4xbf16>
    %c3 = arith.constant 3 : index
    %c0_68 = arith.constant 0 : index
    %c0_69 = arith.constant 0 : index
    %39 = vector.load %arg2[%c3, %c0_68, %c0_69] : memref<9x4x128xbf16, #tpu.memory_space<vmem>>, vector<1x4x128xbf16>
    %40 = vector.shape_cast %39 : vector<1x4x128xbf16> to vector<4x128xbf16>
    %cst_70 = arith.constant dense<0.000000e+00> : vector<256x128xf32>
    %41 = tpu.matmul %38, %40, %cst_70 {dimension_numbers = #tpu.dot_dimension_numbers<[1], [0], [0], [1], [0, 0, 1, 1], [], []>} : vector<256x4xbf16>, vector<4x128xbf16>, vector<256x128xf32> -> vector<256x128xf32>
    %42 = arith.addf %35, %41 : vector<256x128xf32>
    %c0_71 = arith.constant 0 : index
    %c1_72 = arith.constant 1 : index
    %c1_73 = arith.constant 1 : index
    %c0_74 = arith.constant 0 : index
    %43 = vector.load %arg12[%c0_71, %c1_72, %c1_73, %c0_74] : memref<1x18x18x4xf32, #tpu.memory_space<vmem>>, vector<1x16x16x4xf32>
    %44 = vector.shape_cast %43 : vector<1x16x16x4xf32> to vector<256x4xf32>
    %45 = arith.truncf %44 : vector<256x4xf32> to vector<256x4xbf16>
    %c4 = arith.constant 4 : index
    %c0_75 = arith.constant 0 : index
    %c0_76 = arith.constant 0 : index
    %46 = vector.load %arg2[%c4, %c0_75, %c0_76] : memref<9x4x128xbf16, #tpu.memory_space<vmem>>, vector<1x4x128xbf16>
    %47 = vector.shape_cast %46 : vector<1x4x128xbf16> to vector<4x128xbf16>
    %cst_77 = arith.constant dense<0.000000e+00> : vector<256x128xf32>
    %48 = tpu.matmul %45, %47, %cst_77 {dimension_numbers = #tpu.dot_dimension_numbers<[1], [0], [0], [1], [0, 0, 1, 1], [], []>} : vector<256x4xbf16>, vector<4x128xbf16>, vector<256x128xf32> -> vector<256x128xf32>
    %49 = arith.addf %42, %48 : vector<256x128xf32>
    %c0_78 = arith.constant 0 : index
    %c1_79 = arith.constant 1 : index
    %c2_80 = arith.constant 2 : index
    %c0_81 = arith.constant 0 : index
    %50 = vector.load %arg12[%c0_78, %c1_79, %c2_80, %c0_81] : memref<1x18x18x4xf32, #tpu.memory_space<vmem>>, vector<1x16x16x4xf32>
    %51 = vector.shape_cast %50 : vector<1x16x16x4xf32> to vector<256x4xf32>
    %52 = arith.truncf %51 : vector<256x4xf32> to vector<256x4xbf16>
    %c5 = arith.constant 5 : index
    %c0_82 = arith.constant 0 : index
    %c0_83 = arith.constant 0 : index
    %53 = vector.load %arg2[%c5, %c0_82, %c0_83] : memref<9x4x128xbf16, #tpu.memory_space<vmem>>, vector<1x4x128xbf16>
    %54 = vector.shape_cast %53 : vector<1x4x128xbf16> to vector<4x128xbf16>
    %cst_84 = arith.constant dense<0.000000e+00> : vector<256x128xf32>
    %55 = tpu.matmul %52, %54, %cst_84 {dimension_numbers = #tpu.dot_dimension_numbers<[1], [0], [0], [1], [0, 0, 1, 1], [], []>} : vector<256x4xbf16>, vector<4x128xbf16>, vector<256x128xf32> -> vector<256x128xf32>
    %56 = arith.addf %49, %55 : vector<256x128xf32>
    %c0_85 = arith.constant 0 : index
    %c2_86 = arith.constant 2 : index
    %c0_87 = arith.constant 0 : index
    %c0_88 = arith.constant 0 : index
    %57 = vector.load %arg12[%c0_85, %c2_86, %c0_87, %c0_88] : memref<1x18x18x4xf32, #tpu.memory_space<vmem>>, vector<1x16x16x4xf32>
    %58 = vector.shape_cast %57 : vector<1x16x16x4xf32> to vector<256x4xf32>
    %59 = arith.truncf %58 : vector<256x4xf32> to vector<256x4xbf16>
    %c6 = arith.constant 6 : index
    %c0_89 = arith.constant 0 : index
    %c0_90 = arith.constant 0 : index
    %60 = vector.load %arg2[%c6, %c0_89, %c0_90] : memref<9x4x128xbf16, #tpu.memory_space<vmem>>, vector<1x4x128xbf16>
    %61 = vector.shape_cast %60 : vector<1x4x128xbf16> to vector<4x128xbf16>
    %cst_91 = arith.constant dense<0.000000e+00> : vector<256x128xf32>
    %62 = tpu.matmul %59, %61, %cst_91 {dimension_numbers = #tpu.dot_dimension_numbers<[1], [0], [0], [1], [0, 0, 1, 1], [], []>} : vector<256x4xbf16>, vector<4x128xbf16>, vector<256x128xf32> -> vector<256x128xf32>
    %63 = arith.addf %56, %62 : vector<256x128xf32>
    %c0_92 = arith.constant 0 : index
    %c2_93 = arith.constant 2 : index
    %c1_94 = arith.constant 1 : index
    %c0_95 = arith.constant 0 : index
    %64 = vector.load %arg12[%c0_92, %c2_93, %c1_94, %c0_95] : memref<1x18x18x4xf32, #tpu.memory_space<vmem>>, vector<1x16x16x4xf32>
    %65 = vector.shape_cast %64 : vector<1x16x16x4xf32> to vector<256x4xf32>
    %66 = arith.truncf %65 : vector<256x4xf32> to vector<256x4xbf16>
    %c7 = arith.constant 7 : index
    %c0_96 = arith.constant 0 : index
    %c0_97 = arith.constant 0 : index
    %67 = vector.load %arg2[%c7, %c0_96, %c0_97] : memref<9x4x128xbf16, #tpu.memory_space<vmem>>, vector<1x4x128xbf16>
    %68 = vector.shape_cast %67 : vector<1x4x128xbf16> to vector<4x128xbf16>
    %cst_98 = arith.constant dense<0.000000e+00> : vector<256x128xf32>
    %69 = tpu.matmul %66, %68, %cst_98 {dimension_numbers = #tpu.dot_dimension_numbers<[1], [0], [0], [1], [0, 0, 1, 1], [], []>} : vector<256x4xbf16>, vector<4x128xbf16>, vector<256x128xf32> -> vector<256x128xf32>
    %70 = arith.addf %63, %69 : vector<256x128xf32>
    %c0_99 = arith.constant 0 : index
    %c2_100 = arith.constant 2 : index
    %c2_101 = arith.constant 2 : index
    %c0_102 = arith.constant 0 : index
    %71 = vector.load %arg12[%c0_99, %c2_100, %c2_101, %c0_102] : memref<1x18x18x4xf32, #tpu.memory_space<vmem>>, vector<1x16x16x4xf32>
    %72 = vector.shape_cast %71 : vector<1x16x16x4xf32> to vector<256x4xf32>
    %73 = arith.truncf %72 : vector<256x4xf32> to vector<256x4xbf16>
    %c8 = arith.constant 8 : index
    %c0_103 = arith.constant 0 : index
    %c0_104 = arith.constant 0 : index
    %74 = vector.load %arg2[%c8, %c0_103, %c0_104] : memref<9x4x128xbf16, #tpu.memory_space<vmem>>, vector<1x4x128xbf16>
    %75 = vector.shape_cast %74 : vector<1x4x128xbf16> to vector<4x128xbf16>
    %cst_105 = arith.constant dense<0.000000e+00> : vector<256x128xf32>
    %76 = tpu.matmul %73, %75, %cst_105 {dimension_numbers = #tpu.dot_dimension_numbers<[1], [0], [0], [1], [0, 0, 1, 1], [], []>} : vector<256x4xbf16>, vector<4x128xbf16>, vector<256x128xf32> -> vector<256x128xf32>
    %77 = arith.addf %70, %76 : vector<256x128xf32>
    %c0_106 = arith.constant 0 : index
    %c0_107 = arith.constant 0 : index
    %78 = vector.load %arg3[%c0_106, %c0_107] : memref<1x128xf32, #tpu.memory_space<vmem>>, vector<1x128xf32>
    %79 = vector.broadcast %78 : vector<1x128xf32> to vector<256x128xf32>
    %80 = arith.mulf %77, %79 : vector<256x128xf32>
    %c0_108 = arith.constant 0 : index
    %c0_109 = arith.constant 0 : index
    %81 = vector.load %arg4[%c0_108, %c0_109] : memref<1x128xf32, #tpu.memory_space<vmem>>, vector<1x128xf32>
    %82 = vector.broadcast %81 : vector<1x128xf32> to vector<256x128xf32>
    %83 = arith.addf %80, %82 : vector<256x128xf32>
    %cst_110 = arith.constant 0.000000e+00 : f32
    %84 = vector.broadcast %cst_110 : f32 to vector<256x128xf32>
    %85 = arith.maximumf %83, %84 : vector<256x128xf32>
    %86 = vector.shape_cast %85 : vector<256x128xf32> to vector<1x16x16x128xf32>
    %87 = arith.truncf %86 : vector<1x16x16x128xf32> to vector<1x16x16x128xbf16>
    %c0_111 = arith.constant 0 : index
    %c1_112 = arith.constant 1 : index
    %c1_113 = arith.constant 1 : index
    %c0_114 = arith.constant 0 : index
    %88 = vector.load %arg13[%c0_111, %c1_112, %c1_113, %c0_114] : memref<1x18x18x128xbf16, #tpu.memory_space<vmem>>, vector<1x16x16x128xbf16>
    tpu.vector_store %arg13[%c0_111, %c1_112, %c1_113, %c0_114], %87 {strides = array<i32>} : memref<1x18x18x128xbf16, #tpu.memory_space<vmem>>, vector<1x16x16x128xbf16>,
    %c0_115 = arith.constant 0 : index
    %c0_116 = arith.constant 0 : index
    %c0_117 = arith.constant 0 : index
    %c0_118 = arith.constant 0 : index
    %89 = vector.load %arg13[%c0_115, %c0_116, %c0_117, %c0_118] : memref<1x18x18x128xbf16, #tpu.memory_space<vmem>>, vector<1x16x16x128xbf16>
    %90 = vector.shape_cast %89 : vector<1x16x16x128xbf16> to vector<256x128xbf16>
    %c0_119 = arith.constant 0 : index
    %c0_120 = arith.constant 0 : index
    %91 = vector.load %arg14[%c0_119, %c0_120] : memref<256x1152xbf16, #tpu.memory_space<vmem>>, vector<256x128xbf16>
    tpu.vector_store %arg14[%c0_119, %c0_120], %90 {strides = array<i32>} : memref<256x1152xbf16, #tpu.memory_space<vmem>>, vector<256x128xbf16>,
    %c0_121 = arith.constant 0 : index
    %c0_122 = arith.constant 0 : index
    %c1_123 = arith.constant 1 : index
    %c0_124 = arith.constant 0 : index
    %92 = vector.load %arg13[%c0_121, %c0_122, %c1_123, %c0_124] : memref<1x18x18x128xbf16, #tpu.memory_space<vmem>>, vector<1x16x16x128xbf16>
    %93 = vector.shape_cast %92 : vector<1x16x16x128xbf16> to vector<256x128xbf16>
    %c0_125 = arith.constant 0 : index
    %c128 = arith.constant 128 : index
    %94 = vector.load %arg14[%c0_125, %c128] : memref<256x1152xbf16, #tpu.memory_space<vmem>>, vector<256x128xbf16>
    tpu.vector_store %arg14[%c0_125, %c128], %93 {strides = array<i32>} : memref<256x1152xbf16, #tpu.memory_space<vmem>>, vector<256x128xbf16>,
    %c0_126 = arith.constant 0 : index
    %c0_127 = arith.constant 0 : index
    %c2_128 = arith.constant 2 : index
    %c0_129 = arith.constant 0 : index
    %95 = vector.load %arg13[%c0_126, %c0_127, %c2_128, %c0_129] : memref<1x18x18x128xbf16, #tpu.memory_space<vmem>>, vector<1x16x16x128xbf16>
    %96 = vector.shape_cast %95 : vector<1x16x16x128xbf16> to vector<256x128xbf16>
    %c0_130 = arith.constant 0 : index
    %c256 = arith.constant 256 : index
    %97 = vector.load %arg14[%c0_130, %c256] : memref<256x1152xbf16, #tpu.memory_space<vmem>>, vector<256x128xbf16>
    tpu.vector_store %arg14[%c0_130, %c256], %96 {strides = array<i32>} : memref<256x1152xbf16, #tpu.memory_space<vmem>>, vector<256x128xbf16>,
    %c0_131 = arith.constant 0 : index
    %c1_132 = arith.constant 1 : index
    %c0_133 = arith.constant 0 : index
    %c0_134 = arith.constant 0 : index
    %98 = vector.load %arg13[%c0_131, %c1_132, %c0_133, %c0_134] : memref<1x18x18x128xbf16, #tpu.memory_space<vmem>>, vector<1x16x16x128xbf16>
    %99 = vector.shape_cast %98 : vector<1x16x16x128xbf16> to vector<256x128xbf16>
    %c0_135 = arith.constant 0 : index
    %c384 = arith.constant 384 : index
    %100 = vector.load %arg14[%c0_135, %c384] : memref<256x1152xbf16, #tpu.memory_space<vmem>>, vector<256x128xbf16>
    tpu.vector_store %arg14[%c0_135, %c384], %99 {strides = array<i32>} : memref<256x1152xbf16, #tpu.memory_space<vmem>>, vector<256x128xbf16>,
    %c0_136 = arith.constant 0 : index
    %c1_137 = arith.constant 1 : index
    %c1_138 = arith.constant 1 : index
    %c0_139 = arith.constant 0 : index
    %101 = vector.load %arg13[%c0_136, %c1_137, %c1_138, %c0_139] : memref<1x18x18x128xbf16, #tpu.memory_space<vmem>>, vector<1x16x16x128xbf16>
    %102 = vector.shape_cast %101 : vector<1x16x16x128xbf16> to vector<256x128xbf16>
    %c0_140 = arith.constant 0 : index
    %c512 = arith.constant 512 : index
    %103 = vector.load %arg14[%c0_140, %c512] : memref<256x1152xbf16, #tpu.memory_space<vmem>>, vector<256x128xbf16>
    tpu.vector_store %arg14[%c0_140, %c512], %102 {strides = array<i32>} : memref<256x1152xbf16, #tpu.memory_space<vmem>>, vector<256x128xbf16>,
    %c0_141 = arith.constant 0 : index
    %c1_142 = arith.constant 1 : index
    %c2_143 = arith.constant 2 : index
    %c0_144 = arith.constant 0 : index
    %104 = vector.load %arg13[%c0_141, %c1_142, %c2_143, %c0_144] : memref<1x18x18x128xbf16, #tpu.memory_space<vmem>>, vector<1x16x16x128xbf16>
    %105 = vector.shape_cast %104 : vector<1x16x16x128xbf16> to vector<256x128xbf16>
    %c0_145 = arith.constant 0 : index
    %c640 = arith.constant 640 : index
    %106 = vector.load %arg14[%c0_145, %c640] : memref<256x1152xbf16, #tpu.memory_space<vmem>>, vector<256x128xbf16>
    tpu.vector_store %arg14[%c0_145, %c640], %105 {strides = array<i32>} : memref<256x1152xbf16, #tpu.memory_space<vmem>>, vector<256x128xbf16>,
    %c0_146 = arith.constant 0 : index
    %c2_147 = arith.constant 2 : index
    %c0_148 = arith.constant 0 : index
    %c0_149 = arith.constant 0 : index
    %107 = vector.load %arg13[%c0_146, %c2_147, %c0_148, %c0_149] : memref<1x18x18x128xbf16, #tpu.memory_space<vmem>>, vector<1x16x16x128xbf16>
    %108 = vector.shape_cast %107 : vector<1x16x16x128xbf16> to vector<256x128xbf16>
    %c0_150 = arith.constant 0 : index
    %c768 = arith.constant 768 : index
    %109 = vector.load %arg14[%c0_150, %c768] : memref<256x1152xbf16, #tpu.memory_space<vmem>>, vector<256x128xbf16>
    tpu.vector_store %arg14[%c0_150, %c768], %108 {strides = array<i32>} : memref<256x1152xbf16, #tpu.memory_space<vmem>>, vector<256x128xbf16>,
    %c0_151 = arith.constant 0 : index
    %c2_152 = arith.constant 2 : index
    %c1_153 = arith.constant 1 : index
    %c0_154 = arith.constant 0 : index
    %110 = vector.load %arg13[%c0_151, %c2_152, %c1_153, %c0_154] : memref<1x18x18x128xbf16, #tpu.memory_space<vmem>>, vector<1x16x16x128xbf16>
    %111 = vector.shape_cast %110 : vector<1x16x16x128xbf16> to vector<256x128xbf16>
    %c0_155 = arith.constant 0 : index
    %c896 = arith.constant 896 : index
    %112 = vector.load %arg14[%c0_155, %c896] : memref<256x1152xbf16, #tpu.memory_space<vmem>>, vector<256x128xbf16>
    tpu.vector_store %arg14[%c0_155, %c896], %111 {strides = array<i32>} : memref<256x1152xbf16, #tpu.memory_space<vmem>>, vector<256x128xbf16>,
    %c0_156 = arith.constant 0 : index
    %c2_157 = arith.constant 2 : index
    %c2_158 = arith.constant 2 : index
    %c0_159 = arith.constant 0 : index
    %113 = vector.load %arg13[%c0_156, %c2_157, %c2_158, %c0_159] : memref<1x18x18x128xbf16, #tpu.memory_space<vmem>>, vector<1x16x16x128xbf16>
    %114 = vector.shape_cast %113 : vector<1x16x16x128xbf16> to vector<256x128xbf16>
    %c0_160 = arith.constant 0 : index
    %c1024 = arith.constant 1024 : index
    %115 = vector.load %arg14[%c0_160, %c1024] : memref<256x1152xbf16, #tpu.memory_space<vmem>>, vector<256x128xbf16>
    tpu.vector_store %arg14[%c0_160, %c1024], %114 {strides = array<i32>} : memref<256x1152xbf16, #tpu.memory_space<vmem>>, vector<256x128xbf16>,
    %c0_161 = arith.constant 0 : index
    %c0_162 = arith.constant 0 : index
    %116 = vector.load %arg14[%c0_161, %c0_162] : memref<256x1152xbf16, #tpu.memory_space<vmem>>, vector<256x1152xbf16>
    %c0_163 = arith.constant 0 : index
    %c0_164 = arith.constant 0 : index
    %117 = vector.load %arg5[%c0_163, %c0_164] : memref<1152x128xbf16, #tpu.memory_space<vmem>>, vector<1152x128xbf16>
    %cst_165 = arith.constant dense<0.000000e+00> : vector<256x128xf32>
    %118 = tpu.matmul %116, %117, %cst_165 {dimension_numbers = #tpu.dot_dimension_numbers<[1], [0], [0], [1], [0, 0, 1, 1], [], []>} : vector<256x1152xbf16>, vector<1152x128xbf16>, vector<256x128xf32> -> vector<256x128xf32>
    %c0_166 = arith.constant 0 : index
    %c0_167 = arith.constant 0 : index
    %119 = vector.load %arg6[%c0_166, %c0_167] : memref<1x128xf32, #tpu.memory_space<vmem>>, vector<1x128xf32>
    %120 = vector.broadcast %119 : vector<1x128xf32> to vector<256x128xf32>
    %121 = arith.mulf %118, %120 : vector<256x128xf32>
    %c0_168 = arith.constant 0 : index
    %c0_169 = arith.constant 0 : index
    %122 = vector.load %arg7[%c0_168, %c0_169] : memref<1x128xf32, #tpu.memory_space<vmem>>, vector<1x128xf32>
    %123 = vector.broadcast %122 : vector<1x128xf32> to vector<256x128xf32>
    %124 = arith.addf %121, %123 : vector<256x128xf32>
    %c0_170 = arith.constant 0 : index
    %c1_171 = arith.constant 1 : index
    %c1_172 = arith.constant 1 : index
    %c0_173 = arith.constant 0 : index
    %125 = vector.load %arg12[%c0_170, %c1_171, %c1_172, %c0_173] : memref<1x18x18x4xf32, #tpu.memory_space<vmem>>, vector<1x16x16x4xf32>
    %126 = vector.shape_cast %125 : vector<1x16x16x4xf32> to vector<256x4xf32>
    %127 = arith.truncf %126 : vector<256x4xf32> to vector<256x4xbf16>
    %c0_174 = arith.constant 0 : index
    %c0_175 = arith.constant 0 : index
    %128 = vector.load %arg8[%c0_174, %c0_175] : memref<4x128xbf16, #tpu.memory_space<vmem>>, vector<4x128xbf16>
    %cst_176 = arith.constant dense<0.000000e+00> : vector<256x128xf32>
    %129 = tpu.matmul %127, %128, %cst_176 {dimension_numbers = #tpu.dot_dimension_numbers<[1], [0], [0], [1], [0, 0, 1, 1], [], []>} : vector<256x4xbf16>, vector<4x128xbf16>, vector<256x128xf32> -> vector<256x128xf32>
    %c0_177 = arith.constant 0 : index
    %c0_178 = arith.constant 0 : index
    %130 = vector.load %arg9[%c0_177, %c0_178] : memref<1x128xf32, #tpu.memory_space<vmem>>, vector<1x128xf32>
    %131 = vector.broadcast %130 : vector<1x128xf32> to vector<256x128xf32>
    %132 = arith.mulf %129, %131 : vector<256x128xf32>
    %c0_179 = arith.constant 0 : index
    %c0_180 = arith.constant 0 : index
    %133 = vector.load %arg10[%c0_179, %c0_180] : memref<1x128xf32, #tpu.memory_space<vmem>>, vector<1x128xf32>
    %134 = vector.broadcast %133 : vector<1x128xf32> to vector<256x128xf32>
    %135 = arith.addf %132, %134 : vector<256x128xf32>
    %136 = arith.addf %124, %135 : vector<256x128xf32>
    %cst_181 = arith.constant 0.000000e+00 : f32
    %137 = vector.broadcast %cst_181 : f32 to vector<256x128xf32>
    %138 = arith.maximumf %136, %137 : vector<256x128xf32>
    %139 = tpu.transpose %138, [1, 0] : vector<256x128xf32> -> vector<128x256xf32>
    %c0_182 = arith.constant 0 : index
    %c0_183 = arith.constant 0 : index
    %c0_184 = arith.constant 0 : index
    %140 = vector.load %arg11[%c0_182, %c0_183, %c0_184] : memref<1x128x256xf32, #tpu.memory_space<vmem>>, vector<1x128x256xf32>
    %141 = vector.shape_cast %140 : vector<1x128x256xf32> to vector<128x256xf32>
    %142 = vector.shape_cast %139 : vector<128x256xf32> to vector<1x128x256xf32>
    tpu.vector_store %arg11[%c0_182, %c0_183, %c0_184], %142 {strides = array<i32>} : memref<1x128x256xf32, #tpu.memory_space<vmem>>, vector<1x128x256xf32>,
    return
  }
  func.func @transform_0(%arg0: i32) -> (i32, i32, i32, i32) {
    %c0_i32 = arith.constant 0 : i32
    %c0_i32_0 = arith.constant 0 : i32
    %c0_i32_1 = arith.constant 0 : i32
    %c0_i32_2 = arith.constant 0 : i32
    return %arg0, %c0_i32, %c0_i32_0, %c0_i32_1 : i32, i32, i32, i32
  }
  func.func @transform_1(%arg0: i32) -> (i32, i32, i32) {
    %c0_i32 = arith.constant 0 : i32
    %c0_i32_0 = arith.constant 0 : i32
    %c0_i32_1 = arith.constant 0 : i32
    %c0_i32_2 = arith.constant 0 : i32
    return %c0_i32, %c0_i32_0, %c0_i32_1 : i32, i32, i32
  }
  func.func @transform_2(%arg0: i32) -> (i32, i32) {
    %c0_i32 = arith.constant 0 : i32
    %c0_i32_0 = arith.constant 0 : i32
    %c0_i32_1 = arith.constant 0 : i32
    return %c0_i32, %c0_i32_0 : i32, i32
  }
  func.func @transform_3(%arg0: i32) -> (i32, i32) {
    %c0_i32 = arith.constant 0 : i32
    %c0_i32_0 = arith.constant 0 : i32
    %c0_i32_1 = arith.constant 0 : i32
    return %c0_i32, %c0_i32_0 : i32, i32
  }
  func.func @transform_4(%arg0: i32) -> (i32, i32) {
    %c0_i32 = arith.constant 0 : i32
    %c0_i32_0 = arith.constant 0 : i32
    %c0_i32_1 = arith.constant 0 : i32
    return %c0_i32, %c0_i32_0 : i32, i32
  }
  func.func @transform_5(%arg0: i32) -> (i32, i32) {
    %c0_i32 = arith.constant 0 : i32
    %c0_i32_0 = arith.constant 0 : i32
    %c0_i32_1 = arith.constant 0 : i32
    return %c0_i32, %c0_i32_0 : i32, i32
  }
  func.func @transform_6(%arg0: i32) -> (i32, i32) {
    %c0_i32 = arith.constant 0 : i32
    %c0_i32_0 = arith.constant 0 : i32
    %c0_i32_1 = arith.constant 0 : i32
    return %c0_i32, %c0_i32_0 : i32, i32
  }
  func.func @transform_7(%arg0: i32) -> (i32, i32) {
    %c0_i32 = arith.constant 0 : i32
    %c0_i32_0 = arith.constant 0 : i32
    %c0_i32_1 = arith.constant 0 : i32
    return %c0_i32, %c0_i32_0 : i32, i32
  }
  func.func @transform_8(%arg0: i32) -> (i32, i32) {
    %c0_i32 = arith.constant 0 : i32
    %c0_i32_0 = arith.constant 0 : i32
    %c0_i32_1 = arith.constant 0 : i32
    return %c0_i32, %c0_i32_0 : i32, i32
  }
  func.func @transform_9(%arg0: i32) -> (i32, i32) {
    %c0_i32 = arith.constant 0 : i32
    %c0_i32_0 = arith.constant 0 : i32
    %c0_i32_1 = arith.constant 0 : i32
    return %c0_i32, %c0_i32_0 : i32, i32
  }
  func.func @transform_10(%arg0: i32) -> (i32, i32, i32) {
    %c0_i32 = arith.constant 0 : i32
    %c0_i32_0 = arith.constant 0 : i32
    %c0_i32_1 = arith.constant 0 : i32
    return %arg0, %c0_i32, %c0_i32_0 : i32, i32, i32
  }
}

</mosaic_0001>

<bundles_post_ra>
// kernel: residual_block.1
= control target key start
LH: loop header
LB: loop body
LE: loop exit
PB: predicated region body
PF: predicated region fallthrough
CT: control target
= control target key end

     0   :  { %s10825_s13 = smov 0   ;;  %s13277_s0 = inlined_call_operand.vmem [shape: f32[2,16,16,4], index: 0, kind: input, shape index: {}]   ;;  %s13278_s1 = inlined_call_operand.vmem [shape: bf16[9,4,128], index: 1, kind: input, shape index: {}]   ;;  %s13279_s2 = inlined_call_operand.vmem [shape: f32[1,128], index: 2, kind: input, shape index: {}]   ;;  %s13280_s3 = inlined_call_operand.vmem [shape: f32[1,128], index: 3, kind: input, shape index: {}]   ;;  %s13281_s4 = inlined_call_operand.vmem [shape: bf16[1152,128], index: 4, kind: input, shape index: {}]   ;;  %s13282_s5 = inlined_call_operand.vmem [shape: f32[1,128], index: 5, kind: input, shape index: {}]   ;;  %s13283_s6 = inlined_call_operand.vmem [shape: f32[1,128], index: 6, kind: input, shape index: {}]   ;;  %s13284_s7 = inlined_call_operand.vmem [shape: bf16[4,128], index: 7, kind: input, shape index: {}]   ;;  %s13285_s8 = inlined_call_operand.vmem [shape: f32[1,128], index: 8, kind: input, shape index: {}]   ;;  %s13286_s9 = inlined_call_operand.vmem [shape: f32[1,128], index: 9, kind: input, shape index: {}]   ;;  %s13287_s10 = inlined_call_operand.vmem [shape: f32[2,128,256], index: 10, kind: output, shape index: {}]  }
   0x1 LB: > { %s8814_s14 = sadd.s32 4294967295, %s10766_s13   ;;  %p8818_p0 = scmp.ge.s32.totalorder %s10766_s13, 1  ;;  %s10766_s13 = sphi %s10825_s13, %s20_s13  }
   0x2   : > { %p312_p1 = scmp.lt.s32.totalorder %s10766_s13, 3 }
   0x4   : > { %p313_p2 = pnand %p8818_p0, %p312_p1 }
   0x6   : > { %316 = sbr.rel (%p313_p2) target bundleno = 1770 (0x6ea), region = 60 }
   0xd   : > { %v8823_v0 = vld [vmem:[%s13278_s1 + $0x2] sm:$0x3]  ;;  %vm739_vm0 = vcmask 1041408   ;;  %vm361_vm1 = vcmask 31744   ;;  %vm364_vm2 = vcmask 25600   ;;  %v10768_v2 = vmov 0.0  }
   0xe   : > { %10617 = vmatprep.subr.msk.bf16.mxu0 %vm739_vm0, %v8823_v0  ;;  %v741_v1 = vsel %vm739_vm0, %v8823_v0, 0  ;;  %362 = vst.msk [vmem:[#allocation2] sm:$0xff] %vm361_vm1, %v10768_v2  ;;  %363 = vst.msk [vmem:[#allocation2 + $0x8] sm:$0xff] %vm361_vm1, %v10768_v2  ;;  %vm370_vm3 = vcmask 24576   ;;  %v10845_v3 = vld [vmem:[%s13278_s1] sm:$0x3]  ;;  %10618 = vmatprep.subr.msk.bf16.mxu1 %vm739_vm0, %v8823_v0 }
   0xf   : > { %365 = vst.msk [vmem:[#allocation2 + $0x10] sm:$0x3] %vm364_vm2, %v10768_v2  ;;  %369 = vst.msk [vmem:[#allocation2 + $0x1a8] sm:$0x3] %vm364_vm2, %v10768_v2  ;;  %p10849_p3 = scmp.lt.s32.totalorder %s8814_s14, 1  ;;  %9972 = vmatpush3.bf16.msra.mxu0 %v741_v1  ;;  %10360 = vmatpush3.bf16.msra.mxu1 %v741_v1  ;;  %v953_v31 = vsel %vm739_vm0, %v10845_v3, 0 }
  0x10   : > { %367 = vst.msk [vmem:[#allocation2 + $0x198] sm:$0xff] %vm361_vm1, %v10768_v2  ;;  %368 = vst.msk [vmem:[#allocation2 + $0x1a0] sm:$0xff] %vm361_vm1, %v10768_v2  ;;  %10619 = vmatprep.subr.msk.bf16.mxu0 %vm739_vm0, %v10845_v3  ;;  %v8856_v34 = vld [vmem:[%s13278_s1 + $0x4] sm:$0x3]  ;;  %vm414_vm4 = vcmask 1040384   ;;  %vm3704_vm12 = vcmask 1043456  }
  0x11   : > { %371 = vst.msk [vmem:[#allocation2] sm:$0x1] %vm370_vm3, %v10768_v2  ;;  %389 = vst.msk [vmem:[#allocation2 + $0x11] sm:$0x1] %vm370_vm3, %v10768_v2  ;;  %s13360_s14 = smov (!%p10849_p3, %s8814_s14), 1  ;;  %v1215_v1 = vsel %vm739_vm0, %v8856_v34, 0 }
  0x12   : > { %406 = vst.msk [vmem:[#allocation2 + $0x1a9] sm:$0x1] %vm370_vm3, %v10768_v2  ;;  %372 = vst.msk [vmem:[#allocation2 + $0x18] sm:$0x1] %vm370_vm3, %v10768_v2  ;;  %s9295_s20 = sshll.u32 %s13360_s14, 8  ;;  %vm4573_vm2 = vcmask 1042432  }
  0x13   : > { %373 = vst.msk [vmem:[#allocation2 + $0x30] sm:$0x1] %vm370_vm3, %v10768_v2  ;;  %374 = vst.msk [vmem:[#allocation2 + $0x48] sm:$0x1] %vm370_vm3, %v10768_v2  ;;  %s10904_s23 = scalar_lea.vmem %s13277_s0, %s9295_s20  ;;  %vm415_vm5 = vsmask.f32 256  ;;  %s13240_s12 = scalar_lea.vmem %s13287_s10, %s9295_s20 }
  0x14   : > { %375 = vst.msk [vmem:[#allocation2 + $0x60] sm:$0x1] %vm370_vm3, %v10768_v2  ;;  %376 = vst.msk [vmem:[#allocation2 + $0x78] sm:$0x1] %vm370_vm3, %v10768_v2  ;;  %v527_v4 = vld [vmem:[%s10904_s23] sm:$0xff]  ;;  %v528_v5 = vld [vmem:[%s10904_s23 + $0x8] sm:$0xff] }
  0x15   : > { %377 = vst.msk [vmem:[#allocation2 + $0x90] sm:$0x1] %vm370_vm3, %v10768_v2  ;;  %378 = vst.msk [vmem:[#allocation2 + $0xa8] sm:$0x1] %vm370_vm3, %v10768_v2  ;;  %v529_v6 = vld [vmem:[%s10904_s23 + $0x10] sm:$0xff]  ;;  %v641_v7 = vld [vmem:[#allocation2 + $0x1] sm:$0xff] }
  0x16   : > { %379 = vst.msk [vmem:[#allocation2 + $0xc0] sm:$0x1] %vm370_vm3, %v10768_v2  ;;  %380 = vst.msk [vmem:[#allocation2 + $0xd8] sm:$0x1] %vm370_vm3, %v10768_v2  ;;  %v642_v8 = vld [vmem:[#allocation2 + $0x9] sm:$0xff]  ;;  %v530_v9 = vld [vmem:[%s10904_s23 + $0x18] sm:$0xff] }
  0x17   : > { %381 = vst.msk [vmem:[#allocation2 + $0xf0] sm:$0x1] %vm370_vm3, %v10768_v2  ;;  %382 = vst.msk [vmem:[#allocation2 + $0x108] sm:$0x1] %vm370_vm3, %v10768_v2  ;;  %v673_v10 = vpack.c.bf16 %v642_v8, %v641_v7  ;;  %v531_v11 = vld [vmem:[%s10904_s23 + $0x20] sm:$0xff]  ;;  %v532_v12 = vld [vmem:[%s10904_s23 + $0x28] sm:$0xff] }
  0x18   : > { %383 = vst.msk [vmem:[#allocation2 + $0x120] sm:$0x1] %vm370_vm3, %v10768_v2  ;;  %384 = vst.msk [vmem:[#allocation2 + $0x138] sm:$0x1] %vm370_vm3, %v10768_v2  ;;  %v533_v13 = vld [vmem:[%s10904_s23 + $0x30] sm:$0xff]  ;;  %v534_v14 = vld [vmem:[%s10904_s23 + $0x38] sm:$0xff] }
  0x19   : > { %385 = vst.msk [vmem:[#allocation2 + $0x150] sm:$0x1] %vm370_vm3, %v10768_v2  ;;  %386 = vst.msk [vmem:[#allocation2 + $0x168] sm:$0x1] %vm370_vm3, %v10768_v2  ;;  %v535_v15 = vld [vmem:[%s10904_s23 + $0x40] sm:$0xff]  ;;  %v536_v16 = vld [vmem:[%s10904_s23 + $0x48] sm:$0xff]  ;;  %9973 = vmatprep.mubr.msk.bf16.mxu0 %vm361_vm1, %v673_v10 }
  0x1a   : > { %387 = vst.msk [vmem:[#allocation2 + $0x180] sm:$0x1] %vm370_vm3, %v10768_v2  ;;  %390 = vst.msk [vmem:[#allocation2 + $0x29] sm:$0x1] %vm370_vm3, %v10768_v2  ;;  %v537_v17 = vld [vmem:[%s10904_s23 + $0x50] sm:$0xff]  ;;  %v538_v18 = vld [vmem:[%s10904_s23 + $0x58] sm:$0xff] }
  0x1b   : > { %391 = vst.msk [vmem:[#allocation2 + $0x41] sm:$0x1] %vm370_vm3, %v10768_v2  ;;  %392 = vst.msk [vmem:[#allocation2 + $0x59] sm:$0x1] %vm370_vm3, %v10768_v2  ;;  %v539_v19 = vld [vmem:[%s10904_s23 + $0x60] sm:$0xff]  ;;  %v540_v20 = vld [vmem:[%s10904_s23 + $0x68] sm:$0xff] }
  0x1c   : > { %393 = vst.msk [vmem:[#allocation2 + $0x71] sm:$0x1] %vm370_vm3, %v10768_v2  ;;  %394 = vst.msk [vmem:[#allocation2 + $0x89] sm:$0x1] %vm370_vm3, %v10768_v2  ;;  %v541_v21 = vld [vmem:[%s10904_s23 + $0x70] sm:$0xff]  ;;  %v542_v22 = vld [vmem:[%s10904_s23 + $0x78] sm:$0xff] }
  0x1d   : > { %395 = vst.msk [vmem:[#allocation2 + $0xa1] sm:$0x1] %vm370_vm3, %v10768_v2  ;;  %396 = vst.msk [vmem:[#allocation2 + $0xb9] sm:$0x1] %vm370_vm3, %v10768_v2  ;;  %v543_v23 = vld [vmem:[%s10904_s23 + $0x80] sm:$0xff]  ;;  %v544_v24 = vld [vmem:[%s10904_s23 + $0x88] sm:$0xff] }
  0x1e   : > { %397 = vst.msk [vmem:[#allocation2 + $0xd1] sm:$0x1] %vm370_vm3, %v10768_v2  ;;  %398 = vst.msk [vmem:[#allocation2 + $0xe9] sm:$0x1] %vm370_vm3, %v10768_v2  ;;  %v545_v25 = vld [vmem:[%s10904_s23 + $0x90] sm:$0xff]  ;;  %v546_v26 = vld [vmem:[%s10904_s23 + $0x98] sm:$0xff] }
  0x1f   : > { %399 = vst.msk [vmem:[#allocation2 + $0x101] sm:$0x1] %vm370_vm3, %v10768_v2  ;;  %400 = vst.msk [vmem:[#allocation2 + $0x119] sm:$0x1] %vm370_vm3, %v10768_v2  ;;  %v547_v45 = vld [vmem:[%s10904_s23 + $0xa0] sm:$0xff]  ;;  %v548_v46 = vld [vmem:[%s10904_s23 + $0xa8] sm:$0xff] }
  0x20   : > { %401 = vst.msk [vmem:[#allocation2 + $0x131] sm:$0x1] %vm370_vm3, %v10768_v2  ;;  %402 = vst.msk [vmem:[#allocation2 + $0x149] sm:$0x1] %vm370_vm3, %v10768_v2  ;;  %v549_v47 = vld [vmem:[%s10904_s23 + $0xb0] sm:$0xff]  ;;  %v550_v48 = vld [vmem:[%s10904_s23 + $0xb8] sm:$0xff] }
  0x21   : > { %403 = vst.msk [vmem:[#allocation2 + $0x161] sm:$0x1] %vm370_vm3, %v10768_v2  ;;  %404 = vst.msk [vmem:[#allocation2 + $0x179] sm:$0x1] %vm370_vm3, %v10768_v2  ;;  %v551_v49 = vld [vmem:[%s10904_s23 + $0xc0] sm:$0xff]  ;;  %v552_v50 = vld [vmem:[%s10904_s23 + $0xc8] sm:$0xff] }
  0x22   : > { %405 = vst.msk [vmem:[#allocation2 + $0x191] sm:$0x1] %vm370_vm3, %v10768_v2  ;;  %388 = vst.msk [vmem:[#allocation2 + $0x198] sm:$0x1] %vm370_vm3, %v10768_v2  ;;  %v553_v51 = vld [vmem:[%s10904_s23 + $0xd0] sm:$0xff]  ;;  %v554_v52 = vld [vmem:[%s10904_s23 + $0xd8] sm:$0xff] }
  0x23   : > { %560 = vst.msk [vmem:[#allocation2 + $0x19] sm:$0xff] %vm361_vm1, %v527_v4  ;;  %561 = vst.msk [vmem:[#allocation2 + $0x21] sm:$0xff] %vm361_vm1, %v528_v5  ;;  %v555_v53 = vld [vmem:[%s10904_s23 + $0xe0] sm:$0xff]  ;;  %v556_v54 = vld [vmem:[%s10904_s23 + $0xe8] sm:$0xff]  ;;  %vm471_vm7 = vsmask.f32 7938 }
  0x24   : > { %562 = vst.msk [vmem:[#allocation2 + $0x31] sm:$0xff] %vm361_vm1, %v529_v6  ;;  %563 = vst.msk [vmem:[#allocation2 + $0x39] sm:$0xff] %vm361_vm1, %v530_v9  ;;  %v592_v59 = vld [vmem:[#allocation2] sm:$0xff]  ;;  %v593_v60 = vld [vmem:[#allocation2 + $0x8] sm:$0xff]  ;;  %vm4010_vm9 = vsmask.f32 3328 }
  0x25   : > { %564 = vst.msk [vmem:[#allocation2 + $0x49] sm:$0xff] %vm361_vm1, %v531_v11  ;;  %565 = vst.msk [vmem:[#allocation2 + $0x51] sm:$0xff] %vm361_vm1, %v532_v12  ;;  %v624_v62 = vpack.c.bf16 %v593_v60, %v592_v59  ;;  %v11010_v6 = vld [vmem:[%s13278_s1 + $0x6] sm:$0x3]  ;;  %vm4011_vm10 = vsmask.f32 7440 }
  0x26   : > { %566 = vst.msk [vmem:[#allocation2 + $0x61] sm:$0xff] %vm361_vm1, %v533_v13  ;;  %567 = vst.msk [vmem:[#allocation2 + $0x69] sm:$0xff] %vm361_vm1, %v534_v14  ;;  %vm3381_vm13 = vsmask.f32 4368  ;;  %vm4574_vm3 = vcmask 1046532  }
  0x27   : > { %568 = vst.msk [vmem:[#allocation2 + $0x79] sm:$0xff] %vm361_vm1, %v535_v15  ;;  %569 = vst.msk [vmem:[#allocation2 + $0x81] sm:$0xff] %vm361_vm1, %v536_v16 }
  0x28   : > { %570 = vst.msk [vmem:[#allocation2 + $0x91] sm:$0xff] %vm361_vm1, %v537_v17  ;;  %571 = vst.msk [vmem:[#allocation2 + $0x99] sm:$0xff] %vm361_vm1, %v538_v18 }
  0x29   : > { %572 = vst.msk [vmem:[#allocation2 + $0xa9] sm:$0xff] %vm361_vm1, %v539_v19  ;;  %573 = vst.msk [vmem:[#allocation2 + $0xb1] sm:$0xff] %vm361_vm1, %v540_v20 }
  0x2a   : > { %574 = vst.msk [vmem:[#allocation2 + $0xc1] sm:$0xff] %vm361_vm1, %v541_v21  ;;  %575 = vst.msk [vmem:[#allocation2 + $0xc9] sm:$0xff] %vm361_vm1, %v542_v22  ;;  %v643_v27 = vld [vmem:[#allocation2 + $0x19] sm:$0xff]  ;;  %v644_v28 = vld [vmem:[#allocation2 + $0x21] sm:$0xff] }
  0x2b   : > { %576 = vst.msk [vmem:[#allocation2 + $0xd9] sm:$0xff] %vm361_vm1, %v543_v23  ;;  %v645_v29 = vld [vmem:[#allocation2 + $0x31] sm:$0xff]  ;;  %577 = vst.msk [vmem:[#allocation2 + $0xe1] sm:$0xff] %vm361_vm1, %v544_v24  ;;  %v10947_v30 = vpack.c.bf16 %v644_v28, %v643_v27  ;;  %v646_v32 = vld [vmem:[#allocation2 + $0x39] sm:$0xff] }
  0x2c   : > { %578 = vst.msk [vmem:[#allocation2 + $0xf1] sm:$0xff] %vm361_vm1, %v545_v25  ;;  %579 = vst.msk [vmem:[#allocation2 + $0xf9] sm:$0xff] %vm361_vm1, %v546_v26  ;;  %v10951_v33 = vpack.c.bf16 %v646_v32, %v645_v29  ;;  %v647_v35 = vld [vmem:[#allocation2 + $0x49] sm:$0xff]  ;;  %v648_v36 = vld [vmem:[#allocation2 + $0x51] sm:$0xff] }
  0x2d   : > { %9974 = vmatmul.mubr.msk.bf16.vlgmr.msra.gmra.mrb[0].mxu0 %vm361_vm1, %v10947_v30  ;;  %v649_v37 = vld [vmem:[#allocation2 + $0x61] sm:$0xff]  ;;  %v650_v38 = vld [vmem:[#allocation2 + $0x69] sm:$0xff]  ;;  %v10961_v39 = vpack.c.bf16 %v648_v36, %v647_v35  ;;  %580 = vst.msk [vmem:[#allocation2 + $0x109] sm:$0xff] %vm361_vm1, %v547_v45  ;;  %581 = vst.msk [vmem:[#allocation2 + $0x111] sm:$0xff] %vm361_vm1, %v548_v46 }
  0x2e   : > { %10006 = vmatpush3.bf16.msra.mxu0 %v953_v31  ;;  %9977 = vmatprep.mubr.msk.bf16.mxu0 %vm361_vm1, %v10951_v33  ;;  %v10963_v40 = vpack.c.bf16 %v650_v38, %v649_v37  ;;  %v651_v41 = vld [vmem:[#allocation2 + $0x79] sm:$0xff]  ;;  %v652_v42 = vld [vmem:[#allocation2 + $0x81] sm:$0xff]  ;;  %582 = vst.msk [vmem:[#allocation2 + $0x121] sm:$0xff] %vm361_vm1, %v549_v47  ;;  %583 = vst.msk [vmem:[#allocation2 + $0x129] sm:$0xff] %vm361_vm1, %v550_v48 }
  0x2f   : > { %10620 = vmatprep.subr.msk.bf16.mxu0 %vm739_vm0, %v8856_v34  ;;  %v653_v43 = vld [vmem:[#allocation2 + $0x91] sm:$0xff]  ;;  %v654_v44 = vld [vmem:[#allocation2 + $0x99] sm:$0xff]  ;;  %584 = vst.msk [vmem:[#allocation2 + $0x139] sm:$0xff] %vm361_vm1, %v551_v49  ;;  %585 = vst.msk [vmem:[#allocation2 + $0x141] sm:$0xff] %vm361_vm1, %v552_v50  ;;  %v10987_v55 = vpack.c.bf16 %v652_v42, %v651_v41 }
  0x30   : > { %586 = vst.msk [vmem:[#allocation2 + $0x151] sm:$0xff] %vm361_vm1, %v553_v51  ;;  %587 = vst.msk [vmem:[#allocation2 + $0x159] sm:$0xff] %vm361_vm1, %v554_v52  ;;  %v10991_v56 = vpack.c.bf16 %v654_v44, %v653_v43  ;;  %v655_v57 = vld [vmem:[#allocation2 + $0xa9] sm:$0xff]  ;;  %v656_v58 = vld [vmem:[#allocation2 + $0xb1] sm:$0xff] }
  0x31   : > { %588 = vst.msk [vmem:[#allocation2 + $0x169] sm:$0xff] %vm361_vm1, %v555_v53  ;;  %589 = vst.msk [vmem:[#allocation2 + $0x171] sm:$0xff] %vm361_vm1, %v556_v54  ;;  %v10997_v61 = vpack.c.bf16 %v656_v58, %v655_v57  ;;  %v594_v63 = vld [vmem:[#allocation2 + $0x18] sm:$0xff]  ;;  %v595_v0 = vld [vmem:[#allocation2 + $0x20] sm:$0xff] }
  0x32   : > { %v596_v2 = vld [vmem:[#allocation2 + $0x30] sm:$0xff]  ;;  %v597_v3 = vld [vmem:[#allocation2 + $0x38] sm:$0xff]  ;;  %v11003_v4 = vpack.c.bf16 %v595_v0, %v594_v63  ;;  %v598_v7 = vld [vmem:[#allocation2 + $0x48] sm:$0xff]  ;;  %v1509_v0 = vsel %vm739_vm0, %v11010_v6, 0 }
  0x33   : > { %v11005_v5 = vpack.c.bf16 %v597_v3, %v596_v2  ;;  %v599_v8 = vld [vmem:[#allocation2 + $0x50] sm:$0xff]  ;;  %v600_v9 = vld [vmem:[#allocation2 + $0x60] sm:$0xff]  ;;  %v601_v10 = vld [vmem:[#allocation2 + $0x68] sm:$0xff] }
  0x34   : > { %v11018_v11 = vpack.c.bf16 %v599_v8, %v598_v7  ;;  %v11020_v12 = vpack.c.bf16 %v601_v10, %v600_v9  ;;  %v602_v13 = vld [vmem:[#allocation2 + $0x78] sm:$0xff]  ;;  %v603_v14 = vld [vmem:[#allocation2 + $0x80] sm:$0xff]  ;;  %v604_v15 = vld [vmem:[#allocation2 + $0x90] sm:$0xff] }
  0x35   : > { %9978 = vmatmul.mubr.msk.bf16.gmra.mrb[4].mxu0 %vm361_vm1, %v10961_v39  ;;  %v605_v16 = vld [vmem:[#allocation2 + $0x98] sm:$0xff]  ;;  %v11026_v17 = vpack.c.bf16 %v603_v14, %v602_v13  ;;  %v606_v19 = vld [vmem:[#allocation2 + $0xa8] sm:$0xff]  ;;  %v607_v20 = vld [vmem:[#allocation2 + $0xb0] sm:$0xff] }
  0x36   : > { %9981 = vmatprep.mubr.msk.bf16.mxu0 %vm361_vm1, %v10963_v40  ;;  %v11028_v18 = vpack.c.bf16 %v605_v16, %v604_v15  ;;  %v608_v21 = vld [vmem:[#allocation2 + $0xc0] sm:$0xff]  ;;  %v609_v22 = vld [vmem:[#allocation2 + $0xc8] sm:$0xff]  ;;  %v11034_v23 = vpack.c.bf16 %v607_v20, %v606_v19  ;;  %v610_v25 = vld [vmem:[#allocation2 + $0xd8] sm:$0xff] }
  0x37   : > { %v11036_v24 = vpack.c.bf16 %v609_v22, %v608_v21  ;;  %v611_v26 = vld [vmem:[#allocation2 + $0xe0] sm:$0xff]  ;;  %v612_v27 = vld [vmem:[#allocation2 + $0xf0] sm:$0xff]  ;;  %v613_v28 = vld [vmem:[#allocation2 + $0xf8] sm:$0xff] }
  0x38   : > { %v11042_v29 = vpack.c.bf16 %v611_v26, %v610_v25  ;;  %v11044_v31 = vpack.c.bf16 %v613_v28, %v612_v27  ;;  %v614_v32 = vld [vmem:[#allocation2 + $0x108] sm:$0xff]  ;;  %v615_v34 = vld [vmem:[#allocation2 + $0x110] sm:$0xff]  ;;  %v616_v35 = vld [vmem:[#allocation2 + $0x120] sm:$0xff] }
  0x39   : > { %v617_v36 = vld [vmem:[#allocation2 + $0x128] sm:$0xff]  ;;  %v11050_v37 = vpack.c.bf16 %v615_v34, %v614_v32  ;;  %v618_v41 = vld [vmem:[#allocation2 + $0x138] sm:$0xff]  ;;  %v619_v42 = vld [vmem:[#allocation2 + $0x140] sm:$0xff] }
  0x3a   : > { %v11052_v38 = vpack.c.bf16 %v617_v36, %v616_v35  ;;  %v620_v43 = vld [vmem:[#allocation2 + $0x150] sm:$0xff]  ;;  %v621_v44 = vld [vmem:[#allocation2 + $0x158] sm:$0xff]  ;;  %v11058_v45 = vpack.c.bf16 %v619_v42, %v618_v41  ;;  %v622_v49 = vld [vmem:[#allocation2 + $0x168] sm:$0xff] }
  0x3b   : > { %v11060_v46 = vpack.c.bf16 %v621_v44, %v620_v43  ;;  %v557_v47 = vld [vmem:[%s10904_s23 + $0xf0] sm:$0xff]  ;;  %v558_v48 = vld [vmem:[%s10904_s23 + $0xf8] sm:$0xff]  ;;  %v1116_v51 = vld [vmem:[#allocation2 + $0x2] sm:$0xff] }
  0x3c   : > { %590 = vst.msk [vmem:[#allocation2 + $0x181] sm:$0xff] %vm361_vm1, %v557_v47  ;;  %591 = vst.msk [vmem:[#allocation2 + $0x189] sm:$0xff] %vm361_vm1, %v558_v48  ;;  %v623_v50 = vld [vmem:[#allocation2 + $0x170] sm:$0xff]  ;;  %v1118_v57 = vld [vmem:[#allocation2 + $0x1a] sm:$0xff] }
  0x3d   : > { %9982 = vmatmul.mubr.msk.bf16.gmra.mrb[8].mxu0 %vm361_vm1, %v10987_v55  ;;  %v1117_v52 = vld [vmem:[#allocation2 + $0xa] sm:$0xff]  ;;  %v11070_v53 = vpack.c.bf16 %v623_v50, %v622_v49  ;;  %v1119_v58 = vld [vmem:[#allocation2 + $0x22] sm:$0xff]  ;;  %v1120_v59 = vld [vmem:[#allocation2 + $0x32] sm:$0xff] }
  0x3e   : > { %9985 = vmatprep.mubr.msk.bf16.mxu0 %vm361_vm1, %v10991_v56  ;;  %v1148_v54 = vpack.c.bf16 %v1117_v52, %v1116_v51  ;;  %v1121_v60 = vld [vmem:[#allocation2 + $0x3a] sm:$0xff]  ;;  %v1122_v2 = vld [vmem:[#allocation2 + $0x4a] sm:$0xff]  ;;  %v1123_v3 = vld [vmem:[#allocation2 + $0x52] sm:$0xff] }
  0x3f   : > { %v11077_v63 = vpack.c.bf16 %v1121_v60, %v1120_v59  ;;  %v1124_v7 = vld [vmem:[#allocation2 + $0x62] sm:$0xff]  ;;  %v1125_v8 = vld [vmem:[#allocation2 + $0x6a] sm:$0xff]  ;;  %v1126_v10 = vld [vmem:[#allocation2 + $0x7a] sm:$0xff] }
  0x40   : > { %v11094_v9 = vpack.c.bf16 %v1125_v8, %v1124_v7  ;;  %v1127_v13 = vld [vmem:[#allocation2 + $0x82] sm:$0xff]  ;;  %v1128_v14 = vld [vmem:[#allocation2 + $0x92] sm:$0xff]  ;;  %v1129_v15 = vld [vmem:[#allocation2 + $0x9a] sm:$0xff] }
  0x41   : > { %v11100_v16 = vpack.c.bf16 %v1127_v13, %v1126_v10  ;;  %v11102_v19 = vpack.c.bf16 %v1129_v15, %v1128_v14  ;;  %v1130_v20 = vld [vmem:[#allocation2 + $0xaa] sm:$0xff]  ;;  %v1131_v21 = vld [vmem:[#allocation2 + $0xb2] sm:$0xff]  ;;  %v1718_v22 = vld [vmem:[#allocation2 + $0xc1] sm:$0xff] }
  0x42   : > { %v1719_v25 = vld [vmem:[#allocation2 + $0xc9] sm:$0xff]  ;;  %v11110_v32 = vpack.c.bf16 %v1131_v21, %v1130_v20  ;;  %v1134_v35 = vld [vmem:[#allocation2 + $0xda] sm:$0xff]  ;;  %v1722_v44 = vld [vmem:[#allocation2 + $0xf1] sm:$0xff] }
  0x43   : > { %v1132_v26 = vld [vmem:[#allocation2 + $0xc2] sm:$0xff]  ;;  %v1133_v27 = vld [vmem:[#allocation2 + $0xca] sm:$0xff]  ;;  %v11108_v28 = vpack.c.bf16 %v1719_v25, %v1718_v22  ;;  %v1720_v36 = vld [vmem:[#allocation2 + $0xd9] sm:$0xff] }
  0x44   : > { %v11114_v34 = vpack.c.bf16 %v1133_v27, %v1132_v26  ;;  %v1721_v41 = vld [vmem:[#allocation2 + $0xe1] sm:$0xff]  ;;  %v1723_v47 = vld [vmem:[#allocation2 + $0xf9] sm:$0xff]  ;;  %v1141_v7 = vld [vmem:[#allocation2 + $0x12a] sm:$0xff] }
  0x45   : > { %9986 = vmatmul.mubr.msk.bf16.gmra.mrb[12].mxu0 %vm361_vm1, %v10997_v61  ;;  %9989 = vmatprep.mubr.msk.bf16.mxu1 %vm361_vm1, %v11108_v28  ;;  %v1135_v42 = vld [vmem:[#allocation2 + $0xe2] sm:$0xff]  ;;  %v11120_v43 = vpack.c.bf16 %v1721_v41, %v1720_v36  ;;  %v1136_v48 = vld [vmem:[#allocation2 + $0xf2] sm:$0xff]  ;;  %v1137_v49 = vld [vmem:[#allocation2 + $0xfa] sm:$0xff]  ;;  %v11122_v50 = vpack.c.bf16 %v1723_v47, %v1722_v44 }
  0x46   : > { %10007 = vmatprep.mubr.msk.bf16.mxu0 %vm361_vm1, %v624_v62  ;;  %v11075_v62 = vpack.c.bf16 %v1119_v58, %v1118_v57  ;;  %v11126_v51 = vpack.c.bf16 %v1135_v42, %v1134_v35  ;;  %v11130_v52 = vpack.c.bf16 %v1137_v49, %v1136_v48  ;;  %v1724_v57 = vld [vmem:[#allocation2 + $0x109] sm:$0xff]  ;;  %v1725_v58 = vld [vmem:[#allocation2 + $0x111] sm:$0xff]  ;;  %v1142_v14 = vld [vmem:[#allocation2 + $0x13a] sm:$0xff] }
  0x47   : > { %9990 = vmatmul.mubr.msk.bf16.vlgmr.msra.gmra.mrb[0].mxu1 %vm361_vm1, %v11120_v43  ;;  %v1139_v59 = vld [vmem:[#allocation2 + $0x112] sm:$0xff]  ;;  %v11136_v60 = vpack.c.bf16 %v1725_v58, %v1724_v57  ;;  %v1729_v20 = vld [vmem:[#allocation2 + $0x141] sm:$0xff]  ;;  %v1732_v44 = vld [vmem:[#allocation2 + $0x169] sm:$0xff] }
  0x48   : > { %9993 = vmatprep.mubr.msk.bf16.mxu1 %vm361_vm1, %v11122_v50  ;;  %v1728_v15 = vld [vmem:[#allocation2 + $0x139] sm:$0xff]  ;;  %v1143_v21 = vld [vmem:[#allocation2 + $0x142] sm:$0xff]  ;;  %v1730_v25 = vld [vmem:[#allocation2 + $0x151] sm:$0xff] }
  0x49   : > { %v11152_v22 = vpack.c.bf16 %v1729_v20, %v1728_v15  ;;  %v1731_v26 = vld [vmem:[#allocation2 + $0x159] sm:$0xff]  ;;  %v11158_v41 = vpack.c.bf16 %v1143_v21, %v1142_v14  ;;  %v1733_v47 = vld [vmem:[#allocation2 + $0x171] sm:$0xff]  ;;  %v8941_v20 = vld [vmem:[%s13278_s1 + $0xe] sm:$0x3] }
  0x4a   : > { %v1144_v27 = vld [vmem:[#allocation2 + $0x152] sm:$0xff]  ;;  %v1145_v35 = vld [vmem:[#allocation2 + $0x15a] sm:$0xff]  ;;  %v11154_v36 = vpack.c.bf16 %v1731_v26, %v1730_v25  ;;  %v1146_v48 = vld [vmem:[#allocation2 + $0x16a] sm:$0xff]  ;;  %v2686_v26 = vsel %vm739_vm0, %v8941_v20, 0 }
  0x4b   : > { %v11162_v42 = vpack.c.bf16 %v1145_v35, %v1144_v27  ;;  %v1147_v49 = vld [vmem:[#allocation2 + $0x172] sm:$0xff]  ;;  %v2029_v21 = vld [vmem:[#allocation2 + $0x18a] sm:$0xff]  ;;  %vm11340_vm6 = vmand %vm414_vm4, %vm415_vm5 }
  0x4c   : > { %v11172_v57 = vpack.c.bf16 %v1147_v49, %v1146_v48  ;;  %v8958_v27 = vld [vmem:[%s13278_s1 + $0x10] sm:$0x3]  ;;  %vm11421_vm8 = vmand %vm414_vm4, %vm471_vm7  ;;  %v482_v48 = vld [vmem:[#allocation3 + $0x2c] sm:$0x1] }
  0x4d   : > { %10008 = vmatmul.mubr.msk.bf16.vlgmr.msra.gmra.mrb[0].mxu0 %vm361_vm1, %v11003_v4  ;;  %v483_v49 = vsel %vm11421_vm8, 0, %v482_v48  ;;  %vm11481_vm11 = vmor %vm4010_vm9, %vm4011_vm10  ;;  %v450_v48 = vld [vmem:[#allocation3 + $0x84] sm:$0x1] }
  0x4e   : > { %10040 = vmatpush3.bf16.msra.mxu0 %v1215_v1  ;;  %10011 = vmatprep.mubr.msk.bf16.mxu0 %vm361_vm1, %v11005_v5  ;;  %v11084_v1 = vld [vmem:[%s13278_s1 + $0x8] sm:$0x3]  ;;  %484 = vst [vmem:[#allocation3 + $0x2c] sm:$0x1] %v483_v49  ;;  %v451_v49 = vsel %vm11340_vm6, 0, %v450_v48  ;;  %vm11611_vm14 = vmand %vm3704_vm12, %vm471_vm7 }
  0x4f   : > { %10621 = vmatprep.subr.msk.bf16.mxu0 %vm739_vm0, %v11010_v6  ;;  %v11092_v6 = vpack.c.bf16 %v1123_v3, %v1122_v2  ;;  %v1727_v2 = vld [vmem:[#allocation2 + $0x129] sm:$0xff]  ;;  %9994 = vmatmul.mubr.msk.bf16.gmra.mrb[4].mxu1 %vm361_vm1, %v11136_v60  ;;  %v1803_v58 = vsel %vm739_vm0, %v11084_v1, 0  ;;  %452 = vst [vmem:[#allocation3 + $0x84] sm:$0x1] %v451_v49  ;;  %v10670_v49 = vld [vmem:[%s13281_s4 + $0xe0] sm:$0xff]   ;;  %vm11618_vm15 = vmor %vm415_vm5, %vm3381_vm13 }
  0x50   : > { %v1140_v3 = vld [vmem:[#allocation2 + $0x122] sm:$0xff]  ;;  %vm11964_vm4 = vmor %vm4573_vm2, %vm4574_vm3 }
  0x51   : > { %v11146_v13 = vpack.c.bf16 %v1141_v7, %v1140_v3  ;;  %v8924_v3 = vld [vmem:[%s13278_s1 + $0xc] sm:$0x3] }
  0x52   : > { %v1735_v7 = vld [vmem:[#allocation2 + $0x189] sm:$0xff]  ;;  %v2392_v15 = vsel %vm739_vm0, %v8924_v3, 0 }
  0x55   : > { %10012 = vmatmul.mubr.msk.bf16.gmra.mrb[4].mxu0 %vm361_vm1, %v11018_v11 }
  0x56   : > { %10015 = vmatprep.mubr.msk.bf16.mxu0 %vm361_vm1, %v11020_v12 }
  0x5d   : > { %10016 = vmatmul.mubr.msk.bf16.gmra.mrb[8].mxu0 %vm361_vm1, %v11026_v17 }
  0x5e   : > { %10019 = vmatprep.mubr.msk.bf16.mxu0 %vm361_vm1, %v11028_v18 }
  0x65   : > { %10020 = vmatmul.mubr.msk.bf16.gmra.mrb[12].mxu0 %vm361_vm1, %v11034_v23 }
  0x66   : > { %10023 = vmatprep.mubr.msk.bf16.mxu0 %vm361_vm1, %v11036_v24 }
  0x6d   : > { %10024 = vmatmul.mubr.msk.bf16.gmra.mrb[16].mxu0 %vm361_vm1, %v11042_v29 }
  0x6e   : > { %10027 = vmatprep.mubr.msk.bf16.mxu0 %vm361_vm1, %v11044_v31 }
  0x75   : > { %10028 = vmatmul.mubr.msk.bf16.gmra.mrb[20].mxu0 %vm361_vm1, %v11050_v37 }
  0x76   : > { %10031 = vmatprep.mubr.msk.bf16.mxu0 %vm361_vm1, %v11052_v38 }
  0x7d   : > { %10032 = vmatmul.mubr.msk.bf16.gmra.mrb[24].mxu0 %vm361_vm1, %v11058_v45 }
  0x7e   : > { %10035 = vmatprep.mubr.msk.bf16.mxu0 %vm361_vm1, %v11060_v46 }
  0x85   : > { %10036 = vmatmul.mubr.msk.bf16.gmra.mrb[28].mxu0 %vm361_vm1, %v11070_v53 }
  0x86   : > { %10041 = vmatprep.mubr.msk.bf16.mxu0 %vm361_vm1, %v1148_v54  ;;  %v1138_v54 = vld [vmem:[#allocation2 + $0x10a] sm:$0xff] }
  0x87   : > { %v11142_v10 = vpack.c.bf16 %v1139_v59, %v1138_v54  ;;  %v11168_v54 = vpack.c.bf16 %v1733_v47, %v1732_v44  ;;  %v8907_v59 = vld [vmem:[%s13278_s1 + $0xa] sm:$0x3] }
  0x88   : > { %v10648_v44 = vld [vmem:[%s13281_s4 + $0x68] sm:$0xff]  }
  0x89   : > { %v10649_v47 = vld [vmem:[%s13281_s4 + $0x28] sm:$0xff]  }
  0x8d   : > { %10042 = vmatmul.mubr.msk.bf16.vlgmr.msra.gmra.mrb[0].mxu0 %vm361_vm1, %v11075_v62 }
  0x8e   : > { %10074 = vmatpush3.bf16.msra.mxu0 %v1509_v0  ;;  %10045 = vmatprep.mubr.msk.bf16.mxu0 %vm361_vm1, %v11077_v63  ;;  %v1726_v0 = vld [vmem:[#allocation2 + $0x121] sm:$0xff] }
  0x8f   : > { %10622 = vmatprep.subr.msk.bf16.mxu0 %vm739_vm0, %v11084_v1  ;;  %v11138_v8 = vpack.c.bf16 %v1727_v2, %v1726_v0  ;;  %v1441_v1 = vld [vmem:[#allocation2 + $0x188] sm:$0xff]  ;;  %v2097_v2 = vsel %vm739_vm0, %v8907_v59, 0 }
  0x91   : > { %9997 = vmatprep.mubr.msk.bf16.mxu1 %vm361_vm1, %v11138_v8 }
  0x92   : > { %9998 = vmatmul.mubr.msk.bf16.gmra.mrb[8].mxu1 %vm361_vm1, %v11152_v22 }
  0x93   : > { %10001 = vmatprep.mubr.msk.bf16.mxu1 %vm361_vm1, %v11154_v36 }
  0x95   : > { %10046 = vmatmul.mubr.msk.bf16.gmra.mrb[4].mxu0 %vm361_vm1, %v11092_v6 }
  0x96   : > { %10049 = vmatprep.mubr.msk.bf16.mxu0 %vm361_vm1, %v11094_v9 }
  0x9a   : > { %10002 = vmatmul.mubr.msk.bf16.gmra.mrb[12].mxu1 %vm361_vm1, %v11168_v54 }
  0x9d   : > { %10050 = vmatmul.mubr.msk.bf16.gmra.mrb[8].mxu0 %vm361_vm1, %v11100_v16 }
  0x9e   : > { %10053 = vmatprep.mubr.msk.bf16.mxu0 %vm361_vm1, %v11102_v19 }
  0xa5   : > { %10054 = vmatmul.mubr.msk.bf16.gmra.mrb[12].mxu0 %vm361_vm1, %v11110_v32 }
  0xa6   : > { %10057 = vmatprep.mubr.msk.bf16.mxu0 %vm361_vm1, %v11114_v34 }
  0xad   : > { %10058 = vmatmul.mubr.msk.bf16.gmra.mrb[16].mxu0 %vm361_vm1, %v11126_v51 }
  0xae   : > { %10061 = vmatprep.mubr.msk.bf16.mxu0 %vm361_vm1, %v11130_v52 }
  0xb5   : > { %10062 = vmatmul.mubr.msk.bf16.gmra.mrb[20].mxu0 %vm361_vm1, %v11142_v10 }
  0xb6   : > { %10065 = vmatprep.mubr.msk.bf16.mxu0 %vm361_vm1, %v11146_v13 }
  0xbd   : > { %10066 = vmatmul.mubr.msk.bf16.gmra.mrb[24].mxu0 %vm361_vm1, %v11158_v41 }
  0xbe   : > { %10069 = vmatprep.mubr.msk.bf16.mxu0 %vm361_vm1, %v11162_v42 }
  0xc5   : > { %10070 = vmatmul.mubr.msk.bf16.gmra.mrb[28].mxu0 %vm361_vm1, %v11172_v57 }
  0xc6   : > { %10075 = vmatprep.mubr.msk.bf16.mxu0 %vm361_vm1, %v11003_v4  ;;  %v1440_v4 = vld [vmem:[#allocation2 + $0x180] sm:$0xff] }
  0xc7   : > { %v11212_v0 = vpack.c.bf16 %v1441_v1, %v1440_v4  ;;  %v10651_v1 = vld [vmem:[%s13281_s4 + $0x30] sm:$0xff]  }
  0xcd   : > { %10076 = vmatmul.mubr.msk.bf16.vlgmr.msra.gmra.mrb[0].mxu0 %vm361_vm1, %v11005_v5 }
  0xce   : > { %10108 = vmatpush3.bf16.msra.mxu0 %v1803_v58  ;;  %10079 = vmatprep.mubr.msk.bf16.mxu0 %vm361_vm1, %v11018_v11 }
  0xcf   : > { %10623 = vmatprep.subr.msk.bf16.mxu0 %vm739_vm0, %v8907_v59 }
  0xd5   : > { %10080 = vmatmul.mubr.msk.bf16.gmra.mrb[4].mxu0 %vm361_vm1, %v11020_v12 }
  0xd6   : > { %10083 = vmatprep.mubr.msk.bf16.mxu0 %vm361_vm1, %v11026_v17 }
  0xdd   : > { %10084 = vmatmul.mubr.msk.bf16.gmra.mrb[8].mxu0 %vm361_vm1, %v11028_v18 }
  0xde   : > { %10087 = vmatprep.mubr.msk.bf16.mxu0 %vm361_vm1, %v11034_v23 }
  0xe5   : > { %10088 = vmatmul.mubr.msk.bf16.gmra.mrb[12].mxu0 %vm361_vm1, %v11036_v24 }
  0xe6   : > { %10091 = vmatprep.mubr.msk.bf16.mxu0 %vm361_vm1, %v11042_v29 }
  0xed   : > { %10092 = vmatmul.mubr.msk.bf16.gmra.mrb[16].mxu0 %vm361_vm1, %v11044_v31 }
  0xee   : > { %10095 = vmatprep.mubr.msk.bf16.mxu0 %vm361_vm1, %v11050_v37 }
  0xf5   : > { %10096 = vmatmul.mubr.msk.bf16.gmra.mrb[20].mxu0 %vm361_vm1, %v11052_v38 }
  0xf6   : > { %10099 = vmatprep.mubr.msk.bf16.mxu0 %vm361_vm1, %v11058_v45 }
  0xfd   : > { %10100 = vmatmul.mubr.msk.bf16.gmra.mrb[24].mxu0 %vm361_vm1, %v11060_v46 }
  0xfe   : > { %10103 = vmatprep.mubr.msk.bf16.mxu0 %vm361_vm1, %v11070_v53 }
 0x105   : > { %10104 = vmatmul.mubr.msk.bf16.gmra.mrb[28].mxu0 %vm361_vm1, %v11212_v0 }
 0x106   : > { %10109 = vmatprep.mubr.msk.bf16.mxu0 %vm361_vm1, %v10947_v30  ;;  %v1734_v30 = vld [vmem:[#allocation2 + $0x181] sm:$0xff] }
 0x107   : > { %v11251_v14 = vpack.c.bf16 %v1735_v7, %v1734_v30  ;;  %v435_v7 = vld [vmem:[#allocation3 + $0x48] sm:$0x1] }
 0x10d   : > { %10110 = vmatmul.mubr.msk.bf16.vlgmr.msra.gmra.mrb[0].mxu0 %vm361_vm1, %v10951_v33 }
 0x10e   : > { %10142 = vmatpush3.bf16.msra.mxu0 %v2097_v2  ;;  %10113 = vmatprep.mubr.msk.bf16.mxu0 %vm361_vm1, %v10961_v39 }
 0x10f   : > { %10624 = vmatprep.subr.msk.bf16.mxu0 %vm739_vm0, %v8924_v3 }
 0x115   : > { %10114 = vmatmul.mubr.msk.bf16.gmra.mrb[4].mxu0 %vm361_vm1, %v10963_v40 }
 0x116   : > { %10117 = vmatprep.mubr.msk.bf16.mxu0 %vm361_vm1, %v10987_v55 }
 0x11d   : > { %10118 = vmatmul.mubr.msk.bf16.gmra.mrb[8].mxu0 %vm361_vm1, %v10991_v56 }
 0x11e   : > { %10121 = vmatprep.mubr.msk.bf16.mxu0 %vm361_vm1, %v10997_v61 }
 0x125   : > { %10122 = vmatmul.mubr.msk.bf16.gmra.mrb[12].mxu0 %vm361_vm1, %v11108_v28 }
 0x126   : > { %10125 = vmatprep.mubr.msk.bf16.mxu0 %vm361_vm1, %v11120_v43 }
 0x12d   : > { %10126 = vmatmul.mubr.msk.bf16.gmra.mrb[16].mxu0 %vm361_vm1, %v11122_v50 }
 0x12e   : > { %10129 = vmatprep.mubr.msk.bf16.mxu0 %vm361_vm1, %v11136_v60 }
 0x135   : > { %10130 = vmatmul.mubr.msk.bf16.gmra.mrb[20].mxu0 %vm361_vm1, %v11138_v8 }
 0x136   : > { %10133 = vmatprep.mubr.msk.bf16.mxu0 %vm361_vm1, %v11152_v22 }
 0x13d   : > { %10134 = vmatmul.mubr.msk.bf16.gmra.mrb[24].mxu0 %vm361_vm1, %v11154_v36 }
 0x13e   : > { %10137 = vmatprep.mubr.msk.bf16.mxu0 %vm361_vm1, %v11168_v54 }
 0x145   : > { %10138 = vmatmul.mubr.msk.bf16.gmra.mrb[28].mxu0 %vm361_vm1, %v11251_v14 }
 0x146   : > { %10143 = vmatprep.mubr.msk.bf16.mxu0 %vm361_vm1, %v11075_v62  ;;  %v2028_v62 = vld [vmem:[#allocation2 + $0x182] sm:$0xff] }
 0x147   : > { %v11290_v25 = vpack.c.bf16 %v2029_v21, %v2028_v62  ;;  %v436_v62 = vsel %vm11340_vm6, 0, %v435_v7  ;;  %v432_v21 = vld [vmem:[#allocation3 + $0x3c] sm:$0x1] }
 0x148   : > { %437 = vst [vmem:[#allocation3 + $0x48] sm:$0x1] %v436_v62 }
 0x14d   : > { %10144 = vmatmul.mubr.msk.bf16.vlgmr.msra.gmra.mrb[0].mxu0 %vm361_vm1, %v11077_v63 }
 0x14e   : > { %10176 = vmatpush3.bf16.msra.mxu0 %v2392_v15  ;;  %10147 = vmatprep.mubr.msk.bf16.mxu0 %vm361_vm1, %v11092_v6 }
 0x14f   : > { %10625 = vmatprep.subr.msk.bf16.mxu0 %vm739_vm0, %v8941_v20 }
 0x155   : > { %10148 = vmatmul.mubr.msk.bf16.gmra.mrb[4].mxu0 %vm361_vm1, %v11094_v9 }
 0x156   : > { %10151 = vmatprep.mubr.msk.bf16.mxu0 %vm361_vm1, %v11100_v16 }
 0x15d   : > { %10152 = vmatmul.mubr.msk.bf16.gmra.mrb[8].mxu0 %vm361_vm1, %v11102_v19 }
 0x15e   : > { %10155 = vmatprep.mubr.msk.bf16.mxu0 %vm361_vm1, %v11110_v32 }
 0x165   : > { %10156 = vmatmul.mubr.msk.bf16.gmra.mrb[12].mxu0 %vm361_vm1, %v11114_v34 }
 0x166   : > { %10159 = vmatprep.mubr.msk.bf16.mxu0 %vm361_vm1, %v11126_v51 }
 0x16d   : > { %10160 = vmatmul.mubr.msk.bf16.gmra.mrb[16].mxu0 %vm361_vm1, %v11130_v52 }
 0x16e   : > { %10163 = vmatprep.mubr.msk.bf16.mxu0 %vm361_vm1, %v11142_v10 }
 0x175   : > { %10164 = vmatmul.mubr.msk.bf16.gmra.mrb[20].mxu0 %vm361_vm1, %v11146_v13 }
 0x176   : > { %10167 = vmatprep.mubr.msk.bf16.mxu0 %vm361_vm1, %v11158_v41 }
 0x17d   : > { %10168 = vmatmul.mubr.msk.bf16.gmra.mrb[24].mxu0 %vm361_vm1, %v11162_v42 }
 0x17e   : > { %10171 = vmatprep.mubr.msk.bf16.mxu0 %vm361_vm1, %v11172_v57 }
 0x185   : > { %10172 = vmatmul.mubr.msk.bf16.gmra.mrb[28].mxu0 %vm361_vm1, %v11290_v25 }
 0x186   : > { %10177 = vmatprep.mubr.msk.bf16.mxu0 %vm361_vm1, %v11005_v5  ;;  %v2323_v5 = vld [vmem:[#allocation2 + $0x198] sm:$0xff] }
 0x18d   : > { %10178 = vmatmul.mubr.msk.bf16.vlgmr.msra.gmra.mrb[0].mxu0 %vm361_vm1, %v11018_v11  ;;  %v2324_v11 = vld [vmem:[#allocation2 + $0x1a0] sm:$0xff] }
 0x18e   : > { %10210 = vmatpush3.bf16.msra.mxu0 %v2686_v26  ;;  %10181 = vmatprep.mubr.msk.bf16.mxu0 %vm361_vm1, %v11020_v12  ;;  %v2340_v12 = vpack.c.bf16 %v2324_v11, %v2323_v5  ;;  %v433_v5 = vsel %vm11340_vm6, 0, %v432_v21  ;;  %v491_v11 = vld [vmem:[#allocation3 + $0x50] sm:$0x1] }
 0x18f   : > { %10626 = vmatprep.subr.msk.bf16.mxu0 %vm739_vm0, %v8958_v27  ;;  %434 = vst [vmem:[#allocation3 + $0x3c] sm:$0x1] %v433_v5  ;;  %v512_v5 = vld [vmem:[#allocation3 + $0xa4] sm:$0x1] }
 0x195   : > { %10182 = vmatmul.mubr.msk.bf16.gmra.mrb[4].mxu0 %vm361_vm1, %v11026_v17  ;;  %v10638_v17 = vld [vmem:[%s13281_s4 + $0x40] sm:$0xff]  }
 0x196   : > { %10185 = vmatprep.mubr.msk.bf16.mxu0 %vm361_vm1, %v11028_v18  ;;  %v10639_v18 = vld [vmem:[%s13281_s4] sm:$0xff]   ;;  %9482 = vmatprep.subr.bf16.mxu1 %v10638_v17 }
 0x197   : > { %9483 = vmatpush3.bf16.msra.mxu1 %v10639_v18  ;;  %v492_v18 = vsel %vm11421_vm8, 0, %v491_v11  ;;  %v513_v11 = vsel %vm11421_vm8, 0, %v512_v5 }
 0x198   : > { %493 = vst [vmem:[#allocation3 + $0x50] sm:$0x1] %v492_v18  ;;  %v462_v18 = vld [vmem:[#allocation3 + $0xb4] sm:$0x1]  ;;  %514 = vst [vmem:[#allocation3 + $0xa4] sm:$0x1] %v513_v11 }
 0x19d   : > { %10186 = vmatmul.mubr.msk.bf16.gmra.mrb[8].mxu0 %vm361_vm1, %v11034_v23 }
 0x19e   : > { %10189 = vmatprep.mubr.msk.bf16.mxu0 %vm361_vm1, %v11036_v24  ;;  %v423_v24 = vld [vmem:[#allocation3 + $0x18] sm:$0x1] }
 0x1a5   : > { %10190 = vmatmul.mubr.msk.bf16.gmra.mrb[12].mxu0 %vm361_vm1, %v11042_v29  ;;  %v424_v29 = vsel %vm11340_vm6, 0, %v423_v24  ;;  %v488_v24 = vld [vmem:[#allocation3 + $0x44] sm:$0x1] }
 0x1a6   : > { %10193 = vmatprep.mubr.msk.bf16.mxu0 %vm361_vm1, %v11044_v31  ;;  %425 = vst [vmem:[#allocation3 + $0x18] sm:$0x1] %v424_v29  ;;  %v2980_v31 = vsel %vm739_vm0, %v8958_v27, 0 }
 0x1ad   : > { %10194 = vmatmul.mubr.msk.bf16.gmra.mrb[16].mxu0 %vm361_vm1, %v11050_v37  ;;  %v10640_v37 = vld [vmem:[%s13281_s4 + $0x48] sm:$0xff]  }
 0x1ae   : > { %10197 = vmatprep.mubr.msk.bf16.mxu0 %vm361_vm1, %v11052_v38  ;;  %v10641_v38 = vld [vmem:[%s13281_s4 + $0x8] sm:$0xff]   ;;  %9484 = vmatprep.subr.bf16.mxu1 %v10640_v37  ;;  %v441_v37 = vld [vmem:[#allocation3 + $0x60] sm:$0x1] }
 0x1af   : > { %9485 = vmatpush3.bf16.msra.mxu1 %v10641_v38 }
 0x1b5   : > { %10198 = vmatmul.mubr.msk.bf16.gmra.mrb[20].mxu0 %vm361_vm1, %v11058_v45  ;;  %v10642_v45 = vld [vmem:[%s13281_s4 + $0x50] sm:$0xff]  }
 0x1b6   : > { %10201 = vmatprep.mubr.msk.bf16.mxu0 %vm361_vm1, %v11060_v46  ;;  %v10643_v46 = vld [vmem:[%s13281_s4 + $0x10] sm:$0xff]   ;;  %9486 = vmatprep.subr.bf16.mxu1 %v10642_v45  ;;  %v442_v45 = vsel %vm11340_vm6, 0, %v441_v37 }
 0x1b7   : > { %9487 = vmatpush3.bf16.msra.mxu1 %v10643_v46  ;;  %v438_v46 = vld [vmem:[#allocation3 + $0x54] sm:$0x1]  ;;  %443 = vst [vmem:[#allocation3 + $0x60] sm:$0x1] %v442_v45  ;;  %v10662_v37 = vld [vmem:[%s13281_s4 + $0xd0] sm:$0xff]   ;;  %v10666_v45 = vld [vmem:[%s13281_s4 + $0xd8] sm:$0xff]  }
 0x1bd   : > { %10202 = vmatmul.mubr.msk.bf16.gmra.mrb[24].mxu0 %vm361_vm1, %v11070_v53 }
 0x1be   : > { %10205 = vmatprep.mubr.msk.bf16.mxu0 %vm361_vm1, %v11212_v0 }
 0x1c5   : > { %10206 = vmatmul.mubr.msk.bf16.gmra.mrb[28].mxu0 %vm361_vm1, %v2340_v12  ;;  %v10653_v12 = vld [vmem:[%s13281_s4 + $0x38] sm:$0xff]  }
 0x1c6   : > { %10211 = vmatprep.mubr.msk.bf16.mxu0 %vm361_vm1, %v10951_v33  ;;  %v2617_v33 = vld [vmem:[#allocation2 + $0x199] sm:$0xff] }
 0x1cd   : > { %10212 = vmatmul.mubr.msk.bf16.vlgmr.msra.gmra.mrb[0].mxu0 %vm361_vm1, %v10961_v39  ;;  %v2618_v39 = vld [vmem:[#allocation2 + $0x1a1] sm:$0xff] }
 0x1ce   : > { %10244 = vmatpush3.bf16.msra.mxu0 %v2980_v31  ;;  %10215 = vmatprep.mubr.msk.bf16.mxu0 %vm361_vm1, %v10963_v40  ;;  %v2634_v40 = vpack.c.bf16 %v2618_v39, %v2617_v33  ;;  %v489_v31 = vsel %vm11421_vm8, 0, %v488_v24 }
 0x1cf   : > { %490 = vst [vmem:[#allocation3 + $0x44] sm:$0x1] %v489_v31 }
 0x1d5   : > { %10216 = vmatmul.mubr.msk.bf16.gmra.mrb[4].mxu0 %vm361_vm1, %v10987_v55  ;;  %v2911_v55 = vld [vmem:[#allocation2 + $0x19a] sm:$0xff] }
 0x1d6   : > { %10219 = vmatprep.mubr.msk.bf16.mxu0 %vm361_vm1, %v10991_v56  ;;  %v2912_v56 = vld [vmem:[#allocation2 + $0x1a2] sm:$0xff] }
 0x1dd   : > { %10220 = vmatmul.mubr.msk.bf16.gmra.mrb[8].mxu0 %vm361_vm1, %v10997_v61  ;;  %v2928_v61 = vpack.c.bf16 %v2912_v56, %v2911_v55 }
 0x1de   : > { %10223 = vmatprep.mubr.msk.bf16.mxu0 %vm361_vm1, %v11108_v28 }
 0x1e5   : > { %10224 = vmatmul.mubr.msk.bf16.gmra.mrb[12].mxu0 %vm361_vm1, %v11120_v43  ;;  %v10769_v43 = vmov 0  }
 0x1e6   : > { %10227 = vmatprep.mubr.msk.bf16.mxu0 %vm361_vm1, %v11122_v50  ;;  %407 = vst [vmem:[#allocation3] sm:$0xf] %v10769_v43  ;;  %408 = vst [vmem:[#allocation3 + $0x4] sm:$0xf] %v10769_v43  ;;  %v429_v50 = vld [vmem:[#allocation3 + $0x30] sm:$0x1] }
 0x1e7   : > { %409 = vst [vmem:[#allocation3 + $0x8] sm:$0x1] %v10769_v43  ;;  %411 = vst [vmem:[#allocation3 + $0xcc] sm:$0xf] %v10769_v43 }
 0x1e8   : > { %412 = vst [vmem:[#allocation3 + $0xd0] sm:$0xf] %v10769_v43  ;;  %413 = vst [vmem:[#allocation3 + $0xd4] sm:$0x1] %v10769_v43 }
 0x1ed   : > { %10228 = vmatmul.mubr.msk.bf16.gmra.mrb[16].mxu0 %vm361_vm1, %v11136_v60 }
 0x1ee   : > { %10231 = vmatprep.mubr.msk.bf16.mxu0 %vm361_vm1, %v11138_v8  ;;  %v485_v8 = vld [vmem:[#allocation3 + $0x38] sm:$0x1] }
 0x1f5   : > { %10232 = vmatmul.mubr.msk.bf16.gmra.mrb[20].mxu0 %vm361_vm1, %v11152_v22  ;;  %v10646_v22 = vld [vmem:[%s13281_s4 + $0x60] sm:$0xff]  }
 0x1f6   : > { %10235 = vmatprep.mubr.msk.bf16.mxu0 %vm361_vm1, %v11154_v36  ;;  %v10647_v36 = vld [vmem:[%s13281_s4 + $0x20] sm:$0xff]  }
 0x1fd   : > { %10236 = vmatmul.mubr.msk.bf16.gmra.mrb[24].mxu0 %vm361_vm1, %v11168_v54  ;;  %v3963_v54 = vld [vmem:[#allocation3 + $0x4] sm:$0xf] }
 0x1fe   : > { %10239 = vmatprep.mubr.msk.bf16.mxu0 %vm361_vm1, %v11251_v14  ;;  %v4023_v59 = vshll.u32 %v3963_v54, 16  ;;  %v4027_v4 = vshrl.u32 %v3963_v54, 16 }
 0x200   : > { %v4025_v3 = vrot.slane %v4023_v59, 5  ;;  %v4029_v30 = vrot.slane %v4027_v4, 4  ;;  %v506_v59 = vld [vmem:[#allocation3 + $0x8c] sm:$0x1] }
 0x202   : > { %v4030_v26 = vor.u32 %v4029_v30, %v4025_v3  ;;  %v459_v30 = vld [vmem:[#allocation3 + $0xa8] sm:$0x1] }
 0x203   : > { %v460_v7 = vsel %vm11340_vm6, 0, %v459_v30 }
 0x204   : > { %v4031_v29 = vrot.slane %v4030_v26, 4  ;;  %461 = vst [vmem:[#allocation3 + $0xa8] sm:$0x1] %v460_v7 }
 0x205   : > { %10240 = vmatmul.mubr.msk.bf16.gmra.mrb[28].mxu0 %vm361_vm1, %v2634_v40 }
 0x206   : > { %10245 = vmatprep.mubr.msk.bf16.mxu0 %vm361_vm1, %v11077_v63  ;;  %v420_v63 = vld [vmem:[#allocation3 + $0xc] sm:$0x1] }
 0x20d   : > { %10246 = vmatmul.mubr.msk.bf16.vlgmr.msra.gmra.mrb[0].mxu0 %vm361_vm1, %v11092_v6  ;;  %v10644_v6 = vld [vmem:[%s13281_s4 + $0x58] sm:$0xff]  }
 0x20e   : > { %10249 = vmatprep.mubr.msk.bf16.mxu0 %vm361_vm1, %v11094_v9  ;;  %v421_v9 = vsel %vm11340_vm6, 0, %v420_v63  ;;  %9488 = vmatprep.subr.bf16.mxu1 %v10644_v6  ;;  %v439_v63 = vsel %vm11340_vm6, 0, %v438_v46  ;;  %v497_v6 = vld [vmem:[#allocation3 + $0x68] sm:$0x1]  ;;  %v11585_v46 = vld [vmem:[%s13279_s2] ss:$0 sm:$0xff] }
 0x20f   : > { %422 = vst [vmem:[#allocation3 + $0xc] sm:$0x1] %v421_v9  ;;  %440 = vst [vmem:[#allocation3 + $0x54] sm:$0x1] %v439_v63  ;;  %v498_v9 = vsel %vm11421_vm8, 0, %v497_v6  ;;  %v10668_v63 = vld [vmem:[%s13281_s4 + $0x98] sm:$0xff]  }
 0x210   : > { %499 = vst [vmem:[#allocation3 + $0x68] sm:$0x1] %v498_v9  ;;  %v11593_v9 = vld [vmem:[%s13280_s3] ss:$0 sm:$0xff] }
 0x215   : > { %10250 = vmatmul.mubr.msk.bf16.gmra.mrb[4].mxu0 %vm361_vm1, %v11100_v16  ;;  %v479_v16 = vld [vmem:[#allocation3 + $0x20] sm:$0x1] }
 0x216   : > { %10253 = vmatprep.mubr.msk.bf16.mxu0 %vm361_vm1, %v11102_v19  ;;  %v10645_v19 = vld [vmem:[%s13281_s4 + $0x18] sm:$0xff]   ;;  %v480_v28 = vsel %vm11421_vm8, 0, %v479_v16  ;;  %v494_v16 = vld [vmem:[#allocation3 + $0x5c] sm:$0x1] }
 0x217   : > { %481 = vst [vmem:[#allocation3 + $0x20] sm:$0x1] %v480_v28  ;;  %9489 = vmatpush3.bf16.msra.mxu1 %v10645_v19  ;;  %v11495_v19 = vpop.f32.mrb[0].mxu1  ;;  %v495_v28 = vsel %vm11421_vm8, 0, %v494_v16 }
 0x218   : > { %9490 = vmatprep.subr.bf16.mxu1 %v10646_v22  ;;  %496 = vst [vmem:[#allocation3 + $0x5c] sm:$0x1] %v495_v28  ;;  %v10656_v22 = vld [vmem:[%s13281_s4 + $0x80] sm:$0xff]  }
 0x21b   : > { %9491 = vmatpush3.bf16.msra.mxu1 %v10647_v36 }
 0x21c   : > { %9492 = vmatprep.subr.bf16.mxu1 %v10648_v44 }
 0x21d   : > { %10254 = vmatmul.mubr.msk.bf16.gmra.mrb[8].mxu0 %vm361_vm1, %v11110_v32  ;;  %v476_v32 = vld [vmem:[#allocation3 + $0x14] sm:$0x1] }
 0x21e   : > { %10257 = vmatprep.mubr.msk.bf16.mxu0 %vm361_vm1, %v11114_v34  ;;  %v477_v34 = vsel %vm11421_vm8, 0, %v476_v32  ;;  %v11499_v32 = vpop.f32.mrb[1].mxu1 }
 0x21f   : > { %478 = vst [vmem:[#allocation3 + $0x14] sm:$0x1] %v477_v34  ;;  %9493 = vmatpush3.bf16.msra.mxu1 %v10649_v47  ;;  %v11501_v34 = vpop.f32.mrb[2].mxu1 }
 0x220   : > { %v11503_v43 = vpop.f32.mrb[3].mxu1 }
 0x225   : > { %10258 = vmatmul.mubr.msk.bf16.gmra.mrb[12].mxu0 %vm361_vm1, %v11126_v51  ;;  %v430_v51 = vsel %vm11340_vm6, 0, %v429_v50  ;;  %v447_v50 = vld [vmem:[#allocation3 + $0x78] sm:$0x1] }
 0x226   : > { %10261 = vmatprep.mubr.msk.bf16.mxu0 %vm361_vm1, %v11130_v52  ;;  %v426_v52 = vld [vmem:[#allocation3 + $0x24] sm:$0x1]  ;;  %431 = vst [vmem:[#allocation3 + $0x30] sm:$0x1] %v430_v51  ;;  %v448_v51 = vsel %vm11340_vm6, 0, %v447_v50 }
 0x227   : > { %v427_v60 = vsel %vm11340_vm6, 0, %v426_v52  ;;  %v444_v52 = vld [vmem:[#allocation3 + $0x6c] sm:$0x1]  ;;  %449 = vst [vmem:[#allocation3 + $0x78] sm:$0x1] %v448_v51 }
 0x228   : > { %428 = vst [vmem:[#allocation3 + $0x24] sm:$0x1] %v427_v60  ;;  %v445_v60 = vsel %vm11340_vm6, 0, %v444_v52 }
 0x229   : > { %446 = vst [vmem:[#allocation3 + $0x6c] sm:$0x1] %v445_v60 }
 0x22d   : > { %10262 = vmatmul.mubr.msk.bf16.gmra.mrb[16].mxu0 %vm361_vm1, %v11142_v10  ;;  %v486_v10 = vsel %vm11421_vm8, 0, %v485_v8  ;;  %v503_v8 = vld [vmem:[#allocation3 + $0x80] sm:$0x1] }
 0x22e   : > { %10265 = vmatprep.mubr.msk.bf16.mxu0 %vm361_vm1, %v11146_v13  ;;  %v417_v13 = vld [vmem:[#allocation3] sm:$0x1]  ;;  %487 = vst [vmem:[#allocation3 + $0x38] sm:$0x1] %v486_v10  ;;  %v504_v10 = vsel %vm11421_vm8, 0, %v503_v8 }
 0x22f   : > { %v418_v35 = vsel %vm11340_vm6, 0, %v417_v13  ;;  %v10655_v13 = vld [vmem:[%s13281_s4 + $0xc0] sm:$0xff]   ;;  %505 = vst [vmem:[#allocation3 + $0x80] sm:$0x1] %v504_v10 }
 0x230   : > { %419 = vst [vmem:[#allocation3] sm:$0x1] %v418_v35  ;;  %v500_v35 = vld [vmem:[#allocation3 + $0x74] sm:$0x1] }
 0x231   : > { %v501_v36 = vsel %vm11421_vm8, 0, %v500_v35 }
 0x232   : > { %502 = vst [vmem:[#allocation3 + $0x74] sm:$0x1] %v501_v36 }
 0x235   : > { %10266 = vmatmul.mubr.msk.bf16.gmra.mrb[20].mxu0 %vm361_vm1, %v11158_v41  ;;  %v473_v41 = vld [vmem:[#allocation3 + $0x8] sm:$0x1] }
 0x236   : > { %10269 = vmatprep.mubr.msk.bf16.mxu0 %vm361_vm1, %v11162_v42  ;;  %v474_v42 = vsel %vm11421_vm8, 0, %v473_v41  ;;  %v11519_v41 = vpop.f32.mrb[4].mxu1 }
 0x237   : > { %475 = vst [vmem:[#allocation3 + $0x8] sm:$0x1] %v474_v42  ;;  %v3962_v58 = vld [vmem:[#allocation3] sm:$0xf]  ;;  %v453_v42 = vld [vmem:[#allocation3 + $0x90] sm:$0x1] }
 0x238   : > { %v4014_v0 = vshrl.u32 %v3962_v58, 16  ;;  %v4017_v2 = vshll.u32 %v3962_v58, 16  ;;  %v454_v44 = vsel %vm11340_vm6, 0, %v453_v42  ;;  %v11523_v47 = vpop.f32.mrb[5].mxu1  ;;  %v509_v58 = vld [vmem:[#allocation3 + $0x98] sm:$0x1] }
 0x239   : > { %455 = vst [vmem:[#allocation3 + $0x90] sm:$0x1] %v454_v44  ;;  %v11527_v54 = vpop.f32.mrb[6].mxu1  ;;  %v510_v4 = vsel %vm11421_vm8, 0, %v509_v58 }
 0x23a   : > { %v4016_v15 = vrot.slane %v4014_v0, 4  ;;  %v4019_v20 = vrot.slane %v4017_v2, 5  ;;  %511 = vst [vmem:[#allocation3 + $0x98] sm:$0x1] %v510_v4  ;;  %v10658_v0 = vld [vmem:[%s13281_s4 + $0xc8] sm:$0xff]  }
 0x23b   : > { %v10660_v2 = vld [vmem:[%s13281_s4 + $0x88] sm:$0xff]  }
 0x23c   : > { %v4020_v17 = vor.u32 %v4019_v20, %v4016_v15  ;;  %v456_v15 = vld [vmem:[#allocation3 + $0x9c] sm:$0x1] }
 0x23d   : > { %10270 = vmatmul.mubr.msk.bf16.gmra.mrb[24].mxu0 %vm361_vm1, %v11172_v57  ;;  %v10650_v57 = vld [vmem:[%s13281_s4 + $0x70] sm:$0xff]   ;;  %v457_v20 = vsel %vm11340_vm6, 0, %v456_v15 }
 0x23e   : > { %10273 = vmatprep.mubr.msk.bf16.mxu0 %vm361_vm1, %v11290_v25  ;;  %9494 = vmatprep.subr.bf16.mxu1 %v10650_v57  ;;  %v3964_v14 = vld [vmem:[#allocation3 + $0x8] sm:$0x1]  ;;  %v4021_v33 = vrot.slane %v4020_v17, 4  ;;  %v11529_v57 = vpop.f32.mrb[7].mxu1  ;;  %458 = vst [vmem:[#allocation3 + $0x9c] sm:$0x1] %v457_v20 }
 0x23f   : > { %9495 = vmatpush3.bf16.msra.mxu1 %v10651_v1  ;;  %v10652_v25 = vld [vmem:[%s13281_s4 + $0x78] sm:$0xff]   ;;  %v4033_v27 = vshll.u32 %v3964_v14, 16  ;;  %v507_v1 = vsel %vm11421_vm8, 0, %v506_v59 }
 0x240   : > { %9496 = vmatprep.subr.bf16.mxu1 %v10652_v25  ;;  %v4026_v55 = vsel %vm11481_vm11, %v4021_v33, %v4025_v3  ;;  %508 = vst [vmem:[#allocation3 + $0x8c] sm:$0x1] %v507_v1  ;;  %v11541_v3 = vpop.f32.mrb[8].mxu1  ;;  %v515_v25 = vld [vmem:[#allocation3 + $0xb0] sm:$0x1] }
 0x241   : > { %v4035_v39 = vrot.slane %v4033_v27, 5  ;;  %v11545_v14 = vpop.f32.mrb[9].mxu1  ;;  %v516_v27 = vsel %vm11421_vm8, 0, %v515_v25  ;;  %v521_v33 = vld [vmem:[#allocation3 + $0xc8] sm:$0x1] }
 0x242   : > { %v11549_v62 = vpop.f32.mrb[10].mxu1  ;;  %517 = vst [vmem:[#allocation3 + $0xb0] sm:$0x1] %v516_v27 }
 0x243   : > { %9497 = vmatpush3.bf16.msra.mxu1 %v10653_v12  ;;  %v4036_v56 = vsel %vm11481_vm11, %v4031_v29, %v4035_v39  ;;  %v11551_v21 = vpop.f32.mrb[11].mxu1  ;;  %v465_v12 = vld [vmem:[#allocation3 + $0xc0] sm:$0x1]  ;;  %v463_v29 = vsel %vm11340_vm6, 0, %v462_v18 }
 0x244   : > { %v9025_v38 = vcombine.low %v4026_v55, %v4036_v56  ;;  %9594 = vmatprep.subr.bf16.mxu1 %v10655_v13  ;;  %v11553_v26 = vpop.f32.mrb[12].mxu1  ;;  %v466_v24 = vsel %vm11340_vm6, 0, %v465_v12  ;;  %464 = vst [vmem:[#allocation3 + $0xb4] sm:$0x1] %v463_v29  ;;  %v518_v55 = vld [vmem:[#allocation3 + $0xbc] sm:$0x1] }
 0x245   : > { %10274 = vmatmul.mubr.msk.bf16.gmra.mrb[28].mxu0 %vm361_vm1, %v2928_v61  ;;  %v10654_v61 = vld [vmem:[#allocation3] sm:$0xff]   ;;  %v11559_v17 = vpop.f32.mrb[13].mxu1  ;;  %467 = vst [vmem:[#allocation3 + $0xc0] sm:$0x1] %v466_v24  ;;  %v522_v56 = vsel %vm11421_vm8, 0, %v521_v33 }
 0x246   : > { %7409 = vmatprep.mubr.bf16.mxu1 %v9025_v38  ;;  %v11565_v31 = vpop.f32.mrb[14].mxu1  ;;  %523 = vst [vmem:[#allocation3 + $0xc8] sm:$0x1] %v522_v56  ;;  %v10664_v38 = vld [vmem:[%s13281_s4 + $0x90] sm:$0xff]  }
 0x247   : > { %7410 = vmatmul.mubr.bf16.vlgmr.msra.gmra.mrb[16].mxu1 %v10654_v61  ;;  %v11567_v39 = vpop.f32.mrb[15].mxu1  ;;  %v519_v61 = vsel %vm11421_vm8, 0, %v518_v55  ;;  %v3713_v55 = vld [vmem:[#allocation3 + $0x18] sm:$0xf] }
 0x248   : > { %9595 = vmatpush3.bf16.msra.mxu1 %v10656_v22  ;;  %520 = vst [vmem:[#allocation3 + $0xbc] sm:$0x1] %v519_v61 }
 0x249   : > { %9596 = vmatprep.subr.bf16.mxu1 %v10658_v0 }
 0x24c   : > { %9597 = vmatpush3.bf16.msra.mxu1 %v10660_v2 }
 0x24d   : > { %9598 = vmatprep.subr.bf16.mxu1 %v10662_v37 }
 0x250   : > { %9599 = vmatpush3.bf16.msra.mxu1 %v10664_v38 }
 0x251   : > { %9600 = vmatprep.subr.bf16.mxu1 %v10666_v45 }
 0x254   : > { %9601 = vmatpush3.bf16.msra.mxu1 %v10668_v63 }
 0x255   : > { %9602 = vmatprep.subr.bf16.mxu1 %v10670_v49 }
 0x2e0   : > { %v10247_v6 = vpop.f32.mrb[0].mxu0 }
 0x2e1   : > { %v3184_v16 = vmul.f32 %v10247_v6, %v11585_v46  ;;  %v3016_v28 = vpop.f32.mrb[1].mxu0  ;;  %v3706_v6 = vld [vmem:[#allocation3 + $0xc] sm:$0xf] }
 0x2e2   : > { %v3182_v50 = vmul.f32 %v11585_v46, %v3016_v28  ;;  %v10248_v51 = vpop.f32.mrb[2].mxu0 }
 0x2e3   : > { %v3223_v52 = vadd.f32 %v11593_v9, %v3184_v16  ;;  %v3185_v60 = vmul.f32 %v10248_v51, %v11585_v46  ;;  %v3019_v8 = vpop.f32.mrb[3].mxu0 }
 0x2e4   : > { %v3221_v10 = vadd.f32 %v11593_v9, %v3182_v50  ;;  %v3183_v13 = vmul.f32 %v11585_v46, %v3019_v8 }
 0x2e5   : > { %v3255_v22 = vmax.f32 %v3223_v52, 0.0  ;;  %v3224_v35 = vadd.f32 %v11593_v9, %v3185_v60  ;;  %v3717_v60 = vld [vmem:[#allocation3 + $0x20] sm:$0x1] }
 0x2e6   : > { %v3253_v36 = vmax.f32 %v3221_v10, 0.0  ;;  %v3222_v42 = vadd.f32 %v11593_v9, %v3183_v13  ;;  %v10672_v13 = vld [vmem:[%s13281_s4 + $0xa0] sm:$0xff]  }
 0x2e7   : > { %v9299_v44 = vpack.c.bf16 %v3255_v22, %v3255_v22  ;;  %v3256_v48 = vmax.f32 %v3224_v35, 0.0  ;;  %9603 = vmatpush3.bf16.msra.mxu1 %v10672_v13 }
 0x2e8   : > { %v9297_v58 = vpack.c.bf16 %v3253_v36, %v3253_v36  ;;  %v3254_v59 = vmax.f32 %v3222_v42, 0.0  ;;  %v10251_v4 = vpop.f32.mrb[4].mxu0  ;;  %v3710_v42 = vld [vmem:[#allocation3 + $0x14] sm:$0x1] }
 0x2e9   : > { %v3401_v1 = vshrl.u32 %v9299_v44, 16  ;;  %v3404_v0 = vshll.u32 %v9299_v44, 16  ;;  %v9300_v2 = vpack.c.bf16 %v3256_v48, %v3256_v48  ;;  %v3188_v30 = vmul.f32 %v10251_v4, %v11585_v46  ;;  %v3032_v7 = vpop.f32.mrb[5].mxu0 }
 0x2ea   : > { %v3384_v15 = vshrl.u32 %v9297_v58, 16  ;;  %v3387_v20 = vshll.u32 %v9297_v58, 16  ;;  %v9298_v25 = vpack.c.bf16 %v3254_v59, %v3254_v59  ;;  %v3186_v27 = vmul.f32 %v11585_v46, %v3032_v7  ;;  %v10252_v5 = vpop.f32.mrb[6].mxu0 }
 0x2eb   : > { %v3403_v11 = vrot.slane %v3401_v1, 7  ;;  %v3409_v12 = vshrl.u32 %v9300_v2, 16  ;;  %v3412_v18 = vshll.u32 %v9300_v2, 16  ;;  %v3227_v24 = vadd.f32 %v11593_v9, %v3188_v30  ;;  %v3035_v29 = vpop.f32.mrb[7].mxu0 }
 0x2ec   : > { %v3386_v56 = vrot.slane %v3384_v15, 7  ;;  %v3392_v61 = vshrl.u32 %v9298_v25, 16  ;;  %v3395_v37 = vshll.u32 %v9298_v25, 16  ;;  %v3225_v38 = vadd.f32 %v11593_v9, %v3186_v27 }
 0x2ed   : > { %v3406_v45 = vor.u32 %v3404_v0, %v3403_v11  ;;  %v3407_v63 = vrot.slane %v3403_v11, 4  ;;  %v3411_v16 = vrot.slane %v3409_v12, 7  ;;  %v3259_v28 = vmax.f32 %v3227_v24, 0.0 }
 0x2ee   : > { %v3389_v50 = vor.u32 %v3387_v20, %v3386_v56  ;;  %v3390_v51 = vrot.slane %v3386_v56, 4  ;;  %v3394_v8 = vrot.slane %v3392_v61, 7  ;;  %v3257_v10 = vmax.f32 %v3225_v38, 0.0  ;;  %v3727_v61 = vld [vmem:[#allocation3 + $0x30] sm:$0xf] }
 0x2ef   : > { %v3714_v22 = vsel %vm11611_vm14, %v3406_v45, %v3713_v55  ;;  %v3414_v35 = vor.u32 %v3412_v18, %v3411_v16  ;;  %v3416_v36 = vrot.slane %v3411_v16, 4  ;;  %v9303_v44 = vpack.c.bf16 %v3259_v28, %v3259_v28  ;;  %v3720_v28 = vld [vmem:[#allocation3 + $0x24] sm:$0xf] }
 0x2f0   : > { %3715 = vst [vmem:[#allocation3 + $0x18] sm:$0xf] %v3714_v22  ;;  %v3707_v48 = vsel %vm11611_vm14, %v3389_v50, %v3706_v6  ;;  %v3397_v49 = vor.u32 %v3395_v37, %v3394_v8  ;;  %v3399_v58 = vrot.slane %v3394_v8, 4  ;;  %v9301_v59 = vpack.c.bf16 %v3257_v10, %v3257_v10  ;;  %v10255_v4 = vpop.f32.mrb[8].mxu0 }
 0x2f1   : > { %3708 = vst [vmem:[#allocation3 + $0xc] sm:$0xf] %v3707_v48  ;;  %v3415_v1 = vsel %vm11618_vm15, %v3407_v63, %v3414_v35  ;;  %v3718_v0 = vsel %vm11340_vm6, %v3416_v36, %v3717_v60  ;;  %v3435_v2 = vshrl.u32 %v9303_v44, 16  ;;  %v3438_v30 = vshll.u32 %v9303_v44, 16  ;;  %v3048_v7 = vpop.f32.mrb[9].mxu0 }
 0x2f2   : > { %3716 = vst [vmem:[#allocation3 + $0x1c] sm:$0xf] %v3415_v1  ;;  %3719 = vst [vmem:[#allocation3 + $0x20] sm:$0x1] %v3718_v0  ;;  %v3398_v15 = vsel %vm11618_vm15, %v3390_v51, %v3397_v49  ;;  %v3711_v20 = vsel %vm11340_vm6, %v3399_v58, %v3710_v42  ;;  %v3418_v25 = vshrl.u32 %v9301_v59, 16  ;;  %v3421_v27 = vshll.u32 %v9301_v59, 16 }
 0x2f3   : > { %v10256_v11 = vpop.f32.mrb[10].mxu0  ;;  %3709 = vst [vmem:[#allocation3 + $0x10] sm:$0xf] %v3398_v15  ;;  %3712 = vst [vmem:[#allocation3 + $0x14] sm:$0x1] %v3711_v20  ;;  %v11637_v12 = vrot.slane %v3435_v2, 7  ;;  %v3189_v18 = vmul.f32 %v10252_v5, %v11585_v46  ;;  %v3187_v24 = vmul.f32 %v11585_v46, %v3035_v29  ;;  %v3192_v55 = vmul.f32 %v10255_v4, %v11585_v46 }
 0x2f4   : > { %v3051_v56 = vpop.f32.mrb[11].mxu0  ;;  %v11642_v37 = vrot.slane %v3418_v25, 7  ;;  %v3190_v38 = vmul.f32 %v11585_v46, %v3048_v7  ;;  %v3193_v45 = vmul.f32 %v10256_v11, %v11585_v46  ;;  %v10674_v58 = vld [vmem:[%s13281_s4 + $0xe8] sm:$0xff]  }
 0x2f5   : > { %v3191_v63 = vmul.f32 %v11585_v46, %v3051_v56  ;;  %v3440_v6 = vor.u32 %v3438_v30, %v11637_v12  ;;  %v3441_v16 = vrot.slane %v11637_v12, 4  ;;  %v3228_v5 = vadd.f32 %v11593_v9, %v3189_v18  ;;  %9604 = vmatprep.subr.bf16.mxu1 %v10674_v58  ;;  %v3731_v56 = vld [vmem:[#allocation3 + $0x38] sm:$0x1] }
 0x2f6   : > { %v3226_v29 = vadd.f32 %v11593_v9, %v3187_v24  ;;  %v3423_v50 = vor.u32 %v3421_v27, %v11642_v37  ;;  %v3424_v51 = vrot.slane %v11642_v37, 4  ;;  %v3231_v60 = vadd.f32 %v11593_v9, %v3192_v55 }
 0x2f7   : > { %v3229_v8 = vadd.f32 %v11593_v9, %v3190_v38  ;;  %v3728_v10 = vsel %vm11611_vm14, %v3440_v6, %v3727_v61  ;;  %v3260_v13 = vmax.f32 %v3228_v5, 0.0  ;;  %v3232_v35 = vadd.f32 %v11593_v9, %v3193_v45  ;;  %v3724_v61 = vld [vmem:[#allocation3 + $0x2c] sm:$0x1]  ;;  %v3741_v5 = vld [vmem:[#allocation3 + $0x48] sm:$0xf] }
 0x2f8   : > { %v3258_v22 = vmax.f32 %v3226_v29, 0.0  ;;  %3729 = vst [vmem:[#allocation3 + $0x30] sm:$0xf] %v3728_v10  ;;  %v3721_v36 = vsel %vm11611_vm14, %v3423_v50, %v3720_v28  ;;  %v3263_v42 = vmax.f32 %v3231_v60, 0.0  ;;  %v3230_v48 = vadd.f32 %v11593_v9, %v3191_v63  ;;  %v10259_v49 = vpop.f32.mrb[12].mxu0 }
 0x2f9   : > { %v3261_v44 = vmax.f32 %v3229_v8, 0.0  ;;  %3722 = vst [vmem:[#allocation3 + $0x24] sm:$0xf] %v3721_v36  ;;  %v9304_v59 = vpack.c.bf16 %v3260_v13, %v3260_v13  ;;  %v3264_v1 = vmax.f32 %v3232_v35, 0.0  ;;  %v3196_v0 = vmul.f32 %v10259_v49, %v11585_v46  ;;  %v3064_v2 = vpop.f32.mrb[13].mxu0 }
 0x2fa   : > { %v9302_v4 = vpack.c.bf16 %v3258_v22, %v3258_v22  ;;  %v9307_v30 = vpack.c.bf16 %v3263_v42, %v3263_v42  ;;  %v3262_v15 = vmax.f32 %v3230_v48, 0.0  ;;  %v3194_v20 = vmul.f32 %v11585_v46, %v3064_v2  ;;  %v10260_v25 = vpop.f32.mrb[14].mxu0  ;;  %v10676_v22 = vld [vmem:[%s13281_s4 + $0xa8] sm:$0xff]  }
 0x2fb   : > { %v9305_v7 = vpack.c.bf16 %v3261_v44, %v3261_v44  ;;  %v3443_v27 = vshrl.u32 %v9304_v59, 16  ;;  %v3446_v11 = vshll.u32 %v9304_v59, 16  ;;  %v3067_v55 = vpop.f32.mrb[15].mxu0  ;;  %v9308_v29 = vpack.c.bf16 %v3264_v1, %v3264_v1  ;;  %v3734_v48 = vld [vmem:[#allocation3 + $0x3c] sm:$0xf]  ;;  %9605 = vmatpush3.bf16.msra.mxu1 %v10676_v22 }
 0x2fc   : > { %v3426_v18 = vshrl.u32 %v9302_v4, 16  ;;  %v3429_v24 = vshll.u32 %v9302_v4, 16  ;;  %v3469_v37 = vshrl.u32 %v9307_v30, 16  ;;  %v3472_v38 = vshll.u32 %v9307_v30, 16  ;;  %v6369_v40 = vld [vmem:[#allocation3 + $0x18] sm:$0xe] }
 0x2fd   : > { %v3452_v45 = vshrl.u32 %v9305_v7, 16  ;;  %v3455_v63 = vshll.u32 %v9305_v7, 16  ;;  %v3445_v6 = vrot.slane %v3443_v27, 7  ;;  %v9306_v50 = vpack.c.bf16 %v3262_v15, %v3262_v15 }
 0x2fe   : > { %v3428_v28 = vrot.slane %v3426_v18, 7  ;;  %v3471_v60 = vrot.slane %v3469_v37, 7  ;;  %v3235_v10 = vadd.f32 %v11593_v9, %v3196_v0  ;;  %v3233_v13 = vadd.f32 %v11593_v9, %v3194_v20 }
 0x2ff   : > { %v11666_v8 = vrot.slane %v3452_v45, 7  ;;  %v3448_v35 = vor.u32 %v3446_v11, %v3445_v6  ;;  %v3450_v36 = vrot.slane %v3445_v6, 4  ;;  %v3477_v15 = vshrl.u32 %v9308_v29, 16 }
 0x300   : > { %v3431_v42 = vor.u32 %v3429_v24, %v3428_v28  ;;  %v3433_v44 = vrot.slane %v3428_v28, 4  ;;  %v3474_v49 = vor.u32 %v3472_v38, %v3471_v60  ;;  %v3475_v58 = vrot.slane %v3471_v60, 4  ;;  %v10263_v4 = vpop.f32.mrb[16].mxu0 }
 0x301   : > { %v3457_v59 = vor.u32 %v3455_v63, %v11666_v8  ;;  %v3449_v1 = vsel %vm11618_vm15, %v3441_v16, %v3448_v35  ;;  %v3732_v0 = vsel %vm11340_vm6, %v3450_v36, %v3731_v56  ;;  %v3080_v7 = vpop.f32.mrb[17].mxu0  ;;  %v3480_v20 = vshll.u32 %v9308_v29, 16  ;;  %v3745_v63 = vld [vmem:[#allocation3 + $0x50] sm:$0x1] }
 0x302   : > { %v3432_v2 = vsel %vm11618_vm15, %v3424_v51, %v3431_v42  ;;  %v3725_v30 = vsel %vm11340_vm6, %v3433_v44, %v3724_v61  ;;  %3730 = vst [vmem:[#allocation3 + $0x34] sm:$0xf] %v3449_v1  ;;  %3733 = vst [vmem:[#allocation3 + $0x38] sm:$0x1] %v3732_v0  ;;  %v3742_v12 = vsel %vm11611_vm14, %v3474_v49, %v3741_v5  ;;  %v11688_v27 = vpop.f32.mrb[18].mxu0  ;;  %v3460_v51 = vshrl.u32 %v9306_v50, 16 }
 0x303   : > { %3723 = vst [vmem:[#allocation3 + $0x28] sm:$0xf] %v3432_v2  ;;  %3726 = vst [vmem:[#allocation3 + $0x2c] sm:$0x1] %v3725_v30  ;;  %v3735_v16 = vsel %vm11611_vm14, %v3457_v59, %v3734_v48  ;;  %v3463_v11 = vshll.u32 %v9306_v50, 16  ;;  %v3267_v18 = vmax.f32 %v3235_v10, 0.0  ;;  %v3197_v37 = vmul.f32 %v10260_v25, %v11585_v46 }
 0x304   : > { %3743 = vst [vmem:[#allocation3 + $0x48] sm:$0xf] %v3742_v12  ;;  %3736 = vst [vmem:[#allocation3 + $0x3c] sm:$0xf] %v3735_v16  ;;  %v3265_v24 = vmax.f32 %v3233_v13, 0.0  ;;  %v11690_v56 = vpop.f32.mrb[19].mxu0  ;;  %v3195_v38 = vmul.f32 %v11585_v46, %v3067_v55  ;;  %v10361_v45 = vadd.f32 %v10263_v4, %v11495_v19  ;;  %v10362_v29 = vadd.f32 %v3080_v7, %v11499_v32 }
 0x305   : > { %v3479_v61 = vrot.slane %v3477_v15, 7  ;;  %v3462_v6 = vrot.slane %v3460_v51, 7  ;;  %v9311_v28 = vpack.c.bf16 %v3267_v18, %v3267_v18  ;;  %v3738_v50 = vld [vmem:[#allocation3 + $0x44] sm:$0x1]  ;;  %v3236_v10 = vadd.f32 %v11593_v9, %v3197_v37  ;;  %v3748_v51 = vld [vmem:[#allocation3 + $0x54] sm:$0xf] }
 0x306   : > { %v9309_v5 = vpack.c.bf16 %v3265_v24, %v3265_v24  ;;  %v3234_v13 = vadd.f32 %v11593_v9, %v3195_v38  ;;  %v3458_v35 = vrot.slane %v11666_v8, 4  ;;  %v10678_v19 = vld [vmem:[%s13281_s4 + $0xf0] sm:$0xff]   ;;  %v3200_v12 = vmul.f32 %v10361_v45, %v11585_v46 }
 0x307   : > { %v3482_v60 = vor.u32 %v3480_v20, %v3479_v61  ;;  %v3484_v22 = vrot.slane %v3479_v61, 4  ;;  %v3465_v25 = vor.u32 %v3463_v11, %v3462_v6  ;;  %v3467_v36 = vrot.slane %v3462_v6, 4  ;;  %9606 = vmatprep.subr.bf16.mxu1 %v10678_v19  ;;  %v3759_v19 = vld [vmem:[#allocation3 + $0x68] sm:$0x1] }
 0x308   : > { %v3503_v55 = vshrl.u32 %v9311_v28, 16  ;;  %v3506_v44 = vshll.u32 %v9311_v28, 16  ;;  %v3486_v48 = vshrl.u32 %v9309_v5, 16  ;;  %v11706_v49 = vpop.f32.mrb[20].mxu0  ;;  %v3268_v1 = vmax.f32 %v3236_v10, 0.0 }
 0x309   : > { %v3483_v42 = vsel %vm11618_vm15, %v3475_v58, %v3482_v60  ;;  %v3746_v32 = vsel %vm11340_vm6, %v3484_v22, %v3745_v63  ;;  %v3466_v8 = vsel %vm11618_vm15, %v3458_v35, %v3465_v25  ;;  %v3739_v59 = vsel %vm11340_vm6, %v3467_v36, %v3738_v50  ;;  %v11712_v0 = vpop.f32.mrb[21].mxu0  ;;  %v3755_v58 = vld [vmem:[#allocation3 + $0x60] sm:$0xf]  ;;  %v3965_v60 = vld [vmem:[#allocation3 + $0xc] sm:$0xf] }
 0x30a   : > { %3744 = vst [vmem:[#allocation3 + $0x4c] sm:$0xf] %v3483_v42  ;;  %3747 = vst [vmem:[#allocation3 + $0x50] sm:$0x1] %v3746_v32  ;;  %v3505_v4 = vrot.slane %v3503_v55, 7  ;;  %v3488_v2 = vrot.slane %v3486_v48, 7  ;;  %v9312_v11 = vpack.c.bf16 %v3268_v1, %v3268_v1  ;;  %v3198_v18 = vmul.f32 %v10362_v29, %v11585_v46 }
 0x30b   : > { %3737 = vst [vmem:[#allocation3 + $0x40] sm:$0xf] %v3466_v8  ;;  %3740 = vst [vmem:[#allocation3 + $0x44] sm:$0x1] %v3739_v59  ;;  %v3489_v30 = vshll.u32 %v9309_v5, 16  ;;  %v3266_v7 = vmax.f32 %v3234_v13, 0.0  ;;  %v3239_v63 = vadd.f32 %v11593_v9, %v3200_v12  ;;  %v10363_v36 = vadd.f32 %v11688_v27, %v11501_v34 }
 0x30c   : > { %v11715_v16 = vpop.f32.mrb[22].mxu0  ;;  %v3508_v15 = vor.u32 %v3506_v44, %v3505_v4  ;;  %v3509_v20 = vrot.slane %v3505_v4, 4  ;;  %v3492_v37 = vrot.slane %v3488_v2, 4  ;;  %v3511_v28 = vshrl.u32 %v9312_v11, 16  ;;  %v10680_v13 = vld [vmem:[%s13281_s4 + $0xb0] sm:$0xff]  }
 0x30d   : > { %v11718_v24 = vpop.f32.mrb[23].mxu0  ;;  %v3491_v61 = vor.u32 %v3489_v30, %v3488_v2  ;;  %v9310_v38 = vpack.c.bf16 %v3266_v7, %v3266_v7  ;;  %v3514_v45 = vshll.u32 %v9312_v11, 16  ;;  %v3237_v5 = vadd.f32 %v11593_v9, %v3198_v18  ;;  %9607 = vmatpush3.bf16.msra.mxu1 %v10680_v13  ;;  %v3752_v1 = vld [vmem:[#allocation3 + $0x5c] sm:$0x1]  ;;  %v3967_v13 = vld [vmem:[#allocation3 + $0x14] sm:$0x1] }
 0x30e   : > { %v3756_v6 = vsel %vm11611_vm14, %v3508_v15, %v3755_v58  ;;  %v3271_v10 = vmax.f32 %v3239_v63, 0.0  ;;  %v3513_v35 = vrot.slane %v3511_v28, 7  ;;  %v10364_v55 = vadd.f32 %v11690_v56, %v11503_v43 }
 0x30f   : > { %3757 = vst [vmem:[#allocation3 + $0x60] sm:$0xf] %v3756_v6  ;;  %v3749_v22 = vsel %vm11611_vm14, %v3491_v61, %v3748_v51  ;;  %v3494_v29 = vshrl.u32 %v9310_v38, 16  ;;  %v3497_v50 = vshll.u32 %v9310_v38, 16  ;;  %v3269_v25 = vmax.f32 %v3237_v5, 0.0 }
 0x310   : > { %3750 = vst [vmem:[#allocation3 + $0x54] sm:$0xf] %v3749_v22  ;;  %v9315_v32 = vpack.c.bf16 %v3271_v10, %v3271_v10  ;;  %v4038_v44 = vshrl.u32 %v3965_v60, 16  ;;  %v4041_v48 = vshll.u32 %v3965_v60, 16  ;;  %v11733_v8 = vpop.f32.mrb[24].mxu0  ;;  %v3516_v59 = vor.u32 %v3514_v45, %v3513_v35 }
 0x311   : > { %v3496_v42 = vrot.slane %v3494_v29, 7  ;;  %v3518_v4 = vrot.slane %v3513_v35, 4  ;;  %v9313_v58 = vpack.c.bf16 %v3269_v25, %v3269_v25  ;;  %v3201_v2 = vmul.f32 %v10363_v36, %v11585_v46  ;;  %v11736_v30 = vpop.f32.mrb[25].mxu0  ;;  %v3769_v51 = vld [vmem:[#allocation3 + $0x78] sm:$0xf] }
 0x312   : > { %v3537_v7 = vshrl.u32 %v9315_v32, 16  ;;  %v3540_v43 = vshll.u32 %v9315_v32, 16  ;;  %v11738_v56 = vpop.f32.mrb[26].mxu0  ;;  %v3517_v12 = vsel %vm11618_vm15, %v3509_v20, %v3516_v59  ;;  %v3966_v61 = vld [vmem:[#allocation3 + $0x10] sm:$0xf]  ;;  %v3199_v60 = vmul.f32 %v10364_v55, %v11585_v46  ;;  %v10682_v55 = vld [vmem:[%s13281_s4 + $0xf8] sm:$0xff]  }
 0x313   : > { %v3499_v34 = vor.u32 %v3497_v50, %v3496_v42  ;;  %v3501_v27 = vrot.slane %v3496_v42, 4  ;;  %v3760_v15 = vsel %vm11340_vm6, %v3518_v4, %v3759_v19  ;;  %v3520_v11 = vshrl.u32 %v9313_v58, 16  ;;  %v11744_v38 = vpop.f32.mrb[27].mxu0  ;;  %3758 = vst [vmem:[#allocation3 + $0x64] sm:$0xf] %v3517_v12  ;;  %9608 = vmatprep.subr.bf16.mxu1 %v10682_v55 }
 0x314   : > { %v3523_v18 = vshll.u32 %v9313_v58, 16  ;;  %3761 = vst [vmem:[#allocation3 + $0x68] sm:$0x1] %v3760_v15  ;;  %v11750_v28 = vrot.slane %v3537_v7, 7  ;;  %v3240_v20 = vadd.f32 %v11593_v9, %v3201_v2  ;;  %v3762_v5 = vld [vmem:[#allocation3 + $0x6c] sm:$0xf]  ;;  %v3238_v42 = vadd.f32 %v11593_v9, %v3199_v60 }
 0x315   : > { %v3500_v63 = vsel %vm11618_vm15, %v3492_v37, %v3499_v34  ;;  %v3753_v6 = vsel %vm11340_vm6, %v3501_v27, %v3752_v1  ;;  %v11753_v45 = vrot.slane %v3520_v11, 7  ;;  %v4040_v22 = vrot.slane %v4038_v44, 4  ;;  %v3968_v25 = vld [vmem:[#allocation3 + $0x18] sm:$0xf]  ;;  %v3969_v11 = vld [vmem:[#allocation3 + $0x1c] sm:$0xf] }
 0x316   : > { %3751 = vst [vmem:[#allocation3 + $0x58] sm:$0xf] %v3500_v63  ;;  %3754 = vst [vmem:[#allocation3 + $0x5c] sm:$0x1] %v3753_v6  ;;  %v4043_v29 = vrot.slane %v4041_v48, 5  ;;  %v3542_v50 = vor.u32 %v3540_v43, %v11750_v28  ;;  %v3543_v37 = vrot.slane %v11750_v28, 4 }
 0x317   : > { %v3272_v10 = vmax.f32 %v3240_v20, 0.0  ;;  %v4047_v35 = vshll.u32 %v3966_v61, 16  ;;  %v3525_v36 = vor.u32 %v3523_v18, %v11753_v45  ;;  %v3526_v19 = vrot.slane %v11753_v45, 4  ;;  %v3773_v60 = vld [vmem:[#allocation3 + $0x80] sm:$0x1] }
 0x318   : > { %v4044_v32 = vor.u32 %v4043_v29, %v4040_v22  ;;  %v3770_v44 = vsel %vm11611_vm14, %v3542_v50, %v3769_v51  ;;  %v4051_v4 = vshrl.u32 %v3966_v61, 16  ;;  %v11766_v1 = vpop.f32.mrb[28].mxu0  ;;  %v3270_v2 = vmax.f32 %v3238_v42, 0.0  ;;  %v3970_v55 = vld [vmem:[#allocation3 + $0x20] sm:$0x1] }
 0x319   : > { %v9316_v48 = vpack.c.bf16 %v3272_v10, %v3272_v10  ;;  %v4049_v59 = vrot.slane %v4047_v35, 5  ;;  %3771 = vst [vmem:[#allocation3 + $0x78] sm:$0xf] %v3770_v44  ;;  %v3763_v58 = vsel %vm11611_vm14, %v3525_v36, %v3762_v5  ;;  %v4057_v27 = vshll.u32 %v3967_v13, 16  ;;  %v11770_v7 = vpop.f32.mrb[29].mxu0  ;;  %v10684_v44 = vld [vmem:[%s13281_s4 + $0xb8] sm:$0xff]  }
 0x31a   : > { %v4045_v34 = vrot.slane %v4044_v32, 4  ;;  %3764 = vst [vmem:[#allocation3 + $0x6c] sm:$0xf] %v3763_v58  ;;  %v4053_v15 = vrot.slane %v4051_v4, 4  ;;  %v10365_v51 = vadd.f32 %v11706_v49, %v11519_v41  ;;  %v11774_v18 = vpop.f32.mrb[30].mxu0  ;;  %v9314_v61 = vpack.c.bf16 %v3270_v2, %v3270_v2  ;;  %9609 = vmatpush3.bf16.msra.mxu1 %v10684_v44 }
 0x31b   : > { %v3545_v43 = vshrl.u32 %v9316_v48, 16  ;;  %v3548_v12 = vshll.u32 %v9316_v48, 16  ;;  %v4059_v6 = vrot.slane %v4057_v27, 5  ;;  %v4062_v28 = vshrl.u32 %v3968_v25, 16  ;;  %v11778_v20 = vpop.f32.mrb[31].mxu0 }
 0x31c   : > { %v4050_v63 = vsel %vm11481_vm11, %v4045_v34, %v4049_v59  ;;  %v4054_v22 = vor.u32 %v4053_v15, %v4049_v59  ;;  %v3204_v29 = vmul.f32 %v10365_v51, %v11585_v46  ;;  %v4065_v50 = vshll.u32 %v3968_v25, 16  ;;  %v3766_v34 = vld [vmem:[#allocation3 + $0x74] sm:$0x1] }
 0x31d   : > { %v3547_v5 = vrot.slane %v3545_v43, 7  ;;  %v3528_v10 = vshrl.u32 %v9314_v61, 16  ;;  %v3531_v13 = vshll.u32 %v9314_v61, 16  ;;  %v4064_v41 = vrot.slane %v4062_v28, 4  ;;  %v10657_v28 = vld [vmem:[#allocation3 + $0xc] sm:$0xff]  }
 0x31e   : > { %v4071_v49 = vshll.u32 %v3969_v11, 16  ;;  %v4055_v42 = vrot.slane %v4054_v22, 4  ;;  %v3243_v32 = vadd.f32 %v11593_v9, %v3204_v29  ;;  %v4067_v4 = vrot.slane %v4065_v50, 5 }
 0x31f   : > { %v3550_v35 = vor.u32 %v3548_v12, %v3547_v5  ;;  %v3552_v36 = vrot.slane %v3547_v5, 4  ;;  %v3530_v48 = vrot.slane %v3528_v10, 7  ;;  %v4075_v58 = vshrl.u32 %v3969_v11, 16 }
 0x320   : > { %v4073_v59 = vrot.slane %v4071_v49, 5  ;;  %v4060_v27 = vsel %vm11481_vm11, %v4055_v42, %v4059_v6  ;;  %v3275_v43 = vmax.f32 %v3243_v32, 0.0  ;;  %v4068_v61 = vor.u32 %v4067_v4, %v4064_v41  ;;  %v3783_v42 = vld [vmem:[#allocation3 + $0x90] sm:$0xf] }
 0x321   : > { %v3551_v25 = vsel %vm11618_vm15, %v3543_v37, %v3550_v35  ;;  %v3774_v2 = vsel %vm11340_vm6, %v3552_v36, %v3773_v60  ;;  %v3533_v12 = vor.u32 %v3531_v13, %v3530_v48  ;;  %v3535_v15 = vrot.slane %v3530_v48, 4  ;;  %v3971_v60 = vld [vmem:[#allocation3 + $0x24] sm:$0xf]  ;;  %v10687_v4 = vld [vmem:[%s13281_s4 + $0x140] sm:$0xff]   ;;  %v3989_v52 = vld [vmem:[#allocation3 + $0x6c] sm:$0xf] }
 0x322   : > { %3772 = vst [vmem:[#allocation3 + $0x7c] sm:$0xf] %v3551_v25  ;;  %3775 = vst [vmem:[#allocation3 + $0x80] sm:$0x1] %v3774_v2  ;;  %v9026_v51 = vcombine.low %v4050_v63, %v4060_v27  ;;  %v9319_v11 = vpack.c.bf16 %v3275_v43, %v3275_v43  ;;  %v4077_v5 = vrot.slane %v4075_v58, 4  ;;  %v4081_v22 = vshll.u32 %v3970_v55, 16  ;;  %9706 = vmatprep.subr.bf16.mxu1 %v10687_v4 }
 0x323   : > { %v10366_v37 = vadd.f32 %v11712_v0, %v11523_v47  ;;  %v3534_v6 = vsel %vm11618_vm15, %v3526_v19, %v3533_v12  ;;  %v3767_v29 = vsel %vm11340_vm6, %v3535_v15, %v3766_v34  ;;  %v4069_v50 = vrot.slane %v4068_v61, 4  ;;  %v3973_v27 = vld [vmem:[#allocation3 + $0x2c] sm:$0x1]  ;;  %v10659_v12 = vld [vmem:[#allocation3 + $0x18] sm:$0xff]  }
 0x324   : > { %7417 = vmatprep.mubr.bf16.mxu1 %v9026_v51  ;;  %v10367_v63 = vadd.f32 %v11715_v16, %v11527_v54  ;;  %3765 = vst [vmem:[#allocation3 + $0x70] sm:$0xf] %v3534_v6  ;;  %3768 = vst [vmem:[#allocation3 + $0x74] sm:$0x1] %v3767_v29  ;;  %v3571_v10 = vshrl.u32 %v9319_v11, 16  ;;  %v3574_v13 = vshll.u32 %v9319_v11, 16  ;;  %v4078_v47 = vor.u32 %v4077_v5, %v4073_v59 }
 0x325   : > { %7418 = vmatmul.mubr.bf16.gmra.mrb[20].mxu1 %v10657_v28  ;;  %v4083_v0 = vrot.slane %v4081_v22, 5  ;;  %v4074_v45 = vsel %vm11481_vm11, %v4069_v50, %v4073_v59  ;;  %v3202_v19 = vmul.f32 %v10366_v37, %v11585_v46  ;;  %v10368_v49 = vadd.f32 %v11718_v24, %v11529_v57  ;;  %v3972_v59 = vld [vmem:[#allocation3 + $0x28] sm:$0xf] }
 0x326   : > { %v3205_v41 = vmul.f32 %v10367_v63, %v11585_v46  ;;  %v11807_v35 = vrot.slane %v3571_v10, 7  ;;  %v4079_v54 = vrot.slane %v4078_v47, 4  ;;  %v10369_v16 = vadd.f32 %v11733_v8, %v11541_v3  ;;  %v3776_v47 = vld [vmem:[#allocation3 + $0x84] sm:$0xf] }
 0x327   : > { %v4086_v36 = vshrl.u32 %v3971_v60, 16  ;;  %v3241_v32 = vadd.f32 %v11593_v9, %v3202_v19  ;;  %v3203_v44 = vmul.f32 %v10368_v49, %v11585_v46  ;;  %v4089_v48 = vshll.u32 %v3971_v60, 16 }
 0x328   : > { %v3244_v55 = vadd.f32 %v11593_v9, %v3205_v41  ;;  %v3576_v57 = vor.u32 %v3574_v13, %v11807_v35  ;;  %v3577_v24 = vrot.slane %v11807_v35, 4  ;;  %v4084_v3 = vsel %vm11481_vm11, %v4079_v54, %v4083_v0 }
 0x329   : > { %v3208_v8 = vmul.f32 %v10369_v16, %v11585_v46  ;;  %v9027_v58 = vcombine.low %v4074_v45, %v4084_v3  ;;  %v3273_v25 = vmax.f32 %v3241_v32, 0.0  ;;  %v3242_v34 = vadd.f32 %v11593_v9, %v3203_v44 }
 0x32a   : > { %v3276_v2 = vmax.f32 %v3244_v55, 0.0  ;;  %v3784_v43 = vsel %vm11611_vm14, %v3576_v57, %v3783_v42  ;;  %v4088_v51 = vrot.slane %v4086_v36, 4  ;;  %v4091_v61 = vrot.slane %v4089_v48, 5  ;;  %v3787_v36 = vld [vmem:[#allocation3 + $0x98] sm:$0x1] }
 0x32b   : > { %v3247_v15 = vadd.f32 %v11593_v9, %v3208_v8  ;;  %3785 = vst [vmem:[#allocation3 + $0x90] sm:$0xf] %v3784_v43  ;;  %7425 = vmatprep.mubr.bf16.mxu1 %v9027_v58  ;;  %v9317_v28 = vpack.c.bf16 %v3273_v25, %v3273_v25  ;;  %v3274_v5 = vmax.f32 %v3242_v34, 0.0  ;;  %v4095_v22 = vshll.u32 %v3972_v59, 16 }
 0x32c   : > { %v9320_v11 = vpack.c.bf16 %v3276_v2, %v3276_v2  ;;  %v4092_v60 = vor.u32 %v4091_v61, %v4088_v51  ;;  %v4099_v6 = vshrl.u32 %v3972_v59, 16  ;;  %v4105_v29 = vshll.u32 %v3973_v27, 16  ;;  %v3780_v59 = vld [vmem:[#allocation3 + $0x8c] sm:$0x1] }
 0x32d   : > { %7426 = vmatmul.mubr.bf16.gmra.mrb[24].mxu1 %v10659_v12  ;;  %v3279_v37 = vmax.f32 %v3247_v15, 0.0  ;;  %v3554_v50 = vshrl.u32 %v9317_v28, 16  ;;  %v3557_v63 = vshll.u32 %v9317_v28, 16  ;;  %v9318_v0 = vpack.c.bf16 %v3274_v5, %v3274_v5  ;;  %v3797_v12 = vld [vmem:[#allocation3 + $0xa8] sm:$0xf] }
 0x32e   : > { %v3579_v10 = vshrl.u32 %v9320_v11, 16  ;;  %v3582_v13 = vshll.u32 %v9320_v11, 16  ;;  %v4093_v19 = vrot.slane %v4092_v60, 4  ;;  %v4097_v41 = vrot.slane %v4095_v22, 5  ;;  %v3974_v5 = vld [vmem:[#allocation3 + $0x30] sm:$0xf] }
 0x32f   : > { %v9323_v45 = vpack.c.bf16 %v3279_v37, %v3279_v37  ;;  %v3556_v49 = vrot.slane %v3554_v50, 7  ;;  %v4101_v54 = vrot.slane %v4099_v6, 4  ;;  %v4107_v16 = vrot.slane %v4105_v29, 5  ;;  %v3975_v50 = vld [vmem:[#allocation3 + $0x34] sm:$0xf] }
 0x330   : > { %v3581_v35 = vrot.slane %v3579_v10, 7  ;;  %v3562_v42 = vshrl.u32 %v9318_v0, 16  ;;  %v3565_v32 = vshll.u32 %v9318_v0, 16  ;;  %v4098_v25 = vsel %vm11481_vm11, %v4093_v19, %v4097_v41  ;;  %v3976_v19 = vld [vmem:[#allocation3 + $0x38] sm:$0x1] }
 0x331   : > { %v3605_v55 = vshrl.u32 %v9323_v45, 16  ;;  %v3608_v44 = vshll.u32 %v9323_v45, 16  ;;  %v3559_v48 = vor.u32 %v3557_v63, %v3556_v49  ;;  %v3560_v4 = vrot.slane %v3556_v49, 4  ;;  %v10661_v45 = vld [vmem:[#allocation3 + $0x24] sm:$0xff]   ;;  %v11864_v49 = vld [vmem:[%s13280_s3] ss:$0 sm:$0xff] }
 0x332   : > { %v3584_v57 = vor.u32 %v3582_v13, %v3581_v35  ;;  %v3586_v3 = vrot.slane %v3581_v35, 4  ;;  %v3564_v8 = vrot.slane %v3562_v42, 7  ;;  %v4102_v2 = vor.u32 %v4101_v54, %v4097_v41 }
 0x333   : > { %v11826_v58 = vrot.slane %v3605_v55, 7  ;;  %v3777_v34 = vsel %vm11611_vm14, %v3559_v48, %v3776_v47  ;;  %v10370_v15 = vadd.f32 %v11736_v30, %v11545_v14  ;;  %v10371_v37 = vadd.f32 %v11738_v56, %v11549_v62 }
 0x334   : > { %v3585_v27 = vsel %vm11618_vm15, %v3577_v24, %v3584_v57  ;;  %v3788_v43 = vsel %vm11340_vm6, %v3586_v3, %v3787_v36  ;;  %3778 = vst [vmem:[#allocation3 + $0x84] sm:$0xf] %v3777_v34  ;;  %v3567_v51 = vor.u32 %v3565_v32, %v3564_v8  ;;  %v3569_v61 = vrot.slane %v3564_v8, 4 }
 0x335   : > { %3786 = vst [vmem:[#allocation3 + $0x94] sm:$0xf] %v3585_v27  ;;  %3789 = vst [vmem:[#allocation3 + $0x98] sm:$0x1] %v3788_v43  ;;  %v3610_v28 = vor.u32 %v3608_v44, %v11826_v58  ;;  %v3611_v11 = vrot.slane %v11826_v58, 4  ;;  %v4103_v22 = vrot.slane %v4102_v2, 4  ;;  %v3206_v24 = vmul.f32 %v10370_v15, %v11585_v46 }
 0x336   : > { %v10372_v60 = vadd.f32 %v11744_v38, %v11551_v21  ;;  %v3568_v14 = vsel %vm11618_vm15, %v3560_v4, %v3567_v51  ;;  %v3781_v30 = vsel %vm11340_vm6, %v3569_v61, %v3780_v59  ;;  %v10373_v29 = vadd.f32 %v11766_v1, %v11553_v26 }
 0x337   : > { %v3798_v6 = vsel %vm11611_vm14, %v3610_v28, %v3797_v12  ;;  %3779 = vst [vmem:[#allocation3 + $0x88] sm:$0xf] %v3568_v14  ;;  %3782 = vst [vmem:[#allocation3 + $0x8c] sm:$0x1] %v3781_v30  ;;  %v4108_v62 = vsel %vm11481_vm11, %v4103_v22, %v4107_v16  ;;  %v3245_v21 = vadd.f32 %v11593_v9, %v3206_v24  ;;  %v4110_v13 = vshrl.u32 %v3974_v5, 16 }
 0x338   : > { %3799 = vst [vmem:[#allocation3 + $0xa8] sm:$0xf] %v3798_v6  ;;  %v3209_v56 = vmul.f32 %v10371_v37, %v11585_v46  ;;  %v3207_v38 = vmul.f32 %v10372_v60, %v11585_v46  ;;  %v9028_v63 = vcombine.low %v4098_v25, %v4108_v62  ;;  %v3212_v10 = vmul.f32 %v10373_v29, %v11585_v46  ;;  %v3790_v25 = vld [vmem:[#allocation3 + $0x9c] sm:$0xf]  ;;  %v3801_v28 = vld [vmem:[#allocation3 + $0xb0] sm:$0x1] }
 0x339   : > { %v4113_v47 = vshll.u32 %v3974_v5, 16  ;;  %v3277_v0 = vmax.f32 %v3245_v21, 0.0  ;;  %v4119_v41 = vshll.u32 %v3975_v50, 16  ;;  %v4112_v54 = vrot.slane %v4110_v13, 4  ;;  %v3794_v29 = vld [vmem:[#allocation3 + $0xa4] sm:$0x1] }
 0x33a   : > { %v3248_v26 = vadd.f32 %v11593_v9, %v3209_v56  ;;  %v3246_v1 = vadd.f32 %v11593_v9, %v3207_v38  ;;  %7433 = vmatprep.mubr.bf16.mxu1 %v9028_v63  ;;  %v3251_v35 = vadd.f32 %v11864_v49, %v3212_v10  ;;  %v4123_v16 = vshrl.u32 %v3975_v50, 16  ;;  %v3811_v50 = vld [vmem:[#allocation3 + $0xc0] sm:$0xf]  ;;  %v3977_v63 = vld [vmem:[#allocation3 + $0x3c] sm:$0xf] }
 0x33b   : > { %v4115_v46 = vrot.slane %v4113_v47, 5  ;;  %v9321_v36 = vpack.c.bf16 %v3277_v0, %v3277_v0  ;;  %7434 = vmatmul.mubr.bf16.gmra.mrb[28].mxu1 %v10661_v45  ;;  %v4121_v55 = vrot.slane %v4119_v41, 5  ;;  %v4129_v4 = vshll.u32 %v3976_v19, 16 }
 0x33c   : > { %v3280_v42 = vmax.f32 %v3248_v26, 0.0  ;;  %v3278_v32 = vmax.f32 %v3246_v1, 0.0  ;;  %v3283_v9 = vmax.f32 %v3251_v35, 0.0  ;;  %v4125_v48 = vrot.slane %v4123_v16, 4  ;;  %v3978_v26 = vld [vmem:[#allocation3 + $0x40] sm:$0xf] }
 0x33d   : > { %v4116_v44 = vor.u32 %v4115_v46, %v4112_v54  ;;  %v3588_v57 = vshrl.u32 %v9321_v36, 16  ;;  %v3591_v3 = vshll.u32 %v9321_v36, 16  ;;  %v4131_v43 = vrot.slane %v4129_v4, 5  ;;  %v3979_v35 = vld [vmem:[#allocation3 + $0x44] sm:$0x1]  ;;  %v10663_v36 = vld [vmem:[#allocation3 + $0x30] sm:$0xff]  }
 0x33e   : > { %v9324_v8 = vpack.c.bf16 %v3280_v42, %v3280_v42  ;;  %v9322_v59 = vpack.c.bf16 %v3278_v32, %v3278_v32  ;;  %v9327_v2 = vpack.c.bf16 %v3283_v9, %v3283_v9  ;;  %v4126_v27 = vor.u32 %v4125_v48, %v4121_v55 }
 0x33f   : > { %v4117_v34 = vrot.slane %v4116_v44, 4  ;;  %v3590_v12 = vrot.slane %v3588_v57, 7  ;;  %v10374_v56 = vadd.f32 %v11770_v7, %v11559_v17  ;;  %v10375_v38 = vadd.f32 %v11774_v18, %v11565_v31 }
 0x340   : > { %v3613_v15 = vshrl.u32 %v9324_v8, 16  ;;  %v3616_v51 = vshll.u32 %v9324_v8, 16  ;;  %v3596_v61 = vshrl.u32 %v9322_v59, 16  ;;  %v3599_v5 = vshll.u32 %v9322_v59, 16 }
 0x341   : > { %v3639_v22 = vshrl.u32 %v9327_v2, 16  ;;  %v3642_v24 = vshll.u32 %v9327_v2, 16  ;;  %v4122_v37 = vsel %vm11481_vm11, %v4117_v34, %v4121_v55  ;;  %v3593_v60 = vor.u32 %v3591_v3, %v3590_v12  ;;  %v3980_v3 = vld [vmem:[#allocation3 + $0x48] sm:$0xf]  ;;  %v3981_v34 = vld [vmem:[#allocation3 + $0x4c] sm:$0xf] }
 0x342   : > { %v3594_v14 = vrot.slane %v3590_v12, 4  ;;  %v3615_v30 = vrot.slane %v3613_v15, 7  ;;  %v3598_v6 = vrot.slane %v3596_v61, 7  ;;  %v4127_v21 = vrot.slane %v4126_v27, 4 }
 0x343   : > { %v11869_v62 = vrot.slane %v3639_v22, 7  ;;  %v3791_v10 = vsel %vm11611_vm14, %v3593_v60, %v3790_v25  ;;  %v10376_v42 = vadd.f32 %v11778_v20, %v11567_v39  ;;  %v4134_v32 = vshrl.u32 %v3977_v63, 16 }
 0x344   : > { %v3618_v13 = vor.u32 %v3616_v51, %v3615_v30  ;;  %v3620_v47 = vrot.slane %v3615_v30, 4  ;;  %v3601_v0 = vor.u32 %v3599_v5, %v3598_v6  ;;  %3792 = vst [vmem:[#allocation3 + $0x9c] sm:$0xf] %v3791_v10  ;;  %v3603_v1 = vrot.slane %v3598_v6, 4 }
 0x345   : > { %v3644_v45 = vor.u32 %v3642_v24, %v11869_v62  ;;  %v3645_v19 = vrot.slane %v11869_v62, 4  ;;  %v4132_v17 = vsel %vm11481_vm11, %v4127_v21, %v4131_v43  ;;  %v4137_v55 = vshll.u32 %v3977_v63, 16  ;;  %v3987_v62 = vld [vmem:[#allocation3 + $0x64] sm:$0xf] }
 0x346   : > { %v3619_v31 = vsel %vm11618_vm15, %v3611_v11, %v3618_v13  ;;  %v3802_v7 = vsel %vm11340_vm6, %v3620_v47, %v3801_v28  ;;  %v3602_v18 = vsel %vm11618_vm15, %v3594_v14, %v3601_v0  ;;  %v9029_v41 = vcombine.low %v4122_v37, %v4132_v17  ;;  %v10759_v11 = vld [vmem:[%s13279_s2] ss:$0 sm:$0xff] }
 0x347   : > { %3800 = vst [vmem:[#allocation3 + $0xac] sm:$0xf] %v3619_v31  ;;  %3803 = vst [vmem:[#allocation3 + $0xb0] sm:$0x1] %v3802_v7  ;;  %v3795_v54 = vsel %vm11340_vm6, %v3603_v1, %v3794_v29  ;;  %v3812_v58 = vsel %vm11611_vm14, %v3644_v45, %v3811_v50  ;;  %v3210_v46 = vmul.f32 %v10759_v11, %v10374_v56  ;;  %v4143_v9 = vshll.u32 %v3978_v26, 16 }
 0x348   : > { %3793 = vst [vmem:[#allocation3 + $0xa0] sm:$0xf] %v3602_v18  ;;  %v3213_v16 = vmul.f32 %v10759_v11, %v10375_v38  ;;  %3796 = vst [vmem:[#allocation3 + $0xa4] sm:$0x1] %v3795_v54  ;;  %7441 = vmatprep.mubr.bf16.mxu1 %v9029_v41  ;;  %v4147_v4 = vshrl.u32 %v3978_v26, 16  ;;  %v4153_v57 = vshll.u32 %v3979_v35, 16  ;;  %v3211_v8 = vmul.f32 %v10759_v11, %v10376_v42 }
 0x349   : > { %3813 = vst [vmem:[#allocation3 + $0xc0] sm:$0xf] %v3812_v58  ;;  %v3249_v44 = vadd.f32 %v11864_v49, %v3210_v46  ;;  %7442 = vmatmul.mubr.bf16.gmra.mrb[32].mxu1 %v10663_v36  ;;  %v4136_v59 = vrot.slane %v4134_v32, 4  ;;  %v4139_v25 = vrot.slane %v4137_v55, 5  ;;  %v4145_v2 = vrot.slane %v4143_v9, 5 }
 0x34a   : > { %v3252_v48 = vadd.f32 %v11864_v49, %v3213_v16  ;;  %v4149_v12 = vrot.slane %v4147_v4, 4  ;;  %v4155_v39 = vrot.slane %v4153_v57, 5  ;;  %v3250_v20 = vadd.f32 %v11864_v49, %v3211_v8  ;;  %v3804_v56 = vld [vmem:[#allocation3 + $0xb4] sm:$0xf]  ;;  %v3815_v38 = vld [vmem:[#allocation3 + $0xc8] sm:$0x1] }
 0x34b   : > { %v3281_v27 = vmax.f32 %v3249_v44, 0.0  ;;  %v4140_v15 = vor.u32 %v4139_v25, %v4136_v59  ;;  %v4158_v51 = vshrl.u32 %v3980_v3, 16  ;;  %v4161_v61 = vshll.u32 %v3980_v3, 16  ;;  %v3982_v26 = vld [vmem:[#allocation3 + $0x50] sm:$0x1]  ;;  %v10665_v4 = vld [vmem:[#allocation3 + $0x3c] sm:$0xff]  }
 0x34c   : > { %v3284_v43 = vmax.f32 %v3252_v48, 0.0  ;;  %v4150_v22 = vor.u32 %v4149_v12, %v4145_v2  ;;  %v4167_v24 = vshll.u32 %v3981_v34, 16  ;;  %v3282_v37 = vmax.f32 %v3250_v20, 0.0  ;;  %v3983_v11 = vld [vmem:[#allocation3 + $0x54] sm:$0xf] }
 0x34d   : > { %v9325_v28 = vpack.c.bf16 %v3281_v27, %v3281_v27  ;;  %v4141_v60 = vrot.slane %v4140_v15, 4  ;;  %v4160_v14 = vrot.slane %v4158_v51, 4  ;;  %v4163_v30 = vrot.slane %v4161_v61, 5  ;;  %v3984_v32 = vld [vmem:[#allocation3 + $0x58] sm:$0xf] }
 0x34e   : > { %v9328_v5 = vpack.c.bf16 %v3284_v43, %v3284_v43  ;;  %v9326_v63 = vpack.c.bf16 %v3282_v37, %v3282_v37  ;;  %v4151_v10 = vrot.slane %v4150_v22, 4  ;;  %v4169_v1 = vrot.slane %v4167_v24, 5  ;;  %v3808_v48 = vld [vmem:[#allocation3 + $0xbc] sm:$0x1]  ;;  %v3986_v3 = vld [vmem:[#allocation3 + $0x60] sm:$0xf] }
 0x34f   : > { %v3622_v6 = vshrl.u32 %v9325_v28, 16  ;;  %v3625_v29 = vshll.u32 %v9325_v28, 16  ;;  %v4146_v49 = vsel %vm11481_vm11, %v4141_v60, %v4145_v2  ;;  %v4164_v13 = vor.u32 %v4163_v30, %v4160_v14  ;;  %v3985_v25 = vld [vmem:[#allocation3 + $0x5c] sm:$0x1]  ;;  %v3988_v22 = vld [vmem:[#allocation3 + $0x68] sm:$0x1] }
 0x350   : > { %v3647_v50 = vshrl.u32 %v9328_v5, 16  ;;  %v3650_v21 = vshll.u32 %v9328_v5, 16  ;;  %v4171_v45 = vshrl.u32 %v3981_v34, 16  ;;  %v3630_v17 = vshrl.u32 %v9326_v63, 16 }
 0x351   : > { %v3624_v47 = vrot.slane %v3622_v6, 7  ;;  %v3633_v31 = vshll.u32 %v9326_v63, 16  ;;  %v4156_v7 = vsel %vm11481_vm11, %v4151_v10, %v4155_v39  ;;  %v4165_v18 = vrot.slane %v4164_v13, 4  ;;  %v10667_v10 = vld [vmem:[#allocation3 + $0x48] sm:$0xff]  }
 0x352   : > { %v3649_v0 = vrot.slane %v3647_v50, 7  ;;  %v3632_v46 = vrot.slane %v3630_v17, 7  ;;  %v9030_v16 = vcombine.low %v4146_v49, %v4156_v7  ;;  %v4173_v42 = vrot.slane %v4171_v45, 4 }
 0x353   : > { %v3627_v41 = vor.u32 %v3625_v29, %v3624_v47  ;;  %v3628_v35 = vrot.slane %v3624_v47, 4  ;;  %v4170_v36 = vsel %vm11481_vm11, %v4165_v18, %v4169_v1  ;;  %v4177_v57 = vshll.u32 %v3982_v26, 16 }
 0x354   : > { %v3652_v54 = vor.u32 %v3650_v21, %v3649_v0  ;;  %v3654_v58 = vrot.slane %v3649_v0, 4  ;;  %v3635_v8 = vor.u32 %v3633_v31, %v3632_v46  ;;  %v3637_v59 = vrot.slane %v3632_v46, 4  ;;  %7449 = vmatprep.mubr.bf16.mxu1 %v9030_v16  ;;  %v3990_v21 = vld [vmem:[#allocation3 + $0x70] sm:$0xf]  ;;  %v3993_v46 = vld [vmem:[#allocation3 + $0x7c] sm:$0xf] }
 0x355   : > { %v3805_v55 = vsel %vm11611_vm14, %v3627_v41, %v3804_v56  ;;  %v4174_v33 = vor.u32 %v4173_v42, %v4169_v1  ;;  %v4182_v2 = vshrl.u32 %v3983_v11, 16  ;;  %7450 = vmatmul.mubr.bf16.gmra.mrb[36].mxu1 %v10665_v4  ;;  %v4179_v34 = vrot.slane %v4177_v57, 5  ;;  %v3992_v41 = vld [vmem:[#allocation3 + $0x78] sm:$0xf] }
 0x356   : > { %v3653_v9 = vsel %vm11618_vm15, %v3645_v19, %v3652_v54  ;;  %v3816_v44 = vsel %vm11340_vm6, %v3654_v58, %v3815_v38  ;;  %3806 = vst [vmem:[#allocation3 + $0xb4] sm:$0xf] %v3805_v55  ;;  %v4185_v19 = vshll.u32 %v3983_v11, 16  ;;  %v4191_v27 = vshll.u32 %v3984_v32, 16  ;;  %v3991_v58 = vld [vmem:[#allocation3 + $0x74] sm:$0x1] }
 0x357   : > { %3814 = vst [vmem:[#allocation3 + $0xc4] sm:$0xf] %v3653_v9  ;;  %3817 = vst [vmem:[#allocation3 + $0xc8] sm:$0x1] %v3816_v44  ;;  %v4195_v43 = vshrl.u32 %v3984_v32, 16  ;;  %v3636_v12 = vsel %vm11618_vm15, %v3628_v35, %v3635_v8  ;;  %v3809_v39 = vsel %vm11340_vm6, %v3637_v59, %v3808_v48  ;;  %v4175_v20 = vrot.slane %v4174_v33, 4 }
 0x358   : > { %v4184_v15 = vrot.slane %v4182_v2, 4  ;;  %3807 = vst [vmem:[#allocation3 + $0xb8] sm:$0xf] %v3636_v12  ;;  %3810 = vst [vmem:[#allocation3 + $0xbc] sm:$0x1] %v3809_v39  ;;  %v4187_v51 = vrot.slane %v4185_v19, 5 }
 0x359   : > { %v4193_v61 = vrot.slane %v4191_v27, 5  ;;  %v4197_v28 = vrot.slane %v4195_v43, 4  ;;  %v4201_v5 = vshll.u32 %v3985_v25, 16  ;;  %v4180_v24 = vsel %vm11481_vm11, %v4175_v20, %v4179_v34  ;;  %v10669_v59 = vld [vmem:[#allocation3 + $0x54] sm:$0xff]   ;;  %v3996_v12 = vld [vmem:[#allocation3 + $0x88] sm:$0xf] }
 0x35a   : > { %v4206_v37 = vshrl.u32 %v3986_v3, 16  ;;  %v4209_v60 = vshll.u32 %v3986_v3, 16  ;;  %v4215_v14 = vshll.u32 %v3987_v62, 16  ;;  %v9031_v30 = vcombine.low %v4170_v36, %v4180_v24 }
 0x35b   : > { %v4188_v6 = vor.u32 %v4187_v51, %v4184_v15  ;;  %v4198_v29 = vor.u32 %v4197_v28, %v4193_v61  ;;  %v4203_v50 = vrot.slane %v4201_v5, 5  ;;  %v4219_v49 = vshrl.u32 %v3987_v62, 16  ;;  %v3994_v15 = vld [vmem:[#allocation3 + $0x80] sm:$0x1]  ;;  %v3995_v28 = vld [vmem:[#allocation3 + $0x84] sm:$0xf] }
 0x35c   : > { %v4208_v56 = vrot.slane %v4206_v37, 4  ;;  %v4211_v38 = vrot.slane %v4209_v60, 5  ;;  %v4217_v63 = vrot.slane %v4215_v14, 5  ;;  %7457 = vmatprep.mubr.bf16.mxu1 %v9031_v30  ;;  %v4225_v0 = vshll.u32 %v3988_v22, 16  ;;  %v10671_v14 = vld [vmem:[#allocation3 + $0x60] sm:$0xff]  }
 0x35d   : > { %v4189_v13 = vrot.slane %v4188_v6, 4  ;;  %v4199_v47 = vrot.slane %v4198_v29, 4  ;;  %v4230_v26 = vshrl.u32 %v3989_v52, 16  ;;  %v4221_v45 = vrot.slane %v4219_v49, 4  ;;  %7458 = vmatmul.mubr.bf16.gmra.mrb[40].mxu1 %v10667_v10 }
 0x35e   : > { %v4212_v1 = vor.u32 %v4211_v38, %v4208_v56  ;;  %v4233_v17 = vshll.u32 %v3989_v52, 16  ;;  %v4239_v31 = vshll.u32 %v3990_v21, 16  ;;  %v4243_v32 = vshrl.u32 %v3990_v21, 16 }
 0x35f   : > { %v4194_v7 = vsel %vm11481_vm11, %v4189_v13, %v4193_v61  ;;  %v4204_v18 = vsel %vm11481_vm11, %v4199_v47, %v4203_v50  ;;  %v4222_v54 = vor.u32 %v4221_v45, %v4217_v63  ;;  %v4232_v11 = vrot.slane %v4230_v26, 4  ;;  %v3997_v13 = vld [vmem:[#allocation3 + $0x8c] sm:$0x1]  ;;  %v3998_v26 = vld [vmem:[#allocation3 + $0x90] sm:$0xf] }
 0x360   : > { %v9032_v35 = vcombine.low %v4194_v7, %v4204_v18  ;;  %v4213_v16 = vrot.slane %v4212_v1, 4  ;;  %v4235_v36 = vrot.slane %v4233_v17, 5  ;;  %v4241_v42 = vrot.slane %v4239_v31, 5  ;;  %v10673_v18 = vld [vmem:[#allocation3 + $0x6c] sm:$0xff]  }
 0x361   : > { %v4223_v55 = vrot.slane %v4222_v54, 4  ;;  %v4227_v9 = vrot.slane %v4225_v0, 5  ;;  %v4245_v44 = vrot.slane %v4243_v32, 4  ;;  %v4263_v48 = vshll.u32 %v3993_v46, 16  ;;  %v11937_v32 = vpop.f32.mrb[16].mxu1 }
 0x362   : > { %7465 = vmatprep.mubr.bf16.mxu1 %v9032_v35  ;;  %v4249_v57 = vshll.u32 %v3991_v58, 16  ;;  %v4254_v3 = vshrl.u32 %v3992_v41, 16  ;;  %v4267_v8 = vshrl.u32 %v3993_v46, 16  ;;  %v4218_v33 = vsel %vm11481_vm11, %v4213_v16, %v4217_v63  ;;  %v3999_v63 = vld [vmem:[#allocation3 + $0x94] sm:$0xf] }
 0x363   : > { %v4228_v4 = vsel %vm11481_vm11, %v4223_v55, %v4227_v9  ;;  %v4236_v25 = vor.u32 %v4235_v36, %v4232_v11  ;;  %v4246_v2 = vor.u32 %v4245_v44, %v4241_v42  ;;  %v4257_v62 = vshll.u32 %v3992_v41, 16  ;;  %v4000_v44 = vld [vmem:[#allocation3 + $0x98] sm:$0x1] }
 0x364   : > { %v9033_v34 = vcombine.low %v4218_v33, %v4228_v4  ;;  %v4265_v27 = vrot.slane %v4263_v48, 5  ;;  %v4269_v43 = vrot.slane %v4267_v8, 4  ;;  %v4251_v20 = vrot.slane %v4249_v57, 5  ;;  %v4001_v57 = vld [vmem:[#allocation3 + $0x9c] sm:$0xf] }
 0x365   : > { %7466 = vmatmul.mubr.bf16.gmra.mrb[44].mxu1 %v10669_v59  ;;  %v4247_v19 = vrot.slane %v4246_v2, 4  ;;  %v4237_v39 = vrot.slane %v4236_v25, 4  ;;  %v4256_v51 = vrot.slane %v4254_v3, 4  ;;  %v4259_v61 = vrot.slane %v4257_v62, 5  ;;  %v10675_v2 = vld [vmem:[#allocation3 + $0x78] sm:$0xff]  }
 0x366   : > { %7473 = vmatprep.mubr.bf16.mxu1 %v9033_v34  ;;  %v4270_v22 = vor.u32 %v4269_v43, %v4265_v27  ;;  %v4287_v24 = vshll.u32 %v3996_v12, 16  ;;  %v4291_v37 = vshrl.u32 %v3996_v12, 16  ;;  %v4273_v60 = vshll.u32 %v3994_v15, 16  ;;  %v9499_v15 = vpop.f32.mrb[17].mxu1 }
 0x367   : > { %v4252_v5 = vsel %vm11481_vm11, %v4247_v19, %v4251_v20  ;;  %v4242_v52 = vsel %vm11481_vm11, %v4237_v39, %v4241_v42  ;;  %v4260_v30 = vor.u32 %v4259_v61, %v4256_v51  ;;  %v4278_v6 = vshrl.u32 %v3995_v28, 16  ;;  %v4002_v42 = vld [vmem:[#allocation3 + $0xa0] sm:$0xf]  ;;  %v4003_v51 = vld [vmem:[#allocation3 + $0xa4] sm:$0x1] }
 0x368   : > { %v4281_v29 = vshll.u32 %v3995_v28, 16  ;;  %v9034_v50 = vcombine.low %v4242_v52, %v4252_v5  ;;  %v4271_v21 = vrot.slane %v4270_v22, 4  ;;  %v4289_v56 = vrot.slane %v4287_v24, 5  ;;  %v4005_v61 = vld [vmem:[#allocation3 + $0xac] sm:$0xf]  ;;  %v9501_v28 = vpop.f32.mrb[18].mxu1 }
 0x369   : > { %v4293_v38 = vrot.slane %v4291_v37, 4  ;;  %v4261_v49 = vrot.slane %v4260_v30, 4  ;;  %v4275_v10 = vrot.slane %v4273_v60, 5  ;;  %v4280_v47 = vrot.slane %v4278_v6, 4  ;;  %v9502_v60 = vpop.f32.mrb[19].mxu1 }
 0x36a   : > { %v4283_v0 = vrot.slane %v4281_v29, 5  ;;  %v4311_v17 = vshll.u32 %v3999_v63, 16  ;;  %v4315_v31 = vshrl.u32 %v3999_v63, 16  ;;  %v4297_v7 = vshll.u32 %v3997_v13, 16 }
 0x36b   : > { %v4276_v1 = vsel %vm11481_vm11, %v4271_v21, %v4275_v10  ;;  %v4294_v45 = vor.u32 %v4293_v38, %v4289_v56  ;;  %v4266_v41 = vsel %vm11481_vm11, %v4261_v49, %v4265_v27  ;;  %v4302_v54 = vshrl.u32 %v3998_v26, 16  ;;  %v10677_v21 = vld [vmem:[#allocation3 + $0x84] sm:$0xff]  }
 0x36c   : > { %v4284_v35 = vor.u32 %v4283_v0, %v4280_v47  ;;  %v4305_v58 = vshll.u32 %v3998_v26, 16  ;;  %v9035_v11 = vcombine.low %v4266_v41, %v4276_v1  ;;  %v4313_v16 = vrot.slane %v4311_v17, 5  ;;  %v4008_v26 = vld [vmem:[#allocation3 + $0xb8] sm:$0xf]  ;;  %v4006_v17 = vld [vmem:[#allocation3 + $0xb0] sm:$0x1] }
 0x36d   : > { %7474 = vmatmul.mubr.bf16.gmra.mrb[48].mxu1 %v10671_v14  ;;  %v4295_v46 = vrot.slane %v4294_v45, 4  ;;  %v4317_v36 = vrot.slane %v4315_v31, 4  ;;  %v4299_v9 = vrot.slane %v4297_v7, 5  ;;  %v4304_v48 = vrot.slane %v4302_v54, 4  ;;  %v4004_v14 = vld [vmem:[#allocation3 + $0xa8] sm:$0xf] }
 0x36e   : > { %7481 = vmatprep.mubr.bf16.mxu1 %v9034_v50  ;;  %v4285_v55 = vrot.slane %v4284_v35, 4  ;;  %v4307_v4 = vrot.slane %v4305_v58, 5  ;;  %v4335_v59 = vshll.u32 %v4002_v42, 16  ;;  %v4339_v33 = vshrl.u32 %v4002_v42, 16 }
 0x36f   : > { %v4300_v3 = vsel %vm11481_vm11, %v4295_v46, %v4299_v9  ;;  %v4318_v8 = vor.u32 %v4317_v36, %v4313_v16  ;;  %v4321_v25 = vshll.u32 %v4000_v44, 16  ;;  %v4326_v19 = vshrl.u32 %v4001_v57, 16  ;;  %v10679_v46 = vld [vmem:[#allocation3 + $0x90] sm:$0xff]  }
 0x370   : > { %v4290_v62 = vsel %vm11481_vm11, %v4285_v55, %v4289_v56  ;;  %v4308_v34 = vor.u32 %v4307_v4, %v4304_v48  ;;  %v4329_v27 = vshll.u32 %v4001_v57, 16  ;;  %v4337_v39 = vrot.slane %v4335_v59, 5 }
 0x371   : > { %v9036_v43 = vcombine.low %v4290_v62, %v4300_v3  ;;  %v4319_v12 = vrot.slane %v4318_v8, 4  ;;  %v4341_v20 = vrot.slane %v4339_v33, 4  ;;  %v4323_v22 = vrot.slane %v4321_v25, 5 }
 0x372   : > { %v4309_v5 = vrot.slane %v4308_v34, 4  ;;  %v4328_v24 = vrot.slane %v4326_v19, 4  ;;  %v4331_v37 = vrot.slane %v4329_v27, 5  ;;  %v4359_v6 = vshll.u32 %v4005_v61, 16  ;;  %v10681_v19 = vld [vmem:[#allocation3 + $0x9c] sm:$0xff]  }
 0x373   : > { %v4324_v52 = vsel %vm11481_vm11, %v4319_v12, %v4323_v22  ;;  %v4342_v30 = vor.u32 %v4341_v20, %v4337_v39  ;;  %v4363_v29 = vshrl.u32 %v4005_v61, 16  ;;  %v4345_v50 = vshll.u32 %v4003_v51, 16  ;;  %v10683_v61 = vld [vmem:[#allocation3 + $0xa8] sm:$0xff]  }
 0x374   : > { %v4314_v56 = vsel %vm11481_vm11, %v4309_v5, %v4313_v16  ;;  %v4332_v38 = vor.u32 %v4331_v37, %v4328_v24  ;;  %v4350_v63 = vshrl.u32 %v4004_v14, 16  ;;  %v4353_v49 = vshll.u32 %v4004_v14, 16  ;;  %v4478_v5 = vld [vmem:[#allocation3 + $0x4] sm:$0xf]  ;;  %v4477_v37 = vld [vmem:[#allocation3] sm:$0xe] }
 0x375   : > { %7482 = vmatmul.mubr.bf16.gmra.mrb[52].mxu1 %v10673_v18  ;;  %v9037_v10 = vcombine.low %v4314_v56, %v4324_v52  ;;  %v4343_v13 = vrot.slane %v4342_v30, 4  ;;  %v4361_v47 = vrot.slane %v4359_v6, 5  ;;  %v4365_v0 = vrot.slane %v4363_v29, 4  ;;  %v4007_v18 = vld [vmem:[#allocation3 + $0xb4] sm:$0xf]  ;;  %v10686_v29 = vld [vmem:[#allocation3 + $0xc] sm:$0xff]  }
 0x376   : > { %7489 = vmatprep.mubr.bf16.mxu1 %v9035_v11  ;;  %v4333_v1 = vrot.slane %v4332_v38, 4  ;;  %v4347_v45 = vrot.slane %v4345_v50, 5  ;;  %v4352_v31 = vrot.slane %v4350_v63, 4  ;;  %v4355_v7 = vrot.slane %v4353_v49, 5  ;;  %v10685_v6 = vld [vmem:[#allocation3 + $0xb4] sm:$0xff]  }
 0x377   : > { %v4366_v35 = vor.u32 %v4365_v0, %v4361_v47  ;;  %v4383_v54 = vshll.u32 %v4008_v26, 16  ;;  %v4387_v58 = vshrl.u32 %v4008_v26, 16  ;;  %v4369_v11 = vshll.u32 %v4006_v17, 16  ;;  %v10689_v0 = vld [vmem:[#allocation3 + $0x18] sm:$0xff]  }
 0x378   : > { %v4348_v41 = vsel %vm11481_vm11, %v4343_v13, %v4347_v45  ;;  %v4338_v16 = vsel %vm11481_vm11, %v4333_v1, %v4337_v39  ;;  %v4356_v36 = vor.u32 %v4355_v7, %v4352_v31  ;;  %v4374_v42 = vshrl.u32 %v4007_v18, 16  ;;  %v4482_v13 = vld [vmem:[#allocation3 + $0x14] sm:$0x1]  ;;  %v4480_v1 = vld [vmem:[#allocation3 + $0xc] sm:$0xe]  ;;  %v10692_v31 = vld [vmem:[%s13281_s4 + $0x108] sm:$0xff]  }
 0x379   : > { %v4377_v55 = vshll.u32 %v4007_v18, 16  ;;  %v9038_v9 = vcombine.low %v4338_v16, %v4348_v41  ;;  %v4367_v44 = vrot.slane %v4366_v35, 4  ;;  %v4385_v48 = vrot.slane %v4383_v54, 5  ;;  %v4484_v45 = vld [vmem:[#allocation3 + $0x1c] sm:$0xf]  ;;  %v10695_v7 = vld [vmem:[%s13281_s4 + $0x150] sm:$0xff]  }
 0x37a   : > { %v4389_v4 = vrot.slane %v4387_v58, 4  ;;  %v11952_v57 = vadd.f32 %v9499_v15, %v11937_v32  ;;  %v11954_v3 = vadd.f32 %v9502_v60, %v9501_v28  ;;  %v4357_v8 = vrot.slane %v4356_v36, 4  ;;  %v4479_v60 = vld [vmem:[#allocation3 + $0x8] sm:$0x1]  ;;  %v10696_v58 = vld [vmem:[%s13281_s4 + $0x110] sm:$0xff]  }
 0x37b   : > { %v4371_v59 = vrot.slane %v4369_v11, 5  ;;  %v4376_v33 = vrot.slane %v4374_v42, 4  ;;  %v4379_v25 = vrot.slane %v4377_v55, 5  ;;  %v4578_v24 = vrot.slane %v4478_v5, 5  ;;  %v10699_v16 = vld [vmem:[%s13281_s4 + $0x158] sm:$0xff]  }
 0x37c   : > { %v4390_v34 = vor.u32 %v4389_v4, %v4385_v48  ;;  %v4362_v27 = vsel %vm11481_vm11, %v4357_v8, %v4361_v47  ;;  %v9041_v14 = vrot.slane %v4477_v37, 9  ;;  %v4581_v30 = vrot.slane %v4479_v60, 5  ;;  %v10691_v47 = vld [vmem:[%s13281_s4 + $0x148] sm:$0xff]   ;;  %v10690_v36 = vld [vmem:[#allocation3 + $0x24] sm:$0xff]   ;;  %v10703_v4 = vld [vmem:[%s13281_s4 + $0x160] sm:$0xff]  }
 0x37d   : > { %7490 = vmatmul.mubr.bf16.gmra.mrb[56].mxu1 %v10675_v2  ;;  %v4009_v2 = vld [vmem:[#allocation3 + $0xbc] sm:$0x1]  ;;  %v4372_v62 = vsel %vm11481_vm11, %v4367_v44, %v4371_v59  ;;  %v4580_v52 = vrot.slane %v4578_v24, 4  ;;  %v13301_v50 = vmov 0  ;;  %v4588_v17 = vrot.slane %v4482_v13, 5  ;;  %v10715_v60 = vld [vmem:[%s13281_s4 + $0x178] sm:$0xff]  }
 0x37e   : > { %7497 = vmatprep.mubr.bf16.mxu1 %v9036_v43  ;;  %v4380_v43 = vor.u32 %v4379_v25, %v4376_v33  ;;  %v4393_v12 = vshll.u32 %v4009_v2, 16  ;;  %v9039_v39 = vcombine.low %v4362_v27, %v4372_v62  ;;  %v4391_v32 = vrot.slane %v4390_v34, 4  ;;  %v4483_v55 = vld [vmem:[#allocation3 + $0x18] sm:$0xe]  ;;  %v10704_v2 = vld [vmem:[%s13281_s4 + $0x120] sm:$0xff]  }
 0x37f   : > { %v13302_v50 = vsel %vm11964_vm4, 4294967295, %v13301_v50  ;;  %v4579_v56 = vsel %vm11964_vm4, %v9041_v14, %v4578_v24  ;;  %v4582_v38 = vsel %vm11964_vm4, %v4580_v52, %v4581_v30  ;;  %v9042_v18 = vrot.slane %v4480_v1, 9  ;;  %v4488_v34 = vld [vmem:[#allocation3 + $0x2c] sm:$0x1]  ;;  %v10693_v27 = vld [vmem:[#allocation3 + $0x30] sm:$0xff]   ;;  %v10694_v14 = vld [vmem:[#allocation3 + $0x3c] sm:$0xff]  }
 0x380   : > { %v4381_v20 = vrot.slane %v4380_v43, 4  ;;  %v4395_v15 = vrot.slane %v4393_v12, 5  ;;  %13303 = vst [vmem:[#allocation5_spill] sm:$0xff] %v13302_v50  ;;  %v9057_v49 = vcombine.low %v4579_v56, %v4582_v38  ;;  %v4592_v35 = vrot.slane %v4484_v45, 5  ;;  %v4486_v12 = vld [vmem:[#allocation3 + $0x24] sm:$0xe] }
 0x381   : > { %v9043_v8 = vrot.slane %v4483_v55, 9  ;;  %v4491_v37 = vld [vmem:[#allocation3 + $0x38] sm:$0x1]  ;;  %v4489_v30 = vld [vmem:[#allocation3 + $0x30] sm:$0xe] }
 0x382   : > { %v4396_v51 = vsel %vm11481_vm11, %v4391_v32, %v4395_v15  ;;  %v4386_v28 = vsel %vm11481_vm11, %v4381_v20, %v4385_v48  ;;  %v4594_v42 = vrot.slane %v4592_v35, 4  ;;  %v10700_v48 = vld [vmem:[%s13281_s4 + $0x118] sm:$0xff]   ;;  %v4602_v32 = vrot.slane %v4488_v34, 5  ;;  %v10708_v20 = vld [vmem:[%s13281_s4 + $0x128] sm:$0xff]   ;;  %v10711_v15 = vld [vmem:[%s13281_s4 + $0x170] sm:$0xff]  }
 0x383   : > { %v9040_v22 = vcombine.low %v4386_v28, %v4396_v51  ;;  %v4593_v25 = vsel %vm11964_vm4, %v9043_v8, %v4592_v35  ;;  %v9044_v51 = vrot.slane %v4486_v12, 9  ;;  %v10718_v56 = vld [vmem:[%s13281_s4 + $0x1c0] sm:$0xff]   ;;  %v9045_v38 = vrot.slane %v4489_v30, 9  ;;  %v4492_v1 = vld [vmem:[#allocation3 + $0x3c] sm:$0xe]  ;;  %v10701_v8 = vld [vmem:[#allocation3 + $0x60] sm:$0xff]  }
 0x384   : > { %v4496_v45 = vld [vmem:[#allocation3 + $0x4c] sm:$0xf]  ;;  %v4503_v12 = vld [vmem:[#allocation3 + $0x68] sm:$0x1]  ;;  %v4508_v30 = vld [vmem:[#allocation3 + $0x7c] sm:$0xf] }
 0x385   : > { %7498 = vmatmul.mubr.bf16.gmra.mrb[60].mxu1 %v10677_v21  ;;  %v4481_v21 = vld [vmem:[#allocation3 + $0x10] sm:$0xf] }
 0x386   : > { %7505 = vmatprep.mubr.bf16.mxu1 %v9037_v10  ;;  %v4585_v63 = vrot.slane %v4481_v21, 5  ;;  %v10688_v10 = vld [vmem:[%s13281_s4 + $0x100] sm:$0xff]   ;;  %v10716_v21 = vld [vmem:[%s13281_s4 + $0x138] sm:$0xff]  }
 0x388   : > { %v4587_v26 = vrot.slane %v4585_v63, 4  ;;  %v4586_v54 = vsel %vm11964_vm4, %v9042_v18, %v4585_v63  ;;  %v4620_v18 = vrot.slane %v4496_v45, 5 }
 0x38a   : > { %v4589_v41 = vsel %vm11964_vm4, %v4587_v26, %v4588_v17 }
 0x38b   : > { %v9058_v11 = vcombine.low %v4586_v54, %v4589_v41  ;;  %v4497_v54 = vld [vmem:[#allocation3 + $0x50] sm:$0x1] }
 0x38d   : > { %7506 = vmatmul.mubr.bf16.gmra.mrb[64].mxu1 %v10679_v46  ;;  %v4485_v46 = vld [vmem:[#allocation3 + $0x20] sm:$0x1] }
 0x38e   : > { %7513 = vmatprep.mubr.bf16.mxu1 %v9038_v9  ;;  %v4487_v9 = vld [vmem:[#allocation3 + $0x28] sm:$0xf]  ;;  %v4595_v44 = vrot.slane %v4485_v46, 5 }
 0x38f   : > { %v4599_v33 = vrot.slane %v4487_v9, 5  ;;  %v4495_v46 = vld [vmem:[#allocation3 + $0x48] sm:$0xe] }
 0x390   : > { %v4596_v59 = vsel %vm11964_vm4, %v4594_v42, %v4595_v44  ;;  %v9047_v42 = vrot.slane %v4495_v46, 9  ;;  %v4512_v46 = vld [vmem:[#allocation3 + $0x8c] sm:$0x1] }
 0x391   : > { %v9059_v62 = vcombine.low %v4593_v25, %v4596_v59  ;;  %v4601_v43 = vrot.slane %v4599_v33, 4  ;;  %v4600_v5 = vsel %vm11964_vm4, %v9044_v51, %v4599_v33  ;;  %v4498_v33 = vld [vmem:[#allocation3 + $0x54] sm:$0xe]  ;;  %v4502_v25 = vld [vmem:[#allocation3 + $0x64] sm:$0xf]  ;;  %v4637_v51 = vrot.slane %v4503_v12, 5 }
 0x392   : > { %v4621_v44 = vsel %vm11964_vm4, %v9047_v42, %v4620_v18  ;;  %v4510_v42 = vld [vmem:[#allocation3 + $0x84] sm:$0xe] }
 0x395   : > { %7514 = vmatmul.mubr.bf16.gmra.mrb[68].mxu1 %v10681_v19  ;;  %v10707_v19 = vld [vmem:[%s13281_s4 + $0x168] sm:$0xff]  }
 0x396   : > { %7521 = vmatprep.mubr.bf16.mxu1 %v9039_v39  ;;  %v4490_v39 = vld [vmem:[#allocation3 + $0x34] sm:$0xf] }
 0x397   : > { %v4606_v28 = vrot.slane %v4490_v39, 5  ;;  %v10702_v39 = vld [vmem:[#allocation3 + $0x6c] sm:$0xff]  }
 0x399   : > { %v4608_v52 = vrot.slane %v4606_v28, 4 }
 0x39d   : > { %7522 = vmatmul.mubr.bf16.gmra.mrb[72].mxu1 %v10683_v61  ;;  %v4603_v61 = vsel %vm11964_vm4, %v4601_v43, %v4602_v32 }
 0x39e   : > { %7529 = vmatprep.mubr.bf16.mxu1 %v9040_v22  ;;  %v10712_v22 = vld [vmem:[%s13281_s4 + $0x130] sm:$0xff]   ;;  %v9060_v24 = vcombine.low %v4600_v5, %v4603_v61 }
 0x3a5   : > { %7530 = vmatmul.mubr.bf16.gmra.mrb[76].mxu1 %v10685_v6  ;;  %v4493_v6 = vld [vmem:[#allocation3 + $0x40] sm:$0xf] }
 0x3a6   : > { %7570 = vmatprep.mubr.bf16.mxu1 %v10686_v29  ;;  %v4609_v29 = vrot.slane %v4491_v37, 5  ;;  %v4506_v37 = vld [vmem:[#allocation3 + $0x74] sm:$0x1] }
 0x3a8   : > { %v4610_v63 = vsel %vm11964_vm4, %v4608_v52, %v4609_v29  ;;  %v4504_v52 = vld [vmem:[#allocation3 + $0x6c] sm:$0xe] }
 0x3a9   : > { %v9050_v29 = vrot.slane %v4504_v52, 9  ;;  %v4520_v52 = vld [vmem:[#allocation3 + $0xac] sm:$0xf] }
 0x3ad   : > { %7571 = vmatmul.mubr.bf16.vlgmr.msra.gmra.mrb[80].mxu1 %v9057_v49  ;;  %v4613_v49 = vrot.slane %v4493_v6, 5  ;;  %v4644_v6 = vrot.slane %v4506_v37, 5 }
 0x3ae   : > { %9707 = vmatpush3.bf16.msra.mxu1 %v10688_v10  ;;  %7578 = vmatprep.mubr.bf16.mxu1 %v10689_v0  ;;  %v4607_v10 = vsel %vm11964_vm4, %v9045_v38, %v4606_v28  ;;  %v10697_v0 = vld [vmem:[#allocation3 + $0x48] sm:$0xff]  }
 0x3af   : > { %9708 = vmatprep.subr.bf16.mxu1 %v10691_v47  ;;  %v9061_v13 = vcombine.low %v4607_v10, %v4610_v63  ;;  %v4494_v47 = vld [vmem:[#allocation3 + $0x44] sm:$0x1]  ;;  %v4615_v26 = vrot.slane %v4613_v49, 4 }
 0x3b0   : > { %v4616_v17 = vrot.slane %v4494_v47, 5  ;;  %v10706_v10 = vld [vmem:[#allocation3 + $0x84] sm:$0xff]   ;;  %v4507_v47 = vld [vmem:[#allocation3 + $0x78] sm:$0xe] }
 0x3b2   : > { %9709 = vmatpush3.bf16.msra.mxu1 %v10692_v31  ;;  %v9046_v31 = vrot.slane %v4492_v1, 9 }
 0x3b3   : > { %9710 = vmatprep.subr.bf16.mxu1 %v10695_v7  ;;  %v4617_v7 = vsel %vm11964_vm4, %v4615_v26, %v4616_v17  ;;  %v9051_v17 = vrot.slane %v4507_v47, 9 }
 0x3b4   : > { %v4614_v41 = vsel %vm11964_vm4, %v9046_v31, %v4613_v49  ;;  %v4509_v49 = vld [vmem:[#allocation3 + $0x80] sm:$0x1] }
 0x3b5   : > { %7579 = vmatmul.mubr.bf16.gmra.mrb[84].mxu1 %v9058_v11  ;;  %v9062_v35 = vcombine.low %v4614_v41, %v4617_v7  ;;  %v4622_v11 = vrot.slane %v4620_v18, 4  ;;  %v4651_v26 = vrot.slane %v4509_v49, 5  ;;  %v4676_v49 = vrot.slane %v4520_v52, 5 }
 0x3b6   : > { %7586 = vmatprep.mubr.bf16.mxu1 %v10690_v36  ;;  %9711 = vmatpush3.bf16.msra.mxu1 %v10696_v58  ;;  %v10698_v58 = vld [vmem:[#allocation3 + $0x54] sm:$0xff]   ;;  %v4623_v36 = vrot.slane %v4497_v54, 5 }
 0x3b7   : > { %9712 = vmatprep.subr.bf16.mxu1 %v10699_v16  ;;  %v4499_v16 = vld [vmem:[#allocation3 + $0x58] sm:$0xf] }
 0x3b8   : > { %v4624_v55 = vsel %vm11964_vm4, %v4622_v11, %v4623_v36  ;;  %v4627_v9 = vrot.slane %v4499_v16, 5  ;;  %v10709_v16 = vld [vmem:[#allocation3 + $0x90] sm:$0xff]  }
 0x3ba   : > { %9713 = vmatpush3.bf16.msra.mxu1 %v10700_v48  ;;  %v9063_v48 = vcombine.low %v4621_v44, %v4624_v55  ;;  %v4629_v59 = vrot.slane %v4627_v9, 4  ;;  %v4514_v55 = vld [vmem:[#allocation3 + $0x94] sm:$0xf] }
 0x3bb   : > { %9714 = vmatprep.subr.bf16.mxu1 %v10703_v4  ;;  %v4500_v4 = vld [vmem:[#allocation3 + $0x5c] sm:$0x1] }
 0x3bd   : > { %7587 = vmatmul.mubr.bf16.gmra.mrb[88].mxu1 %v9059_v62  ;;  %v9048_v62 = vrot.slane %v4498_v33, 9 }
 0x3be   : > { %7594 = vmatprep.mubr.bf16.mxu1 %v10693_v27  ;;  %9715 = vmatpush3.bf16.msra.mxu1 %v10704_v2  ;;  %v4630_v2 = vrot.slane %v4500_v4, 5  ;;  %v9052_v4 = vrot.slane %v4510_v42, 9 }
 0x3bf   : > { %9716 = vmatprep.subr.bf16.mxu1 %v10707_v19  ;;  %v4634_v19 = vrot.slane %v4502_v25, 5  ;;  %v4628_v27 = vsel %vm11964_vm4, %v9048_v62, %v4627_v9  ;;  %v4658_v9 = vrot.slane %v4512_v46, 5 }
 0x3c0   : > { %v4631_v34 = vsel %vm11964_vm4, %v4629_v59, %v4630_v2  ;;  %v4662_v59 = vrot.slane %v4514_v55, 5 }
 0x3c1   : > { %v9064_v43 = vcombine.low %v4628_v27, %v4631_v34  ;;  %v4636_v32 = vrot.slane %v4634_v19, 4  ;;  %v4515_v27 = vld [vmem:[#allocation3 + $0x98] sm:$0x1] }
 0x3c2   : > { %9717 = vmatpush3.bf16.msra.mxu1 %v10708_v20  ;;  %v4501_v20 = vld [vmem:[#allocation3 + $0x60] sm:$0xe]  ;;  %v4664_v12 = vrot.slane %v4662_v59, 4 }
 0x3c3   : > { %9718 = vmatprep.subr.bf16.mxu1 %v10711_v15  ;;  %v4505_v15 = vld [vmem:[#allocation3 + $0x70] sm:$0xf]  ;;  %v9049_v61 = vrot.slane %v4501_v20, 9  ;;  %v4638_v28 = vsel %vm11964_vm4, %v4636_v32, %v4637_v51  ;;  %v4517_v32 = vld [vmem:[#allocation3 + $0xa0] sm:$0xf]  ;;  %v4665_v20 = vrot.slane %v4515_v27, 5 }
 0x3c4   : > { %v4641_v5 = vrot.slane %v4505_v15, 5 }
 0x3c5   : > { %7595 = vmatmul.mubr.bf16.gmra.mrb[92].mxu1 %v9060_v24  ;;  %v4666_v51 = vsel %vm11964_vm4, %v4664_v12, %v4665_v20 }
 0x3c6   : > { %7602 = vmatprep.mubr.bf16.mxu1 %v10694_v14  ;;  %9719 = vmatpush3.bf16.msra.mxu1 %v10712_v22  ;;  %v4635_v22 = vsel %vm11964_vm4, %v9049_v61, %v4634_v19  ;;  %v4643_v14 = vrot.slane %v4641_v5, 4  ;;  %v4642_v38 = vsel %vm11964_vm4, %v9050_v29, %v4641_v5  ;;  %v4669_v61 = vrot.slane %v4517_v32, 5 }
 0x3c7   : > { %9720 = vmatprep.subr.bf16.mxu1 %v10715_v60  ;;  %v9065_v24 = vcombine.low %v4635_v22, %v4638_v28  ;;  %v10705_v60 = vld [vmem:[#allocation3 + $0x78] sm:$0xff]   ;;  %v4518_v22 = vld [vmem:[#allocation3 + $0xa4] sm:$0x1] }
 0x3c8   : > { %v4671_v37 = vrot.slane %v4669_v61, 4 }
 0x3ca   : > { %9721 = vmatpush3.bf16.msra.mxu1 %v10716_v21  ;;  %v4645_v21 = vsel %vm11964_vm4, %v4643_v14, %v4644_v6 }
 0x3cb   : > { %9818 = vmatprep.subr.bf16.mxu1 %v10718_v56  ;;  %v4648_v56 = vrot.slane %v4508_v30, 5  ;;  %v9066_v63 = vcombine.low %v4642_v38, %v4645_v21  ;;  %v4672_v30 = vrot.slane %v4518_v22, 5 }
 0x3cd   : > { %7603 = vmatmul.mubr.bf16.gmra.mrb[96].mxu1 %v9061_v13  ;;  %v4650_v13 = vrot.slane %v4648_v56, 4  ;;  %v4649_v54 = vsel %vm11964_vm4, %v9051_v17, %v4648_v56  ;;  %v4673_v38 = vsel %vm11964_vm4, %v4671_v37, %v4672_v30  ;;  %v4523_v17 = vld [vmem:[#allocation3 + $0xb8] sm:$0xf]  ;;  %v4914_v37 = vld [vmem:[#allocation3 + $0x14] sm:$0x1] }
 0x3ce   : > { %7610 = vmatprep.mubr.bf16.mxu1 %v10697_v0  ;;  %v4511_v0 = vld [vmem:[#allocation3 + $0x88] sm:$0xf]  ;;  %v4683_v46 = vrot.slane %v4523_v17, 5  ;;  %v4915_v30 = vld [vmem:[#allocation3 + $0x18] sm:$0xf] }
 0x3cf   : > { %v4652_v31 = vsel %vm11964_vm4, %v4650_v13, %v4651_v26  ;;  %v4655_v7 = vrot.slane %v4511_v0, 5  ;;  %v4521_v0 = vld [vmem:[#allocation3 + $0xb0] sm:$0x1]  ;;  %v10714_v26 = vld [vmem:[#allocation3 + $0xb4] sm:$0xff]  }
 0x3d0   : > { %v9067_v11 = vcombine.low %v4649_v54, %v4652_v31  ;;  %v4913_v31 = vld [vmem:[#allocation3 + $0x10] sm:$0xf]  ;;  %v4685_v12 = vrot.slane %v4683_v46, 4 }
 0x3d1   : > { %v4657_v36 = vrot.slane %v4655_v7, 4  ;;  %v4656_v62 = vsel %vm11964_vm4, %v9052_v4, %v4655_v7  ;;  %v4679_v7 = vrot.slane %v4521_v0, 5  ;;  %v5426_v4 = vld [vmem:[#allocation3 + $0x14] sm:$0x1]  ;;  %v4980_v0 = vshll.u32 %v4914_v37, 16 }
 0x3d5   : > { %7611 = vmatmul.mubr.bf16.gmra.mrb[100].mxu1 %v9062_v35 }
 0x3d6   : > { %7618 = vmatprep.mubr.bf16.mxu1 %v10698_v58 }
 0x3dd   : > { %7619 = vmatmul.mubr.bf16.gmra.mrb[104].mxu1 %v9063_v48 }
 0x3de   : > { %7626 = vmatprep.mubr.bf16.mxu1 %v10701_v8  ;;  %v4659_v8 = vsel %vm11964_vm4, %v4657_v36, %v4658_v9  ;;  %v4974_v36 = vshrl.u32 %v4913_v31, 16 }
 0x3df   : > { %v9068_v19 = vcombine.low %v4656_v62, %v4659_v8  ;;  %v12088_v62 = vld [vmem:[#allocation3 + $0x1c] sm:$0xf] }
 0x3e0   : > { %v4976_v32 = vrot.slane %v4974_v36, 4  ;;  %v5529_v52 = vrot.slane %v12088_v62, 5  ;;  %v12108_v36 = vld [vmem:[#allocation3 + $0x28] sm:$0xf] }
 0x3e5   : > { %7627 = vmatmul.mubr.bf16.gmra.mrb[108].mxu1 %v9064_v43  ;;  %v10710_v43 = vld [vmem:[#allocation3 + $0x9c] sm:$0xff]  }
 0x3e6   : > { %7634 = vmatprep.mubr.bf16.mxu1 %v10702_v39  ;;  %v4513_v39 = vld [vmem:[#allocation3 + $0x90] sm:$0xe] }
 0x3e7   : > { %v9053_v15 = vrot.slane %v4513_v39, 9 }
 0x3e9   : > { %v4663_v28 = vsel %vm11964_vm4, %v9053_v15, %v4662_v59  ;;  %v10717_v59 = vld [vmem:[#allocation3 + $0xc0] sm:$0xff]  }
 0x3ea   : > { %v9069_v5 = vcombine.low %v4663_v28, %v4666_v51  ;;  %v4916_v28 = vld [vmem:[#allocation3 + $0x1c] sm:$0xf] }
 0x3ed   : > { %7635 = vmatmul.mubr.bf16.gmra.mrb[112].mxu1 %v9065_v24  ;;  %v10713_v24 = vld [vmem:[#allocation3 + $0xa8] sm:$0xff]  }
 0x3ee   : > { %7642 = vmatprep.mubr.bf16.mxu1 %v10705_v60  ;;  %v4516_v60 = vld [vmem:[#allocation3 + $0x9c] sm:$0xe] }
 0x3ef   : > { %v9054_v56 = vrot.slane %v4516_v60, 9 }
 0x3f1   : > { %v4670_v13 = vsel %vm11964_vm4, %v9054_v56, %v4669_v61  ;;  %v4994_v56 = vshll.u32 %v4916_v28, 16 }
 0x3f2   : > { %v9070_v47 = vcombine.low %v4670_v13, %v4673_v38  ;;  %v4998_v38 = vshrl.u32 %v4916_v28, 16 }
 0x3f5   : > { %7643 = vmatmul.mubr.bf16.gmra.mrb[116].mxu1 %v9066_v63 }
 0x3f6   : > { %7650 = vmatprep.mubr.bf16.mxu1 %v10706_v10 }
 0x3f8   : > { %v9504_v1 = vpop.f32.mrb[20].mxu1 }
 0x3f9   : > { %v9505_v45 = vpop.f32.mrb[21].mxu1 }
 0x3fa   : > { %v12058_v18 = vadd.f32 %v9505_v45, %v9504_v1  ;;  %v9507_v41 = vpop.f32.mrb[22].mxu1  ;;  %v4519_v1 = vld [vmem:[#allocation3 + $0xa8] sm:$0xe]  ;;  %v4678_v45 = vrot.slane %v4676_v49, 4 }
 0x3fb   : > { %v9508_v35 = vpop.f32.mrb[23].mxu1  ;;  %v9055_v54 = vrot.slane %v4519_v1, 9  ;;  %v4985_v1 = vshrl.u32 %v4915_v30, 16 }
 0x3fc   : > { %v12062_v58 = vadd.f32 %v9508_v35, %v9507_v41  ;;  %v5425_v41 = vld [vmem:[#allocation3 + $0x10] sm:$0xf]  ;;  %v4912_v35 = vld [vmem:[#allocation3 + $0xc] sm:$0xf] }
 0x3fd   : > { %7651 = vmatmul.mubr.bf16.gmra.mrb[120].mxu1 %v9067_v11  ;;  %v4680_v11 = vsel %vm11964_vm4, %v4678_v45, %v4679_v7  ;;  %v5522_v42 = vrot.slane %v5425_v41, 5  ;;  %v4961_v55 = vshrl.u32 %v4912_v35, 16  ;;  %v4964_v9 = vshll.u32 %v4912_v35, 16  ;;  %v5427_v7 = vld [vmem:[#allocation3 + $0x18] sm:$0xe] }
 0x3fe   : > { %7658 = vmatprep.mubr.bf16.mxu1 %v10709_v16  ;;  %v4970_v16 = vshll.u32 %v4913_v31, 16  ;;  %v4988_v45 = vshll.u32 %v4915_v30, 16  ;;  %v5531_v41 = vrot.slane %v5529_v52, 4 }
 0x3ff   : > { %v5524_v15 = vrot.slane %v5522_v42, 4  ;;  %v4963_v51 = vrot.slane %v4961_v55, 4  ;;  %v4966_v61 = vrot.slane %v4964_v9, 5  ;;  %v4919_v9 = vld [vmem:[#allocation3 + $0x28] sm:$0xf] }
 0x400   : > { %v9510_v44 = vpop.f32.mrb[24].mxu1  ;;  %v12092_v39 = vrot.slane %v4970_v16, 5  ;;  %v5000_v16 = vrot.slane %v4998_v38, 4  ;;  %v5430_v38 = vld [vmem:[#allocation3 + $0x24] sm:$0xe] }
 0x401   : > { %v9511_v48 = vpop.f32.mrb[25].mxu1  ;;  %v4967_v13 = vor.u32 %v4966_v61, %v4963_v51 }
 0x402   : > { %v12066_v33 = vadd.f32 %v9511_v48, %v9510_v44  ;;  %v9513_v25 = vpop.f32.mrb[26].mxu1  ;;  %v4677_v44 = vsel %vm11964_vm4, %v9055_v54, %v4676_v49 }
 0x403   : > { %v9514_v2 = vpop.f32.mrb[27].mxu1  ;;  %v9071_v8 = vcombine.low %v4677_v44, %v4680_v11  ;;  %v12106_v11 = vrot.slane %v4994_v56, 5  ;;  %v4968_v55 = vrot.slane %v4967_v13, 4  ;;  %v4982_v44 = vrot.slane %v4980_v0, 5  ;;  %v12133_v0 = vld [vmem:[#allocation3 + $0x34] sm:$0xf] }
 0x404   : > { %v12070_v34 = vadd.f32 %v9514_v2, %v9513_v25  ;;  %v4524_v2 = vld [vmem:[#allocation3 + $0xbc] sm:$0x1] }
 0x405   : > { %7659 = vmatmul.mubr.bf16.gmra.mrb[124].mxu1 %v9068_v19  ;;  %v4686_v22 = vrot.slane %v4524_v2, 5  ;;  %v4918_v2 = vld [vmem:[#allocation3 + $0x24] sm:$0xf] }
 0x406   : > { %7666 = vmatprep.mubr.bf16.mxu1 %v10710_v43  ;;  %v4522_v43 = vld [vmem:[#allocation3 + $0xb4] sm:$0xe]  ;;  %v5012_v30 = vshll.u32 %v4918_v2, 16 }
 0x407   : > { %v9056_v60 = vrot.slane %v4522_v43, 9  ;;  %v5001_v43 = vor.u32 %v5000_v16, %v12106_v11 }
 0x40d   : > { %7667 = vmatmul.mubr.bf16.gmra.mrb[128].mxu1 %v9069_v5 }
 0x40e   : > { %v9516_v14 = vpop.f32.mrb[28].mxu1  ;;  %7674 = vmatprep.mubr.bf16.mxu1 %v10713_v24  ;;  %v5424_v24 = vld [vmem:[#allocation3 + $0xc] sm:$0xe] }
 0x40f   : > { %v9517_v6 = vpop.f32.mrb[29].mxu1 }
 0x410   : > { %v12076_v29 = vadd.f32 %v9517_v6, %v9516_v14  ;;  %v9519_v21 = vpop.f32.mrb[30].mxu1  ;;  %v5525_v14 = vrot.slane %v5426_v4, 5  ;;  %v4687_v6 = vsel %vm11964_vm4, %v4685_v12, %v4686_v22  ;;  %v4987_v4 = vrot.slane %v4985_v1, 4  ;;  %v4921_v1 = vld [vmem:[#allocation3 + $0x30] sm:$0xf] }
 0x411   : > { %v9520_v63 = vpop.f32.mrb[31].mxu1  ;;  %v5018_v12 = vshll.u32 %v4919_v9, 16 }
 0x412   : > { %v12080_v10 = vadd.f32 %v9520_v63, %v9519_v21  ;;  %v4977_v21 = vor.u32 %v4976_v32, %v12092_v39  ;;  %v9105_v63 = vrot.slane %v5424_v24, 9  ;;  %v5526_v49 = vsel %vm11964_vm4, %v5524_v15, %v5525_v14  ;;  %v10719_v24 = vld [vmem:[%s13281_s4 + $0x180] sm:$0xff]  }
 0x413   : > { %v5022_v32 = vshrl.u32 %v4919_v9, 16  ;;  %v4973_v15 = vsel %vm11481_vm11, %v4968_v55, %v12092_v39  ;;  %v5009_v14 = vshrl.u32 %v4918_v2, 16  ;;  %v12131_v13 = vrot.slane %v5018_v12, 5 }
 0x414   : > { %v5523_v31 = vsel %vm11964_vm4, %v9105_v63, %v5522_v42  ;;  %v4978_v54 = vrot.slane %v4977_v21, 4  ;;  %v5543_v55 = vrot.slane %v12133_v0, 5  ;;  %v5033_v2 = vshrl.u32 %v4921_v1, 16  ;;  %v4924_v0 = vld [vmem:[#allocation3 + $0x3c] sm:$0xf] }
 0x415   : > { %7675 = vmatmul.mubr.bf16.gmra.mrb[132].mxu1 %v9070_v47  ;;  %v4684_v47 = vsel %vm11964_vm4, %v9056_v60, %v4683_v46  ;;  %v9121_v35 = vcombine.low %v5523_v31, %v5526_v49  ;;  %v5432_v60 = vld [vmem:[#allocation3 + $0x2c] sm:$0x1]  ;;  %v5002_v49 = vrot.slane %v5001_v43, 4 }
 0x416   : > { %7682 = vmatprep.mubr.bf16.mxu1 %v10714_v26  ;;  %v5429_v26 = vld [vmem:[#allocation3 + $0x20] sm:$0x1]  ;;  %v9072_v17 = vcombine.low %v4684_v47, %v4687_v6  ;;  %v5024_v47 = vrot.slane %v5022_v32, 4 }
 0x417   : > { %v5532_v46 = vrot.slane %v5429_v26, 5  ;;  %v5539_v26 = vrot.slane %v5432_v60, 5  ;;  %v10724_v60 = vld [vmem:[%s13281_s4 + $0x1d8] sm:$0xff]  }
 0x419   : > { %v5533_v42 = vsel %vm11964_vm4, %v5531_v41, %v5532_v46  ;;  %v5014_v41 = vrot.slane %v5012_v30, 5  ;;  %v10722_v46 = vld [vmem:[%s13281_s4 + $0x1d0] sm:$0xff]  }
 0x41c   : > { %v9522_v48 = vpop.f32.mrb[32].mxu1 }
 0x41d   : > { %v9523_v25 = vpop.f32.mrb[33].mxu1  ;;  %7683 = vmatmul.mubr.bf16.gmra.mrb[136].mxu1 %v9071_v8  ;;  %v4990_v8 = vrot.slane %v4988_v45, 5  ;;  %v4922_v45 = vld [vmem:[#allocation3 + $0x34] sm:$0xf] }
 0x41e   : > { %v12090_v19 = vadd.f32 %v9523_v25, %v9522_v48  ;;  %v9525_v27 = vpop.f32.mrb[34].mxu1  ;;  %7690 = vmatprep.mubr.bf16.mxu1 %v10717_v59  ;;  %v4917_v48 = vld [vmem:[#allocation3 + $0x20] sm:$0x1]  ;;  %v9106_v59 = vrot.slane %v5427_v7, 9  ;;  %v5536_v25 = vrot.slane %v12108_v36, 5  ;;  %v5011_v7 = vrot.slane %v5009_v14, 4 }
 0x41f   : > { %v9526_v20 = vpop.f32.mrb[35].mxu1  ;;  %v5004_v61 = vshll.u32 %v4917_v48, 16  ;;  %v4991_v37 = vor.u32 %v4990_v8, %v4987_v4  ;;  %v4920_v36 = vld [vmem:[#allocation3 + $0x2c] sm:$0x1]  ;;  %v5025_v48 = vor.u32 %v5024_v47, %v12131_v13  ;;  %v5042_v4 = vshll.u32 %v4922_v45, 16 }
 0x420   : > { %v12094_v5 = vadd.f32 %v9526_v20, %v9525_v27  ;;  %v4983_v27 = vsel %vm11481_vm11, %v4978_v54, %v4982_v44  ;;  %v5530_v51 = vsel %vm11964_vm4, %v9106_v59, %v5529_v52  ;;  %v5538_v39 = vrot.slane %v5536_v25, 4  ;;  %v10720_v52 = vld [vmem:[%s13281_s4 + $0x1c8] sm:$0xff]  }
 0x421   : > { %v9089_v21 = vcombine.low %v4973_v15, %v4983_v27  ;;  %v9122_v56 = vcombine.low %v5530_v51, %v5533_v42  ;;  %v5006_v31 = vrot.slane %v5004_v61, 5  ;;  %v9107_v54 = vrot.slane %v5430_v38, 9  ;;  %v5435_v15 = vld [vmem:[#allocation3 + $0x38] sm:$0x1]  ;;  %v10723_v51 = vld [vmem:[%s13281_s4 + $0x190] sm:$0xff]  }
 0x422   : > { %v5540_v16 = vsel %vm11964_vm4, %v5538_v39, %v5539_v26  ;;  %v5046_v8 = vshrl.u32 %v4922_v45, 16  ;;  %v5015_v32 = vor.u32 %v5014_v41, %v5011_v7  ;;  %v12162_v30 = vrot.slane %v5042_v4, 5  ;;  %v10725_v26 = vld [vmem:[%s13281_s4 + $0x198] sm:$0xff]   ;;  %v10726_v7 = vld [vmem:[%s13281_s4 + $0x1e0] sm:$0xff]  }
 0x423   : > { %v5007_v44 = vsel %vm11481_vm11, %v5002_v49, %v5006_v31  ;;  %v5537_v42 = vsel %vm11964_vm4, %v9107_v54, %v5536_v25  ;;  %v5035_v38 = vrot.slane %v5033_v2, 4 }
 0x424   : > { %v9123_v25 = vcombine.low %v5537_v42, %v5540_v16  ;;  %v5016_v49 = vrot.slane %v5015_v32, 4 }
 0x425   : > { %7691 = vmatmul.mubr.bf16.gmra.mrb[140].mxu1 %v9072_v17  ;;  %v4992_v17 = vrot.slane %v4991_v37, 4  ;;  %v5545_v37 = vrot.slane %v5543_v55, 4 }
 0x426   : > { %7731 = vmatprep.mubr.bf16.mxu1 %v9121_v35  ;;  %v10721_v35 = vld [vmem:[%s13281_s4 + $0x188] sm:$0xff]  }
 0x427   : > { %v4997_v12 = vsel %vm11481_vm11, %v4992_v17, %v12106_v11  ;;  %v5026_v11 = vrot.slane %v5025_v48, 4  ;;  %v4923_v17 = vld [vmem:[#allocation3 + $0x38] sm:$0x1]  ;;  %v5060_v48 = vshll.u32 %v4924_v0, 16 }
 0x428   : > { %v9528_v62 = vpop.f32.mrb[36].mxu1  ;;  %v5052_v2 = vshll.u32 %v4923_v17, 16 }
 0x429   : > { %v9529_v20 = vpop.f32.mrb[37].mxu1 }
 0x42a   : > { %v12121_v28 = vadd.f32 %v9529_v20, %v9528_v62  ;;  %v9531_v22 = vpop.f32.mrb[38].mxu1  ;;  %v5036_v62 = vshll.u32 %v4921_v1, 16  ;;  %v5028_v20 = vshll.u32 %v4920_v36, 16 }
 0x42b   : > { %v9532_v6 = vpop.f32.mrb[39].mxu1 }
 0x42c   : > { %v12129_v63 = vadd.f32 %v9532_v6, %v9531_v22  ;;  %v9090_v22 = vcombine.low %v4997_v12, %v5007_v44  ;;  %v5048_v6 = vrot.slane %v5046_v8, 4  ;;  %v5038_v39 = vrot.slane %v5036_v62, 5  ;;  %v5438_v62 = vld [vmem:[#allocation3 + $0x44] sm:$0x1] }
 0x42d   : > { %7732 = vmatmul.mubr.bf16.vlgmr.msra.gmra.mrb[144].mxu1 %v9089_v21  ;;  %v12164_v21 = vld [vmem:[#allocation3 + $0x40] sm:$0xf]  ;;  %v5030_v47 = vrot.slane %v5028_v20, 5  ;;  %v5057_v44 = vshrl.u32 %v4924_v0, 16  ;;  %v4927_v0 = vld [vmem:[#allocation3 + $0x48] sm:$0xf] }
 0x42e   : > { %9819 = vmatpush3.bf16.msra.mxu1 %v10719_v24  ;;  %7739 = vmatprep.mubr.bf16.mxu1 %v9122_v56  ;;  %v5433_v24 = vld [vmem:[#allocation3 + $0x30] sm:$0xe]  ;;  %v5546_v56 = vrot.slane %v5435_v15, 5  ;;  %v5550_v31 = vrot.slane %v12164_v21, 5  ;;  %v5049_v54 = vor.u32 %v5048_v6, %v12162_v30  ;;  %v5436_v15 = vld [vmem:[#allocation3 + $0x3c] sm:$0xe] }
 0x42f   : > { %9820 = vmatprep.subr.bf16.mxu1 %v10720_v52  ;;  %v4925_v52 = vld [vmem:[#allocation3 + $0x40] sm:$0xf]  ;;  %v9108_v1 = vrot.slane %v5433_v24, 9  ;;  %v12195_v24 = vld [vmem:[#allocation3 + $0x4c] sm:$0xf]  ;;  %v5062_v6 = vrot.slane %v5060_v48, 5 }
 0x430   : > { %v9534_v9 = vpop.f32.mrb[40].mxu1  ;;  %v5547_v45 = vsel %vm11964_vm4, %v5545_v37, %v5546_v56  ;;  %v5066_v16 = vshll.u32 %v4925_v52, 16  ;;  %v5070_v36 = vshrl.u32 %v4925_v52, 16  ;;  %v4928_v21 = vld [vmem:[#allocation3 + $0x4c] sm:$0xf]  ;;  %v5054_v56 = vrot.slane %v5052_v2, 5 }
 0x431   : > { %v9535_v59 = vpop.f32.mrb[41].mxu1  ;;  %v5544_v42 = vsel %vm11964_vm4, %v9108_v1, %v5543_v55  ;;  %v5050_v55 = vrot.slane %v5049_v54, 4  ;;  %v9109_v52 = vrot.slane %v5436_v15, 9 }
 0x432   : > { %v12149_v27 = vadd.f32 %v9535_v59, %v9534_v9  ;;  %v9537_v43 = vpop.f32.mrb[42].mxu1  ;;  %9821 = vmatpush3.bf16.msra.mxu1 %v10721_v35  ;;  %v5031_v35 = vsel %vm11481_vm11, %v5026_v11, %v5030_v47  ;;  %v5039_v9 = vor.u32 %v5038_v39, %v5035_v38  ;;  %v5021_v59 = vsel %vm11481_vm11, %v5016_v49, %v12131_v13  ;;  %v10728_v13 = vld [vmem:[%s13281_s4 + $0x1e8] sm:$0xff]   ;;  %v4926_v38 = vld [vmem:[#allocation3 + $0x44] sm:$0x1] }
 0x433   : > { %v9538_v61 = vpop.f32.mrb[43].mxu1  ;;  %9822 = vmatprep.subr.bf16.mxu1 %v10722_v46  ;;  %v9091_v32 = vcombine.low %v5021_v59, %v5031_v35  ;;  %v9124_v20 = vcombine.low %v5544_v42, %v5547_v45  ;;  %v5059_v11 = vrot.slane %v5057_v44, 4  ;;  %v10729_v39 = vld [vmem:[%s13281_s4 + $0x1a8] sm:$0xff]   ;;  %v5557_v47 = vrot.slane %v12195_v24, 5  ;;  %v10731_v42 = vld [vmem:[%s13281_s4 + $0x1b0] sm:$0xff]  }
 0x434   : > { %v12160_v14 = vadd.f32 %v9538_v61, %v9537_v43  ;;  %v10727_v43 = vld [vmem:[%s13281_s4 + $0x1a0] sm:$0xff]   ;;  %v5040_v37 = vrot.slane %v5039_v9, 4  ;;  %v5055_v45 = vsel %vm11481_vm11, %v5050_v55, %v5054_v56  ;;  %v5076_v48 = vshll.u32 %v4926_v38, 16  ;;  %v4931_v24 = vld [vmem:[#allocation3 + $0x58] sm:$0xf] }
 0x435   : > { %7740 = vmatmul.mubr.bf16.gmra.mrb[148].mxu1 %v9090_v22  ;;  %v12193_v22 = vrot.slane %v5066_v16, 5  ;;  %v5551_v16 = vsel %vm11964_vm4, %v9109_v52, %v5550_v31  ;;  %v5084_v59 = vshll.u32 %v4927_v0, 16  ;;  %v4930_v52 = vld [vmem:[#allocation3 + $0x54] sm:$0xf] }
 0x436   : > { %7747 = vmatprep.mubr.bf16.mxu1 %v9123_v25  ;;  %9823 = vmatpush3.bf16.msra.mxu1 %v10723_v51  ;;  %v5552_v51 = vrot.slane %v5550_v31, 4  ;;  %v5072_v25 = vrot.slane %v5070_v36, 4  ;;  %v5045_v54 = vsel %vm11481_vm11, %v5040_v37, %v12162_v30  ;;  %v5063_v36 = vor.u32 %v5062_v6, %v5059_v11  ;;  %v5439_v30 = vld [vmem:[#allocation3 + $0x48] sm:$0xe] }
 0x437   : > { %9824 = vmatprep.subr.bf16.mxu1 %v10724_v60  ;;  %v5553_v60 = vrot.slane %v5438_v62, 5  ;;  %v9092_v62 = vcombine.low %v5045_v54, %v5055_v45  ;;  %v10732_v31 = vld [vmem:[%s13281_s4 + $0x1f8] sm:$0xff]   ;;  %v5078_v37 = vrot.slane %v5076_v48, 5  ;;  %v5086_v6 = vrot.slane %v5084_v59, 5 }
 0x438   : > { %v9540_v41 = vpop.f32.mrb[44].mxu1  ;;  %v5073_v17 = vor.u32 %v5072_v25, %v12193_v22  ;;  %v5064_v55 = vrot.slane %v5063_v36, 4  ;;  %v9110_v56 = vrot.slane %v5439_v30, 9  ;;  %v5114_v45 = vshll.u32 %v4931_v24, 16 }
 0x439   : > { %v9541_v46 = vpop.f32.mrb[45].mxu1  ;;  %v5554_v49 = vsel %vm11964_vm4, %v5552_v51, %v5553_v60  ;;  %v4929_v60 = vld [vmem:[#allocation3 + $0x50] sm:$0x1]  ;;  %v5105_v48 = vshrl.u32 %v4930_v52, 16 }
 0x43a   : > { %v12178_v4 = vadd.f32 %v9541_v46, %v9540_v41  ;;  %v9543_v8 = vpop.f32.mrb[46].mxu1  ;;  %9825 = vmatpush3.bf16.msra.mxu1 %v10725_v26  ;;  %v10730_v26 = vld [vmem:[%s13281_s4 + $0x1f0] sm:$0xff]   ;;  %v5094_v41 = vshrl.u32 %v4928_v21, 16  ;;  %v5441_v46 = vld [vmem:[#allocation3 + $0x50] sm:$0x1]  ;;  %v5100_v54 = vshll.u32 %v4929_v60, 16 }
 0x43b   : > { %v9544_v12 = vpop.f32.mrb[47].mxu1  ;;  %9826 = vmatprep.subr.bf16.mxu1 %v10726_v7  ;;  %v5090_v7 = vshll.u32 %v4928_v21, 16  ;;  %v5560_v25 = vrot.slane %v5441_v46, 5  ;;  %v10733_v21 = vld [vmem:[%s13281_s4 + $0x1b8] sm:$0xff]  }
 0x43c   : > { %v12191_v61 = vadd.f32 %v9544_v12, %v9543_v8  ;;  %v5081_v8 = vshrl.u32 %v4927_v0, 16  ;;  %v5559_v12 = vrot.slane %v5557_v47, 4  ;;  %v5096_v51 = vrot.slane %v5094_v41, 4 }
 0x43d   : > { %7748 = vmatmul.mubr.bf16.gmra.mrb[152].mxu1 %v9091_v32  ;;  %v12224_v15 = vrot.slane %v5090_v7, 5  ;;  %v5069_v41 = vsel %vm11481_vm11, %v5064_v55, %v12193_v22  ;;  %v5102_v55 = vrot.slane %v5100_v54, 5 }
 0x43e   : > { %7755 = vmatprep.mubr.bf16.mxu1 %v9124_v20  ;;  %9827 = vmatpush3.bf16.msra.mxu1 %v10727_v43  ;;  %v9125_v43 = vcombine.low %v5551_v16, %v5554_v49  ;;  %v5074_v20 = vrot.slane %v5073_v17, 4  ;;  %v5083_v11 = vrot.slane %v5081_v8, 4  ;;  %v5561_v38 = vsel %vm11964_vm4, %v5559_v12, %v5560_v25  ;;  %v12237_v49 = vld [vmem:[%s13281_s4 + $0x200] sm:$0xff]  }
 0x43f   : > { %9828 = vmatprep.subr.bf16.mxu1 %v10728_v13  ;;  %v12226_v13 = vld [vmem:[#allocation3 + $0x58] sm:$0xf]  ;;  %v5118_v17 = vshrl.u32 %v4931_v24, 16  ;;  %v5108_v8 = vshll.u32 %v4930_v52, 16  ;;  %v5107_v25 = vrot.slane %v5105_v48, 4 }
 0x440   : > { %v9546_v1 = vpop.f32.mrb[48].mxu1  ;;  %v5087_v46 = vor.u32 %v5086_v6, %v5083_v11  ;;  %v4932_v6 = vld [vmem:[#allocation3 + $0x5c] sm:$0x1] }
 0x441   : > { %v9547_v35 = vpop.f32.mrb[49].mxu1  ;;  %v5120_v12 = vrot.slane %v5118_v17, 4  ;;  %v5110_v24 = vrot.slane %v5108_v8, 5 }
 0x442   : > { %v12214_v9 = vadd.f32 %v9547_v35, %v9546_v1  ;;  %v9549_v44 = vpop.f32.mrb[50].mxu1  ;;  %9829 = vmatpush3.bf16.msra.mxu1 %v10729_v39  ;;  %v5564_v39 = vrot.slane %v12226_v13, 5  ;;  %v5097_v1 = vor.u32 %v5096_v51, %v12224_v15  ;;  %v5558_v35 = vsel %vm11964_vm4, %v9110_v56, %v5557_v47  ;;  %v4934_v51 = vld [vmem:[#allocation3 + $0x64] sm:$0xf] }
 0x443   : > { %v9550_v2 = vpop.f32.mrb[51].mxu1  ;;  %9830 = vmatprep.subr.bf16.mxu1 %v10730_v26  ;;  %v5079_v26 = vsel %vm11481_vm11, %v5074_v20, %v5078_v37  ;;  %v12252_v47 = vrot.slane %v5114_v45, 5  ;;  %v5088_v13 = vrot.slane %v5087_v46, 4  ;;  %v4933_v37 = vld [vmem:[#allocation3 + $0x60] sm:$0xf]  ;;  %v5124_v46 = vshll.u32 %v4932_v6, 16 }
 0x444   : > { %v12222_v32 = vadd.f32 %v9550_v2, %v9549_v44  ;;  %v5444_v44 = vld [vmem:[#allocation3 + $0x5c] sm:$0x1]  ;;  %v9126_v2 = vcombine.low %v5558_v35, %v5561_v38  ;;  %v5098_v30 = vrot.slane %v5097_v1, 4  ;;  %v5129_v17 = vshrl.u32 %v4933_v37, 16 }
 0x445   : > { %7756 = vmatmul.mubr.bf16.gmra.mrb[156].mxu1 %v9092_v62  ;;  %v5442_v62 = vld [vmem:[#allocation3 + $0x54] sm:$0xe]  ;;  %v5567_v20 = vrot.slane %v5444_v44, 5  ;;  %v5121_v52 = vor.u32 %v5120_v12, %v12252_v47  ;;  %v5093_v54 = vsel %vm11481_vm11, %v5088_v13, %v12224_v15  ;;  %v5447_v44 = vld [vmem:[#allocation3 + $0x68] sm:$0x1] }
 0x446   : > { %7763 = vmatprep.mubr.bf16.mxu1 %v9125_v43  ;;  %9831 = vmatpush3.bf16.msra.mxu1 %v10731_v42  ;;  %v9093_v42 = vcombine.low %v5069_v41, %v5079_v26  ;;  %v5566_v43 = vrot.slane %v5564_v39, 4  ;;  %v9111_v60 = vrot.slane %v5442_v62, 9  ;;  %v5103_v38 = vsel %vm11481_vm11, %v5098_v30, %v5102_v55  ;;  %v5449_v12 = vld [vmem:[#allocation3 + $0x70] sm:$0xf] }
 0x447   : > { %9832 = vmatprep.subr.bf16.mxu1 %v10732_v31  ;;  %v12254_v31 = vld [vmem:[#allocation3 + $0x64] sm:$0xf]  ;;  %v5142_v26 = vshrl.u32 %v4934_v51, 16  ;;  %v9094_v8 = vcombine.low %v5093_v54, %v5103_v38  ;;  %v4937_v15 = vld [vmem:[#allocation3 + $0x70] sm:$0xf]  ;;  %v5126_v55 = vrot.slane %v5124_v46, 5 }
 0x448   : > { %v9552_v0 = vpop.f32.mrb[52].mxu1  ;;  %v5568_v11 = vsel %vm11964_vm4, %v5566_v43, %v5567_v20  ;;  %v5565_v45 = vsel %vm11964_vm4, %v9111_v60, %v5564_v39  ;;  %v5122_v39 = vrot.slane %v5121_v52, 4  ;;  %v5131_v20 = vrot.slane %v5129_v17, 4  ;;  %v4935_v60 = vld [vmem:[#allocation3 + $0x68] sm:$0x1] }
 0x449   : > { %v9553_v7 = vpop.f32.mrb[53].mxu1  ;;  %v5144_v30 = vrot.slane %v5142_v26, 4  ;;  %v5162_v52 = vshll.u32 %v4937_v15, 16  ;;  %v5148_v46 = vshll.u32 %v4935_v60, 16 }
 0x44a   : > { %v12247_v16 = vadd.f32 %v9553_v7, %v9552_v0  ;;  %v9555_v36 = vpop.f32.mrb[54].mxu1  ;;  %9833 = vmatpush3.bf16.msra.mxu1 %v10733_v21  ;;  %v5571_v21 = vrot.slane %v12254_v31, 5  ;;  %v5138_v0 = vshll.u32 %v4934_v51, 16  ;;  %v5132_v7 = vshll.u32 %v4933_v37, 16 }
 0x44b   : > { %v9556_v59 = vpop.f32.mrb[55].mxu1  ;;  %10277 = vmatprep.subr.bf16.mxu1 %v12237_v49  ;;  %v5574_v31 = vrot.slane %v5447_v44, 5  ;;  %v5450_v44 = vld [vmem:[#allocation3 + $0x74] sm:$0x1] }
 0x44c   : > { %v12250_v22 = vadd.f32 %v9556_v59, %v9555_v36  ;;  %v5111_v36 = vor.u32 %v5110_v24, %v5107_v25  ;;  %v9127_v59 = vcombine.low %v5565_v45, %v5568_v11  ;;  %v12271_v43 = vrot.slane %v5138_v0, 5  ;;  %v4936_v25 = vld [vmem:[#allocation3 + $0x6c] sm:$0xf] }
 0x44d   : > { %7764 = vmatmul.mubr.bf16.gmra.mrb[160].mxu1 %v9093_v42  ;;  %v5445_v42 = vld [vmem:[#allocation3 + $0x60] sm:$0xe]  ;;  %v5134_v51 = vrot.slane %v5132_v7, 5  ;;  %v5578_v11 = vrot.slane %v5449_v12, 5  ;;  %v5166_v0 = vshrl.u32 %v4937_v15, 16  ;;  %v5153_v45 = vshrl.u32 %v4936_v25, 16 }
 0x44e   : > { %7771 = vmatprep.mubr.bf16.mxu1 %v9126_v2  ;;  %v5573_v2 = vrot.slane %v5571_v21, 4  ;;  %v5112_v13 = vrot.slane %v5111_v36, 4  ;;  %v9112_v24 = vrot.slane %v5445_v42, 9  ;;  %v5145_v38 = vor.u32 %v5144_v30, %v12271_v43  ;;  %v5448_v42 = vld [vmem:[#allocation3 + $0x6c] sm:$0xe] }
 0x44f   : > { %v5156_v17 = vshll.u32 %v4936_v25, 16  ;;  %v12287_v12 = vrot.slane %v5162_v52, 5  ;;  %v5155_v15 = vrot.slane %v5153_v45, 4  ;;  %v9113_v25 = vrot.slane %v5448_v42, 9 }
 0x450   : > { %v9558_v56 = vpop.f32.mrb[56].mxu1  ;;  %v5575_v37 = vsel %vm11964_vm4, %v5573_v2, %v5574_v31  ;;  %v5117_v54 = vsel %vm11481_vm11, %v5112_v13, %v12252_v47  ;;  %v5572_v36 = vsel %vm11964_vm4, %v9112_v24, %v5571_v21  ;;  %v5580_v2 = vrot.slane %v5578_v11, 4  ;;  %v4940_v21 = vld [vmem:[#allocation3 + $0x7c] sm:$0xf] }
 0x451   : > { %v9559_v1 = vpop.f32.mrb[57].mxu1  ;;  %v5146_v30 = vrot.slane %v5145_v38, 4  ;;  %v5168_v31 = vrot.slane %v5166_v0, 4  ;;  %v5581_v47 = vrot.slane %v5450_v44, 5  ;;  %v5158_v13 = vrot.slane %v5156_v17, 5 }
 0x452   : > { %v12264_v41 = vadd.f32 %v9559_v1, %v9558_v56  ;;  %v9561_v35 = vpop.f32.mrb[58].mxu1  ;;  %v5127_v56 = vsel %vm11481_vm11, %v5122_v39, %v5126_v55  ;;  %v5135_v1 = vor.u32 %v5134_v51, %v5131_v20  ;;  %v5452_v20 = vld [vmem:[#allocation3 + $0x7c] sm:$0xf]  ;;  %v5150_v55 = vrot.slane %v5148_v46, 5  ;;  %v5453_v44 = vld [vmem:[#allocation3 + $0x80] sm:$0x1] }
 0x453   : > { %v9562_v48 = vpop.f32.mrb[59].mxu1  ;;  %v5582_v24 = vsel %vm11964_vm4, %v5580_v2, %v5581_v47  ;;  %v5585_v60 = vrot.slane %v5452_v20, 5  ;;  %v5169_v52 = vor.u32 %v5168_v31, %v12287_v12  ;;  %v5186_v0 = vshll.u32 %v4940_v21, 16 }
 0x454   : > { %v12269_v62 = vadd.f32 %v9562_v48, %v9561_v35  ;;  %v5136_v51 = vrot.slane %v5135_v1, 4  ;;  %v5151_v38 = vsel %vm11481_vm11, %v5146_v30, %v5150_v55  ;;  %v5579_v17 = vsel %vm11964_vm4, %v9113_v25, %v5578_v11  ;;  %v5451_v30 = vld [vmem:[#allocation3 + $0x78] sm:$0xe]  ;;  %v12305_v11 = vld [vmem:[#allocation3 + $0x88] sm:$0xf] }
 0x455   : > { %7772 = vmatmul.mubr.bf16.gmra.mrb[164].mxu1 %v9094_v8  ;;  %v9095_v8 = vcombine.low %v5117_v54, %v5127_v56  ;;  %v9129_v2 = vcombine.low %v5579_v17, %v5582_v24  ;;  %v5587_v31 = vrot.slane %v5585_v60, 4  ;;  %v5170_v47 = vrot.slane %v5169_v52, 4  ;;  %v4941_v25 = vld [vmem:[#allocation3 + $0x80] sm:$0x1]  ;;  %v4942_v52 = vld [vmem:[#allocation3 + $0x84] sm:$0xf] }
 0x456   : > { %7779 = vmatprep.mubr.bf16.mxu1 %v9127_v59  ;;  %v9128_v59 = vcombine.low %v5572_v36, %v5575_v37  ;;  %v4938_v37 = vld [vmem:[#allocation3 + $0x74] sm:$0x1]  ;;  %v5141_v45 = vsel %vm11481_vm11, %v5136_v51, %v12271_v43  ;;  %v12303_v43 = vrot.slane %v5186_v0, 5  ;;  %v9114_v24 = vrot.slane %v5451_v30, 9 }
 0x457   : > { %v5172_v46 = vshll.u32 %v4938_v37, 16  ;;  %v9096_v42 = vcombine.low %v5141_v45, %v5151_v38  ;;  %v5592_v38 = vrot.slane %v12305_v11, 5  ;;  %v5204_v30 = vshll.u32 %v4942_v52, 16  ;;  %v5454_v11 = vld [vmem:[#allocation3 + $0x84] sm:$0xe] }
 0x458   : > { %v9564_v6 = vpop.f32.mrb[60].mxu1 }
 0x459   : > { %v9565_v26 = vpop.f32.mrb[61].mxu1  ;;  %v5174_v55 = vrot.slane %v5172_v46, 5  ;;  %v5586_v46 = vsel %vm11964_vm4, %v9114_v24, %v5585_v60  ;;  %v12324_v60 = vld [vmem:[#allocation3 + $0x94] sm:$0xf]  ;;  %v4945_v24 = vld [vmem:[#allocation3 + $0x90] sm:$0xf] }
 0x45a   : > { %v12278_v7 = vadd.f32 %v9565_v26, %v9564_v6  ;;  %v9567_v35 = vpop.f32.mrb[62].mxu1  ;;  %v4939_v6 = vld [vmem:[#allocation3 + $0x78] sm:$0xf]  ;;  %v5190_v26 = vshrl.u32 %v4940_v21, 16  ;;  %v4943_v21 = vld [vmem:[#allocation3 + $0x88] sm:$0xf] }
 0x45b   : > { %v9568_v48 = vpop.f32.mrb[63].mxu1  ;;  %v5210_v45 = vshll.u32 %v4943_v21, 16  ;;  %v5214_v17 = vshrl.u32 %v4943_v21, 16 }
 0x45c   : > { %v12285_v39 = vadd.f32 %v9568_v48, %v9567_v35  ;;  %v5159_v35 = vor.u32 %v5158_v13, %v5155_v15  ;;  %v5177_v48 = vshrl.u32 %v4939_v6, 16  ;;  %v5192_v51 = vrot.slane %v5190_v26, 4 }
 0x45d   : > { %7780 = vmatmul.mubr.bf16.gmra.mrb[168].mxu1 %v9095_v8  ;;  %v5180_v8 = vshll.u32 %v4939_v6, 16  ;;  %v5588_v13 = vrot.slane %v5453_v44, 5  ;;  %v5175_v26 = vsel %vm11481_vm11, %v5170_v47, %v5174_v55  ;;  %v5196_v44 = vshll.u32 %v4941_v25, 16 }
 0x45e   : > { %7787 = vmatprep.mubr.bf16.mxu1 %v9128_v59  ;;  %v5160_v15 = vrot.slane %v5159_v35, 4  ;;  %v5179_v37 = vrot.slane %v5177_v48, 4 }
 0x45f   : > { %v5182_v6 = vrot.slane %v5180_v8, 5 }
 0x460   : > { %v9570_v56 = vpop.f32.mrb[64].mxu1 }
 0x461   : > { %v9571_v1 = vpop.f32.mrb[65].mxu1 }
 0x462   : > { %v12299_v54 = vadd.f32 %v9571_v1, %v9570_v56  ;;  %v9573_v36 = vpop.f32.mrb[66].mxu1  ;;  %v5589_v56 = vsel %vm11964_vm4, %v5587_v31, %v5588_v13  ;;  %v5193_v1 = vor.u32 %v5192_v51, %v12303_v43  ;;  %v5594_v13 = vrot.slane %v5592_v38, 4 }
 0x463   : > { %v9574_v59 = vpop.f32.mrb[67].mxu1  ;;  %v9130_v51 = vcombine.low %v5586_v46, %v5589_v56  ;;  %v8308_v56 = vld [vmem:[%s13284_s7] sm:$0x3] }
 0x464   : > { %v12301_v20 = vadd.f32 %v9574_v59, %v9573_v36  ;;  %v5165_v36 = vsel %vm11481_vm11, %v5160_v15, %v12287_v12  ;;  %v5183_v59 = vor.u32 %v5182_v6, %v5179_v37  ;;  %v5194_v55 = vrot.slane %v5193_v1, 4  ;;  %v4946_v37 = vld [vmem:[#allocation3 + $0x94] sm:$0xf]  ;;  %10627 = vmatprep.subr.msk.bf16.mxu0 %vm739_vm0, %v8308_v56 }
 0x465   : > { %7788 = vmatmul.mubr.bf16.gmra.mrb[172].mxu1 %v9096_v42  ;;  %v5456_v42 = vld [vmem:[#allocation3 + $0x8c] sm:$0x1]  ;;  %v9097_v47 = vcombine.low %v5165_v36, %v5175_v26  ;;  %v12322_v12 = vrot.slane %v5210_v45, 5  ;;  %v5216_v15 = vrot.slane %v5214_v17, 4  ;;  %v5206_v26 = vrot.slane %v5204_v30, 5 }
 0x466   : > { %7795 = vmatprep.mubr.bf16.mxu1 %v9129_v2  ;;  %v5201_v2 = vshrl.u32 %v4942_v52, 16  ;;  %v5595_v25 = vrot.slane %v5456_v42, 5  ;;  %v5184_v6 = vrot.slane %v5183_v59, 4  ;;  %v5198_v52 = vrot.slane %v5196_v44, 5  ;;  %v4944_v45 = vld [vmem:[#allocation3 + $0x8c] sm:$0x1] }
 0x467   : > { %v5599_v17 = vrot.slane %v12324_v60, 5  ;;  %v8358_v36 = vsel %vm739_vm0, %v8308_v56, 0  ;;  %v5234_v59 = vshll.u32 %v4946_v37, 16  ;;  %v5238_v42 = vshrl.u32 %v4946_v37, 16 }
 0x468   : > { %v9576_v0 = vpop.f32.mrb[68].mxu1  ;;  %v5596_v1 = vsel %vm11964_vm4, %v5594_v13, %v5595_v25  ;;  %v5199_v44 = vsel %vm11481_vm11, %v5194_v55, %v5198_v52  ;;  %10326 = vmatpush3.bf16.msra.mxu0 %v8358_v36  ;;  %v5189_v13 = vsel %vm11481_vm11, %v5184_v6, %v12303_v43  ;;  %v5220_v55 = vshll.u32 %v4944_v45, 16  ;;  %v5459_v25 = vld [vmem:[#allocation3 + $0x98] sm:$0x1] }
 0x469   : > { %v9577_v35 = vpop.f32.mrb[69].mxu1  ;;  %v9098_v52 = vcombine.low %v5189_v13, %v5199_v44  ;;  %v5601_v56 = vrot.slane %v5599_v17, 4  ;;  %v4948_v44 = vld [vmem:[#allocation3 + $0x9c] sm:$0xf] }
 0x46a   : > { %v12318_v48 = vadd.f32 %v9577_v35, %v9576_v0  ;;  %v9579_v8 = vpop.f32.mrb[70].mxu1  ;;  %v5203_v0 = vrot.slane %v5201_v2, 4  ;;  %v9115_v35 = vrot.slane %v5454_v11, 9  ;;  %v5222_v6 = vrot.slane %v5220_v55, 5  ;;  %v5460_v55 = vld [vmem:[#allocation3 + $0x9c] sm:$0xe] }
 0x46b   : > { %v9580_v31 = vpop.f32.mrb[71].mxu1 }
 0x46c   : > { %13304 = vst [vmem:[#allocation6_spill] sm:$0xff] %v12318_v48  ;;  %v12320_v21 = vadd.f32 %v9580_v31, %v9579_v8  ;;  %v5217_v8 = vor.u32 %v5216_v15, %v12322_v12  ;;  %v5593_v30 = vsel %vm11964_vm4, %v9115_v35, %v5592_v38  ;;  %v5225_v31 = vshrl.u32 %v4945_v24, 16  ;;  %v5457_v38 = vld [vmem:[#allocation3 + $0x90] sm:$0xe]  ;;  %v4949_v48 = vld [vmem:[#allocation3 + $0xa0] sm:$0xf] }
 0x46d   : > { %7796 = vmatmul.mubr.bf16.gmra.mrb[176].mxu1 %v9097_v47  ;;  %v5228_v47 = vshll.u32 %v4945_v24, 16  ;;  %v5207_v60 = vor.u32 %v5206_v26, %v5203_v0  ;;  %v9131_v37 = vcombine.low %v5593_v30, %v5596_v1  ;;  %v12346_v35 = vrot.slane %v5234_v59, 5  ;;  %v4947_v0 = vld [vmem:[#allocation3 + $0x98] sm:$0x1]  ;;  %v5461_v26 = vld [vmem:[#allocation3 + $0xa0] sm:$0xf] }
 0x46e   : > { %13305 = vst [vmem:[#allocation7_spill] sm:$0xff] %v12320_v21  ;;  %7803 = vmatprep.mubr.bf16.mxu1 %v9130_v51  ;;  %v5218_v21 = vrot.slane %v5217_v8, 4  ;;  %v5240_v24 = vrot.slane %v5238_v42, 4  ;;  %v9116_v45 = vrot.slane %v5457_v38, 9  ;;  %v5258_v30 = vshll.u32 %v4949_v48, 16 }
 0x46f   : > { %v5208_v43 = vrot.slane %v5207_v60, 4  ;;  %v5244_v60 = vshll.u32 %v4947_v0, 16  ;;  %v5252_v38 = vshll.u32 %v4948_v44, 16 }
 0x470   : > { %v9582_v46 = vpop.f32.mrb[72].mxu1  ;;  %v5223_v59 = vsel %vm11481_vm11, %v5218_v21, %v5222_v6  ;;  %v5241_v42 = vor.u32 %v5240_v24, %v12346_v35  ;;  %v5462_v21 = vld [vmem:[#allocation3 + $0xa4] sm:$0x1]  ;;  %v12360_v6 = vld [vmem:[#allocation3 + $0xac] sm:$0xf]  ;;  %v12364_v0 = vrot.slane %v5258_v30, 5 }
 0x471   : > { %v9583_v2 = vpop.f32.mrb[73].mxu1 }
 0x472   : > { %v12339_v51 = vadd.f32 %v9583_v2, %v9582_v46  ;;  %v9585_v11 = vpop.f32.mrb[74].mxu1  ;;  %v5602_v46 = vrot.slane %v5459_v25, 5  ;;  %v5227_v2 = vrot.slane %v5225_v31, 4  ;;  %v5262_v31 = vshrl.u32 %v4949_v48, 16 }
 0x473   : > { %v9586_v15 = vpop.f32.mrb[75].mxu1  ;;  %v5606_v25 = vrot.slane %v5461_v26, 5 }
 0x474   : > { %13306 = vst [vmem:[#allocation8_spill] sm:$0xff] %v12339_v51  ;;  %v12344_v36 = vadd.f32 %v9586_v15, %v9585_v11  ;;  %v5230_v51 = vrot.slane %v5228_v47, 5  ;;  %v5603_v1 = vsel %vm11964_vm4, %v5601_v56, %v5602_v46  ;;  %v5600_v11 = vsel %vm11964_vm4, %v9116_v45, %v5599_v17  ;;  %v4952_v17 = vld [vmem:[#allocation3 + $0xac] sm:$0xf]  ;;  %v4951_v45 = vld [vmem:[#allocation3 + $0xa8] sm:$0xf] }
 0x475   : > { %7804 = vmatmul.mubr.bf16.gmra.mrb[180].mxu1 %v9098_v52  ;;  %v5249_v56 = vshrl.u32 %v4948_v44, 16  ;;  %v9132_v46 = vcombine.low %v5600_v11, %v5603_v1  ;;  %v5264_v26 = vrot.slane %v5262_v31, 4  ;;  %v4950_v44 = vld [vmem:[#allocation3 + $0xa4] sm:$0x1]  ;;  %v5282_v1 = vshll.u32 %v4952_v17, 16 }
 0x476   : > { %13307 = vst [vmem:[#allocation9_spill] sm:$0xff] %v12344_v36  ;;  %7811 = vmatprep.mubr.bf16.mxu1 %v9131_v37  ;;  %v5231_v13 = vor.u32 %v5230_v51, %v5227_v2  ;;  %v5213_v37 = vsel %vm11481_vm11, %v5208_v43, %v12322_v12  ;;  %v5242_v2 = vrot.slane %v5241_v42, 4  ;;  %v9117_v12 = vrot.slane %v5460_v55, 9 }
 0x477   : > { %v9099_v48 = vcombine.low %v5213_v37, %v5223_v59  ;;  %v5608_v43 = vrot.slane %v5606_v25, 4  ;;  %v5254_v59 = vrot.slane %v5252_v38, 5  ;;  %v5286_v11 = vshrl.u32 %v4952_v17, 16 }
 0x478   : > { %v9588_v8 = vpop.f32.mrb[76].mxu1  ;;  %v5609_v37 = vrot.slane %v5462_v21, 5  ;;  %v5276_v42 = vshll.u32 %v4951_v45, 16  ;;  %v5268_v38 = vshll.u32 %v4950_v44, 16 }
 0x479   : > { %v9589_v47 = vpop.f32.mrb[77].mxu1 }
 0x47a   : > { %v12355_v15 = vadd.f32 %v9589_v47, %v9588_v8  ;;  %v9591_v52 = vpop.f32.mrb[78].mxu1  ;;  %v5232_v8 = vrot.slane %v5231_v13, 4  ;;  %v5246_v47 = vrot.slane %v5244_v60, 5  ;;  %v5265_v13 = vor.u32 %v5264_v26, %v12364_v0  ;;  %v12379_v26 = vld [vmem:[#allocation3 + $0xb8] sm:$0xf] }
 0x47b   : > { %v9592_v24 = vpop.f32.mrb[79].mxu1  ;;  %v5610_v21 = vsel %vm11964_vm4, %v5608_v43, %v5609_v37  ;;  %v5463_v37 = vld [vmem:[#allocation3 + $0xa8] sm:$0xe] }
 0x47c   : > { %13308 = vst [vmem:[#allocation10_spill] sm:$0xff] %v12355_v15  ;;  %v12362_v51 = vadd.f32 %v9592_v24, %v9591_v52  ;;  %v5251_v15 = vrot.slane %v5249_v56, 4  ;;  %v5613_v52 = vrot.slane %v12360_v6, 5  ;;  %v5273_v24 = vshrl.u32 %v4951_v45, 16 }
 0x47d   : > { %7812 = vmatmul.mubr.bf16.gmra.mrb[184].mxu1 %v9099_v48  ;;  %v5247_v31 = vsel %vm11481_vm11, %v5242_v2, %v5246_v47  ;;  %v5237_v55 = vsel %vm11481_vm11, %v5232_v8, %v12346_v35  ;;  %v5607_v56 = vsel %vm11964_vm4, %v9117_v12, %v5606_v25  ;;  %v5465_v48 = vld [vmem:[#allocation3 + $0xb0] sm:$0x1]  ;;  %v12377_v45 = vrot.slane %v5282_v1, 5  ;;  %v4955_v1 = vld [vmem:[#allocation3 + $0xb8] sm:$0xf] }
 0x47e   : > { %13309 = vst [vmem:[#allocation11_spill] sm:$0xff] %v12362_v51  ;;  %7819 = vmatprep.mubr.bf16.mxu1 %v9132_v46  ;;  %v5255_v17 = vor.u32 %v5254_v59, %v5251_v15  ;;  %v5288_v2 = vrot.slane %v5286_v11, 4  ;;  %v9100_v51 = vcombine.low %v5237_v55, %v5247_v31  ;;  %v5615_v36 = vrot.slane %v5613_v52, 4 }
 0x47f   : > { %v5275_v35 = vrot.slane %v5273_v24, 4  ;;  %v5278_v8 = vrot.slane %v5276_v42, 5  ;;  %v9133_v43 = vcombine.low %v5607_v56, %v5610_v21  ;;  %v5266_v44 = vrot.slane %v5265_v13, 4 }
 0x480   : > { %v9610_v30 = vpop.f32.mrb[80].mxu1  ;;  %v5616_v15 = vrot.slane %v5465_v48, 5  ;;  %v5620_v59 = vrot.slane %v12379_v26, 5  ;;  %v5256_v31 = vrot.slane %v5255_v17, 4  ;;  %v5270_v24 = vrot.slane %v5268_v38, 5 }
 0x481   : > { %v9611_v60 = vpop.f32.mrb[81].mxu1  ;;  %v5289_v42 = vor.u32 %v5288_v2, %v12377_v45  ;;  %v5279_v55 = vor.u32 %v5278_v8, %v5275_v35  ;;  %v5468_v48 = vld [vmem:[#allocation3 + $0xbc] sm:$0x1] }
 0x482   : > { %v9612_v46 = vadd.f32 %v9611_v60, %v9610_v30  ;;  %v9613_v6 = vpop.f32.mrb[82].mxu1  ;;  %v4953_v30 = vld [vmem:[#allocation3 + $0xb0] sm:$0x1]  ;;  %v9118_v60 = vrot.slane %v5463_v37, 9  ;;  %v5617_v13 = vsel %vm11964_vm4, %v5615_v36, %v5616_v15  ;;  %v5271_v21 = vsel %vm11481_vm11, %v5266_v44, %v5270_v24  ;;  %v12398_v24 = vld [vmem:[#allocation3 + $0xc4] sm:$0xf] }
 0x483   : > { %v9614_v47 = vpop.f32.mrb[83].mxu1  ;;  %v5292_v56 = vshll.u32 %v4953_v30, 16  ;;  %v5622_v17 = vrot.slane %v5620_v59, 4  ;;  %v5261_v36 = vsel %vm11481_vm11, %v5256_v31, %v12364_v0  ;;  %v5290_v8 = vrot.slane %v5289_v42, 4 }
 0x484   : > { %v12382_v25 = vadd.f32 %v9612_v46, %v11952_v57  ;;  %v9615_v12 = vadd.f32 %v9614_v47, %v9613_v6  ;;  %v4954_v57 = vld [vmem:[#allocation3 + $0xb4] sm:$0xf]  ;;  %v5306_v46 = vshll.u32 %v4955_v1, 16  ;;  %v5614_v38 = vsel %vm11964_vm4, %v9118_v60, %v5613_v52  ;;  %v4956_v60 = vld [vmem:[#allocation3 + $0xbc] sm:$0x1] }
 0x485   : > { %7820 = vmatmul.mubr.bf16.gmra.mrb[188].mxu1 %v9100_v51  ;;  %v5297_v2 = vshrl.u32 %v4954_v57, 16  ;;  %v5300_v26 = vshll.u32 %v4954_v57, 16  ;;  %v9134_v35 = vcombine.low %v5614_v38, %v5617_v13  ;;  %v9101_v37 = vcombine.low %v5261_v36, %v5271_v21  ;;  %v4957_v38 = vld [vmem:[#allocation3 + $0xc0] sm:$0xf] }
 0x486   : > { %v12386_v11 = vadd.f32 %v9615_v12, %v11954_v3  ;;  %7827 = vmatprep.mubr.bf16.mxu1 %v9133_v43  ;;  %v5310_v3 = vshrl.u32 %v4955_v1, 16  ;;  %v5466_v43 = vld [vmem:[#allocation3 + $0xb4] sm:$0xe]  ;;  %v5280_v30 = vrot.slane %v5279_v55, 4  ;;  %v5294_v15 = vrot.slane %v5292_v56, 5 }
 0x487   : > { %v5623_v1 = vrot.slane %v5468_v48, 5  ;;  %v9119_v0 = vrot.slane %v5466_v43, 9  ;;  %v5299_v42 = vrot.slane %v5297_v2, 4  ;;  %v5302_v13 = vrot.slane %v5300_v26, 5  ;;  %v5469_v55 = vld [vmem:[#allocation3 + $0xc0] sm:$0xe] }
 0x488   : > { %13310 = vst [vmem:[#allocation12_spill] sm:$0xff] %v12386_v11  ;;  %v9616_v51 = vpop.f32.mrb[84].mxu1  ;;  %v4958_v11 = vld [vmem:[#allocation3 + $0xc4] sm:$0xf]  ;;  %v5627_v21 = vrot.slane %v12398_v24, 5  ;;  %v9120_v36 = vrot.slane %v5469_v55, 9 }
 0x489   : > { %v9617_v6 = vpop.f32.mrb[85].mxu1  ;;  %v5624_v31 = vsel %vm11964_vm4, %v5622_v17, %v5623_v1  ;;  %v5858_v48 = vld [vmem:[#allocation3 + $0x1c] sm:$0xf]  ;;  %v5330_v17 = vshll.u32 %v4958_v11, 16  ;;  %v5334_v2 = vshrl.u32 %v4958_v11, 16 }
 0x48a   : > { %v9618_v47 = vadd.f32 %v9617_v6, %v9616_v51  ;;  %v9619_v12 = vpop.f32.mrb[86].mxu1  ;;  %v12403_v51 = vrot.slane %v5306_v46, 5  ;;  %v5312_v6 = vrot.slane %v5310_v3, 4  ;;  %v5285_v46 = vsel %vm11481_vm11, %v5280_v30, %v12377_v45 }
 0x48b   : > { %v9620_v44 = vpop.f32.mrb[87].mxu1  ;;  %v5621_v3 = vsel %vm11964_vm4, %v9119_v0, %v5620_v59  ;;  %v5919_v1 = vshrl.u32 %v5858_v48, 16  ;;  %v5629_v24 = vrot.slane %v5627_v21, 4  ;;  %v5321_v59 = vshrl.u32 %v4957_v38, 16 }
 0x48c   : > { %v12401_v52 = vadd.f32 %v9618_v47, %v12058_v18  ;;  %v9621_v57 = vadd.f32 %v9620_v44, %v9619_v12  ;;  %v5295_v18 = vsel %vm11481_vm11, %v5290_v8, %v5294_v15  ;;  %v5313_v47 = vor.u32 %v5312_v6, %v12403_v51 }
 0x48d   : > { %7828 = vmatmul.mubr.bf16.gmra.mrb[192].mxu1 %v9101_v37  ;;  %v5316_v12 = vshll.u32 %v4956_v60, 16  ;;  %v9102_v43 = vcombine.low %v5285_v46, %v5295_v18  ;;  %v5303_v44 = vor.u32 %v5302_v13, %v5299_v42  ;;  %v5471_v37 = vld [vmem:[#allocation3 + $0xc8] sm:$0x1]  ;;  %v5915_v15 = vshll.u32 %v5858_v48, 16 }
 0x48e   : > { %v12408_v56 = vadd.f32 %v9621_v57, %v12062_v58  ;;  %7835 = vmatprep.mubr.bf16.mxu1 %v9134_v35  ;;  %v9135_v58 = vcombine.low %v5621_v3, %v5624_v31  ;;  %v5857_v35 = vld [vmem:[#allocation3 + $0x18] sm:$0xf]  ;;  %v5324_v57 = vshll.u32 %v4957_v38, 16  ;;  %v12419_v11 = vrot.slane %v5330_v17, 5 }
 0x48f   : > { %v5336_v31 = vrot.slane %v5334_v2, 4  ;;  %v5906_v3 = vshrl.u32 %v5857_v35, 16  ;;  %v5909_v6 = vshll.u32 %v5857_v35, 16  ;;  %v5314_v18 = vrot.slane %v5313_v47, 4  ;;  %v4959_v2 = vld [vmem:[#allocation3 + $0xc8] sm:$0x1] }
 0x490   : > { %v9622_v26 = vpop.f32.mrb[88].mxu1  ;;  %v5630_v42 = vrot.slane %v5471_v37, 5  ;;  %v5304_v13 = vrot.slane %v5303_v44, 4  ;;  %v5318_v48 = vrot.slane %v5316_v12, 5  ;;  %v12424_v46 = vrot.slane %v5915_v15, 5 }
 0x491   : > { %v9623_v8 = vpop.f32.mrb[89].mxu1  ;;  %v5326_v35 = vrot.slane %v5324_v57, 5  ;;  %v5337_v47 = vor.u32 %v5336_v31, %v12419_v11  ;;  %v5908_v37 = vrot.slane %v5906_v3, 4  ;;  %v5860_v44 = vld [vmem:[#allocation3 + $0x24] sm:$0xf]  ;;  %v5340_v57 = vshll.u32 %v4959_v2, 16 }
 0x492   : > { %v9624_v45 = vadd.f32 %v9623_v8, %v9622_v26  ;;  %v9625_v30 = vpop.f32.mrb[90].mxu1  ;;  %v5921_v26 = vrot.slane %v5919_v1, 4  ;;  %v5861_v8 = vld [vmem:[#allocation3 + $0x28] sm:$0xf]  ;;  %v5631_v17 = vsel %vm11964_vm4, %v5629_v24, %v5630_v42  ;;  %v5319_v15 = vsel %vm11481_vm11, %v5314_v18, %v5318_v48  ;;  %v5859_v1 = vld [vmem:[#allocation3 + $0x20] sm:$0x1] }
 0x493   : > { %v9626_v0 = vpop.f32.mrb[91].mxu1  ;;  %v5309_v24 = vsel %vm11481_vm11, %v5304_v13, %v12403_v51  ;;  %v5933_v18 = vshll.u32 %v5860_v44, 16  ;;  %v5925_v50 = vshll.u32 %v5859_v1, 16  ;;  %v5342_v13 = vrot.slane %v5340_v57, 5 }
 0x494   : > { %v12422_v60 = vadd.f32 %v9624_v45, %v12066_v33  ;;  %v9627_v55 = vadd.f32 %v9626_v0, %v9625_v30  ;;  %v5323_v33 = vrot.slane %v5321_v59, 4  ;;  %v5943_v45 = vshrl.u32 %v5861_v8, 16 }
 0x495   : > { %7836 = vmatmul.mubr.bf16.gmra.mrb[196].mxu1 %v9102_v43  ;;  %v5911_v43 = vrot.slane %v5909_v6, 5  ;;  %v5922_v0 = vor.u32 %v5921_v26, %v12424_v46  ;;  %v9103_v48 = vcombine.low %v5309_v24, %v5319_v15 }
 0x496   : > { %13311 = vst [vmem:[#allocation13_spill] sm:$0xff] %v12422_v60  ;;  %v12427_v38 = vadd.f32 %v9627_v55, %v12070_v34  ;;  %7843 = vmatprep.mubr.bf16.mxu1 %v9135_v58  ;;  %v5628_v34 = vsel %vm11964_vm4, %v9120_v36, %v5627_v21  ;;  %v5939_v58 = vshll.u32 %v5861_v8, 16  ;;  %v5327_v6 = vor.u32 %v5326_v35, %v5323_v33 }
 0x497   : > { %v9136_v59 = vcombine.low %v5628_v34, %v5631_v17  ;;  %v5930_v55 = vshrl.u32 %v5860_v44, 16  ;;  %v5338_v21 = vrot.slane %v5337_v47, 4  ;;  %v5912_v36 = vor.u32 %v5911_v43, %v5908_v37  ;;  %v5864_v47 = vld [vmem:[#allocation3 + $0x34] sm:$0xf]  ;;  %v5862_v44 = vld [vmem:[#allocation3 + $0x2c] sm:$0x1] }
 0x498   : > { %13312 = vst [vmem:[#allocation14_spill] sm:$0xff] %v12427_v38  ;;  %v9628_v12 = vpop.f32.mrb[92].mxu1  ;;  %v12443_v60 = vrot.slane %v5939_v58, 5  ;;  %v5945_v51 = vrot.slane %v5943_v45, 4  ;;  %v5923_v26 = vrot.slane %v5922_v0, 4  ;;  %v5328_v2 = vrot.slane %v5327_v6, 4 }
 0x499   : > { %v9629_v30 = vpop.f32.mrb[93].mxu1  ;;  %v5932_v33 = vrot.slane %v5930_v55, 4  ;;  %v5935_v35 = vrot.slane %v5933_v18, 5  ;;  %v5913_v37 = vrot.slane %v5912_v36, 4  ;;  %v5927_v43 = vrot.slane %v5925_v50, 5 }
 0x49a   : > { %v9630_v31 = vadd.f32 %v9629_v30, %v9628_v12  ;;  %v9631_v3 = vpop.f32.mrb[94].mxu1  ;;  %v5343_v12 = vsel %vm11481_vm11, %v5338_v21, %v5342_v13  ;;  %v5946_v15 = vor.u32 %v5945_v51, %v12443_v60  ;;  %v5863_v34 = vld [vmem:[#allocation3 + $0x30] sm:$0xf]  ;;  %v5967_v58 = vshrl.u32 %v5864_v47, 16  ;;  %v5867_v36 = vld [vmem:[#allocation3 + $0x40] sm:$0xf] }
 0x49b   : > { %v9632_v42 = vpop.f32.mrb[95].mxu1  ;;  %v5333_v50 = vsel %vm11481_vm11, %v5328_v2, %v12419_v11  ;;  %v5936_v24 = vor.u32 %v5935_v35, %v5932_v33  ;;  %v5957_v6 = vshll.u32 %v5863_v34, 16  ;;  %v524_v2 = vld [vmem:[#allocation3 + $0xd4] sm:$0x1] }
 0x49c   : > { %v12441_v8 = vadd.f32 %v9630_v31, %v12076_v29  ;;  %v9633_v38 = vadd.f32 %v9632_v42, %v9631_v3  ;;  %v9104_v0 = vcombine.low %v5333_v50, %v5343_v12  ;;  %v5918_v31 = vsel %vm11481_vm11, %v5913_v37, %v12424_v46  ;;  %v468_v46 = vld [vmem:[#allocation3 + $0xcc] sm:$0x1] }
 0x49d   : > { %7844 = vmatmul.mubr.bf16.gmra.mrb[200].mxu1 %v9103_v48  ;;  %v5954_v3 = vshrl.u32 %v5863_v34, 16  ;;  %v5947_v48 = vrot.slane %v5946_v15, 4  ;;  %v5969_v11 = vrot.slane %v5967_v58, 4  ;;  %v5937_v13 = vrot.slane %v5936_v24, 4 }
 0x49e   : > { %v12446_v17 = vadd.f32 %v9633_v38, %v12080_v10  ;;  %7851 = vmatprep.mubr.bf16.mxu1 %v9136_v59  ;;  %v5928_v10 = vsel %vm11481_vm11, %v5923_v26, %v5927_v43  ;;  %v5963_v38 = vshll.u32 %v5864_v47, 16  ;;  %v5949_v59 = vshll.u32 %v5862_v44, 16 }
 0x49f   : > { %v9153_v42 = vcombine.low %v5918_v31, %v5928_v10  ;;  %v5956_v33 = vrot.slane %v5954_v3, 4  ;;  %v5959_v35 = vrot.slane %v5957_v6, 5  ;;  %v469_v47 = vsel %vm11340_vm6, 0, %v468_v46  ;;  %v5868_v6 = vld [vmem:[#allocation3 + $0x44] sm:$0x1] }
 0x4a0   : > { %v9634_v29 = vpop.f32.mrb[96].mxu1  ;;  %v12462_v21 = vrot.slane %v5963_v38, 5  ;;  %v5951_v26 = vrot.slane %v5949_v59, 5  ;;  %v525_v37 = vsel %vm11421_vm8, 0, %v524_v2  ;;  %v5991_v12 = vshrl.u32 %v5867_v36, 16  ;;  %v10737_v59 = vld [vmem:[%s13281_s4 + $0x208] sm:$0xff]  }
 0x4a1   : > { %v9635_v1 = vpop.f32.mrb[97].mxu1  ;;  %470 = vst [vmem:[#allocation3 + $0xcc] sm:$0x1] %v469_v47  ;;  %526 = vst [vmem:[#allocation3 + $0xd4] sm:$0x1] %v525_v37  ;;  %v5942_v23 = vsel %vm11481_vm11, %v5937_v13, %v12443_v60  ;;  %v5960_v50 = vor.u32 %v5959_v35, %v5956_v33  ;;  %v8261_v13 = vld [vmem:[#allocation2 + $0x21] sm:$0xff] }
 0x4a2   : > { %v9636_v45 = vadd.f32 %v9635_v1, %v9634_v29  ;;  %v9637_v30 = vpop.f32.mrb[98].mxu1  ;;  %v5952_v44 = vsel %vm11481_vm11, %v5947_v48, %v5951_v26  ;;  %v5987_v29 = vshll.u32 %v5867_v36, 16  ;;  %v5970_v34 = vor.u32 %v5969_v11, %v12462_v21  ;;  %v8260_v36 = vld [vmem:[#allocation2 + $0x19] sm:$0xff]  ;;  %v10740_v2 = vld [vmem:[%s13281_s4 + $0x210] sm:$0xff]  }
 0x4a3   : > { %v9638_v57 = vpop.f32.mrb[99].mxu1  ;;  %v5993_v3 = vrot.slane %v5991_v12, 4  ;;  %v5961_v26 = vrot.slane %v5960_v50, 4  ;;  %v8292_v33 = vpack.c.bf16 %v8261_v13, %v8260_v36  ;;  %v8263_v47 = vld [vmem:[#allocation2 + $0x39] sm:$0xff]  ;;  %v5872_v13 = vld [vmem:[#allocation3 + $0x54] sm:$0xf] }
 0x4a4   : > { %v12460_v55 = vadd.f32 %v9636_v45, %v12090_v19  ;;  %v9639_v18 = vadd.f32 %v9638_v57, %v9637_v30  ;;  %v5866_v19 = vld [vmem:[#allocation3 + $0x3c] sm:$0xf]  ;;  %v9154_v30 = vcombine.low %v5942_v23, %v5952_v44  ;;  %v12483_v31 = vrot.slane %v5987_v29, 5 }
 0x4a5   : > { %7852 = vmatmul.mubr.bf16.gmra.mrb[204].mxu1 %v9104_v0  ;;  %v5978_v53 = vshrl.u32 %v5866_v19, 16  ;;  %v5981_v38 = vshll.u32 %v5866_v19, 16  ;;  %v10735_v45 = vld [vmem:[#allocation3 + $0x18] sm:$0xff]   ;;  %v5971_v60 = vrot.slane %v5970_v34, 4  ;;  %v5869_v19 = vld [vmem:[#allocation3 + $0x48] sm:$0xf]  ;;  %10327 = vmatprep.mubr.msk.bf16.mxu0 %vm361_vm1, %v8292_v33  ;;  %v5966_v23 = vsel %vm11481_vm11, %v5961_v26, %v12462_v21 }
 0x4a6   : > { %v12465_v51 = vadd.f32 %v9639_v18, %v12094_v5  ;;  %7892 = vmatprep.mubr.bf16.mxu1 %v9153_v42  ;;  %v5865_v5 = vld [vmem:[#allocation3 + $0x38] sm:$0x1]  ;;  %v5870_v18 = vld [vmem:[#allocation3 + $0x4c] sm:$0xf]  ;;  %v5997_v34 = vshll.u32 %v5868_v6, 16 }
 0x4a7   : > { %v5973_v24 = vshll.u32 %v5865_v5, 16  ;;  %v5980_v48 = vrot.slane %v5978_v53, 4  ;;  %v5983_v11 = vrot.slane %v5981_v38, 5  ;;  %v6015_v44 = vshrl.u32 %v5870_v18, 16  ;;  %v5873_v21 = vld [vmem:[#allocation3 + $0x58] sm:$0xf] }
 0x4a8   : > { %v9640_v43 = vpop.f32.mrb[100].mxu1  ;;  %v6002_v53 = vshrl.u32 %v5869_v19, 16  ;;  %v6005_v38 = vshll.u32 %v5869_v19, 16  ;;  %v5999_v6 = vrot.slane %v5997_v34, 5 }
 0x4a9   : > { %v9641_v15 = vpop.f32.mrb[101].mxu1  ;;  %v5975_v46 = vrot.slane %v5973_v24, 5 }
 0x4aa   : > { %v9642_v1 = vadd.f32 %v9641_v15, %v9640_v43  ;;  %v9643_v10 = vpop.f32.mrb[102].mxu1  ;;  %v6011_v43 = vshll.u32 %v5870_v18, 16  ;;  %v5984_v15 = vor.u32 %v5983_v11, %v5980_v48  ;;  %v8264_v18 = vld [vmem:[#allocation2 + $0x49] sm:$0xff]  ;;  %v8265_v48 = vld [vmem:[#allocation2 + $0x51] sm:$0xff]  ;;  %v8266_v11 = vld [vmem:[#allocation2 + $0x61] sm:$0xff]  ;;  %v6007_v36 = vrot.slane %v6005_v38, 5 }
 0x4ab   : > { %v9644_v58 = vpop.f32.mrb[103].mxu1  ;;  %v5976_v37 = vsel %vm11481_vm11, %v5971_v60, %v5975_v46  ;;  %v8294_v26 = vpack.c.bf16 %v8265_v48, %v8264_v18  ;;  %v8267_v46 = vld [vmem:[#allocation2 + $0x69] sm:$0xff]  ;;  %v8270_v18 = vld [vmem:[#allocation2 + $0x91] sm:$0xff] }
 0x4ac   : > { %v12481_v57 = vadd.f32 %v9642_v1, %v12121_v28  ;;  %v9645_v0 = vadd.f32 %v9644_v58, %v9643_v10  ;;  %v8262_v28 = vld [vmem:[#allocation2 + $0x31] sm:$0xff]  ;;  %v9155_v50 = vcombine.low %v5966_v23, %v5976_v37  ;;  %v5985_v60 = vrot.slane %v5984_v15, 4  ;;  %v10738_v15 = vld [vmem:[#allocation3 + $0x30] sm:$0xff]   ;;  %v10749_v23 = vld [vmem:[%s13281_s4 + $0x228] sm:$0xff]  }
 0x4ad   : > { %7893 = vmatmul.mubr.bf16.vlgmr.msra.gmra.mrb[208].mxu1 %v10735_v45  ;;  %v8293_v5 = vpack.c.bf16 %v8263_v47, %v8262_v28  ;;  %v10736_v10 = vld [vmem:[#allocation3 + $0x24] sm:$0xff]   ;;  %v10746_v28 = vld [vmem:[%s13281_s4 + $0x220] sm:$0xff]   ;;  %v8295_v19 = vpack.c.bf16 %v8267_v46, %v8266_v11  ;;  %v5874_v11 = vld [vmem:[#allocation3 + $0x5c] sm:$0x1] }
 0x4ae   : > { %v12486_v42 = vadd.f32 %v9645_v0, %v12129_v63  ;;  %10278 = vmatpush3.bf16.msra.mxu1 %v12237_v49  ;;  %7900 = vmatprep.mubr.bf16.mxu1 %v9154_v30  ;;  %v5994_v63 = vor.u32 %v5993_v3, %v12483_v31  ;;  %v10743_v58 = vld [vmem:[%s13281_s4 + $0x218] sm:$0xff]   ;;  %v6017_v0 = vrot.slane %v6015_v44, 4  ;;  %v5990_v44 = vsel %vm11481_vm11, %v5985_v60, %v12483_v31  ;;  %v5875_v46 = vld [vmem:[#allocation3 + $0x60] sm:$0xf] }
 0x4af   : > { %10279 = vmatprep.subr.bf16.mxu1 %v10737_v59  ;;  %10328 = vmatmul.mubr.msk.bf16.vlgmr.msra.gmra.mrb[32].mxu0 %vm361_vm1, %v8293_v5  ;;  %v6026_v5 = vshrl.u32 %v5872_v13, 16  ;;  %v8268_v60 = vld [vmem:[#allocation2 + $0x79] sm:$0xff] }
 0x4b0   : > { %v9646_v35 = vpop.f32.mrb[104].mxu1  ;;  %v5995_v24 = vrot.slane %v5994_v63, 4  ;;  %v6035_v63 = vshll.u32 %v5873_v21, 16  ;;  %10331 = vmatprep.mubr.msk.bf16.mxu0 %vm361_vm1, %v8294_v26 }
 0x4b1   : > { %v9647_v49 = vpop.f32.mrb[105].mxu1 }
 0x4b2   : > { %v9648_v29 = vadd.f32 %v9647_v49, %v9646_v35  ;;  %v9649_v12 = vpop.f32.mrb[106].mxu1  ;;  %10280 = vmatpush3.bf16.msra.mxu1 %v10737_v59  ;;  %v12506_v59 = vrot.slane %v6011_v43, 5  ;;  %v5871_v35 = vld [vmem:[#allocation3 + $0x50] sm:$0x1]  ;;  %v12528_v31 = vrot.slane %v6035_v63, 5 }
 0x4b3   : > { %v9650_v1 = vpop.f32.mrb[107].mxu1  ;;  %10281 = vmatprep.subr.bf16.mxu1 %v10740_v2 }
 0x4b4   : > { %v12504_v45 = vadd.f32 %v9648_v29, %v12149_v27  ;;  %v9651_v30 = vadd.f32 %v9650_v1, %v9649_v12  ;;  %v6004_v27 = vrot.slane %v6002_v53, 4  ;;  %v6018_v49 = vor.u32 %v6017_v0, %v12506_v59 }
 0x4b5   : > { %7901 = vmatmul.mubr.bf16.gmra.mrb[212].mxu1 %v10736_v10  ;;  %v6029_v29 = vshll.u32 %v5872_v13, 16  ;;  %v6021_v10 = vshll.u32 %v5871_v35, 16  ;;  %v6028_v0 = vrot.slane %v6026_v5, 4  ;;  %v8271_v13 = vld [vmem:[#allocation2 + $0x99] sm:$0xff]  ;;  %v6050_v5 = vshrl.u32 %v5875_v46, 16 }
 0x4b6   : > { %v12509_v3 = vadd.f32 %v9651_v30, %v12160_v14  ;;  %7908 = vmatprep.mubr.bf16.mxu1 %v9155_v50  ;;  %10282 = vmatpush3.bf16.msra.mxu1 %v10740_v2  ;;  %v6000_v14 = vsel %vm11481_vm11, %v5995_v24, %v5999_v6  ;;  %v6039_v2 = vshrl.u32 %v5873_v21, 16  ;;  %v6008_v1 = vor.u32 %v6007_v36, %v6004_v27  ;;  %v5876_v50 = vld [vmem:[#allocation3 + $0x64] sm:$0xf]  ;;  %v8269_v6 = vld [vmem:[#allocation2 + $0x81] sm:$0xff] }
 0x4b7   : > { %10283 = vmatprep.subr.bf16.mxu1 %v10743_v58  ;;  %v9156_v34 = vcombine.low %v5990_v44, %v6000_v14  ;;  %10332 = vmatmul.mubr.msk.bf16.gmra.mrb[36].mxu0 %vm361_vm1, %v8295_v19  ;;  %v6031_v21 = vrot.slane %v6029_v29, 5  ;;  %v10752_v27 = vld [vmem:[%s13281_s4 + $0x230] sm:$0xff]   ;;  %v8296_v36 = vpack.c.bf16 %v8269_v6, %v8268_v60  ;;  %v6059_v35 = vshll.u32 %v5876_v50, 16  ;;  %v8274_v60 = vld [vmem:[#allocation2 + $0xc1] sm:$0xff] }
 0x4b8   : > { %v9652_v33 = vpop.f32.mrb[108].mxu1  ;;  %v6041_v30 = vrot.slane %v6039_v2, 4  ;;  %v6009_v48 = vrot.slane %v6008_v1, 4  ;;  %v6063_v63 = vshrl.u32 %v5876_v50, 16  ;;  %v6053_v29 = vshll.u32 %v5875_v46, 16 }
 0x4b9   : > { %v9653_v47 = vpop.f32.mrb[109].mxu1  ;;  %10335 = vmatprep.mubr.msk.bf16.mxu0 %vm361_vm1, %v8296_v36 }
 0x4ba   : > { %v9654_v37 = vadd.f32 %v9653_v47, %v9652_v33  ;;  %v9655_v43 = vpop.f32.mrb[110].mxu1  ;;  %10284 = vmatpush3.bf16.msra.mxu1 %v10743_v58  ;;  %v6019_v58 = vrot.slane %v6018_v49, 4  ;;  %v8297_v33 = vpack.c.bf16 %v8271_v13, %v8270_v18  ;;  %v6032_v47 = vor.u32 %v6031_v21, %v6028_v0  ;;  %v8272_v0 = vld [vmem:[#allocation2 + $0xa9] sm:$0xff]  ;;  %v8273_v21 = vld [vmem:[#allocation2 + $0xb1] sm:$0xff]  ;;  %v5878_v18 = vld [vmem:[#allocation3 + $0x6c] sm:$0xf] }
 0x4bb   : > { %v9656_v12 = vpop.f32.mrb[111].mxu1  ;;  %10285 = vmatprep.subr.bf16.mxu1 %v10746_v28  ;;  %v6045_v49 = vshll.u32 %v5874_v11, 16  ;;  %v6014_v44 = vsel %vm11481_vm11, %v6009_v48, %v12506_v59  ;;  %v5879_v59 = vld [vmem:[#allocation3 + $0x70] sm:$0xf]  ;;  %v6055_v6 = vrot.slane %v6053_v29, 5  ;;  %v8298_v48 = vpack.c.bf16 %v8273_v21, %v8272_v0 }
 0x4bc   : > { %v12526_v53 = vadd.f32 %v9654_v37, %v12178_v4  ;;  %v9657_v38 = vadd.f32 %v9656_v12, %v9655_v43  ;;  %v6023_v4 = vrot.slane %v6021_v10, 5  ;;  %v10739_v43 = vld [vmem:[#allocation3 + $0x3c] sm:$0xff]   ;;  %v10755_v12 = vld [vmem:[%s13281_s4 + $0x238] sm:$0xff]   ;;  %v5881_v21 = vld [vmem:[#allocation3 + $0x78] sm:$0xf] }
 0x4bd   : > { %7909 = vmatmul.mubr.bf16.gmra.mrb[216].mxu1 %v10738_v15  ;;  %v6047_v50 = vrot.slane %v6045_v49, 5  ;;  %v5877_v13 = vld [vmem:[#allocation3 + $0x68] sm:$0x1] }
 0x4be   : > { %v12531_v24 = vadd.f32 %v9657_v38, %v12191_v61  ;;  %7916 = vmatprep.mubr.bf16.mxu1 %v9156_v34  ;;  %10286 = vmatpush3.bf16.msra.mxu1 %v10746_v28  ;;  %v6042_v61 = vor.u32 %v6041_v30, %v12528_v31  ;;  %v6024_v28 = vsel %vm11481_vm11, %v6019_v58, %v6023_v4  ;;  %v6065_v38 = vrot.slane %v6063_v63, 4  ;;  %v8275_v4 = vld [vmem:[#allocation2 + $0xc9] sm:$0xff] }
 0x4bf   : > { %10287 = vmatprep.subr.bf16.mxu1 %v10749_v23  ;;  %10336 = vmatmul.mubr.msk.bf16.gmra.mrb[40].mxu0 %vm361_vm1, %v8297_v33  ;;  %v9157_v1 = vcombine.low %v6014_v44, %v6024_v28  ;;  %v6033_v58 = vrot.slane %v6032_v47, 4  ;;  %v6077_v63 = vshll.u32 %v5878_v18, 16 }
 0x4c0   : > { %v9658_v26 = vpop.f32.mrb[112].mxu1  ;;  %v6043_v10 = vrot.slane %v6042_v61, 4  ;;  %v8299_v61 = vpack.c.bf16 %v8275_v4, %v8274_v60  ;;  %10339 = vmatprep.mubr.msk.bf16.mxu0 %vm361_vm1, %v8298_v48 }
 0x4c1   : > { %v9659_v14 = vpop.f32.mrb[113].mxu1  ;;  %v6038_v28 = vsel %vm11481_vm11, %v6033_v58, %v12528_v31  ;;  %v5880_v31 = vld [vmem:[#allocation3 + $0x74] sm:$0x1] }
 0x4c2   : > { %v9660_v2 = vadd.f32 %v9659_v14, %v9658_v26  ;;  %v9661_v19 = vpop.f32.mrb[114].mxu1  ;;  %10288 = vmatpush3.bf16.msra.mxu1 %v10749_v23  ;;  %v12550_v23 = vrot.slane %v6059_v35, 5  ;;  %v6048_v36 = vsel %vm11481_vm11, %v6043_v10, %v6047_v50  ;;  %v6087_v26 = vshrl.u32 %v5879_v59, 16  ;;  %v8277_v58 = vld [vmem:[#allocation2 + $0xe1] sm:$0xff]  ;;  %v8278_v50 = vld [vmem:[#allocation2 + $0xf1] sm:$0xff] }
 0x4c3   : > { %v9662_v37 = vpop.f32.mrb[115].mxu1  ;;  %10289 = vmatprep.subr.bf16.mxu1 %v10752_v27  ;;  %v6074_v35 = vshrl.u32 %v5878_v18, 16  ;;  %v9158_v47 = vcombine.low %v6038_v28, %v6048_v36 }
 0x4c4   : > { %v12548_v15 = vadd.f32 %v9660_v2, %v12214_v9  ;;  %v9663_v34 = vadd.f32 %v9662_v37, %v9661_v19  ;;  %v6052_v9 = vrot.slane %v6050_v5, 4  ;;  %v10741_v19 = vld [vmem:[#allocation3 + $0x48] sm:$0xff]   ;;  %v6069_v37 = vshll.u32 %v5877_v13, 16 }
 0x4c5   : > { %7917 = vmatmul.mubr.bf16.gmra.mrb[220].mxu1 %v10739_v43  ;;  %v6089_v29 = vrot.slane %v6087_v26, 4  ;;  %v6076_v10 = vrot.slane %v6074_v35, 4 }
 0x4c6   : > { %v12553_v30 = vadd.f32 %v9663_v34, %v12222_v32  ;;  %7924 = vmatprep.mubr.bf16.mxu1 %v9157_v1  ;;  %10290 = vmatpush3.bf16.msra.mxu1 %v10752_v27  ;;  %v6083_v32 = vshll.u32 %v5879_v59, 16  ;;  %v6066_v27 = vor.u32 %v6065_v38, %v12550_v23  ;;  %v6056_v49 = vor.u32 %v6055_v6, %v6052_v9  ;;  %v5882_v1 = vld [vmem:[#allocation3 + $0x7c] sm:$0xf]  ;;  %v8276_v59 = vld [vmem:[#allocation2 + $0xd9] sm:$0xff] }
 0x4c7   : > { %10291 = vmatprep.subr.bf16.mxu1 %v10755_v12  ;;  %10340 = vmatmul.mubr.msk.bf16.gmra.mrb[44].mxu0 %vm361_vm1, %v8299_v61  ;;  %v6079_v38 = vrot.slane %v6077_v63, 5  ;;  %v8300_v60 = vpack.c.bf16 %v8277_v58, %v8276_v59  ;;  %v8279_v9 = vld [vmem:[#allocation2 + $0xf9] sm:$0xff]  ;;  %v6107_v36 = vshll.u32 %v5882_v1, 16  ;;  %v6111_v13 = vshrl.u32 %v5882_v1, 16  ;;  %v8280_v1 = vld [vmem:[#allocation2 + $0x109] sm:$0xff] }
 0x4c8   : > { %v9664_v11 = vpop.f32.mrb[116].mxu1  ;;  %v12566_v5 = vrot.slane %v6083_v32, 5  ;;  %v6067_v34 = vrot.slane %v6066_v27, 4  ;;  %v6057_v0 = vrot.slane %v6056_v49, 4  ;;  %v8301_v48 = vpack.c.bf16 %v8279_v9, %v8278_v50  ;;  %v8283_v58 = vld [vmem:[#allocation2 + $0x129] sm:$0xff] }
 0x4c9   : > { %v9665_v46 = vpop.f32.mrb[117].mxu1  ;;  %10343 = vmatprep.mubr.msk.bf16.mxu0 %vm361_vm1, %v8300_v60  ;;  %v6080_v61 = vor.u32 %v6079_v38, %v6076_v10  ;;  %v6101_v27 = vshll.u32 %v5881_v21, 16  ;;  %v12582_v49 = vrot.slane %v6107_v36, 5  ;;  %v8281_v10 = vld [vmem:[#allocation2 + $0x111] sm:$0xff]  ;;  %v5883_v38 = vld [vmem:[#allocation3 + $0x80] sm:$0x1] }
 0x4ca   : > { %v9666_v33 = vadd.f32 %v9665_v46, %v9664_v11  ;;  %v9667_v14 = vpop.f32.mrb[118].mxu1  ;;  %10292 = vmatpush3.bf16.msra.mxu1 %v10755_v12  ;;  %v6090_v18 = vor.u32 %v6089_v29, %v12566_v5  ;;  %v6093_v11 = vshll.u32 %v5880_v31, 16  ;;  %v6098_v46 = vshrl.u32 %v5881_v21, 16  ;;  %v10744_v36 = vld [vmem:[#allocation3 + $0x60] sm:$0xff]  }
 0x4cb   : > { %v9668_v2 = vpop.f32.mrb[119].mxu1  ;;  %v6062_v28 = vsel %vm11481_vm11, %v6057_v0, %v12550_v23  ;;  %v6103_v31 = vrot.slane %v6101_v27, 5  ;;  %v8302_v59 = vpack.c.bf16 %v8281_v10, %v8280_v1  ;;  %v8287_v1 = vld [vmem:[#allocation2 + $0x159] sm:$0xff] }
 0x4cc   : > { %v12564_v43 = vadd.f32 %v9666_v33, %v12247_v16  ;;  %v9669_v44 = vadd.f32 %v9668_v2, %v9667_v14  ;;  %v6071_v16 = vrot.slane %v6069_v37, 5  ;;  %v10742_v14 = vld [vmem:[#allocation3 + $0x54] sm:$0xff]   ;;  %v6113_v37 = vrot.slane %v6111_v13, 4 }
 0x4cd   : > { %7925 = vmatmul.mubr.bf16.gmra.mrb[224].mxu1 %v10741_v19  ;;  %v6091_v19 = vrot.slane %v6090_v18, 4  ;;  %v6100_v23 = vrot.slane %v6098_v46, 4 }
 0x4ce   : > { %v12569_v12 = vadd.f32 %v9669_v44, %v12250_v22  ;;  %7932 = vmatprep.mubr.bf16.mxu1 %v9158_v47  ;;  %v6072_v22 = vsel %vm11481_vm11, %v6067_v34, %v6071_v16  ;;  %v6095_v47 = vrot.slane %v6093_v11, 5  ;;  %v5885_v44 = vld [vmem:[#allocation3 + $0x88] sm:$0xf]  ;;  %v6081_v34 = vrot.slane %v6080_v61, 4  ;;  %v5884_v16 = vld [vmem:[#allocation3 + $0x84] sm:$0xf] }
 0x4cf   : > { %10344 = vmatmul.mubr.msk.bf16.gmra.mrb[48].mxu0 %vm361_vm1, %v8301_v48  ;;  %v9159_v2 = vcombine.low %v6062_v28, %v6072_v22  ;;  %v6131_v21 = vshll.u32 %v5885_v44, 16  ;;  %v6135_v60 = vshrl.u32 %v5885_v44, 16  ;;  %v6104_v22 = vor.u32 %v6103_v31, %v6100_v23 }
 0x4d0   : > { %v9670_v6 = vpop.f32.mrb[120].mxu1  ;;  %v6096_v0 = vsel %vm11481_vm11, %v6091_v19, %v6095_v47  ;;  %10347 = vmatprep.mubr.msk.bf16.mxu0 %vm361_vm1, %v8302_v59  ;;  %v6125_v61 = vshll.u32 %v5884_v16, 16  ;;  %v8284_v19 = vld [vmem:[#allocation2 + $0x139] sm:$0xff]  ;;  %v8285_v47 = vld [vmem:[#allocation2 + $0x141] sm:$0xff] }
 0x4d1   : > { %v9671_v4 = vpop.f32.mrb[121].mxu1  ;;  %v8304_v31 = vpack.c.bf16 %v8285_v47, %v8284_v19  ;;  %v8288_v19 = vld [vmem:[#allocation2 + $0x169] sm:$0xff]  ;;  %v8290_v47 = vld [vmem:[#allocation2 + $0x181] sm:$0xff] }
 0x4d2   : > { %v9672_v32 = vadd.f32 %v9671_v4, %v9670_v6  ;;  %v9673_v26 = vpop.f32.mrb[122].mxu1  ;;  %v6114_v6 = vor.u32 %v6113_v37, %v12582_v49  ;;  %v6086_v4 = vsel %vm11481_vm11, %v6081_v34, %v12566_v5  ;;  %v8286_v37 = vld [vmem:[#allocation2 + $0x151] sm:$0xff]  ;;  %v5886_v34 = vld [vmem:[#allocation3 + $0x8c] sm:$0x1] }
 0x4d3   : > { %v9674_v33 = vpop.f32.mrb[123].mxu1  ;;  %v9160_v13 = vcombine.low %v6086_v4, %v6096_v0  ;;  %v8305_v59 = vpack.c.bf16 %v8287_v1, %v8286_v37 }
 0x4d4   : > { %v12580_v35 = vadd.f32 %v9672_v32, %v12264_v41  ;;  %v9675_v63 = vadd.f32 %v9674_v33, %v9673_v26  ;;  %v8282_v41 = vld [vmem:[#allocation2 + $0x121] sm:$0xff]  ;;  %v6117_v32 = vshll.u32 %v5883_v38, 16  ;;  %v6122_v26 = vshrl.u32 %v5884_v16, 16 }
 0x4d5   : > { %7933 = vmatmul.mubr.bf16.gmra.mrb[228].mxu1 %v10742_v14  ;;  %v8303_v9 = vpack.c.bf16 %v8283_v58, %v8282_v41  ;;  %v12598_v33 = vrot.slane %v6131_v21, 5  ;;  %v6137_v14 = vrot.slane %v6135_v60, 4  ;;  %v6115_v28 = vrot.slane %v6114_v6, 4  ;;  %v5887_v38 = vld [vmem:[#allocation3 + $0x90] sm:$0xf] }
 0x4d6   : > { %v12585_v29 = vadd.f32 %v9675_v63, %v12269_v62  ;;  %7940 = vmatprep.mubr.bf16.mxu1 %v9159_v2  ;;  %v5888_v63 = vld [vmem:[#allocation3 + $0x94] sm:$0xf]  ;;  %v6105_v2 = vrot.slane %v6104_v22, 4  ;;  %v6119_v44 = vrot.slane %v6117_v32, 5  ;;  %v6124_v23 = vrot.slane %v6122_v26, 4 }
 0x4d7   : > { %10348 = vmatmul.mubr.msk.bf16.gmra.mrb[52].mxu0 %vm361_vm1, %v8303_v9  ;;  %v6138_v41 = vor.u32 %v6137_v14, %v12598_v33  ;;  %v6159_v0 = vshrl.u32 %v5888_v63, 16  ;;  %v6141_v60 = vshll.u32 %v5886_v34, 16  ;;  %v6149_v4 = vshll.u32 %v5887_v38, 16  ;;  %v5891_v14 = vld [vmem:[#allocation3 + $0xa0] sm:$0xf] }
 0x4d8   : > { %v9676_v50 = vpop.f32.mrb[124].mxu1  ;;  %10351 = vmatprep.mubr.msk.bf16.mxu0 %vm361_vm1, %v8304_v31  ;;  %v6110_v6 = vsel %vm11481_vm11, %v6105_v2, %v12582_v49  ;;  %v5889_v34 = vld [vmem:[#allocation3 + $0x98] sm:$0x1]  ;;  %v6179_v1 = vshll.u32 %v5891_v14, 16 }
 0x4d9   : > { %v9677_v62 = vpop.f32.mrb[125].mxu1  ;;  %v6161_v26 = vrot.slane %v6159_v0, 4  ;;  %v6143_v49 = vrot.slane %v6141_v60, 5  ;;  %v6151_v2 = vrot.slane %v6149_v4, 5  ;;  %v10747_v0 = vld [vmem:[#allocation3 + $0x78] sm:$0xff]   ;;  %v6165_v60 = vshll.u32 %v5889_v34, 16 }
 0x4da   : > { %v9678_v18 = vadd.f32 %v9677_v62, %v9676_v50  ;;  %v9679_v48 = vpop.f32.mrb[126].mxu1  ;;  %v6155_v50 = vshll.u32 %v5888_v63, 16  ;;  %v10745_v62 = vld [vmem:[#allocation3 + $0x6c] sm:$0xff]   ;;  %v6181_v4 = vrot.slane %v6179_v1, 5 }
 0x4db   : > { %v9680_v11 = vpop.f32.mrb[127].mxu1 }
 0x4dc   : > { %v12596_v46 = vadd.f32 %v9678_v18, %v12278_v7  ;;  %v9681_v27 = vadd.f32 %v9680_v11, %v9679_v48  ;;  %v6127_v7 = vrot.slane %v6125_v61, 5  ;;  %v6146_v48 = vshrl.u32 %v5887_v38, 16 }
 0x4dd   : > { %7941 = vmatmul.mubr.bf16.gmra.mrb[232].mxu1 %v10744_v36  ;;  %v12614_v32 = vrot.slane %v6155_v50, 5 }
 0x4de   : > { %v12601_v5 = vadd.f32 %v9681_v27, %v12285_v39  ;;  %7948 = vmatprep.mubr.bf16.mxu1 %v9160_v13  ;;  %v6120_v39 = vsel %vm11481_vm11, %v6115_v28, %v6119_v44  ;;  %v6128_v18 = vor.u32 %v6127_v7, %v6124_v23  ;;  %v6139_v13 = vrot.slane %v6138_v41, 4  ;;  %v5890_v27 = vld [vmem:[#allocation3 + $0x9c] sm:$0xf] }
 0x4df   : > { %10352 = vmatmul.mubr.msk.bf16.gmra.mrb[56].mxu0 %vm361_vm1, %v8305_v59  ;;  %v9161_v36 = vcombine.low %v6110_v6, %v6120_v39  ;;  %v6148_v63 = vrot.slane %v6146_v48, 4  ;;  %v8291_v7 = vld [vmem:[#allocation2 + $0x189] sm:$0xff]  ;;  %v6173_v39 = vshll.u32 %v5890_v27, 16 }
 0x4e0   : > { %v9682_v10 = vpop.f32.mrb[128].mxu1  ;;  %v6129_v28 = vrot.slane %v6128_v18, 4  ;;  %v6144_v44 = vsel %vm11481_vm11, %v6139_v13, %v6143_v49  ;;  %v8307_v41 = vpack.c.bf16 %v8291_v7, %v8290_v47 }
 0x4e1   : > { %v9683_v58 = vpop.f32.mrb[129].mxu1  ;;  %v6175_v49 = vrot.slane %v6173_v39, 5 }
 0x4e2   : > { %v9684_v16 = vadd.f32 %v9683_v58, %v9682_v10  ;;  %v9685_v21 = vpop.f32.mrb[130].mxu1  ;;  %v6183_v10 = vshrl.u32 %v5891_v14, 16  ;;  %v6170_v58 = vshrl.u32 %v5890_v27, 16  ;;  %v6167_v14 = vrot.slane %v6165_v60, 5 }
 0x4e3   : > { %v9686_v9 = vpop.f32.mrb[131].mxu1 }
 0x4e4   : > { %v12612_v22 = vadd.f32 %v9684_v16, %v12299_v54  ;;  %v9687_v11 = vadd.f32 %v9686_v9, %v9685_v21  ;;  %v8289_v54 = vld [vmem:[#allocation2 + $0x171] sm:$0xff]  ;;  %v6134_v16 = vsel %vm11481_vm11, %v6129_v28, %v12598_v33  ;;  %v6152_v21 = vor.u32 %v6151_v2, %v6148_v63  ;;  %v5894_v33 = vld [vmem:[#allocation3 + $0xac] sm:$0xf] }
 0x4e5   : > { %7949 = vmatmul.mubr.bf16.gmra.mrb[236].mxu1 %v10745_v62  ;;  %v8306_v23 = vpack.c.bf16 %v8289_v54, %v8288_v19  ;;  %v13313_v9 = vld [vmem:[#allocation6_spill] sm:$0xff]  ;;  %v9162_v18 = vcombine.low %v6134_v16, %v6144_v44  ;;  %v5893_v2 = vld [vmem:[#allocation3 + $0xa8] sm:$0xf]  ;;  %v6207_v44 = vshrl.u32 %v5894_v33, 16 }
 0x4e6   : > { %v12617_v61 = vadd.f32 %v9687_v11, %v12301_v20  ;;  %7956 = vmatprep.mubr.bf16.mxu1 %v9161_v36  ;;  %v6162_v20 = vor.u32 %v6161_v26, %v12614_v32  ;;  %v6185_v11 = vrot.slane %v6183_v10, 4  ;;  %v13314_v36 = vld [vmem:[#allocation7_spill] sm:$0xff]  ;;  %v6172_v26 = vrot.slane %v6170_v58, 4  ;;  %v5892_v63 = vld [vmem:[#allocation3 + $0xa4] sm:$0x1] }
 0x4e7   : > { %10355 = vmatprep.mubr.msk.bf16.mxu0 %vm361_vm1, %v8306_v23  ;;  %v6153_v27 = vrot.slane %v6152_v21, 4  ;;  %v6189_v10 = vshll.u32 %v5892_v63, 16  ;;  %v6209_v60 = vrot.slane %v6207_v44, 4  ;;  %v10750_v44 = vld [vmem:[#allocation3 + $0x90] sm:$0xff]  }
 0x4e8   : > { %v9688_v37 = vpop.f32.mrb[132].mxu1  ;;  %10356 = vmatmul.mubr.msk.bf16.gmra.mrb[60].mxu0 %vm361_vm1, %v8307_v41  ;;  %v6163_v48 = vrot.slane %v6162_v20, 4  ;;  %v6186_v47 = vor.u32 %v6185_v11, %v6181_v4  ;;  %v6176_v7 = vor.u32 %v6175_v49, %v6172_v26  ;;  %v10748_v20 = vld [vmem:[#allocation3 + $0x84] sm:$0xff]   ;;  %v6194_v41 = vshrl.u32 %v5893_v2, 16 }
 0x4e9   : > { %v9689_v31 = vpop.f32.mrb[133].mxu1  ;;  %v6158_v1 = vsel %vm11481_vm11, %v6153_v27, %v12614_v32  ;;  %v6191_v32 = vrot.slane %v6189_v10, 5 }
 0x4ea   : > { %v9690_v38 = vadd.f32 %v9689_v31, %v9688_v37  ;;  %v9691_v59 = vpop.f32.mrb[134].mxu1  ;;  %v6168_v54 = vsel %vm11481_vm11, %v6163_v48, %v6167_v14  ;;  %v6203_v37 = vshll.u32 %v5894_v33, 16  ;;  %v6187_v16 = vrot.slane %v6186_v47, 4  ;;  %v5897_v48 = vld [vmem:[#allocation3 + $0xb8] sm:$0xf] }
 0x4eb   : > { %v9692_v50 = vpop.f32.mrb[135].mxu1  ;;  %v6196_v11 = vrot.slane %v6194_v41, 4  ;;  %v5895_v33 = vld [vmem:[#allocation3 + $0xb0] sm:$0x1] }
 0x4ec   : > { %v12628_v62 = vadd.f32 %v9690_v38, %v13313_v9  ;;  %v9693_v6 = vadd.f32 %v9692_v50, %v9691_v59  ;;  %v6197_v38 = vshll.u32 %v5893_v2, 16  ;;  %v13315_v59 = vld [vmem:[#allocation8_spill] sm:$0xff]  ;;  %v9163_v50 = vcombine.low %v6158_v1, %v6168_v54  ;;  %v13316_v9 = vld [vmem:[#allocation9_spill] sm:$0xff] }
 0x4ed   : > { %7957 = vmatmul.mubr.bf16.gmra.mrb[240].mxu1 %v10747_v0  ;;  %v5896_v0 = vld [vmem:[#allocation3 + $0xb4] sm:$0xf]  ;;  %v6205_v21 = vrot.slane %v6203_v37, 5  ;;  %v6227_v2 = vshll.u32 %v5897_v48, 16 }
 0x4ee   : > { %v12631_v13 = vadd.f32 %v9693_v6, %v13314_v36  ;;  %7964 = vmatprep.mubr.bf16.mxu1 %v9162_v18  ;;  %v6177_v18 = vrot.slane %v6176_v7, 4  ;;  %v6199_v36 = vrot.slane %v6197_v38, 5  ;;  %v6218_v26 = vshrl.u32 %v5896_v0, 16 }
 0x4ef   : > { %v6221_v27 = vshll.u32 %v5896_v0, 16  ;;  %v6210_v63 = vor.u32 %v6209_v60, %v6205_v21  ;;  %v6213_v7 = vshll.u32 %v5895_v33, 16  ;;  %v13318_v0 = vld [vmem:[#allocation11_spill] sm:$0xff]  ;;  %v5900_v60 = vld [vmem:[#allocation3 + $0xc4] sm:$0xf] }
 0x4f0   : > { %v9694_v28 = vpop.f32.mrb[136].mxu1  ;;  %v6251_v33 = vshll.u32 %v5900_v60, 16 }
 0x4f1   : > { %v9695_v19 = vpop.f32.mrb[137].mxu1  ;;  %v6223_v38 = vrot.slane %v6221_v27, 5  ;;  %v6255_v27 = vshrl.u32 %v5900_v60, 16 }
 0x4f2   : > { %v9696_v34 = vadd.f32 %v9695_v19, %v9694_v28  ;;  %v9697_v23 = vpop.f32.mrb[138].mxu1  ;;  %v6192_v28 = vsel %vm11481_vm11, %v6187_v16, %v6191_v32  ;;  %v6231_v19 = vshrl.u32 %v5897_v48, 16  ;;  %v5899_v48 = vld [vmem:[#allocation3 + $0xc0] sm:$0xf] }
 0x4f3   : > { %v9698_v31 = vpop.f32.mrb[139].mxu1 }
 0x4f4   : > { %v12639_v58 = vadd.f32 %v9696_v34, %v13315_v59  ;;  %v9699_v39 = vadd.f32 %v9698_v31, %v9697_v23  ;;  %v6182_v34 = vsel %vm11481_vm11, %v6177_v18, %v6181_v4  ;;  %v6200_v23 = vor.u32 %v6199_v36, %v6196_v11  ;;  %v5898_v18 = vld [vmem:[#allocation3 + $0xbc] sm:$0x1] }
 0x4f5   : > { %7965 = vmatmul.mubr.bf16.gmra.mrb[244].mxu1 %v10748_v20  ;;  %v6220_v31 = vrot.slane %v6218_v26, 4  ;;  %v13317_v20 = vld [vmem:[#allocation10_spill] sm:$0xff]  ;;  %v9164_v41 = vcombine.low %v6182_v34, %v6192_v28  ;;  %v6211_v59 = vrot.slane %v6210_v63, 4  ;;  %v6215_v4 = vrot.slane %v6213_v7, 5  ;;  %v5902_v7 = vld [vmem:[#allocation3 + $0xcc] sm:$0xf] }
 0x4f6   : > { %v12642_v6 = vadd.f32 %v9699_v39, %v13316_v9  ;;  %7972 = vmatprep.mubr.bf16.mxu1 %v9163_v50  ;;  %v6229_v39 = vrot.slane %v6227_v2, 5  ;;  %v6233_v50 = vrot.slane %v6231_v19, 4  ;;  %v6201_v9 = vrot.slane %v6200_v23, 4 }
 0x4f7   : > { %v6224_v11 = vor.u32 %v6223_v38, %v6220_v31  ;;  %v6216_v26 = vsel %vm11481_vm11, %v6211_v59, %v6215_v4  ;;  %v6237_v63 = vshll.u32 %v5898_v18, 16  ;;  %v6242_v2 = vshrl.u32 %v5899_v48, 16  ;;  %v5903_v31 = vld [vmem:[#allocation3 + $0xd0] sm:$0xf] }
 0x4f8   : > { %v9700_v49 = vpop.f32.mrb[140].mxu1  ;;  %v6245_v19 = vshll.u32 %v5899_v48, 16  ;;  %v6257_v38 = vrot.slane %v6255_v27, 4  ;;  %v13319_v59 = vld [vmem:[#allocation12_spill] sm:$0xff]  ;;  %v6275_v18 = vshll.u32 %v5903_v31, 16  ;;  %v6279_v48 = vshrl.u32 %v5903_v31, 16 }
 0x4f9   : > { %v9701_v14 = vpop.f32.mrb[141].mxu1  ;;  %v6244_v60 = vrot.slane %v6242_v2, 4  ;;  %v10753_v2 = vld [vmem:[#allocation3 + $0xa8] sm:$0xff]   ;;  %v5904_v31 = vld [vmem:[#allocation3 + $0xd4] sm:$0x1] }
 0x4fa   : > { %v9702_v54 = vadd.f32 %v9701_v14, %v9700_v49  ;;  %v9703_v47 = vpop.f32.mrb[142].mxu1  ;;  %v6234_v49 = vor.u32 %v6233_v50, %v6229_v39  ;;  %v6247_v4 = vrot.slane %v6245_v19, 5 }
 0x4fb   : > { %v9704_v37 = vpop.f32.mrb[143].mxu1 }
 0x4fc   : > { %v12649_v1 = vadd.f32 %v9702_v54, %v13317_v20  ;;  %v9705_v10 = vadd.f32 %v9704_v37, %v9703_v47  ;;  %v10751_v47 = vld [vmem:[#allocation3 + $0x9c] sm:$0xff]   ;;  %v6206_v37 = vsel %vm11481_vm11, %v6201_v9, %v6205_v21  ;;  %v6225_v20 = vrot.slane %v6224_v11, 4  ;;  %v5901_v21 = vld [vmem:[#allocation3 + $0xc8] sm:$0x1] }
 0x4fd   : > { %7973 = vmatmul.mubr.bf16.gmra.mrb[248].mxu1 %v10750_v44  ;;  %v9165_v23 = vcombine.low %v6206_v37, %v6216_v26  ;;  %v6266_v9 = vshrl.u32 %v5902_v7, 16  ;;  %v6281_v37 = vrot.slane %v6279_v48, 4  ;;  %v10754_v48 = vld [vmem:[#allocation3 + $0xb4] sm:$0xff]  }
 0x4fe   : > { %v12652_v16 = vadd.f32 %v9705_v10, %v13318_v0  ;;  %7980 = vmatprep.mubr.bf16.mxu1 %v9164_v41  ;;  %v6235_v10 = vrot.slane %v6234_v49, 4  ;;  %v6253_v41 = vrot.slane %v6251_v33, 5  ;;  %v6239_v0 = vrot.slane %v6237_v63, 5 }
 0x4ff   : > { %v6230_v27 = vsel %vm11481_vm11, %v6225_v20, %v6229_v39  ;;  %v6268_v19 = vrot.slane %v6266_v9, 4 }
 0x500   : > { %v9722_v32 = vpop.f32.mrb[144].mxu1  ;;  %v6240_v11 = vsel %vm11481_vm11, %v6235_v10, %v6239_v0  ;;  %v6258_v26 = vor.u32 %v6257_v38, %v6253_v41 }
 0x501   : > { %v9723_v36 = vpop.f32.mrb[145].mxu1 }
 0x502   : > { %v9724_v14 = vadd.f32 %v9723_v36, %v9722_v32  ;;  %v9725_v28 = vpop.f32.mrb[146].mxu1  ;;  %v6259_v10 = vrot.slane %v6258_v26, 4  ;;  %v13320_v26 = vld [vmem:[#allocation13_spill] sm:$0xff] }
 0x503   : > { %v9726_v54 = vpop.f32.mrb[147].mxu1 }
 0x504   : > { %v12659_v44 = vadd.f32 %v9724_v14, %v12382_v25  ;;  %v9727_v34 = vadd.f32 %v9726_v54, %v9725_v28  ;;  %v6269_v25 = vshll.u32 %v5902_v7, 16  ;;  %v6248_v14 = vor.u32 %v6247_v4, %v6244_v60 }
 0x505   : > { %7981 = vmatmul.mubr.bf16.gmra.mrb[252].mxu1 %v10751_v47  ;;  %v6261_v28 = vshll.u32 %v5901_v21, 16  ;;  %v6277_v47 = vrot.slane %v6275_v18, 5  ;;  %v9166_v7 = vcombine.low %v6230_v27, %v6240_v11  ;;  %v6285_v60 = vshll.u32 %v5904_v31, 16 }
 0x506   : > { %v12662_v50 = vadd.f32 %v9727_v34, %v13319_v59  ;;  %7988 = vmatprep.mubr.bf16.mxu1 %v9165_v23  ;;  %v6271_v54 = vrot.slane %v6269_v25, 5  ;;  %v6249_v20 = vrot.slane %v6248_v14, 4  ;;  %v13321_v14 = vld [vmem:[#allocation14_spill] sm:$0xff] }
 0x507   : > { %v6263_v39 = vrot.slane %v6261_v28, 5  ;;  %v6282_v0 = vor.u32 %v6281_v37, %v6277_v47  ;;  %v6287_v11 = vrot.slane %v6285_v60, 5  ;;  %v6373_v60 = vld [vmem:[#allocation3 + $0x28] sm:$0xf] }
 0x508   : > { %v9728_v32 = vpop.f32.mrb[148].mxu1  ;;  %v6272_v59 = vor.u32 %v6271_v54, %v6268_v19 }
 0x509   : > { %v9729_v36 = vpop.f32.mrb[149].mxu1 }
 0x50a   : > { %v9730_v49 = vadd.f32 %v9729_v36, %v9728_v32  ;;  %v9731_v33 = vpop.f32.mrb[150].mxu1  ;;  %v6254_v32 = vsel %vm11481_vm11, %v6249_v20, %v6253_v41  ;;  %v6283_v36 = vrot.slane %v6282_v0, 4  ;;  %v6371_v0 = vld [vmem:[#allocation3 + $0x20] sm:$0x1] }
 0x50b   : > { %v9732_v63 = vpop.f32.mrb[151].mxu1 }
 0x50c   : > { %v12669_v34 = vadd.f32 %v9730_v49, %v12401_v52  ;;  %v9733_v23 = vadd.f32 %v9732_v63, %v9731_v33  ;;  %v6264_v52 = vsel %vm11481_vm11, %v6259_v10, %v6263_v39  ;;  %v6370_v63 = vld [vmem:[#allocation3 + $0x1c] sm:$0xf]  ;;  %v6288_v41 = vsel %vm11481_vm11, %v6283_v36, %v6287_v11  ;;  %v10756_v39 = vld [vmem:[#allocation3 + $0xc0] sm:$0xff]  }
 0x50d   : > { %7989 = vmatmul.mubr.bf16.gmra.mrb[0].mxu1 %v10753_v2  ;;  %v9167_v27 = vcombine.low %v6254_v32, %v6264_v52  ;;  %v6467_v37 = vrot.slane %v6370_v63, 5  ;;  %v6470_v52 = vrot.slane %v6371_v0, 5  ;;  %v9169_v32 = vrot.slane %v6369_v40, 9 }
 0x50e   : > { %v12672_v38 = vadd.f32 %v9733_v23, %v12408_v56  ;;  %7996 = vmatprep.mubr.bf16.mxu1 %v9166_v7  ;;  %v6273_v56 = vrot.slane %v6272_v59, 4 }
 0x510   : > { %v9734_v4 = vpop.f32.mrb[152].mxu1  ;;  %v6278_v2 = vsel %vm11481_vm11, %v6273_v56, %v6277_v47 }
 0x511   : > { %v9735_v21 = vpop.f32.mrb[153].mxu1  ;;  %v9168_v31 = vcombine.low %v6278_v2, %v6288_v41 }
 0x512   : > { %v9736_v9 = vadd.f32 %v9735_v21, %v9734_v4  ;;  %v9737_v25 = vpop.f32.mrb[154].mxu1  ;;  %v6469_v4 = vrot.slane %v6467_v37, 4  ;;  %v6376_v21 = vld [vmem:[#allocation3 + $0x34] sm:$0xf] }
 0x513   : > { %v9738_v18 = vpop.f32.mrb[155].mxu1  ;;  %v6481_v36 = vrot.slane %v6376_v21, 5 }
 0x514   : > { %v12679_v49 = vadd.f32 %v9736_v9, %v13320_v26  ;;  %v9739_v33 = vadd.f32 %v9738_v18, %v9737_v25  ;;  %v6474_v9 = vrot.slane %v6373_v60, 5 }
 0x515   : > { %7997 = vmatmul.mubr.bf16.gmra.mrb[4].mxu1 %v10754_v48  ;;  %v10757_v48 = vld [vmem:[#allocation3 + $0xcc] sm:$0xff]  }
 0x516   : > { %v12682_v28 = vadd.f32 %v9739_v33, %v13321_v14  ;;  %8004 = vmatprep.mubr.bf16.mxu1 %v9167_v27  ;;  %v6374_v27 = vld [vmem:[#allocation3 + $0x2c] sm:$0x1]  ;;  %v6476_v41 = vrot.slane %v6474_v9, 4 }
 0x518   : > { %v9740_v19 = vpop.f32.mrb[156].mxu1 }
 0x519   : > { %v9741_v54 = vpop.f32.mrb[157].mxu1 }
 0x51a   : > { %v9742_v23 = vadd.f32 %v9741_v54, %v9740_v19  ;;  %v9743_v7 = vpop.f32.mrb[158].mxu1  ;;  %v6377_v19 = vld [vmem:[#allocation3 + $0x38] sm:$0x1]  ;;  %v6372_v54 = vld [vmem:[#allocation3 + $0x24] sm:$0xe] }
 0x51b   : > { %v9744_v10 = vpop.f32.mrb[159].mxu1  ;;  %v9170_v60 = vrot.slane %v6372_v54, 9  ;;  %v6385_v54 = vld [vmem:[#allocation3 + $0x58] sm:$0xf] }
 0x51c   : > { %v12689_v20 = vadd.f32 %v9742_v23, %v12441_v8  ;;  %v9745_v59 = vadd.f32 %v9744_v10, %v9743_v7  ;;  %v6471_v8 = vsel %vm11964_vm4, %v6469_v4, %v6470_v52  ;;  %v6483_v23 = vrot.slane %v6481_v36, 4  ;;  %v6379_v7 = vld [vmem:[#allocation3 + $0x40] sm:$0xf] }
 0x51d   : > { %8005 = vmatmul.mubr.bf16.gmra.mrb[8].mxu1 %v10756_v39  ;;  %v6477_v10 = vrot.slane %v6374_v27, 5  ;;  %v6375_v39 = vld [vmem:[#allocation3 + $0x30] sm:$0xe]  ;;  %v6488_v4 = vrot.slane %v6379_v7, 5  ;;  %v6381_v7 = vld [vmem:[#allocation3 + $0x48] sm:$0xe] }
 0x51e   : > { %v12692_v47 = vadd.f32 %v9745_v59, %v12446_v17  ;;  %8012 = vmatprep.mubr.bf16.mxu1 %v9168_v31  ;;  %v6468_v17 = vsel %vm11964_vm4, %v9169_v32, %v6467_v37  ;;  %v6382_v59 = vld [vmem:[#allocation3 + $0x4c] sm:$0xf]  ;;  %v6484_v37 = vrot.slane %v6377_v19, 5  ;;  %v9171_v21 = vrot.slane %v6375_v39, 9 }
 0x51f   : > { %v9185_v2 = vcombine.low %v6468_v17, %v6471_v8 }
 0x520   : > { %v9746_v25 = vpop.f32.mrb[160].mxu1  ;;  %v6485_v52 = vsel %vm11964_vm4, %v6483_v23, %v6484_v37  ;;  %v6502_v37 = vrot.slane %v6385_v54, 5  ;;  %v6387_v54 = vld [vmem:[#allocation3 + $0x60] sm:$0xe] }
 0x521   : > { %v9747_v18 = vpop.f32.mrb[161].mxu1 }
 0x522   : > { %v9748_v11 = vadd.f32 %v9747_v18, %v9746_v25  ;;  %v9749_v26 = vpop.f32.mrb[162].mxu1  ;;  %v6495_v25 = vrot.slane %v6382_v59, 5 }
 0x523   : > { %v9750_v33 = vpop.f32.mrb[163].mxu1 }
 0x524   : > { %v12699_v14 = vadd.f32 %v9748_v11, %v12460_v55  ;;  %v9751_v63 = vadd.f32 %v9750_v33, %v9749_v26  ;;  %v6478_v55 = vsel %vm11964_vm4, %v6476_v41, %v6477_v10  ;;  %v6482_v11 = vsel %vm11964_vm4, %v9171_v21, %v6481_v36  ;;  %v6380_v26 = vld [vmem:[#allocation3 + $0x44] sm:$0x1]  ;;  %v6378_v41 = vld [vmem:[#allocation3 + $0x3c] sm:$0xe] }
 0x525   : > { %8013 = vmatmul.mubr.bf16.gmra.mrb[12].mxu1 %v10757_v48  ;;  %v6475_v48 = vsel %vm11964_vm4, %v9170_v60, %v6474_v9  ;;  %v9187_v27 = vcombine.low %v6482_v11, %v6485_v52  ;;  %v6497_v19 = vrot.slane %v6495_v25, 4  ;;  %v6491_v9 = vrot.slane %v6380_v26, 5  ;;  %v6388_v10 = vld [vmem:[#allocation3 + $0x64] sm:$0xf] }
 0x526   : > { %v12702_v31 = vadd.f32 %v9751_v63, %v12465_v51  ;;  %10293 = vmatprep.mubr.bf16.mxu1 %v9185_v2  ;;  %v9186_v8 = vcombine.low %v6475_v48, %v6478_v55  ;;  %v6490_v63 = vrot.slane %v6488_v4, 4  ;;  %v6383_v2 = vld [vmem:[#allocation3 + $0x50] sm:$0x1]  ;;  %v9172_v59 = vrot.slane %v6378_v41, 9 }
 0x527   : > { %v6498_v36 = vrot.slane %v6383_v2, 5  ;;  %v9173_v60 = vrot.slane %v6381_v7, 9  ;;  %v6391_v41 = vld [vmem:[#allocation3 + $0x70] sm:$0xf] }
 0x528   : > { %v9752_v0 = vpop.f32.mrb[164].mxu1  ;;  %v6489_v52 = vsel %vm11964_vm4, %v9172_v59, %v6488_v4  ;;  %v9175_v59 = vrot.slane %v6387_v54, 9 }
 0x529   : > { %v9753_v40 = vpop.f32.mrb[165].mxu1  ;;  %v6499_v55 = vsel %vm11964_vm4, %v6497_v19, %v6498_v36  ;;  %v6496_v48 = vsel %vm11964_vm4, %v9173_v60, %v6495_v25  ;;  %v6516_v36 = vrot.slane %v6391_v41, 5  ;;  %v6393_v41 = vld [vmem:[#allocation3 + $0x78] sm:$0xe] }
 0x52a   : > { %v9754_v18 = vadd.f32 %v9753_v40, %v9752_v0  ;;  %v9755_v51 = vpop.f32.mrb[166].mxu1  ;;  %v6509_v40 = vrot.slane %v6388_v10, 5  ;;  %v9189_v26 = vcombine.low %v6496_v48, %v6499_v55 }
 0x52b   : > { %v9756_v32 = vpop.f32.mrb[167].mxu1 }
 0x52c   : > { %v12713_v33 = vadd.f32 %v9754_v18, %v12481_v57  ;;  %v9757_v17 = vadd.f32 %v9756_v32, %v9755_v51  ;;  %v6492_v57 = vsel %vm11964_vm4, %v6490_v63, %v6491_v9  ;;  %v6386_v32 = vld [vmem:[#allocation3 + $0x5c] sm:$0x1]  ;;  %v6384_v63 = vld [vmem:[#allocation3 + $0x54] sm:$0xe]  ;;  %v6511_v2 = vrot.slane %v6509_v40, 4 }
 0x52d   : > { %10294 = vmatmul.mubr.bf16.vlgmr.msra.gmra.mrb[16].mxu1 %v9186_v8  ;;  %v9188_v51 = vcombine.low %v6489_v52, %v6492_v57  ;;  %v6505_v4 = vrot.slane %v6386_v32, 5  ;;  %v6394_v9 = vld [vmem:[#allocation3 + $0x7c] sm:$0xf]  ;;  %v9174_v10 = vrot.slane %v6384_v63, 9  ;;  %v6510_v52 = vsel %vm11964_vm4, %v9175_v59, %v6509_v40  ;;  %v6397_v63 = vld [vmem:[#allocation3 + $0x88] sm:$0xf] }
 0x52e   : > { %v12716_v23 = vadd.f32 %v9757_v17, %v12486_v42  ;;  %10297 = vmatprep.mubr.bf16.mxu1 %v9187_v27  ;;  %v6504_v17 = vrot.slane %v6502_v37, 4  ;;  %v6389_v27 = vld [vmem:[#allocation3 + $0x68] sm:$0x1] }
 0x52f   : > { %v6512_v25 = vrot.slane %v6389_v27, 5  ;;  %v6503_v55 = vsel %vm11964_vm4, %v9174_v10, %v6502_v37  ;;  %v9177_v10 = vrot.slane %v6393_v41, 9 }
 0x530   : > { %v9758_v39 = vpop.f32.mrb[168].mxu1 }
 0x531   : > { %v9759_v0 = vpop.f32.mrb[169].mxu1  ;;  %v6513_v57 = vsel %vm11964_vm4, %v6511_v2, %v6512_v25  ;;  %v6530_v25 = vrot.slane %v6397_v63, 5  ;;  %v6399_v63 = vld [vmem:[#allocation3 + $0x90] sm:$0xe] }
 0x532   : > { %v9760_v21 = vadd.f32 %v9759_v0, %v9758_v39  ;;  %v9761_v42 = vpop.f32.mrb[170].mxu1  ;;  %v6523_v0 = vrot.slane %v6394_v9, 5  ;;  %v9191_v32 = vcombine.low %v6510_v52, %v6513_v57 }
 0x533   : > { %v9762_v18 = vpop.f32.mrb[171].mxu1 }
 0x534   : > { %v12727_v8 = vadd.f32 %v9760_v21, %v12504_v45  ;;  %v9763_v11 = vadd.f32 %v9762_v18, %v9761_v42  ;;  %v6506_v45 = vsel %vm11964_vm4, %v6504_v17, %v6505_v4  ;;  %v6392_v18 = vld [vmem:[#allocation3 + $0x74] sm:$0x1]  ;;  %v6390_v17 = vld [vmem:[#allocation3 + $0x6c] sm:$0xe]  ;;  %v6525_v27 = vrot.slane %v6523_v0, 4 }
 0x535   : > { %10298 = vmatmul.mubr.bf16.gmra.mrb[20].mxu1 %v9188_v51  ;;  %v9190_v42 = vcombine.low %v6503_v55, %v6506_v45  ;;  %v6519_v37 = vrot.slane %v6392_v18, 5  ;;  %v6400_v4 = vld [vmem:[#allocation3 + $0x94] sm:$0xf]  ;;  %v9176_v9 = vrot.slane %v6390_v17, 9  ;;  %v6524_v55 = vsel %vm11964_vm4, %v9177_v10, %v6523_v0  ;;  %v6403_v17 = vld [vmem:[#allocation3 + $0xa0] sm:$0xf] }
 0x536   : > { %v12730_v19 = vadd.f32 %v9763_v11, %v12509_v3  ;;  %10301 = vmatprep.mubr.bf16.mxu1 %v9189_v26  ;;  %v6518_v11 = vrot.slane %v6516_v36, 4  ;;  %v6395_v26 = vld [vmem:[#allocation3 + $0x80] sm:$0x1] }
 0x537   : > { %v6526_v40 = vrot.slane %v6395_v26, 5  ;;  %v6517_v57 = vsel %vm11964_vm4, %v9176_v9, %v6516_v36  ;;  %v9179_v9 = vrot.slane %v6399_v63, 9 }
 0x538   : > { %v9764_v7 = vpop.f32.mrb[172].mxu1 }
 0x539   : > { %v9765_v39 = vpop.f32.mrb[173].mxu1  ;;  %v6527_v45 = vsel %vm11964_vm4, %v6525_v27, %v6526_v40  ;;  %v6544_v40 = vrot.slane %v6403_v17, 5  ;;  %v6405_v17 = vld [vmem:[#allocation3 + $0xa8] sm:$0xe] }
 0x53a   : > { %v9766_v60 = vadd.f32 %v9765_v39, %v9764_v7  ;;  %v9767_v3 = vpop.f32.mrb[174].mxu1  ;;  %v6537_v39 = vrot.slane %v6400_v4, 5  ;;  %v9193_v18 = vcombine.low %v6524_v55, %v6527_v45 }
 0x53b   : > { %v9768_v21 = vpop.f32.mrb[175].mxu1 }
 0x53c   : > { %v12741_v51 = vadd.f32 %v9766_v60, %v12526_v53  ;;  %v9769_v48 = vadd.f32 %v9768_v21, %v9767_v3  ;;  %v6520_v53 = vsel %vm11964_vm4, %v6518_v11, %v6519_v37  ;;  %v6398_v21 = vld [vmem:[#allocation3 + $0x8c] sm:$0x1]  ;;  %v6396_v11 = vld [vmem:[#allocation3 + $0x84] sm:$0xe]  ;;  %v6539_v26 = vrot.slane %v6537_v39, 4 }
 0x53d   : > { %10302 = vmatmul.mubr.bf16.gmra.mrb[24].mxu1 %v9190_v42  ;;  %v9192_v3 = vcombine.low %v6517_v57, %v6520_v53  ;;  %v6533_v36 = vrot.slane %v6398_v21, 5  ;;  %v6406_v37 = vld [vmem:[#allocation3 + $0xac] sm:$0xf]  ;;  %v9178_v4 = vrot.slane %v6396_v11, 9  ;;  %v6538_v57 = vsel %vm11964_vm4, %v9179_v9, %v6537_v39  ;;  %v6409_v11 = vld [vmem:[#allocation3 + $0xb8] sm:$0xf] }
 0x53e   : > { %v12744_v2 = vadd.f32 %v9769_v48, %v12531_v24  ;;  %10305 = vmatprep.mubr.bf16.mxu1 %v9191_v32  ;;  %v6532_v48 = vrot.slane %v6530_v25, 4  ;;  %v6401_v32 = vld [vmem:[#allocation3 + $0x98] sm:$0x1] }
 0x53f   : > { %v6540_v0 = vrot.slane %v6401_v32, 5  ;;  %v6531_v45 = vsel %vm11964_vm4, %v9178_v4, %v6530_v25  ;;  %v9181_v4 = vrot.slane %v6405_v17, 9 }
 0x540   : > { %v9770_v54 = vpop.f32.mrb[176].mxu1 }
 0x541   : > { %v9771_v7 = vpop.f32.mrb[177].mxu1  ;;  %v6541_v53 = vsel %vm11964_vm4, %v6539_v26, %v6540_v0  ;;  %v6558_v0 = vrot.slane %v6409_v11, 5  ;;  %v6411_v11 = vld [vmem:[#allocation3 + $0xc0] sm:$0xe] }
 0x542   : > { %v9772_v59 = vadd.f32 %v9771_v7, %v9770_v54  ;;  %v9773_v24 = vpop.f32.mrb[178].mxu1  ;;  %v6551_v7 = vrot.slane %v6406_v37, 5  ;;  %v9195_v21 = vcombine.low %v6538_v57, %v6541_v53 }
 0x543   : > { %v9774_v60 = vpop.f32.mrb[179].mxu1 }
 0x544   : > { %v12755_v42 = vadd.f32 %v9772_v59, %v12548_v15  ;;  %v9775_v52 = vadd.f32 %v9774_v60, %v9773_v24  ;;  %v6534_v15 = vsel %vm11964_vm4, %v6532_v48, %v6533_v36  ;;  %v6404_v60 = vld [vmem:[#allocation3 + $0xa4] sm:$0x1]  ;;  %v6402_v48 = vld [vmem:[#allocation3 + $0x9c] sm:$0xe]  ;;  %v6553_v32 = vrot.slane %v6551_v7, 4 }
 0x545   : > { %10306 = vmatmul.mubr.bf16.gmra.mrb[28].mxu1 %v9192_v3  ;;  %v9194_v24 = vcombine.low %v6531_v45, %v6534_v15  ;;  %v6547_v25 = vrot.slane %v6404_v60, 5  ;;  %v6412_v36 = vld [vmem:[#allocation3 + $0xc4] sm:$0xf]  ;;  %v9180_v37 = vrot.slane %v6402_v48, 9  ;;  %v6552_v45 = vsel %vm11964_vm4, %v9181_v4, %v6551_v7 }
 0x546   : > { %v12758_v27 = vadd.f32 %v9775_v52, %v12553_v30  ;;  %10309 = vmatprep.mubr.bf16.mxu1 %v9193_v18  ;;  %v6546_v52 = vrot.slane %v6544_v40, 4  ;;  %v6407_v18 = vld [vmem:[#allocation3 + $0xb0] sm:$0x1] }
 0x547   : > { %v6554_v39 = vrot.slane %v6407_v18, 5  ;;  %v6545_v53 = vsel %vm11964_vm4, %v9180_v37, %v6544_v40  ;;  %v6413_v18 = vld [vmem:[#allocation3 + $0xc8] sm:$0x1] }
 0x548   : > { %v9776_v41 = vpop.f32.mrb[180].mxu1  ;;  %v6568_v17 = vrot.slane %v6413_v18, 5 }
 0x549   : > { %v9777_v54 = vpop.f32.mrb[181].mxu1  ;;  %v6555_v15 = vsel %vm11964_vm4, %v6553_v32, %v6554_v39  ;;  %v6416_v39 = vld [vmem:[#allocation3 + $0xd4] sm:$0x1] }
 0x54a   : > { %v9778_v10 = vadd.f32 %v9777_v54, %v9776_v41  ;;  %v9779_v30 = vpop.f32.mrb[182].mxu1  ;;  %v6565_v54 = vrot.slane %v6412_v36, 5  ;;  %v6414_v36 = vld [vmem:[#allocation3 + $0xcc] sm:$0xe] }
 0x54b   : > { %v9780_v59 = vpop.f32.mrb[183].mxu1 }
 0x54c   : > { %v12769_v3 = vadd.f32 %v9778_v10, %v12564_v43  ;;  %v9781_v55 = vadd.f32 %v9780_v59, %v9779_v30  ;;  %v6548_v43 = vsel %vm11964_vm4, %v6546_v52, %v6547_v25  ;;  %v6410_v59 = vld [vmem:[#allocation3 + $0xbc] sm:$0x1]  ;;  %v6560_v52 = vrot.slane %v6558_v0, 4 }
 0x54d   : > { %10310 = vmatmul.mubr.bf16.gmra.mrb[32].mxu1 %v9194_v24  ;;  %v9196_v30 = vcombine.low %v6545_v53, %v6548_v43  ;;  %v6415_v24 = vld [vmem:[#allocation3 + $0xd0] sm:$0xf]  ;;  %v6567_v48 = vrot.slane %v6565_v54, 4  ;;  %v6561_v40 = vrot.slane %v6410_v59, 5  ;;  %v6575_v53 = vrot.slane %v6416_v39, 5 }
 0x54e   : > { %v12772_v26 = vadd.f32 %v9781_v55, %v12569_v12  ;;  %10313 = vmatprep.mubr.bf16.mxu1 %v9195_v21  ;;  %v9197_v55 = vcombine.low %v6552_v45, %v6555_v15  ;;  %v6408_v21 = vld [vmem:[#allocation3 + $0xb4] sm:$0xe]  ;;  %v6572_v25 = vrot.slane %v6415_v24, 5 }
 0x54f   : > { %v9182_v7 = vrot.slane %v6408_v21, 9 }
 0x550   : > { %v9782_v63 = vpop.f32.mrb[184].mxu1 }
 0x551   : > { %v9783_v41 = vpop.f32.mrb[185].mxu1  ;;  %v6559_v43 = vsel %vm11964_vm4, %v9182_v7, %v6558_v0 }
 0x552   : > { %v9784_v9 = vadd.f32 %v9783_v41, %v9782_v63  ;;  %v9785_v12 = vpop.f32.mrb[186].mxu1  ;;  %v6562_v63 = vsel %vm11964_vm4, %v6560_v52, %v6561_v40  ;;  %v9183_v41 = vrot.slane %v6411_v11, 9 }
 0x553   : > { %v9786_v10 = vpop.f32.mrb[187].mxu1 }
 0x554   : > { %v12783_v57 = vadd.f32 %v9784_v9, %v12580_v35  ;;  %v9787_v60 = vadd.f32 %v9786_v10, %v9785_v12  ;;  %v9184_v9 = vrot.slane %v6414_v36, 9  ;;  %v6574_v12 = vrot.slane %v6572_v25, 4 }
 0x555   : > { %10314 = vmatmul.mubr.bf16.gmra.mrb[36].mxu1 %v9196_v30  ;;  %v9198_v30 = vcombine.low %v6559_v43, %v6562_v63  ;;  %v6566_v45 = vsel %vm11964_vm4, %v9183_v41, %v6565_v54 }
 0x556   : > { %v12786_v32 = vadd.f32 %v9787_v60, %v12585_v29  ;;  %10317 = vmatprep.mubr.bf16.mxu1 %v9197_v55  ;;  %v6569_v29 = vsel %vm11964_vm4, %v6567_v48, %v6568_v17  ;;  %v6573_v55 = vsel %vm11964_vm4, %v9184_v9, %v6572_v25  ;;  %v6576_v21 = vsel %vm11964_vm4, %v6574_v12, %v6575_v53 }
 0x557   : > { %v9199_v60 = vcombine.low %v6566_v45, %v6569_v29  ;;  %v9200_v48 = vcombine.low %v6573_v55, %v6576_v21 }
 0x558   : > { %v9788_v35 = vpop.f32.mrb[188].mxu1 }
 0x559   : > { %v9789_v37 = vpop.f32.mrb[189].mxu1 }
 0x55a   : > { %v9790_v4 = vadd.f32 %v9789_v37, %v9788_v35  ;;  %v9791_v15 = vpop.f32.mrb[190].mxu1 }
 0x55b   : > { %v9792_v10 = vpop.f32.mrb[191].mxu1 }
 0x55c   : > { %v12797_v59 = vadd.f32 %v9790_v4, %v12596_v46  ;;  %v9793_v24 = vadd.f32 %v9792_v10, %v9791_v15 }
 0x55d   : > { %10318 = vmatmul.mubr.bf16.gmra.mrb[40].mxu1 %v9198_v30 }
 0x55e   : > { %v12800_v0 = vadd.f32 %v9793_v24, %v12601_v5  ;;  %10321 = vmatprep.mubr.bf16.mxu1 %v9199_v60 }
 0x560   : > { %v9794_v52 = vpop.f32.mrb[192].mxu1 }
 0x561   : > { %v9795_v18 = vpop.f32.mrb[193].mxu1 }
 0x562   : > { %v9796_v54 = vadd.f32 %v9795_v18, %v9794_v52  ;;  %v9797_v40 = vpop.f32.mrb[194].mxu1 }
 0x563   : > { %v9798_v46 = vpop.f32.mrb[195].mxu1 }
 0x564   : > { %v12807_v11 = vadd.f32 %v9796_v54, %v12612_v22  ;;  %v9799_v7 = vadd.f32 %v9798_v46, %v9797_v40 }
 0x565   : > { %10322 = vmatmul.mubr.bf16.gmra.mrb[44].mxu1 %v9200_v48 }
 0x566   : > { %v12810_v5 = vadd.f32 %v9799_v7, %v12617_v61 }
 0x568   : > { %v9800_v17 = vpop.f32.mrb[196].mxu1 }
 0x569   : > { %v9801_v36 = vpop.f32.mrb[197].mxu1 }
 0x56a   : > { %v9802_v25 = vadd.f32 %v9801_v36, %v9800_v17  ;;  %v9803_v39 = vpop.f32.mrb[198].mxu1 }
 0x56b   : > { %v9804_v56 = vpop.f32.mrb[199].mxu1 }
 0x56c   : > { %v12813_v35 = vadd.f32 %v9802_v25, %v12628_v62  ;;  %v9805_v63 = vadd.f32 %v9804_v56, %v9803_v39 }
 0x56e   : > { %v12816_v37 = vadd.f32 %v9805_v63, %v12631_v13 }
 0x570   : > { %v9806_v43 = vpop.f32.mrb[200].mxu1 }
 0x571   : > { %v9807_v22 = vpop.f32.mrb[201].mxu1 }
 0x572   : > { %v9808_v41 = vadd.f32 %v9807_v22, %v9806_v43  ;;  %v9809_v29 = vpop.f32.mrb[202].mxu1 }
 0x573   : > { %v9810_v4 = vpop.f32.mrb[203].mxu1 }
 0x574   : > { %v12819_v61 = vadd.f32 %v9808_v41, %v12639_v58  ;;  %v9811_v15 = vadd.f32 %v9810_v4, %v9809_v29 }
 0x576   : > { %v12822_v9 = vadd.f32 %v9811_v15, %v12642_v6 }
 0x578   : > { %v9812_v12 = vpop.f32.mrb[204].mxu1 }
 0x579   : > { %v9813_v53 = vpop.f32.mrb[205].mxu1 }
 0x57a   : > { %v9814_v62 = vadd.f32 %v9813_v53, %v9812_v12  ;;  %v9815_v10 = vpop.f32.mrb[206].mxu1 }
 0x57b   : > { %v9816_v30 = vpop.f32.mrb[207].mxu1 }
 0x57c   : > { %v12825_v13 = vadd.f32 %v9814_v62, %v12649_v1  ;;  %v9817_v45 = vadd.f32 %v9816_v30, %v9815_v10 }
 0x57e   : > { %v12828_v24 = vadd.f32 %v9817_v45, %v12652_v16 }
 0x580   : > { %v9834_v60 = vpop.f32.mrb[208].mxu1 }
 0x581   : > { %v9835_v55 = vpop.f32.mrb[209].mxu1 }
 0x582   : > { %v9836_v58 = vadd.f32 %v9835_v55, %v9834_v60  ;;  %v9837_v21 = vpop.f32.mrb[210].mxu1  ;;  %v12833_v48 = vpop.f32.mrb[32].mxu0 }
 0x583   : > { %v9838_v52 = vpop.f32.mrb[211].mxu1  ;;  %v12838_v1 = vpop.f32.mrb[33].mxu0 }
 0x584   : > { %v9839_v18 = vadd.f32 %v9838_v52, %v9837_v21  ;;  %v12831_v6 = vadd.f32 %v9836_v58, %v12659_v44  ;;  %v12840_v46 = vpop.f32.mrb[34].mxu0 }
 0x585   : > { %v12842_v7 = vpop.f32.mrb[35].mxu0 }
 0x586   : > { %v12836_v54 = vadd.f32 %v9839_v18, %v12662_v50 }
 0x588   : > { %v9840_v40 = vpop.f32.mrb[212].mxu1 }
 0x589   : > { %v9841_v16 = vpop.f32.mrb[213].mxu1 }
 0x58a   : > { %v9842_v17 = vadd.f32 %v9841_v16, %v9840_v40  ;;  %v9843_v36 = vpop.f32.mrb[214].mxu1  ;;  %v12850_v50 = vpop.f32.mrb[36].mxu0 }
 0x58b   : > { %v9844_v25 = vpop.f32.mrb[215].mxu1  ;;  %v12852_v63 = vpop.f32.mrb[37].mxu0 }
 0x58c   : > { %v9845_v39 = vadd.f32 %v9844_v25, %v9843_v36  ;;  %v12845_v44 = vadd.f32 %v9842_v17, %v12669_v34  ;;  %v12854_v22 = vpop.f32.mrb[38].mxu0 }
 0x58d   : > { %v12856_v29 = vpop.f32.mrb[39].mxu0 }
 0x58e   : > { %v12848_v56 = vadd.f32 %v9845_v39, %v12672_v38 }
 0x590   : > { %v9846_v43 = vpop.f32.mrb[216].mxu1 }
 0x591   : > { %v9847_v41 = vpop.f32.mrb[217].mxu1 }
 0x592   : > { %v9848_v4 = vadd.f32 %v9847_v41, %v9846_v43  ;;  %v9849_v15 = vpop.f32.mrb[218].mxu1  ;;  %v12864_v62 = vpop.f32.mrb[40].mxu0 }
 0x593   : > { %v9850_v12 = vpop.f32.mrb[219].mxu1  ;;  %v12866_v10 = vpop.f32.mrb[41].mxu0 }
 0x594   : > { %v9851_v53 = vadd.f32 %v9850_v12, %v9849_v15  ;;  %v12859_v34 = vadd.f32 %v9848_v4, %v12679_v49  ;;  %v12868_v45 = vpop.f32.mrb[42].mxu0 }
 0x595   : > { %v12870_v55 = vpop.f32.mrb[43].mxu0 }
 0x596   : > { %v12862_v38 = vadd.f32 %v9851_v53, %v12682_v28 }
 0x598   : > { %v9852_v30 = vpop.f32.mrb[220].mxu1 }
 0x599   : > { %v9853_v60 = vpop.f32.mrb[221].mxu1 }
 0x59a   : > { %v9854_v58 = vadd.f32 %v9853_v60, %v9852_v30  ;;  %v9855_v21 = vpop.f32.mrb[222].mxu1  ;;  %v12878_v40 = vpop.f32.mrb[44].mxu0 }
 0x59b   : > { %v9856_v52 = vpop.f32.mrb[223].mxu1  ;;  %v12880_v16 = vpop.f32.mrb[45].mxu0 }
 0x59c   : > { %v9857_v18 = vadd.f32 %v9856_v52, %v9855_v21  ;;  %v12873_v49 = vadd.f32 %v9854_v58, %v12689_v20  ;;  %v12882_v36 = vpop.f32.mrb[46].mxu0 }
 0x59d   : > { %v12884_v39 = vpop.f32.mrb[47].mxu0 }
 0x59e   : > { %v12876_v28 = vadd.f32 %v9857_v18, %v12692_v47  ;;  %13323 = vst [vmem:[#allocation6_spill] sm:$0xff] %v12884_v39 }
 0x5a0   : > { %v9858_v17 = vpop.f32.mrb[224].mxu1 }
 0x5a1   : > { %v9859_v25 = vpop.f32.mrb[225].mxu1 }
 0x5a2   : > { %v9860_v43 = vadd.f32 %v9859_v25, %v9858_v17  ;;  %v9861_v41 = vpop.f32.mrb[226].mxu1  ;;  %v12892_v12 = vpop.f32.mrb[48].mxu0 }
 0x5a3   : > { %v9862_v4 = vpop.f32.mrb[227].mxu1  ;;  %13324 = vst [vmem:[#allocation7_spill] sm:$0xff] %v12892_v12  ;;  %v12894_v53 = vpop.f32.mrb[49].mxu0 }
 0x5a4   : > { %v9863_v15 = vadd.f32 %v9862_v4, %v9861_v41  ;;  %v12887_v20 = vadd.f32 %v9860_v43, %v12699_v14  ;;  %13325 = vst [vmem:[#allocation8_spill] sm:$0xff] %v12894_v53  ;;  %v12896_v60 = vpop.f32.mrb[50].mxu0 }
 0x5a5   : > { %13326 = vst [vmem:[#allocation9_spill] sm:$0xff] %v12896_v60  ;;  %v12898_v21 = vpop.f32.mrb[51].mxu0 }
 0x5a6   : > { %v12890_v47 = vadd.f32 %v9863_v15, %v12702_v31  ;;  %13327 = vst [vmem:[#allocation10_spill] sm:$0xff] %v12898_v21 }
 0x5a8   : > { %v9864_v30 = vpop.f32.mrb[228].mxu1 }
 0x5a9   : > { %v9865_v58 = vpop.f32.mrb[229].mxu1 }
 0x5aa   : > { %v9866_v52 = vadd.f32 %v9865_v58, %v9864_v30  ;;  %v9867_v18 = vpop.f32.mrb[230].mxu1  ;;  %v12906_v43 = vpop.f32.mrb[52].mxu0 }
 0x5ab   : > { %v9868_v17 = vpop.f32.mrb[231].mxu1  ;;  %13328 = vst [vmem:[#allocation11_spill] sm:$0xff] %v12906_v43  ;;  %v12908_v41 = vpop.f32.mrb[53].mxu0 }
 0x5ac   : > { %v9869_v25 = vadd.f32 %v9868_v17, %v9867_v18  ;;  %v12901_v14 = vadd.f32 %v9866_v52, %v12713_v33  ;;  %13329 = vst [vmem:[#allocation12_spill] sm:$0xff] %v12908_v41  ;;  %v12910_v15 = vpop.f32.mrb[54].mxu0 }
 0x5ad   : > { %13330 = vst [vmem:[#allocation13_spill] sm:$0xff] %v12910_v15  ;;  %v12912_v53 = vpop.f32.mrb[55].mxu0 }
 0x5ae   : > { %v12904_v31 = vadd.f32 %v9869_v25, %v12716_v23  ;;  %13331 = vst [vmem:[#allocation14_spill] sm:$0xff] %v12912_v53  ;;  %v12920_v23 = vld [vmem:[%s13285_s8] ss:$0 sm:$0xff] }
 0x5b0   : > { %v9870_v4 = vpop.f32.mrb[232].mxu1 }
 0x5b1   : > { %v9871_v60 = vpop.f32.mrb[233].mxu1 }
 0x5b2   : > { %v9872_v30 = vadd.f32 %v9871_v60, %v9870_v4  ;;  %v9873_v58 = vpop.f32.mrb[234].mxu1  ;;  %v10353_v17 = vpop.f32.mrb[56].mxu0  ;;  %v12929_v60 = vld [vmem:[%s13286_s9] ss:$0 sm:$0xff] }
 0x5b3   : > { %v9874_v21 = vpop.f32.mrb[235].mxu1  ;;  %v8554_v25 = vmul.f32 %v10353_v17, %v12920_v23  ;;  %v8490_v15 = vpop.f32.mrb[57].mxu0 }
 0x5b4   : > { %v9875_v18 = vadd.f32 %v9874_v21, %v9873_v58  ;;  %v12915_v33 = vadd.f32 %v9872_v30, %v12727_v8  ;;  %v8552_v8 = vmul.f32 %v12920_v23, %v8490_v15  ;;  %v10354_v21 = vpop.f32.mrb[58].mxu0 }
 0x5b5   : > { %v12933_v30 = vadd.f32 %v12929_v60, %v8554_v25  ;;  %v8493_v58 = vpop.f32.mrb[59].mxu0 }
 0x5b6   : > { %v12923_v52 = vadd.f32 %v9875_v18, %v12730_v19  ;;  %v8555_v19 = vmul.f32 %v10354_v21, %v12920_v23  ;;  %v12937_v17 = vadd.f32 %v12929_v60, %v8552_v8  ;;  %v8553_v43 = vmul.f32 %v12920_v23, %v8493_v58 }
 0x5b7   : > { %13333 = vst [vmem:[#allocation15_spill] sm:$0xff] %v12933_v30 }
 0x5b8   : > { %13332 = vst [vmem:[#allocation5_spill] sm:$0xff] %v12923_v52  ;;  %v9876_v53 = vpop.f32.mrb[236].mxu1  ;;  %13334 = vst [vmem:[#allocation16_spill] sm:$0xff] %v12937_v17  ;;  %v12941_v52 = vadd.f32 %v12929_v60, %v8555_v19  ;;  %v12947_v25 = vadd.f32 %v12929_v60, %v8553_v43 }
 0x5b9   : > { %v9877_v4 = vpop.f32.mrb[237].mxu1 }
 0x5ba   : > { %v9878_v18 = vadd.f32 %v9877_v4, %v9876_v53  ;;  %v9879_v41 = vpop.f32.mrb[238].mxu1  ;;  %13335 = vst [vmem:[#allocation17_spill] sm:$0xff] %v12941_v52  ;;  %13336 = vst [vmem:[#allocation18_spill] sm:$0xff] %v12947_v25 }
 0x5bb   : > { %v9880_v12 = vpop.f32.mrb[239].mxu1  ;;  %v10357_v53 = vpop.f32.mrb[60].mxu0 }
 0x5bc   : > { %v9881_v15 = vadd.f32 %v9880_v12, %v9879_v41  ;;  %v12944_v39 = vadd.f32 %v9878_v18, %v12741_v51  ;;  %v8558_v8 = vmul.f32 %v10357_v53, %v12920_v23  ;;  %v8506_v4 = vpop.f32.mrb[61].mxu0 }
 0x5bd   : > { %v8556_v58 = vmul.f32 %v12920_v23, %v8506_v4  ;;  %v10358_v30 = vpop.f32.mrb[62].mxu0 }
 0x5be   : > { %v12950_v21 = vadd.f32 %v9881_v15, %v12744_v2  ;;  %v12955_v12 = vadd.f32 %v12929_v60, %v8558_v8  ;;  %v8559_v51 = vmul.f32 %v10358_v30, %v12920_v23  ;;  %v8509_v41 = vpop.f32.mrb[63].mxu0 }
 0x5bf   : > { %v12959_v2 = vadd.f32 %v12929_v60, %v8556_v58  ;;  %v8557_v15 = vmul.f32 %v12920_v23, %v8509_v41 }
 0x5c0   : > { %13337 = vst [vmem:[#allocation19_spill] sm:$0xff] %v12950_v21  ;;  %v9882_v17 = vpop.f32.mrb[240].mxu1  ;;  %13338 = vst [vmem:[#allocation20_spill] sm:$0xff] %v12955_v12  ;;  %v12963_v25 = vadd.f32 %v12929_v60, %v8559_v51 }
 0x5c1   : > { %v9883_v19 = vpop.f32.mrb[241].mxu1  ;;  %13339 = vst [vmem:[#allocation21_spill] sm:$0xff] %v12959_v2  ;;  %v12969_v8 = vadd.f32 %v12929_v60, %v8557_v15 }
 0x5c2   : > { %v9884_v43 = vadd.f32 %v9883_v19, %v9882_v17  ;;  %v9885_v18 = vpop.f32.mrb[242].mxu1 }
 0x5c3   : > { %v9886_v53 = vpop.f32.mrb[243].mxu1  ;;  %13340 = vst [vmem:[#allocation22_spill] sm:$0xff] %v12969_v8 }
 0x5c4   : > { %v9887_v4 = vadd.f32 %v9886_v53, %v9885_v18  ;;  %v12966_v52 = vadd.f32 %v9884_v43, %v12755_v42 }
 0x5c6   : > { %v12972_v30 = vadd.f32 %v9887_v4, %v12758_v27 }
 0x5c8   : > { %v9888_v17 = vpop.f32.mrb[244].mxu1 }
 0x5c9   : > { %v9889_v19 = vpop.f32.mrb[245].mxu1 }
 0x5ca   : > { %v9890_v58 = vadd.f32 %v9889_v19, %v9888_v17  ;;  %v9891_v2 = vpop.f32.mrb[246].mxu1 }
 0x5cb   : > { %v9892_v12 = vpop.f32.mrb[247].mxu1 }
 0x5cc   : > { %v9893_v41 = vadd.f32 %v9892_v12, %v9891_v2  ;;  %v12975_v21 = vadd.f32 %v9890_v58, %v12769_v3 }
 0x5ce   : > { %v12978_v51 = vadd.f32 %v9893_v41, %v12772_v26 }
 0x5d0   : > { %v9894_v42 = vpop.f32.mrb[248].mxu1 }
 0x5d1   : > { %v9895_v43 = vpop.f32.mrb[249].mxu1 }
 0x5d2   : > { %v9896_v18 = vadd.f32 %v9895_v43, %v9894_v42  ;;  %v9897_v15 = vpop.f32.mrb[250].mxu1 }
 0x5d3   : > { %v9898_v53 = vpop.f32.mrb[251].mxu1 }
 0x5d4   : > { %v9899_v8 = vadd.f32 %v9898_v53, %v9897_v15  ;;  %v12981_v27 = vadd.f32 %v9896_v18, %v12783_v57 }
 0x5d6   : > { %v12984_v4 = vadd.f32 %v9899_v8, %v12786_v32 }
 0x5d8   : > { %v9900_v17 = vpop.f32.mrb[252].mxu1 }
 0x5d9   : > { %v9901_v12 = vpop.f32.mrb[253].mxu1 }
 0x5da   : > { %v9902_v2 = vadd.f32 %v9901_v12, %v9900_v17  ;;  %v9903_v3 = vpop.f32.mrb[254].mxu1 }
 0x5db   : > { %v9904_v19 = vpop.f32.mrb[255].mxu1 }
 0x5dc   : > { %v9905_v58 = vadd.f32 %v9904_v19, %v9903_v3  ;;  %v12987_v26 = vadd.f32 %v9902_v2, %v12797_v59 }
 0x5de   : > { %v12990_v41 = vadd.f32 %v9905_v58, %v12800_v0 }
 0x5e0   : > { %v9906_v42 = vpop.f32.mrb[0].mxu1 }
 0x5e1   : > { %v9907_v43 = vpop.f32.mrb[1].mxu1 }
 0x5e2   : > { %v9908_v15 = vadd.f32 %v9907_v43, %v9906_v42  ;;  %v9909_v57 = vpop.f32.mrb[2].mxu1 }
 0x5e3   : > { %v9910_v18 = vpop.f32.mrb[3].mxu1 }
 0x5e4   : > { %v9911_v53 = vadd.f32 %v9910_v18, %v9909_v57  ;;  %v12993_v32 = vadd.f32 %v9908_v15, %v12807_v11 }
 0x5e6   : > { %v12996_v8 = vadd.f32 %v9911_v53, %v12810_v5 }
 0x5e8   : > { %v9912_v17 = vpop.f32.mrb[4].mxu1 }
 0x5e9   : > { %v9913_v12 = vpop.f32.mrb[5].mxu1 }
 0x5ea   : > { %v9914_v3 = vadd.f32 %v9913_v12, %v9912_v17  ;;  %v9915_v59 = vpop.f32.mrb[6].mxu1 }
 0x5eb   : > { %v9916_v2 = vpop.f32.mrb[7].mxu1 }
 0x5ec   : > { %v9917_v19 = vadd.f32 %v9916_v2, %v9915_v59  ;;  %v12999_v0 = vadd.f32 %v9914_v3, %v12813_v35 }
 0x5ee   : > { %v13002_v58 = vadd.f32 %v9917_v19, %v12816_v37 }
 0x5f0   : > { %v9918_v42 = vpop.f32.mrb[8].mxu1 }
 0x5f1   : > { %v9919_v43 = vpop.f32.mrb[9].mxu1 }
 0x5f2   : > { %v9920_v57 = vadd.f32 %v9919_v43, %v9918_v42  ;;  %v9921_v11 = vpop.f32.mrb[10].mxu1  ;;  %v8530_v42 = vmul.f32 %v12833_v48, %v12920_v23  ;;  %v8528_v43 = vmul.f32 %v12920_v23, %v12838_v1 }
 0x5f3   : > { %v9922_v15 = vpop.f32.mrb[11].mxu1 }
 0x5f4   : > { %v9923_v18 = vadd.f32 %v9922_v15, %v9921_v11  ;;  %v13005_v5 = vadd.f32 %v9920_v57, %v12819_v61  ;;  %v8569_v48 = vadd.f32 %v12929_v60, %v8530_v42 }
 0x5f6   : > { %v13008_v53 = vadd.f32 %v9923_v18, %v12822_v9  ;;  %v13021_v9 = vld [vmem:[%s13282_s5] ss:$0 sm:$0xff] }
 0x5f8   : > { %v9924_v17 = vpop.f32.mrb[12].mxu1 }
 0x5f9   : > { %v9925_v12 = vpop.f32.mrb[13].mxu1 }
 0x5fa   : > { %v9926_v59 = vadd.f32 %v9925_v12, %v9924_v17  ;;  %v9927_v35 = vpop.f32.mrb[14].mxu1  ;;  %v8531_v17 = vmul.f32 %v12840_v46, %v12920_v23 }
 0x5fb   : > { %v9928_v3 = vpop.f32.mrb[15].mxu1 }
 0x5fc   : > { %v9929_v2 = vadd.f32 %v9928_v3, %v9927_v35  ;;  %v13011_v37 = vadd.f32 %v9926_v59, %v12825_v13  ;;  %v8567_v35 = vadd.f32 %v12929_v60, %v8528_v43  ;;  %v8532_v43 = vmul.f32 %v12920_v23, %v12852_v63 }
 0x5fe   : > { %v13014_v19 = vadd.f32 %v9929_v2, %v12828_v24  ;;  %v13030_v24 = vld [vmem:[%s13283_s6] ss:$0 sm:$0xff] }
 0x600   : > { %v10295_v61 = vpop.f32.mrb[16].mxu1 }
 0x601   : > { %v8064_v57 = vadd.f32 %v10295_v61, %v12845_v44  ;;  %v8055_v11 = vpop.f32.mrb[17].mxu1  ;;  %v8534_v61 = vmul.f32 %v12850_v50, %v12920_v23 }
 0x602   : > { %v8056_v13 = vadd.f32 %v8055_v11, %v12831_v6  ;;  %v10296_v15 = vpop.f32.mrb[18].mxu1  ;;  %v8529_v6 = vmul.f32 %v12920_v23, %v12842_v7 }
 0x603   : > { %v8191_v18 = vmul.f32 %v13021_v9, %v8064_v57  ;;  %v8067_v1 = vadd.f32 %v10296_v15, %v12848_v56  ;;  %v8058_v12 = vpop.f32.mrb[19].mxu1  ;;  %v8570_v56 = vadd.f32 %v12929_v60, %v8531_v17 }
 0x604   : > { %v8189_v44 = vmul.f32 %v13021_v9, %v8056_v13  ;;  %v8059_v59 = vadd.f32 %v8058_v12, %v12836_v54  ;;  %v8568_v54 = vadd.f32 %v12929_v60, %v8529_v6 }
 0x605   : > { %v8192_v3 = vmul.f32 %v13021_v9, %v8067_v1  ;;  %v8230_v2 = vadd.f32 %v13030_v24, %v8191_v18 }
 0x606   : > { %v8190_v42 = vmul.f32 %v13021_v9, %v8059_v59  ;;  %v8228_v46 = vadd.f32 %v13030_v24, %v8189_v44  ;;  %v8573_v59 = vadd.f32 %v12929_v60, %v8534_v61 }
 0x607   : > { %v8601_v57 = vadd.f32 %v8569_v48, %v8230_v2  ;;  %v8231_v7 = vadd.f32 %v13030_v24, %v8192_v3  ;;  %v8535_v3 = vmul.f32 %v12854_v22, %v12920_v23  ;;  %v8571_v2 = vadd.f32 %v12929_v60, %v8532_v43 }
 0x608   : > { %v10299_v11 = vpop.f32.mrb[20].mxu1  ;;  %v8599_v13 = vadd.f32 %v8567_v35, %v8228_v46  ;;  %v8229_v15 = vadd.f32 %v13030_v24, %v8190_v42 }
 0x609   : > { %v8080_v18 = vadd.f32 %v10299_v11, %v12873_v49  ;;  %v8071_v1 = vpop.f32.mrb[21].mxu1  ;;  %v8602_v12 = vadd.f32 %v8570_v56, %v8231_v7  ;;  %v8574_v7 = vadd.f32 %v12929_v60, %v8535_v3 }
 0x60a   : > { %v8072_v17 = vadd.f32 %v8071_v1, %v12859_v34  ;;  %v10300_v44 = vpop.f32.mrb[22].mxu1  ;;  %v8631_v50 = vmax.f32 %v8599_v13, 0.0  ;;  %v8600_v48 = vadd.f32 %v8568_v54, %v8229_v15  ;;  %v8533_v34 = vmul.f32 %v12920_v23, %v12856_v29 }
 0x60b   : > { %v8195_v6 = vmul.f32 %v13021_v9, %v8080_v18  ;;  %v8083_v63 = vadd.f32 %v10300_v44, %v12876_v28  ;;  %v8074_v35 = vpop.f32.mrb[23].mxu1  ;;  %v8538_v54 = vmul.f32 %v12864_v62, %v12920_v23  ;;  %v8536_v13 = vmul.f32 %v12920_v23, %v12866_v10 }
 0x60c   : > { %v8193_v49 = vmul.f32 %v13021_v9, %v8072_v17  ;;  %v8075_v42 = vadd.f32 %v8074_v35, %v12862_v38  ;;  %8663 = vxpose.xlu0.b32.start [1/16] %v8631_v50, 128  ;;  %v8632_v22 = vmax.f32 %v8600_v48, 0.0  ;;  %v8572_v38 = vadd.f32 %v12929_v60, %v8533_v34 }
 0x60d   : > { %v8196_v46 = vmul.f32 %v13021_v9, %v8083_v63  ;;  %v8234_v56 = vadd.f32 %v13030_v24, %v8195_v6  ;;  %v8633_v48 = vmax.f32 %v8601_v57, 0.0  ;;  %v8577_v6 = vadd.f32 %v12929_v60, %v8538_v54 }
 0x60e   : > { %v8194_v61 = vmul.f32 %v13021_v9, %v8075_v42  ;;  %v8232_v28 = vadd.f32 %v13030_v24, %v8193_v49  ;;  %v8539_v10 = vmul.f32 %v12868_v45, %v12920_v23  ;;  %v8634_v45 = vmax.f32 %v8602_v12, 0.0 }
 0x60f   : > { %v13073_v11 = vadd.f32 %v8573_v59, %v8234_v56  ;;  %v8235_v29 = vadd.f32 %v13030_v24, %v8196_v46  ;;  %v8542_v56 = vmul.f32 %v12878_v40, %v12920_v23 }
 0x610   : > { %v10303_v43 = vpop.f32.mrb[24].mxu1  ;;  %8664 = vxpose.xlu0.b32.cont [2/16] %v8632_v22, 128  ;;  %v8603_v15 = vadd.f32 %v8571_v2, %v8232_v28  ;;  %v8233_v18 = vadd.f32 %v13030_v24, %v8194_v61  ;;  %v8578_v46 = vadd.f32 %v12929_v60, %v8539_v10  ;;  %v8540_v28 = vmul.f32 %v12920_v23, %v12880_v16 }
 0x611   : > { %v8096_v1 = vadd.f32 %v10303_v43, %v12901_v14  ;;  %v8087_v17 = vpop.f32.mrb[25].mxu1  ;;  %v13081_v44 = vadd.f32 %v8574_v7, %v8235_v29  ;;  %v8575_v14 = vadd.f32 %v12929_v60, %v8536_v13 }
 0x612   : > { %v8088_v62 = vadd.f32 %v8087_v17, %v12887_v20  ;;  %v10304_v50 = vpop.f32.mrb[26].mxu1  ;;  %v8604_v59 = vadd.f32 %v8572_v38, %v8233_v18  ;;  %v8537_v20 = vmul.f32 %v12920_v23, %v12870_v55  ;;  %v8635_v13 = vmax.f32 %v8603_v15, 0.0  ;;  %v13343_v15 = vld [vmem:[#allocation5_spill] sm:$0xff] }
 0x613   : > { %v8199_v3 = vmul.f32 %v13021_v9, %v8096_v1  ;;  %v8099_v63 = vadd.f32 %v10304_v50, %v12904_v31  ;;  %v8090_v35 = vpop.f32.mrb[27].mxu1  ;;  %v8581_v1 = vadd.f32 %v12929_v60, %v8542_v56  ;;  %v8543_v17 = vmul.f32 %v12882_v36, %v12920_v23 }
 0x614   : > { %v8197_v2 = vmul.f32 %v13021_v9, %v8088_v62  ;;  %v8091_v57 = vadd.f32 %v8090_v35, %v12890_v47  ;;  %8665 = vxpose.xlu0.b32.cont [3/16] %v8633_v48, 128  ;;  %v8576_v47 = vadd.f32 %v12929_v60, %v8537_v20  ;;  %v13341_v62 = vld [vmem:[#allocation19_spill] sm:$0xff]  ;;  %v8636_v36 = vmax.f32 %v8604_v59, 0.0 }
 0x615   : > { %v8200_v49 = vmul.f32 %v13021_v9, %v8099_v63  ;;  %v8238_v34 = vadd.f32 %v13030_v24, %v8199_v3  ;;  %v13342_v3 = vld [vmem:[#allocation6_spill] sm:$0xff]  ;;  %v8582_v20 = vadd.f32 %v12929_v60, %v8543_v17 }
 0x616   : > { %v8198_v42 = vmul.f32 %v13021_v9, %v8091_v57  ;;  %v8236_v31 = vadd.f32 %v13030_v24, %v8197_v2  ;;  %v13344_v57 = vld [vmem:[#allocation7_spill] sm:$0xff] }
 0x617   : > { %v13101_v61 = vadd.f32 %v8577_v6, %v8238_v34  ;;  %v8239_v55 = vadd.f32 %v13030_v24, %v8200_v49  ;;  %v8546_v49 = vmul.f32 %v13344_v57, %v12920_v23 }
 0x618   : > { %v10307_v22 = vpop.f32.mrb[28].mxu1  ;;  %8666 = vxpose.xlu0.b32.cont [4/16] %v8634_v45, 128  ;;  %v13107_v7 = vadd.f32 %v8575_v14, %v8236_v31  ;;  %v8237_v12 = vadd.f32 %v13030_v24, %v8198_v42 }
 0x619   : > { %v8112_v54 = vadd.f32 %v10307_v22, %v12944_v39  ;;  %v8103_v29 = vpop.f32.mrb[29].mxu1  ;;  %v13111_v38 = vadd.f32 %v8578_v46, %v8239_v55  ;;  %v8579_v39 = vadd.f32 %v12929_v60, %v8540_v28  ;;  %v13345_v46 = vld [vmem:[#allocation8_spill] sm:$0xff] }
 0x61a   : > { %v8104_v40 = vadd.f32 %v8103_v29, %v12915_v33  ;;  %v10308_v43 = vpop.f32.mrb[30].mxu1  ;;  %v13114_v18 = vadd.f32 %v8576_v47, %v8237_v12  ;;  %v8541_v33 = vmul.f32 %v12920_v23, %v13342_v3  ;;  %v8544_v56 = vmul.f32 %v12920_v23, %v13345_v46  ;;  %v13351_v46 = vld [vmem:[#allocation14_spill] sm:$0xff] }
 0x61b   : > { %v8203_v16 = vmul.f32 %v13021_v9, %v8112_v54  ;;  %v8115_v50 = vadd.f32 %v10308_v43, %v13341_v62  ;;  %v8106_v48 = vpop.f32.mrb[31].mxu1  ;;  %v8637_v29 = vmax.f32 %v13073_v11, 0.0  ;;  %v8585_v43 = vadd.f32 %v12929_v60, %v8546_v49 }
 0x61c   : > { %v8201_v6 = vmul.f32 %v13021_v9, %v8104_v40  ;;  %v8107_v10 = vadd.f32 %v8106_v48, %v13343_v15  ;;  %8667 = vxpose.xlu0.b32.cont [5/16] %v8635_v13, 128  ;;  %v8580_v45 = vadd.f32 %v12929_v60, %v8541_v33  ;;  %v8583_v11 = vadd.f32 %v12929_v60, %v8544_v56 }
 0x61d   : > { %v8204_v63 = vmul.f32 %v13021_v9, %v8115_v50  ;;  %v8242_v35 = vadd.f32 %v13030_v24, %v8203_v16  ;;  %v13347_v50 = vld [vmem:[#allocation10_spill] sm:$0xff]  ;;  %v8638_v33 = vmax.f32 %v13081_v44, 0.0  ;;  %v8549_v56 = vmul.f32 %v12920_v23, %v13351_v46 }
 0x61e   : > { %v8202_v14 = vmul.f32 %v13021_v9, %v8107_v10  ;;  %v8240_v2 = vadd.f32 %v13030_v24, %v8201_v6  ;;  %v13348_v10 = vld [vmem:[#allocation11_spill] sm:$0xff] }
 0x61f   : > { %v13133_v34 = vadd.f32 %v8581_v1, %v8242_v35  ;;  %v8243_v42 = vadd.f32 %v13030_v24, %v8204_v63  ;;  %v13346_v1 = vld [vmem:[#allocation9_spill] sm:$0xff]  ;;  %v8550_v63 = vmul.f32 %v13348_v10, %v12920_v23 }
 0x620   : > { %v10311_v31 = vpop.f32.mrb[32].mxu1  ;;  %8668 = vxpose.xlu0.b32.cont [6/16] %v8636_v36, 128  ;;  %v13139_v55 = vadd.f32 %v8579_v39, %v8240_v2  ;;  %v8241_v59 = vadd.f32 %v13030_v24, %v8202_v14  ;;  %v8547_v16 = vmul.f32 %v13346_v1, %v12920_v23  ;;  %v13349_v2 = vld [vmem:[#allocation12_spill] sm:$0xff] }
 0x621   : > { %v8128_v47 = vadd.f32 %v10311_v31, %v12975_v21  ;;  %v8119_v22 = vpop.f32.mrb[33].mxu1  ;;  %v13143_v28 = vadd.f32 %v8582_v20, %v8243_v42  ;;  %v8548_v20 = vmul.f32 %v12920_v23, %v13349_v2 }
 0x622   : > { %v8120_v12 = vadd.f32 %v8119_v22, %v12966_v52  ;;  %v10312_v54 = vpop.f32.mrb[34].mxu1  ;;  %v13147_v40 = vadd.f32 %v8580_v45, %v8241_v59  ;;  %v8545_v52 = vmul.f32 %v12920_v23, %v13347_v50  ;;  %v8586_v15 = vadd.f32 %v12929_v60, %v8547_v16  ;;  %v13350_v45 = vld [vmem:[#allocation13_spill] sm:$0xff] }
 0x623   : > { %v8207_v13 = vmul.f32 %v13021_v9, %v8128_v47  ;;  %v8131_v17 = vadd.f32 %v10312_v54, %v12978_v51  ;;  %v8122_v21 = vpop.f32.mrb[35].mxu1  ;;  %v8551_v31 = vmul.f32 %v13350_v45, %v12920_v23  ;;  %v8639_v54 = vmax.f32 %v13107_v7, 0.0 }
 0x624   : > { %v8205_v62 = vmul.f32 %v13021_v9, %v8120_v12  ;;  %v8123_v48 = vadd.f32 %v8122_v21, %v12972_v30  ;;  %8669 = vxpose.xlu0.b32.cont [7/16] %v8637_v29, 128  ;;  %v8584_v14 = vadd.f32 %v12929_v60, %v8545_v52  ;;  %v8587_v23 = vadd.f32 %v12929_v60, %v8548_v20 }
 0x625   : > { %v8208_v39 = vmul.f32 %v13021_v9, %v8131_v17  ;;  %v8246_v6 = vadd.f32 %v13030_v24, %v8207_v13  ;;  %v8590_v7 = vadd.f32 %v12929_v60, %v8551_v31  ;;  %v8588_v21 = vadd.f32 %v12929_v60, %v8549_v56 }
 0x626   : > { %v8206_v3 = vmul.f32 %v13021_v9, %v8123_v48  ;;  %v8244_v51 = vadd.f32 %v13030_v24, %v8205_v62  ;;  %v8640_v52 = vmax.f32 %v13114_v18, 0.0 }
 0x627   : > { %v8617_v35 = vadd.f32 %v8585_v43, %v8246_v6  ;;  %v8247_v30 = vadd.f32 %v13030_v24, %v8208_v39 }
 0x628   : > { %v10315_v36 = vpop.f32.mrb[36].mxu1  ;;  %8670 = vxpose.xlu0.b32.cont [8/16] %v8638_v33, 128  ;;  %v8615_v57 = vadd.f32 %v8583_v11, %v8244_v51  ;;  %v8245_v44 = vadd.f32 %v13030_v24, %v8206_v3 }
 0x629   : > { %v8144_v49 = vadd.f32 %v10315_v36, %v12987_v26  ;;  %v8135_v42 = vpop.f32.mrb[37].mxu1  ;;  %v8618_v59 = vadd.f32 %v8586_v15, %v8247_v30  ;;  %v8589_v26 = vadd.f32 %v12929_v60, %v8550_v63  ;;  %v8649_v18 = vmax.f32 %v8617_v35, 0.0 }
 0x62a   : > { %v8136_v47 = vadd.f32 %v8135_v42, %v12981_v27  ;;  %v10316_v22 = vpop.f32.mrb[38].mxu1  ;;  %v8647_v12 = vmax.f32 %v8615_v57, 0.0  ;;  %v8616_v29 = vadd.f32 %v8584_v14, %v8245_v44  ;;  %v8641_v63 = vmax.f32 %v13101_v61, 0.0  ;;  %v13352_v42 = vld [vmem:[#allocation15_spill] sm:$0xff] }
 0x62b   : > { %v8211_v43 = vmul.f32 %v13021_v9, %v8144_v49  ;;  %v8147_v13 = vadd.f32 %v10316_v22, %v12990_v41  ;;  %v8138_v1 = vpop.f32.mrb[39].mxu1  ;;  %v8650_v44 = vmax.f32 %v8618_v59, 0.0  ;;  %v8642_v61 = vmax.f32 %v13111_v38, 0.0 }
 0x62c   : > { %v8209_v16 = vmul.f32 %v13021_v9, %v8136_v47  ;;  %v8139_v17 = vadd.f32 %v8138_v1, %v12984_v4  ;;  %8695 = vxpose.xlu1.b32.start [1/16] %v8647_v12, 128  ;;  %8671 = vxpose.xlu0.b32.cont [9/16] %v8639_v54, 128  ;;  %v8648_v50 = vmax.f32 %v8616_v29, 0.0  ;;  %v13354_v12 = vld [vmem:[#allocation17_spill] sm:$0xff] }
 0x62d   : > { %v8212_v27 = vmul.f32 %v13021_v9, %v8147_v13  ;;  %v8250_v62 = vadd.f32 %v13030_v24, %v8211_v43  ;;  %v8643_v43 = vmax.f32 %v13139_v55, 0.0  ;;  %v13355_v13 = vld [vmem:[#allocation18_spill] sm:$0xff] }
 0x62e   : > { %v8210_v41 = vmul.f32 %v13021_v9, %v8139_v17  ;;  %v8248_v48 = vadd.f32 %v13030_v24, %v8209_v16 }
 0x62f   : > { %v13192_v4 = vadd.f32 %v8589_v26, %v8250_v62  ;;  %v8251_v11 = vadd.f32 %v13030_v24, %v8212_v27 }
 0x630   : > { %v10319_v39 = vpop.f32.mrb[40].mxu1  ;;  %8696 = vxpose.xlu1.b32.cont [2/16] %v8648_v50, 128  ;;  %8672 = vxpose.xlu0.b32.cont [10/16] %v8640_v52, 128  ;;  %v8619_v6 = vadd.f32 %v8587_v23, %v8248_v48  ;;  %v8249_v3 = vadd.f32 %v13030_v24, %v8210_v41  ;;  %v13356_v41 = vld [vmem:[#allocation20_spill] sm:$0xff] }
 0x631   : > { %v8160_v60 = vadd.f32 %v10319_v39, %v12999_v0  ;;  %v8151_v33 = vpop.f32.mrb[41].mxu1  ;;  %v8622_v51 = vadd.f32 %v8590_v7, %v8251_v11  ;;  %v8653_v39 = vmax.f32 %v13192_v4, 0.0 }
 0x632   : > { %v8152_v15 = vadd.f32 %v8151_v33, %v12993_v32  ;;  %v10320_v10 = vpop.f32.mrb[42].mxu1  ;;  %v8620_v30 = vadd.f32 %v8588_v21, %v8249_v3  ;;  %v8651_v29 = vmax.f32 %v8619_v6, 0.0  ;;  %v8644_v21 = vmax.f32 %v13147_v40, 0.0  ;;  %v13358_v6 = vld [vmem:[#allocation22_spill] sm:$0xff] }
 0x633   : > { %v8215_v14 = vmul.f32 %v13021_v9, %v8160_v60  ;;  %v8163_v36 = vadd.f32 %v10320_v10, %v13002_v58  ;;  %v8154_v2 = vpop.f32.mrb[43].mxu1  ;;  %v8654_v3 = vmax.f32 %v8622_v51, 0.0  ;;  %v8646_v60 = vmax.f32 %v13143_v28, 0.0 }
 0x634   : > { %v8213_v20 = vmul.f32 %v13021_v9, %v8152_v15  ;;  %v8155_v57 = vadd.f32 %v8154_v2, %v12996_v8  ;;  %8697 = vxpose.xlu1.b32.cont [3/16] %v8649_v18, 128  ;;  %8673 = vxpose.xlu0.b32.cont [11/16] %v8641_v63, 128  ;;  %v13353_v8 = vld [vmem:[#allocation16_spill] sm:$0xff]  ;;  %v8652_v55 = vmax.f32 %v8620_v30, 0.0 }
 0x635   : > { %v8216_v0 = vmul.f32 %v13021_v9, %v8163_v36  ;;  %v8254_v32 = vadd.f32 %v13030_v24, %v8215_v14 }
 0x636   : > { %v8214_v35 = vmul.f32 %v13021_v9, %v8155_v57  ;;  %v8252_v49 = vadd.f32 %v13030_v24, %v8213_v20 }
 0x637   : > { %v8625_v58 = vadd.f32 %v13352_v42, %v8254_v32  ;;  %v8255_v45 = vadd.f32 %v13030_v24, %v8216_v0 }
 0x638   : > { %v10323_v31 = vpop.f32.mrb[44].mxu1  ;;  %8698 = vxpose.xlu1.b32.cont [4/16] %v8650_v44, 128  ;;  %8674 = vxpose.xlu0.b32.cont [12/16] %v8642_v61, 128  ;;  %v8623_v46 = vadd.f32 %v13353_v8, %v8252_v49  ;;  %v8253_v56 = vadd.f32 %v13030_v24, %v8214_v35 }
 0x639   : > { %v8176_v47 = vadd.f32 %v10323_v31, %v13011_v37  ;;  %v8167_v22 = vpop.f32.mrb[45].mxu1  ;;  %v8626_v59 = vadd.f32 %v13354_v12, %v8255_v45 }
 0x63a   : > { %v8168_v38 = vadd.f32 %v8167_v22, %v13005_v5  ;;  %v10324_v54 = vpop.f32.mrb[46].mxu1  ;;  %v8624_v26 = vadd.f32 %v13355_v13, %v8253_v56  ;;  %v8655_v33 = vmax.f32 %v8623_v46, 0.0 }
 0x63b   : > { %v8219_v1 = vmul.f32 %v13021_v9, %v8176_v47  ;;  %v8179_v16 = vadd.f32 %v10324_v54, %v13014_v19  ;;  %v8170_v17 = vpop.f32.mrb[47].mxu1 }
 0x63c   : > { %v8217_v23 = vmul.f32 %v13021_v9, %v8168_v38  ;;  %v8171_v37 = vadd.f32 %v8170_v17, %v13008_v53  ;;  %8699 = vxpose.xlu1.b32.cont [5/16] %v8651_v29, 128  ;;  %8675 = vxpose.xlu0.b32.cont [13/16] %v8643_v43, 128  ;;  %v13357_v53 = vld [vmem:[#allocation21_spill] sm:$0xff]  ;;  %v8656_v15 = vmax.f32 %v8624_v26, 0.0 }
 0x63d   : > { %v8220_v27 = vmul.f32 %v13021_v9, %v8179_v16  ;;  %v8258_v5 = vadd.f32 %v13030_v24, %v8219_v1 }
 0x63e   : > { %v8218_v7 = vmul.f32 %v13021_v9, %v8171_v37  ;;  %v8256_v62 = vadd.f32 %v13030_v24, %v8217_v23  ;;  %v8645_v9 = vmax.f32 %v13133_v34, 0.0 }
 0x63f   : > { %v8629_v19 = vadd.f32 %v13356_v41, %v8258_v5  ;;  %v8259_v50 = vadd.f32 %v13030_v24, %v8220_v27 }
 0x640   : > { %8700 = vxpose.xlu1.b32.cont [6/16] %v8652_v55, 128  ;;  %8676 = vxpose.xlu0.b32.cont [14/16] %v8644_v21, 128  ;;  %v8627_v52 = vadd.f32 %v13357_v53, %v8256_v62  ;;  %v8257_v48 = vadd.f32 %v13030_v24, %v8218_v7  ;;  %v8657_v24 = vmax.f32 %v8625_v58, 0.0 }
 0x641   : > { %v8630_v11 = vadd.f32 %v12963_v25, %v8259_v50  ;;  %v8658_v25 = vmax.f32 %v8626_v59, 0.0  ;;  %v8661_v10 = vmax.f32 %v8629_v19, 0.0 }
 0x642   : > { %v8628_v40 = vadd.f32 %v13358_v6, %v8257_v48  ;;  %v8659_v4 = vmax.f32 %v8627_v52, 0.0 }
 0x643   : > { %v8662_v51 = vmax.f32 %v8630_v11, 0.0 }
 0x644   : > { %8701 = vxpose.xlu1.b32.cont [7/16] %v8653_v39, 128  ;;  %8677 = vxpose.xlu0.b32.cont [15/16] %v8645_v9, 128  ;;  %v8660_v34 = vmax.f32 %v8628_v40, 0.0 }
 0x648   : > { %8702 = vxpose.xlu1.b32.cont [8/16] %v8654_v3, 128  ;;  %8678 = vxpose.xlu0.b32.end [16/16] %v8646_v60, 128 }
 0x64c   : > { %8703 = vxpose.xlu1.b32.cont [9/16] %v8655_v33, 128 }
 0x650   : > { %8704 = vxpose.xlu1.b32.cont [10/16] %v8656_v15, 128 }
 0x654   : > { %8705 = vxpose.xlu1.b32.cont [11/16] %v8657_v24, 128 }
 0x658   : > { %8706 = vxpose.xlu1.b32.cont [12/16] %v8658_v25, 128 }
 0x65c   : > { %8707 = vxpose.xlu1.b32.cont [13/16] %v8659_v4, 128 }
 0x660   : > { %8708 = vxpose.xlu1.b32.cont [14/16] %v8660_v34, 128 }
 0x664   : > { %8709 = vxpose.xlu1.b32.cont [15/16] %v8661_v10, 128 }
 0x668   : > { %8710 = vxpose.xlu1.b32.end [16/16] %v8662_v51, 128 }
 0x68c   : > { %v8679_v28 = vpop.trf.xlu0 }
 0x68d   : > { %8727 = vst [vmem:[%s13240_s12] sm:$0xff] %v8679_v28 }
 0x690   : > { %v8680_v18 = vpop.trf.xlu0 }
 0x691   : > { %8729 = vst [vmem:[%s13240_s12 + $0x10] sm:$0xff] %v8680_v18 }
 0x694   : > { %v8681_v63 = vpop.trf.xlu0 }
 0x695   : > { %8731 = vst [vmem:[%s13240_s12 + $0x20] sm:$0xff] %v8681_v63 }
 0x698   : > { %v8682_v30 = vpop.trf.xlu0 }
 0x699   : > { %8733 = vst [vmem:[%s13240_s12 + $0x30] sm:$0xff] %v8682_v30 }
 0x69c   : > { %v8683_v14 = vpop.trf.xlu0 }
 0x69d   : > { %8735 = vst [vmem:[%s13240_s12 + $0x40] sm:$0xff] %v8683_v14 }
 0x6a0   : > { %v8684_v36 = vpop.trf.xlu0 }
 0x6a1   : > { %8737 = vst [vmem:[%s13240_s12 + $0x50] sm:$0xff] %v8684_v36 }
 0x6a4   : > { %v8685_v2 = vpop.trf.xlu0 }
 0x6a5   : > { %8739 = vst [vmem:[%s13240_s12 + $0x60] sm:$0xff] %v8685_v2 }
 0x6a8   : > { %v8686_v20 = vpop.trf.xlu0 }
 0x6a9   : > { %8741 = vst [vmem:[%s13240_s12 + $0x70] sm:$0xff] %v8686_v20 }
 0x6ac   : > { %v8711_v57 = vpop.trf.xlu1  ;;  %v8687_v0 = vpop.trf.xlu0 }
 0x6ad   : > { %8728 = vst [vmem:[%s13240_s12 + $0x8] sm:$0xff] %v8711_v57  ;;  %8743 = vst [vmem:[%s13240_s12 + $0x80] sm:$0xff] %v8687_v0 }
 0x6b0   : > { %v8712_v32 = vpop.trf.xlu1  ;;  %v8688_v35 = vpop.trf.xlu0 }
 0x6b1   : > { %8730 = vst [vmem:[%s13240_s12 + $0x18] sm:$0xff] %v8712_v32  ;;  %8745 = vst [vmem:[%s13240_s12 + $0x90] sm:$0xff] %v8688_v35 }
 0x6b4   : > { %v8713_v44 = vpop.trf.xlu1  ;;  %v8689_v61 = vpop.trf.xlu0 }
 0x6b5   : > { %8732 = vst [vmem:[%s13240_s12 + $0x28] sm:$0xff] %v8713_v44  ;;  %8747 = vst [vmem:[%s13240_s12 + $0xa0] sm:$0xff] %v8689_v61 }
 0x6b8   : > { %v8714_v49 = vpop.trf.xlu1  ;;  %v8690_v42 = vpop.trf.xlu0 }
 0x6b9   : > { %8734 = vst [vmem:[%s13240_s12 + $0x38] sm:$0xff] %v8714_v49  ;;  %8749 = vst [vmem:[%s13240_s12 + $0xb0] sm:$0xff] %v8690_v42 }
 0x6bc   : > { %v8715_v58 = vpop.trf.xlu1  ;;  %v8691_v45 = vpop.trf.xlu0 }
 0x6bd   : > { %8736 = vst [vmem:[%s13240_s12 + $0x48] sm:$0xff] %v8715_v58  ;;  %8751 = vst [vmem:[%s13240_s12 + $0xc0] sm:$0xff] %v8691_v45 }
 0x6c0   : > { %v8716_v31 = vpop.trf.xlu1  ;;  %v8692_v8 = vpop.trf.xlu0 }
 0x6c1   : > { %8738 = vst [vmem:[%s13240_s12 + $0x58] sm:$0xff] %v8716_v31  ;;  %8753 = vst [vmem:[%s13240_s12 + $0xd0] sm:$0xff] %v8692_v8 }
 0x6c4   : > { %v8717_v46 = vpop.trf.xlu1  ;;  %v8693_v56 = vpop.trf.xlu0 }
 0x6c5   : > { %8740 = vst [vmem:[%s13240_s12 + $0x68] sm:$0xff] %v8717_v46  ;;  %8755 = vst [vmem:[%s13240_s12 + $0xe0] sm:$0xff] %v8693_v56 }
 0x6c8   : > { %v8718_v47 = vpop.trf.xlu1  ;;  %v8694_v22 = vpop.trf.xlu0 }
 0x6c9   : > { %8742 = vst [vmem:[%s13240_s12 + $0x78] sm:$0xff] %v8718_v47  ;;  %8757 = vst [vmem:[%s13240_s12 + $0xf0] sm:$0xff] %v8694_v22 }
 0x6cc   : > { %v8719_v12 = vpop.trf.xlu1 }
 0x6cd   : > { %8744 = vst [vmem:[%s13240_s12 + $0x88] sm:$0xff] %v8719_v12 }
 0x6d0   : > { %v8720_v59 = vpop.trf.xlu1 }
 0x6d1   : > { %8746 = vst [vmem:[%s13240_s12 + $0x98] sm:$0xff] %v8720_v59 }
 0x6d4   : > { %v8721_v38 = vpop.trf.xlu1 }
 0x6d5   : > { %8748 = vst [vmem:[%s13240_s12 + $0xa8] sm:$0xff] %v8721_v38 }
 0x6d8   : > { %v8722_v54 = vpop.trf.xlu1 }
 0x6d9   : > { %8750 = vst [vmem:[%s13240_s12 + $0xb8] sm:$0xff] %v8722_v54 }
 0x6dc   : > { %v8723_v29 = vpop.trf.xlu1 }
 0x6dd   : > { %8752 = vst [vmem:[%s13240_s12 + $0xc8] sm:$0xff] %v8723_v29 }
 0x6e0   : > { %v8724_v43 = vpop.trf.xlu1 }
 0x6e1   : > { %8754 = vst [vmem:[%s13240_s12 + $0xd8] sm:$0xff] %v8724_v43 }
 0x6e4   : > { %v8725_v13 = vpop.trf.xlu1 }
 0x6e5   : > { %8756 = vst [vmem:[%s13240_s12 + $0xe8] sm:$0xff] %v8725_v13 }
 0x6e8   : > { %v8726_v26 = vpop.trf.xlu1 }
 0x6e9   : > { %8758 = vst [vmem:[%s13240_s12 + $0xf8] sm:$0xff] %v8726_v26 }
 0x6ea PF: > { %s20_s13 = sadd.s32 1, %s10766_s13  }
 0x6eb   : > { %p17_p4 = scmp.ge.s32.totalorder %s20_s13, 4  }
 0x6ed   :  { %19 = sbr.rel (!%p17_p4) target bundleno = 1 (0x1), region = 104 }

</bundles_post_ra>
